<compile_context>
chip_gen: v6e
topology: v6e:2x2x1
jax: 0.10.0
libtpu: 0.0.40
codegen_flags: <defaults>
</compile_context>

<pallas_src>
import functools

import jax
import jax.numpy as jnp
from jax.experimental import pallas as pl
from jax.experimental.pallas import tpu as pltpu

EPS = 1e-5
MXU_DTYPE = jnp.bfloat16      # MXU operand dtype; accumulation & stats stay f32


# ---------------------------------------------------------------------------
# kernel-side helpers (traced inside the Pallas kernel)
# ---------------------------------------------------------------------------
def _channel_fold(v, group):
    """Cyclic log-fold along the lane axis: every lane ends up holding the sum
    of all lanes in its residue class (mod `group`), i.e. its channel's total
    already replicated across the lane dimension.  v: (R, L) f32."""
    L = v.shape[-1]
    shift = group
    while shift < L:
        v = v + pltpu.roll(v, shift=shift, axis=1)
        shift *= 2
    return v


def _shift_down(x):
    """y[i] = x[i-1], y[0] = 0 (static zero-fill row shift, f32)."""
    return jnp.concatenate([jnp.zeros_like(x[:1]), x[:-1]], axis=0)


def _shift_up(x):
    """y[i] = x[i+1], y[last] = 0 (static zero-fill row shift, f32)."""
    return jnp.concatenate([x[1:], jnp.zeros_like(x[:1])], axis=0)


def _conv3x3_rows(inp, not_first, not_last, wband_ref):
    """3x3 'same' conv on row-major activations inp: (B*H, W*Cin), bf16.

    wband_ref[dy] is a (W*Cin, W*Cout) banded weight applying the dx taps (and
    the width zero padding) of kernel row dy.  The dy taps are applied on the
    result side: the f32 partials u_dy are shifted by +/-1 rows and the
    per-image boundary rows are masked (height zero padding), so no O(B^2)
    shift matrices, no MXU shift matmuls and no extra operand casts."""
    u0 = jnp.dot(inp, wband_ref[0], preferred_element_type=jnp.float32)
    u1 = jnp.dot(inp, wband_ref[1], preferred_element_type=jnp.float32)
    u2 = jnp.dot(inp, wband_ref[2], preferred_element_type=jnp.float32)
    # out[h] = u0[h-1] + u1[h] + u2[h+1], with cross-image rows zeroed.
    return u1 + not_first * _shift_down(u0) + not_last * _shift_up(u2)


def _bn_relu(acc, g_row, be_row, group, out_dtype):
    """Training-mode BatchNorm2d + ReLU on (B*H, W*C) rows (channel = lane%group).
    Single traversal: per-lane sum & sum-of-squares, folded to per-channel
    stats on the XLU, then one fused scale+shift (+ReLU + downcast)."""
    n_rows, L = acc.shape
    n = n_rows * (L // group)                       # elements per channel = B*H*W
    s = jnp.sum(acc, axis=0, keepdims=True)         # (1, L) f32
    ss = jnp.sum(acc * acc, axis=0, keepdims=True)  # (1, L) f32
    folded = _channel_fold(jnp.concatenate([s, ss], axis=0), group)   # (2, L)
    mean = folded[0:1, :] * (1.0 / n)
    # E[x^2]-mean^2 in f32; guarded against cancellation.  TODO(synk): use a
    # centered two-pass variance if activations ever drift to |mean| >> std.
    var = jnp.maximum(folded[1:2, :] * (1.0 / n) - mean * mean, 0.0)
    scale = g_row * jax.lax.rsqrt(var + EPS)        # (1, L) folded BN scale
    shift = be_row - mean * scale                   # (1, L) folded BN shift
    return jnp.maximum(acc * scale + shift, 0.0).astype(out_dtype)


def cnn_kernel(x_ref, w1_ref, g1_ref, be1_ref,
               w2_ref, g2_ref, be2_ref,
               wfc_ref, bfc_ref, out_ref, *, h, c1, c2):
    B = out_ref.shape[0]
    BH = x_ref.shape[0]                  # B * H
    half = w2_ref.shape[2] // 2          # (W * C2) / 2 = 256

    # Per-image boundary masks for the +/-1 row shifts (height zero padding).
    rows = jax.lax.broadcasted_iota(jnp.int32, (BH, 1), 0) % h
    not_first = (rows != 0).astype(jnp.float32)       # row h has a row above
    not_last = (rows != h - 1).astype(jnp.float32)    # row h has a row below

    # conv1 -> BN1(batch stats) -> ReLU           rows=(b,h), lanes=(w, c1)
    # NOTE: conv bias omitted on purpose -- exactly cancelled by training BN.
    acc1 = _conv3x3_rows(x_ref[...], not_first, not_last, w1_ref)
    y1 = _bn_relu(acc1, g1_ref[...], be1_ref[...], group=c1, out_dtype=MXU_DTYPE)

    # conv2 -> BN2 -> ReLU                        lanes=(w%2, w//2, c2)
    acc2 = _conv3x3_rows(y1, not_first, not_last, w2_ref)
    y2 = _bn_relu(acc2, g2_ref[...], be2_ref[...], group=c2, out_dtype=jnp.float32)

    # MaxPool2d(2,2): parity-major columns make the W-direction max one aligned
    # half-lane max; pairing adjacent rows makes the H-direction max another.
    wpool = jnp.maximum(y2[:, :half], y2[:, half:])             # (B*H, 256)
    merged = wpool.reshape(BH // 2, 2, half)                    # rows 2h / 2h+1
    pooled = jnp.maximum(merged[:, 0, :], merged[:, 1, :])      # (B*H/2, 256)

    # flatten per sample + FC (weight pre-permuted, output padded to 128 lanes
    # so the final store is lane-dense; sliced back outside the kernel).
    flat = pooled.reshape(B, -1).astype(MXU_DTYPE)              # (B, 4096)
    out_ref[...] = (jnp.dot(flat, wfc_ref[...],
                            preferred_element_type=jnp.float32) + bfc_ref[...])


# ---------------------------------------------------------------------------
# wrapper-side layout / weight repacking (pure XLA, no kernel compute hoisted)
# ---------------------------------------------------------------------------
def _banded_conv_weights(w_oihw, W, pool_parity_major):
    """Repack an OIHW 3x3 conv weight into 3 banded matrices (one per kernel
    row dy) of shape (W*Cin, W*Cout).  The band implements the dx taps and the
    width-edge zero padding of padding=1.  With pool_parity_major the output
    columns are ordered (w%2, w//2, cout) for the following 2x2 max-pool."""
    O, I = w_oihw.shape[0], w_oihw.shape[1]
    wt = jnp.transpose(w_oihw, (2, 3, 1, 0)).astype(jnp.float32)   # (dy, dx, I, O)
    # shift[dx, w_src, w_dst] = 1  iff  w_src == w_dst + dx - 1
    shift = jnp.stack([jnp.eye(W, W, 1 - dx, dtype=jnp.float32) for dx in range(3)])
    bands = []
    for dy in range(3):
        band = jnp.einsum('xuw,xio->uiwo', shift, wt[dy])          # (w_src, I, w_dst, O)
        band = band.reshape(W * I, W, O)
        if pool_parity_major:
            band = band.reshape(W * I, W // 2, 2, O).transpose(0, 2, 1, 3)
        bands.append(band.reshape(W * I, W * O))
    return jnp.stack(bands).astype(MXU_DTYPE)                      # (3, W*I, W*O)


def _tile_row(v, reps):
    return jnp.tile(v.astype(jnp.float32), reps).reshape(1, -1)


def _vmem_limit_bytes(B, H, W, Cin, C1, C2, nc_pad):
    """Scoped-VMEM request derived from the real footprint, not hard-coded.

    Scales with the batch (so larger batches that amortize the ~4.6 MiB of
    weights are not throttled on v6e's 128 MiB) and is capped at ~90% of the
    physical VMEM so it never exceeds v7x's 64 MiB per TensorCore."""
    weights = 2 * (3 * (W * Cin) * (W * C1)                 # conv1 bands (bf16)
                   + 3 * (W * C1) * (W * C2)                # conv2 bands (bf16)
                   + (H // 2) * (W // 2) * C2 * nc_pad)     # padded FC weight
    per_sample = 4 * H * W * (6 * C1 + 6 * C2)              # f32 partials (generous)
    need = weights + B * per_sample + (16 << 20)            # + compiler scratch
    try:
        cap = int(pltpu.get_tpu_info().vmem_capacity_bytes) * 9 // 10
    except Exception:
        cap = 56 << 20                                      # conservative v7x floor
    return min(cap, max(32 << 20, need))


def init_params(key, num_channels, num_classes):
    ks = jax.random.split(key, 6)
    return {
        "w1": jax.random.normal(ks[0], (32, num_channels, 3, 3), jnp.float32) * 0.1,
        "b1": jax.random.normal(ks[1], (32,), jnp.float32) * 0.1,
        "g1": jnp.ones((32,), jnp.float32),
        "be1": jnp.zeros((32,), jnp.float32),
        "w2": jax.random.normal(ks[2], (16, 32, 3, 3), jnp.float32) * 0.05,
        "b2": jax.random.normal(ks[3], (16,), jnp.float32) * 0.1,
        "g2": jnp.ones((16,), jnp.float32),
        "be2": jnp.zeros((16,), jnp.float32),
        "wfc": jax.random.normal(ks[4], (num_classes, 16 * 16 * 16), jnp.float32) * 0.02,
        "bfc": jax.random.normal(ks[5], (num_classes,), jnp.float32) * 0.02,
    }


def model_forward(x_nchw, params):
    B, Cin, H, W = x_nchw.shape
    assert (H, W) == (32, 32), "fc3 = Linear(16*16*16, ...) requires 32x32 input"
    C1, C2 = params["w1"].shape[0], params["w2"].shape[0]       # 32, 16
    num_classes = params["wfc"].shape[0]
    NC_PAD = 128

    x_rows = (jnp.transpose(x_nchw, (0, 2, 3, 1))               # NCHW -> NHWC
              .reshape(B * H, W * Cin).astype(MXU_DTYPE))
    w1b = _banded_conv_weights(params["w1"], W, pool_parity_major=False)  # (3, 96, 1024)
    w2b = _banded_conv_weights(params["w2"], W, pool_parity_major=True)   # (3, 1024, 512)

    # Per-lane BN params (channel = lane % C).  Conv biases b1/b2 are NOT
    # plumbed in: training-mode BN cancels a per-channel bias exactly.
    g1 = _tile_row(params["g1"], W)
    be1 = _tile_row(params["be1"], W)
    g2 = _tile_row(params["g2"], W)
    be2 = _tile_row(params["be2"], W)

    # FC weight: permute PyTorch's NCHW flatten order (c, h2, w2) into the
    # kernel's pooled layout (h2, w2, c); zero-pad the output dim to 128 lanes.
    H2, W2 = H // 2, W // 2
    wfc = (params["wfc"].reshape(num_classes, C2, H2, W2)
           .transpose(2, 3, 1, 0).reshape(H2 * W2 * C2, num_classes))
    wfc_pad = (jnp.zeros((H2 * W2 * C2, NC_PAD), jnp.float32)
               .at[:, :num_classes].set(wfc).astype(MXU_DTYPE))
    bfc_pad = (jnp.zeros((1, NC_PAD), jnp.float32)
               .at[:, :num_classes].set(params["bfc"].reshape(1, num_classes)))

    vmem = pl.BlockSpec(memory_space=pltpu.MemorySpace.VMEM)
    out_pad = pl.pallas_call(
        functools.partial(cnn_kernel, h=H, c1=C1, c2=C2),
        out_shape=jax.ShapeDtypeStruct((B, NC_PAD), jnp.float32),
        in_specs=[vmem] * 9,
        out_specs=vmem,
        compiler_params=pltpu.CompilerParams(
            vmem_limit_bytes=_vmem_limit_bytes(B, H, W, Cin, C1, C2, NC_PAD)),
    )(x_rows, w1b, g1, be1, w2b, g2, be2, wfc_pad, bfc_pad)
    return out_pad[:, :num_classes]


# ---------------------------------------------------------------------------
# pure-JAX f32 reference (mirrors the PyTorch module, incl. conv biases)
# ---------------------------------------------------------------------------
def _bn_ref(x, gamma, beta):
    mean = jnp.mean(x, axis=(0, 2, 3), keepdims=True)
    var = jnp.mean((x - mean) ** 2, axis=(0, 2, 3), keepdims=True)   # biased var
    return (gamma[None, :, None, None] * (x - mean) * jax.lax.rsqrt(var + EPS)
            + beta[None, :, None, None])


def model_reference(x, params):
    hp = jax.lax.Precision.HIGHEST
    conv = lambda a, w: jax.lax.conv_general_dilated(
        a, w, window_strides=(1, 1), padding=((1, 1), (1, 1)),
        dimension_numbers=("NCHW", "OIHW", "NCHW"), precision=hp)
    y = conv(x, params["w1"]) + params["b1"][None, :, None, None]
    y = jnp.maximum(_bn_ref(y, params["g1"], params["be1"]), 0.0)
    y = conv(y, params["w2"]) + params["b2"][None, :, None, None]
    y = jnp.maximum(_bn_ref(y, params["g2"], params["be2"]), 0.0)
    y = jax.lax.reduce_window(y, -jnp.inf, jax.lax.max,
                              (1, 1, 2, 2), (1, 1, 2, 2), "VALID")
    y = y.reshape(y.shape[0], -1)
    return jnp.dot(y, params["wfc"].T, precision=hp) + params["bfc"]


if __name__ == "__main__":
    num_channels, num_classes = 3, 10          # CIFAR10 (32x32 forced by fc3)
    key = jax.random.PRNGKey(0)
    kx, kp = jax.random.split(key)
    x = jax.random.normal(kx, (2, num_channels, 32, 32), jnp.float32)
    params = init_params(kp, num_channels, num_classes)

    out = jax.jit(model_forward)(x, params)
    jax.block_until_ready(out)
    assert out.shape == (2, num_classes)
    assert bool(jnp.all(jnp.isfinite(out)))

    # Numerical check vs the f32 reference (loose: bf16 MXU operands).
    ref = model_reference(x, params)
    rel_err = float(jnp.max(jnp.abs(out - ref)) / (jnp.max(jnp.abs(ref)) + 1e-6))
    assert rel_err < 0.1, f"mismatch vs f32 reference: rel-to-max err {rel_err:.4f}"

    print("KERNEL_OK")
</pallas_src>

<mosaic_0001>
module attributes {stable_mosaic.version = 11 : i64} {
  func.func @cnn_kernel(%arg0: memref<64x96xbf16, #tpu.memory_space<vmem>>, %arg1: memref<3x96x1024xbf16, #tpu.memory_space<vmem>>, %arg2: memref<1x1024xf32, #tpu.memory_space<vmem>>, %arg3: memref<1x1024xf32, #tpu.memory_space<vmem>>, %arg4: memref<3x1024x512xbf16, #tpu.memory_space<vmem>>, %arg5: memref<1x512xf32, #tpu.memory_space<vmem>>, %arg6: memref<1x512xf32, #tpu.memory_space<vmem>>, %arg7: memref<4096x128xbf16, #tpu.memory_space<vmem>>, %arg8: memref<1x128xf32, #tpu.memory_space<vmem>>, %arg9: memref<2x128xf32, #tpu.memory_space<vmem>>) attributes {dimension_semantics = [], scalar_prefetch = 0 : i64, scratch_operands = 0 : i64, tpu.core_type = #tpu.core_type<tc>} {
    %0 = tpu.iota {dimensions = array<i32: 0>} : vector<64x1xi32>
    %c32_i32 = arith.constant 32 : i32
    %c0_i32 = arith.constant 0 : i32
    %1 = arith.cmpi eq, %c32_i32, %c0_i32 : i32
    %c1_i32 = arith.constant 1 : i32
    %2 = arith.select %1, %c1_i32, %c32_i32 : i32
    %3 = vector.broadcast %2 : i32 to vector<64x1xi32>
    %4 = arith.remsi %0, %3 : vector<64x1xi32>
    %c0_i32_0 = arith.constant 0 : i32
    %5 = vector.broadcast %c0_i32_0 : i32 to vector<64x1xi32>
    %6 = arith.cmpi ne, %4, %5 : vector<64x1xi32>
    %c0_i32_1 = arith.constant 0 : i32
    %7 = vector.broadcast %c0_i32_1 : i32 to vector<64x1xi32>
    %8 = arith.cmpi slt, %4, %7 : vector<64x1xi32>
    %c0_i32_2 = arith.constant 0 : i32
    %9 = arith.cmpi slt, %2, %c0_i32_2 : i32
    %10 = vector.broadcast %9 : i1 to vector<64x1xi1>
    %11 = vector.broadcast %10 : vector<64x1xi1> to vector<64x1xi1>
    %12 = arith.xori %8, %11 : vector<64x1xi1>
    %13 = arith.andi %12, %6 : vector<64x1xi1>
    %14 = vector.broadcast %2 : i32 to vector<64x1xi32>
    %15 = arith.addi %4, %14 : vector<64x1xi32>
    %16 = arith.select %13, %15, %4 : vector<64x1xi1>, vector<64x1xi32>
    %c0_i32_3 = arith.constant 0 : i32
    %17 = vector.broadcast %c0_i32_3 : i32 to vector<64x1xi32>
    %18 = arith.cmpi ne, %16, %17 : vector<64x1xi32>
    %19 = arith.extui %18 : vector<64x1xi1> to vector<64x1xi32>
    %20 = arith.sitofp %19 : vector<64x1xi32> to vector<64x1xf32>
    %c31_i32 = arith.constant 31 : i32
    %21 = vector.broadcast %c31_i32 : i32 to vector<64x1xi32>
    %22 = arith.cmpi ne, %16, %21 : vector<64x1xi32>
    %23 = arith.extui %22 : vector<64x1xi1> to vector<64x1xi32>
    %24 = arith.sitofp %23 : vector<64x1xi32> to vector<64x1xf32>
    %c0 = arith.constant 0 : index
    %c0_4 = arith.constant 0 : index
    %25 = vector.load %arg0[%c0, %c0_4] : memref<64x96xbf16, #tpu.memory_space<vmem>>, vector<64x96xbf16>
    %c0_5 = arith.constant 0 : index
    %c0_6 = arith.constant 0 : index
    %c0_7 = arith.constant 0 : index
    %26 = vector.load %arg1[%c0_5, %c0_6, %c0_7] : memref<3x96x1024xbf16, #tpu.memory_space<vmem>>, vector<1x96x1024xbf16>
    %27 = vector.shape_cast %26 : vector<1x96x1024xbf16> to vector<96x1024xbf16>
    %cst = arith.constant dense<0.000000e+00> : vector<64x1024xf32>
    %28 = tpu.matmul %25, %27, %cst {dimension_numbers = #tpu.dot_dimension_numbers<[1], [0], [0], [1], [0, 0, 1, 1], [], []>} : vector<64x96xbf16>, vector<96x1024xbf16>, vector<64x1024xf32> -> vector<64x1024xf32>
    %c1 = arith.constant 1 : index
    %c0_8 = arith.constant 0 : index
    %c0_9 = arith.constant 0 : index
    %29 = vector.load %arg1[%c1, %c0_8, %c0_9] : memref<3x96x1024xbf16, #tpu.memory_space<vmem>>, vector<1x96x1024xbf16>
    %30 = vector.shape_cast %29 : vector<1x96x1024xbf16> to vector<96x1024xbf16>
    %cst_10 = arith.constant dense<0.000000e+00> : vector<64x1024xf32>
    %31 = tpu.matmul %25, %30, %cst_10 {dimension_numbers = #tpu.dot_dimension_numbers<[1], [0], [0], [1], [0, 0, 1, 1], [], []>} : vector<64x96xbf16>, vector<96x1024xbf16>, vector<64x1024xf32> -> vector<64x1024xf32>
    %c2 = arith.constant 2 : index
    %c0_11 = arith.constant 0 : index
    %c0_12 = arith.constant 0 : index
    %32 = vector.load %arg1[%c2, %c0_11, %c0_12] : memref<3x96x1024xbf16, #tpu.memory_space<vmem>>, vector<1x96x1024xbf16>
    %33 = vector.shape_cast %32 : vector<1x96x1024xbf16> to vector<96x1024xbf16>
    %cst_13 = arith.constant dense<0.000000e+00> : vector<64x1024xf32>
    %34 = tpu.matmul %25, %33, %cst_13 {dimension_numbers = #tpu.dot_dimension_numbers<[1], [0], [0], [1], [0, 0, 1, 1], [], []>} : vector<64x96xbf16>, vector<96x1024xbf16>, vector<64x1024xf32> -> vector<64x1024xf32>
    %cst_14 = arith.constant 0.000000e+00 : f32
    %35 = vector.broadcast %cst_14 : f32 to vector<1x1024xf32>
    %36 = vector.extract_strided_slice %28 {offsets = [0, 0], sizes = [63, 1024], strides = [1, 1]} : vector<64x1024xf32> to vector<63x1024xf32>
    %37 = tpu.concatenate %35, %36 in 0 : vector<1x1024xf32>, vector<63x1024xf32> -> vector<64x1024xf32>
    %38 = vector.broadcast %20 : vector<64x1xf32> to vector<64x1024xf32>
    %39 = arith.mulf %38, %37 : vector<64x1024xf32>
    %40 = arith.addf %31, %39 : vector<64x1024xf32>
    %41 = vector.extract_strided_slice %34 {offsets = [1, 0], sizes = [63, 1024], strides = [1, 1]} : vector<64x1024xf32> to vector<63x1024xf32>
    %cst_15 = arith.constant 0.000000e+00 : f32
    %42 = vector.broadcast %cst_15 : f32 to vector<1x1024xf32>
    %43 = tpu.concatenate %41, %42 in 0 : vector<63x1024xf32>, vector<1x1024xf32> -> vector<64x1024xf32>
    %44 = vector.broadcast %24 : vector<64x1xf32> to vector<64x1024xf32>
    %45 = arith.mulf %44, %43 : vector<64x1024xf32>
    %46 = arith.addf %40, %45 : vector<64x1024xf32>
    %c0_16 = arith.constant 0 : index
    %c0_17 = arith.constant 0 : index
    %47 = vector.load %arg2[%c0_16, %c0_17] : memref<1x1024xf32, #tpu.memory_space<vmem>>, vector<1x1024xf32>
    %c0_18 = arith.constant 0 : index
    %c0_19 = arith.constant 0 : index
    %48 = vector.load %arg3[%c0_18, %c0_19] : memref<1x1024xf32, #tpu.memory_space<vmem>>, vector<1x1024xf32>
    %cst_20 = arith.constant dense<0.000000e+00> : vector<1024xf32>
    %49 = vector.multi_reduction <add>, %46, %cst_20 [0] : vector<64x1024xf32> to vector<1024xf32>
    %50 = vector.shape_cast %49 : vector<1024xf32> to vector<1x1024xf32>
    %51 = arith.mulf %46, %46 : vector<64x1024xf32>
    %cst_21 = arith.constant dense<0.000000e+00> : vector<1024xf32>
    %52 = vector.multi_reduction <add>, %51, %cst_21 [0] : vector<64x1024xf32> to vector<1024xf32>
    %53 = vector.shape_cast %52 : vector<1024xf32> to vector<1x1024xf32>
    %54 = tpu.concatenate %50, %53 in 0 : vector<1x1024xf32>, vector<1x1024xf32> -> vector<2x1024xf32>
    %c32_i32_22 = arith.constant 32 : i32
    %55 = tpu.dynamic_rotate %54 by %c32_i32_22 dim 1 : vector<2x1024xf32>, i32 -> vector<2x1024xf32>
    %56 = arith.addf %54, %55 : vector<2x1024xf32>
    %c64_i32 = arith.constant 64 : i32
    %57 = tpu.dynamic_rotate %56 by %c64_i32 dim 1 : vector<2x1024xf32>, i32 -> vector<2x1024xf32>
    %58 = arith.addf %56, %57 : vector<2x1024xf32>
    %c128_i32 = arith.constant 128 : i32
    %59 = tpu.dynamic_rotate %58 by %c128_i32 dim 1 : vector<2x1024xf32>, i32 -> vector<2x1024xf32>
    %60 = arith.addf %58, %59 : vector<2x1024xf32>
    %c256_i32 = arith.constant 256 : i32
    %61 = tpu.dynamic_rotate %60 by %c256_i32 dim 1 : vector<2x1024xf32>, i32 -> vector<2x1024xf32>
    %62 = arith.addf %60, %61 : vector<2x1024xf32>
    %c512_i32 = arith.constant 512 : i32
    %63 = tpu.dynamic_rotate %62 by %c512_i32 dim 1 : vector<2x1024xf32>, i32 -> vector<2x1024xf32>
    %64 = arith.addf %62, %63 : vector<2x1024xf32>
    %65 = vector.extract_strided_slice %64 {offsets = [0, 0], sizes = [1, 1024], strides = [1, 1]} : vector<2x1024xf32> to vector<1x1024xf32>
    %cst_23 = arith.constant 4.8828125E-4 : f32
    %66 = vector.broadcast %cst_23 : f32 to vector<1x1024xf32>
    %67 = arith.mulf %65, %66 : vector<1x1024xf32>
    %68 = vector.extract_strided_slice %64 {offsets = [1, 0], sizes = [1, 1024], strides = [1, 1]} : vector<2x1024xf32> to vector<1x1024xf32>
    %cst_24 = arith.constant 4.8828125E-4 : f32
    %69 = vector.broadcast %cst_24 : f32 to vector<1x1024xf32>
    %70 = arith.mulf %68, %69 : vector<1x1024xf32>
    %71 = arith.mulf %67, %67 : vector<1x1024xf32>
    %72 = arith.subf %70, %71 : vector<1x1024xf32>
    %cst_25 = arith.constant 0.000000e+00 : f32
    %73 = vector.broadcast %cst_25 : f32 to vector<1x1024xf32>
    %74 = arith.maximumf %72, %73 : vector<1x1024xf32>
    %cst_26 = arith.constant 9.99999974E-6 : f32
    %75 = vector.broadcast %cst_26 : f32 to vector<1x1024xf32>
    %76 = arith.addf %74, %75 : vector<1x1024xf32>
    %77 = math.rsqrt %76 : vector<1x1024xf32>
    %78 = arith.mulf %47, %77 : vector<1x1024xf32>
    %79 = arith.mulf %67, %78 : vector<1x1024xf32>
    %80 = arith.subf %48, %79 : vector<1x1024xf32>
    %81 = vector.broadcast %78 : vector<1x1024xf32> to vector<64x1024xf32>
    %82 = arith.mulf %46, %81 : vector<64x1024xf32>
    %83 = vector.broadcast %80 : vector<1x1024xf32> to vector<64x1024xf32>
    %84 = arith.addf %82, %83 : vector<64x1024xf32>
    %cst_27 = arith.constant 0.000000e+00 : f32
    %85 = vector.broadcast %cst_27 : f32 to vector<64x1024xf32>
    %86 = arith.maximumf %84, %85 : vector<64x1024xf32>
    %87 = arith.truncf %86 : vector<64x1024xf32> to vector<64x1024xbf16>
    %c0_28 = arith.constant 0 : index
    %c0_29 = arith.constant 0 : index
    %c0_30 = arith.constant 0 : index
    %88 = vector.load %arg4[%c0_28, %c0_29, %c0_30] : memref<3x1024x512xbf16, #tpu.memory_space<vmem>>, vector<1x1024x512xbf16>
    %89 = vector.shape_cast %88 : vector<1x1024x512xbf16> to vector<1024x512xbf16>
    %cst_31 = arith.constant dense<0.000000e+00> : vector<64x512xf32>
    %90 = tpu.matmul %87, %89, %cst_31 {dimension_numbers = #tpu.dot_dimension_numbers<[1], [0], [0], [1], [0, 0, 1, 1], [], []>} : vector<64x1024xbf16>, vector<1024x512xbf16>, vector<64x512xf32> -> vector<64x512xf32>
    %c1_32 = arith.constant 1 : index
    %c0_33 = arith.constant 0 : index
    %c0_34 = arith.constant 0 : index
    %91 = vector.load %arg4[%c1_32, %c0_33, %c0_34] : memref<3x1024x512xbf16, #tpu.memory_space<vmem>>, vector<1x1024x512xbf16>
    %92 = vector.shape_cast %91 : vector<1x1024x512xbf16> to vector<1024x512xbf16>
    %cst_35 = arith.constant dense<0.000000e+00> : vector<64x512xf32>
    %93 = tpu.matmul %87, %92, %cst_35 {dimension_numbers = #tpu.dot_dimension_numbers<[1], [0], [0], [1], [0, 0, 1, 1], [], []>} : vector<64x1024xbf16>, vector<1024x512xbf16>, vector<64x512xf32> -> vector<64x512xf32>
    %c2_36 = arith.constant 2 : index
    %c0_37 = arith.constant 0 : index
    %c0_38 = arith.constant 0 : index
    %94 = vector.load %arg4[%c2_36, %c0_37, %c0_38] : memref<3x1024x512xbf16, #tpu.memory_space<vmem>>, vector<1x1024x512xbf16>
    %95 = vector.shape_cast %94 : vector<1x1024x512xbf16> to vector<1024x512xbf16>
    %cst_39 = arith.constant dense<0.000000e+00> : vector<64x512xf32>
    %96 = tpu.matmul %87, %95, %cst_39 {dimension_numbers = #tpu.dot_dimension_numbers<[1], [0], [0], [1], [0, 0, 1, 1], [], []>} : vector<64x1024xbf16>, vector<1024x512xbf16>, vector<64x512xf32> -> vector<64x512xf32>
    %cst_40 = arith.constant 0.000000e+00 : f32
    %97 = vector.broadcast %cst_40 : f32 to vector<1x512xf32>
    %98 = vector.extract_strided_slice %90 {offsets = [0, 0], sizes = [63, 512], strides = [1, 1]} : vector<64x512xf32> to vector<63x512xf32>
    %99 = tpu.concatenate %97, %98 in 0 : vector<1x512xf32>, vector<63x512xf32> -> vector<64x512xf32>
    %100 = vector.broadcast %20 : vector<64x1xf32> to vector<64x512xf32>
    %101 = arith.mulf %100, %99 : vector<64x512xf32>
    %102 = arith.addf %93, %101 : vector<64x512xf32>
    %103 = vector.extract_strided_slice %96 {offsets = [1, 0], sizes = [63, 512], strides = [1, 1]} : vector<64x512xf32> to vector<63x512xf32>
    %cst_41 = arith.constant 0.000000e+00 : f32
    %104 = vector.broadcast %cst_41 : f32 to vector<1x512xf32>
    %105 = tpu.concatenate %103, %104 in 0 : vector<63x512xf32>, vector<1x512xf32> -> vector<64x512xf32>
    %106 = vector.broadcast %24 : vector<64x1xf32> to vector<64x512xf32>
    %107 = arith.mulf %106, %105 : vector<64x512xf32>
    %108 = arith.addf %102, %107 : vector<64x512xf32>
    %c0_42 = arith.constant 0 : index
    %c0_43 = arith.constant 0 : index
    %109 = vector.load %arg5[%c0_42, %c0_43] : memref<1x512xf32, #tpu.memory_space<vmem>>, vector<1x512xf32>
    %c0_44 = arith.constant 0 : index
    %c0_45 = arith.constant 0 : index
    %110 = vector.load %arg6[%c0_44, %c0_45] : memref<1x512xf32, #tpu.memory_space<vmem>>, vector<1x512xf32>
    %cst_46 = arith.constant dense<0.000000e+00> : vector<512xf32>
    %111 = vector.multi_reduction <add>, %108, %cst_46 [0] : vector<64x512xf32> to vector<512xf32>
    %112 = vector.shape_cast %111 : vector<512xf32> to vector<1x512xf32>
    %113 = arith.mulf %108, %108 : vector<64x512xf32>
    %cst_47 = arith.constant dense<0.000000e+00> : vector<512xf32>
    %114 = vector.multi_reduction <add>, %113, %cst_47 [0] : vector<64x512xf32> to vector<512xf32>
    %115 = vector.shape_cast %114 : vector<512xf32> to vector<1x512xf32>
    %116 = tpu.concatenate %112, %115 in 0 : vector<1x512xf32>, vector<1x512xf32> -> vector<2x512xf32>
    %c16_i32 = arith.constant 16 : i32
    %117 = tpu.dynamic_rotate %116 by %c16_i32 dim 1 : vector<2x512xf32>, i32 -> vector<2x512xf32>
    %118 = arith.addf %116, %117 : vector<2x512xf32>
    %c32_i32_48 = arith.constant 32 : i32
    %119 = tpu.dynamic_rotate %118 by %c32_i32_48 dim 1 : vector<2x512xf32>, i32 -> vector<2x512xf32>
    %120 = arith.addf %118, %119 : vector<2x512xf32>
    %c64_i32_49 = arith.constant 64 : i32
    %121 = tpu.dynamic_rotate %120 by %c64_i32_49 dim 1 : vector<2x512xf32>, i32 -> vector<2x512xf32>
    %122 = arith.addf %120, %121 : vector<2x512xf32>
    %c128_i32_50 = arith.constant 128 : i32
    %123 = tpu.dynamic_rotate %122 by %c128_i32_50 dim 1 : vector<2x512xf32>, i32 -> vector<2x512xf32>
    %124 = arith.addf %122, %123 : vector<2x512xf32>
    %c256_i32_51 = arith.constant 256 : i32
    %125 = tpu.dynamic_rotate %124 by %c256_i32_51 dim 1 : vector<2x512xf32>, i32 -> vector<2x512xf32>
    %126 = arith.addf %124, %125 : vector<2x512xf32>
    %127 = vector.extract_strided_slice %126 {offsets = [0, 0], sizes = [1, 512], strides = [1, 1]} : vector<2x512xf32> to vector<1x512xf32>
    %cst_52 = arith.constant 4.8828125E-4 : f32
    %128 = vector.broadcast %cst_52 : f32 to vector<1x512xf32>
    %129 = arith.mulf %127, %128 : vector<1x512xf32>
    %130 = vector.extract_strided_slice %126 {offsets = [1, 0], sizes = [1, 512], strides = [1, 1]} : vector<2x512xf32> to vector<1x512xf32>
    %cst_53 = arith.constant 4.8828125E-4 : f32
    %131 = vector.broadcast %cst_53 : f32 to vector<1x512xf32>
    %132 = arith.mulf %130, %131 : vector<1x512xf32>
    %133 = arith.mulf %129, %129 : vector<1x512xf32>
    %134 = arith.subf %132, %133 : vector<1x512xf32>
    %cst_54 = arith.constant 0.000000e+00 : f32
    %135 = vector.broadcast %cst_54 : f32 to vector<1x512xf32>
    %136 = arith.maximumf %134, %135 : vector<1x512xf32>
    %cst_55 = arith.constant 9.99999974E-6 : f32
    %137 = vector.broadcast %cst_55 : f32 to vector<1x512xf32>
    %138 = arith.addf %136, %137 : vector<1x512xf32>
    %139 = math.rsqrt %138 : vector<1x512xf32>
    %140 = arith.mulf %109, %139 : vector<1x512xf32>
    %141 = arith.mulf %129, %140 : vector<1x512xf32>
    %142 = arith.subf %110, %141 : vector<1x512xf32>
    %143 = vector.broadcast %140 : vector<1x512xf32> to vector<64x512xf32>
    %144 = arith.mulf %108, %143 : vector<64x512xf32>
    %145 = vector.broadcast %142 : vector<1x512xf32> to vector<64x512xf32>
    %146 = arith.addf %144, %145 : vector<64x512xf32>
    %cst_56 = arith.constant 0.000000e+00 : f32
    %147 = vector.broadcast %cst_56 : f32 to vector<64x512xf32>
    %148 = arith.maximumf %146, %147 : vector<64x512xf32>
    %149 = vector.extract_strided_slice %148 {offsets = [0, 0], sizes = [64, 256], strides = [1, 1]} : vector<64x512xf32> to vector<64x256xf32>
    %150 = vector.extract_strided_slice %148 {offsets = [0, 256], sizes = [64, 256], strides = [1, 1]} : vector<64x512xf32> to vector<64x256xf32>
    %151 = arith.maximumf %149, %150 : vector<64x256xf32>
    %152 = vector.shape_cast %151 : vector<64x256xf32> to vector<32x2x256xf32>
    %153 = vector.extract_strided_slice %152 {offsets = [0, 0, 0], sizes = [32, 1, 256], strides = [1, 1, 1]} : vector<32x2x256xf32> to vector<32x1x256xf32>
    %154 = vector.shape_cast %153 : vector<32x1x256xf32> to vector<32x256xf32>
    %155 = vector.extract_strided_slice %152 {offsets = [0, 1, 0], sizes = [32, 1, 256], strides = [1, 1, 1]} : vector<32x2x256xf32> to vector<32x1x256xf32>
    %156 = vector.shape_cast %155 : vector<32x1x256xf32> to vector<32x256xf32>
    %157 = arith.maximumf %154, %156 : vector<32x256xf32>
    %158 = vector.shape_cast %157 : vector<32x256xf32> to vector<2x4096xf32>
    %159 = arith.truncf %158 : vector<2x4096xf32> to vector<2x4096xbf16>
    %c0_57 = arith.constant 0 : index
    %c0_58 = arith.constant 0 : index
    %160 = vector.load %arg7[%c0_57, %c0_58] : memref<4096x128xbf16, #tpu.memory_space<vmem>>, vector<4096x128xbf16>
    %cst_59 = arith.constant dense<0.000000e+00> : vector<2x128xf32>
    %161 = tpu.matmul %159, %160, %cst_59 {dimension_numbers = #tpu.dot_dimension_numbers<[1], [0], [0], [1], [0, 0, 1, 1], [], []>} : vector<2x4096xbf16>, vector<4096x128xbf16>, vector<2x128xf32> -> vector<2x128xf32>
    %c0_60 = arith.constant 0 : index
    %c0_61 = arith.constant 0 : index
    %162 = vector.load %arg8[%c0_60, %c0_61] : memref<1x128xf32, #tpu.memory_space<vmem>>, vector<1x128xf32>
    %163 = vector.broadcast %162 : vector<1x128xf32> to vector<2x128xf32>
    %164 = arith.addf %161, %163 : vector<2x128xf32>
    %c0_62 = arith.constant 0 : index
    %c0_63 = arith.constant 0 : index
    %165 = vector.load %arg9[%c0_62, %c0_63] : memref<2x128xf32, #tpu.memory_space<vmem>>, vector<2x128xf32>
    tpu.vector_store %arg9[%c0_62, %c0_63], %164 {strides = array<i32>} : memref<2x128xf32, #tpu.memory_space<vmem>>, vector<2x128xf32>,
    return
  }
}

</mosaic_0001>

<bundles_post_ra>
// kernel: tile.23
= control target key start
LH: loop header
LB: loop body
LE: loop exit
PB: predicated region body
PF: predicated region fallthrough
CT: control target
= control target key end

     0   :  { %s40_s0 = inlined_call_operand.vmem [shape: f32[32], index: 0, kind: input, shape index: {}]   ;;  %s41_s1 = inlined_call_operand.vmem [shape: f32[32,32], index: 1, kind: output, shape index: {}]  }
   0x1   :  { %v4_v0 = vld [vmem:[%s40_s0] ss:$0 sm:$0xff] }
   0x2   :  { %5 = vst [vmem:[%s41_s1] sm:$0xff] %v4_v0  ;;  %12 = vst [vmem:[%s41_s1 + $0x8] sm:$0xff] %v4_v0 }
   0x3   :  { %13 = vst [vmem:[%s41_s1 + $0x10] sm:$0xff] %v4_v0  ;;  %14 = vst [vmem:[%s41_s1 + $0x18] sm:$0xff] %v4_v0 }

// kernel: tile.24
= control target key start
LH: loop header
LB: loop body
LE: loop exit
PB: predicated region body
PF: predicated region fallthrough
CT: control target
= control target key end

     0   :  { %s102_s8 = smov 96   ;;  %vm3_vm0 = vcmask 261120   ;;  %s104_s15 = smov 64   ;;  %vm10_vm1 = vcmask 1048320   ;;  %vm17_vm2 = vcmask 785920   ;;  %vm24_vm3 = vcmask 523520   ;;  %s151_s0 = inlined_call_operand.vmem [shape: f32[32,32], index: 0, kind: input, shape index: {}]   ;;  %s152_s1 = inlined_call_operand.vmem [shape: f32[1,1024], index: 1, kind: output, shape index: {}]  }
   0x1   :  { %v89_v0 = vld [vmem:[%s151_s0 + $0x3] ss:$4 sm:$0xff]   ;;  %v91_v1 = vld [vmem:[%s151_s0 + $0x1] ss:$4 sm:$0xff]   ;;  %v2_v2 = vld [vmem:[%s151_s0] ss:$4 sm:$0xff]  }
   0x2   :  { %8 = vrot.lane.b32.xlu0 %v89_v0, %s102_s8  ;;  %v90_v3 = vld [vmem:[%s151_s0 + $0x2] ss:$4 sm:$0xff]   ;;  %s103_s0 = smov 32   ;;  %4 = vst.msk [vmem:[#allocation0] ss:$8 sm:$0xf] %vm3_vm0, %v2_v2  }
   0x3   :  { %22 = vrot.lane.b32.xlu1 %v91_v1, %s103_s0  ;;  %5 = vst.msk [vmem:[#allocation0] ss:$8 sm:$0xf0] %vm3_vm0, %v2_v2  }
   0x6   :  { %15 = vrot.lane.b32.xlu0 %v90_v3, %s104_s15 }
  0x74   :  { %v9_v4 = vpop.permute.xlu0 %8  }
  0x75   :  { %11 = vst.msk [vmem:[#allocation0] ss:$8 sm:$0xf] %vm10_vm1, %v9_v4   ;;  %12 = vst.msk [vmem:[#allocation0] ss:$8 sm:$0xf0] %vm10_vm1, %v9_v4   ;;  %v23_v5 = vpop.permute.xlu1 %22  }
  0x78   :  { %v16_v6 = vpop.permute.xlu0 %15  }
  0x79   :  { %18 = vst.msk [vmem:[#allocation0] ss:$8 sm:$0xf] %vm17_vm2, %v16_v6   ;;  %19 = vst.msk [vmem:[#allocation0] ss:$8 sm:$0xf0] %vm17_vm2, %v16_v6  }
  0x7a   :  { %25 = vst.msk [vmem:[#allocation0] ss:$8 sm:$0xf] %vm24_vm3, %v23_v5   ;;  %26 = vst.msk [vmem:[#allocation0] ss:$8 sm:$0xf0] %vm24_vm3, %v23_v5  }
  0x81   :  { %v31_v7 = vld [vmem:[#allocation0] sm:$0x1]  ;;  %v36_v8 = vld [vmem:[#allocation0 + $0x8] sm:$0x1]  ;;  %v42_v9 = vld [vmem:[#allocation0 + $0x10] sm:$0x1] }
  0x82   :  { %34 = vst [vmem:[%s152_s1] sm:$0x1] %v31_v7  ;;  %92 = vst [vmem:[%s152_s1 + $0x1] sm:$0x1] %v36_v8  ;;  %v49_v10 = vld [vmem:[#allocation0 + $0x18] sm:$0x1] }
  0x83   :  { %93 = vst [vmem:[%s152_s1 + $0x2] sm:$0x1] %v42_v9  ;;  %v56_v11 = vld [vmem:[#allocation0 + $0x20] sm:$0x1]  ;;  %v63_v12 = vld [vmem:[#allocation0 + $0x28] sm:$0x1] }
  0x84   :  { %94 = vst [vmem:[%s152_s1 + $0x3] sm:$0x1] %v49_v10  ;;  %95 = vst [vmem:[%s152_s1 + $0x4] sm:$0x1] %v56_v11  ;;  %v70_v13 = vld [vmem:[#allocation0 + $0x30] sm:$0x1] }
  0x85   :  { %96 = vst [vmem:[%s152_s1 + $0x5] sm:$0x1] %v63_v12  ;;  %v77_v14 = vld [vmem:[#allocation0 + $0x38] sm:$0x1]  ;;  %97 = vst [vmem:[%s152_s1 + $0x6] sm:$0x1] %v70_v13 }
  0x86   :  { %98 = vst [vmem:[%s152_s1 + $0x7] sm:$0x1] %v77_v14 }

// kernel: tile.33
= control target key start
LH: loop header
LB: loop body
LE: loop exit
PB: predicated region body
PF: predicated region fallthrough
CT: control target
= control target key end

     0   :  { %s40_s0 = inlined_call_operand.vmem [shape: f32[16], index: 0, kind: input, shape index: {}]   ;;  %s41_s1 = inlined_call_operand.vmem [shape: f32[32,16], index: 1, kind: output, shape index: {}]  }
   0x1   :  { %v4_v0 = vld [vmem:[%s40_s0] ss:$0 sm:$0xff] }
   0x2   :  { %5 = vst [vmem:[%s41_s1] sm:$0xff] %v4_v0  ;;  %12 = vst [vmem:[%s41_s1 + $0x8] sm:$0xff] %v4_v0 }
   0x3   :  { %13 = vst [vmem:[%s41_s1 + $0x10] sm:$0xff] %v4_v0  ;;  %14 = vst [vmem:[%s41_s1 + $0x18] sm:$0xff] %v4_v0 }

// kernel: tile.34
= control target key start
LH: loop header
LB: loop body
LE: loop exit
PB: predicated region body
PF: predicated region fallthrough
CT: control target
= control target key end

     0   :  { %s94_s8 = smov 112   ;;  %s95_s11 = smov 80   ;;  %vm3_vm0 = vcmask 130048   ;;  %vm9_vm1 = vcmask 1048448   ;;  %vm15_vm2 = vcmask 917248   ;;  %vm21_vm3 = vcmask 786048   ;;  %s147_s0 = inlined_call_operand.vmem [shape: f32[32,16], index: 0, kind: input, shape index: {}]   ;;  %s148_s1 = inlined_call_operand.vmem [shape: f32[1,512], index: 1, kind: output, shape index: {}]  }
   0x1   :  { %v77_v0 = vld [vmem:[%s147_s0 + $0x7] ss:$8 sm:$0xf]   ;;  %v79_v1 = vld [vmem:[%s147_s0 + $0x5] ss:$8 sm:$0xf]  }
   0x2   :  { %7 = vrot.lane.b32.xlu0 %v77_v0, %s94_s8  ;;  %19 = vrot.lane.b32.xlu1 %v79_v1, %s95_s11  ;;  %v78_v2 = vld [vmem:[%s147_s0 + $0x6] ss:$8 sm:$0xf]   ;;  %v80_v3 = vld [vmem:[%s147_s0 + $0x4] ss:$8 sm:$0xf]  }
   0x3   :  { %s96_s16 = smov 96   ;;  %v2_v4 = vld [vmem:[%s147_s0] ss:$8 sm:$0xf]   ;;  %s97_s19 = smov 64   ;;  %vm27_vm4 = vcmask 654848  }
   0x4   :  { %v81_v5 = vld [vmem:[%s147_s0 + $0x3] ss:$8 sm:$0xf]   ;;  %4 = vst.msk [vmem:[#allocation0] ss:$8 sm:$0xf] %vm3_vm0, %v2_v4  }
   0x5   :  { %v82_v6 = vld [vmem:[%s147_s0 + $0x2] ss:$8 sm:$0xf]   ;;  %s98_s24 = smov 48   ;;  %s99_s25 = smov 32   ;;  %vm33_vm5 = vcmask 523648  }
   0x6   :  { %13 = vrot.lane.b32.xlu0 %v78_v2, %s96_s16  ;;  %25 = vrot.lane.b32.xlu1 %v80_v3, %s97_s19  ;;  %v83_v7 = vld [vmem:[%s147_s0 + $0x1] ss:$8 sm:$0xf]   ;;  %s100_s0 = smov 16   ;;  %vm39_vm6 = vcmask 392448   ;;  %vm45_vm7 = vcmask 261248  }
   0xa   :  { %31 = vrot.lane.b32.xlu0 %v81_v5, %s98_s24  ;;  %37 = vrot.lane.b32.xlu1 %v82_v6, %s99_s25 }
   0xe   :  { %43 = vrot.lane.b32.xlu0 %v83_v7, %s100_s0 }
  0x74   :  { %v8_v8 = vpop.permute.xlu0 %7   ;;  %v20_v9 = vpop.permute.xlu1 %19  }
  0x75   :  { %10 = vst.msk [vmem:[#allocation0] ss:$8 sm:$0xf] %vm9_vm1, %v8_v8  }
  0x78   :  { %v14_v10 = vpop.permute.xlu0 %13   ;;  %v26_v11 = vpop.permute.xlu1 %25  }
  0x79   :  { %16 = vst.msk [vmem:[#allocation0] ss:$8 sm:$0xf] %vm15_vm2, %v14_v10  }
  0x7a   :  { %22 = vst.msk [vmem:[#allocation0] ss:$8 sm:$0xf] %vm21_vm3, %v20_v9  }
  0x7b   :  { %28 = vst.msk [vmem:[#allocation0] ss:$8 sm:$0xf] %vm27_vm4, %v26_v11  }
  0x7c   :  { %v32_v12 = vpop.permute.xlu0 %31   ;;  %v38_v13 = vpop.permute.xlu1 %37  }
  0x7d   :  { %34 = vst.msk [vmem:[#allocation0] ss:$8 sm:$0xf] %vm33_vm5, %v32_v12  }
  0x7e   :  { %40 = vst.msk [vmem:[#allocation0] ss:$8 sm:$0xf] %vm39_vm6, %v38_v13  }
  0x80   :  { %v44_v14 = vpop.permute.xlu0 %43  }
  0x81   :  { %46 = vst.msk [vmem:[#allocation0] ss:$8 sm:$0xf] %vm45_vm7, %v44_v14  }
  0x88   :  { %v51_v15 = vld [vmem:[#allocation0] sm:$0x1]  ;;  %v56_v16 = vld [vmem:[#allocation0 + $0x8] sm:$0x1]  ;;  %v62_v17 = vld [vmem:[#allocation0 + $0x10] sm:$0x1] }
  0x89   :  { %54 = vst [vmem:[%s148_s1] sm:$0x1] %v51_v15  ;;  %84 = vst [vmem:[%s148_s1 + $0x1] sm:$0x1] %v56_v16  ;;  %v69_v18 = vld [vmem:[#allocation0 + $0x18] sm:$0x1] }
  0x8a   :  { %85 = vst [vmem:[%s148_s1 + $0x2] sm:$0x1] %v62_v17  ;;  %86 = vst [vmem:[%s148_s1 + $0x3] sm:$0x1] %v69_v18 }

// kernel: model_forward.1
= control target key start
LH: loop header
LB: loop body
LE: loop exit
PB: predicated region body
PF: predicated region fallthrough
CT: control target
= control target key end

     0   :  { %v17976_v8 = vmov 0   ;;  %vm503_vm0 = vcmask 785408   ;;  %vm1502_vm1 = vcmask 1040384   ;;  %vm2355_vm2 = vcmask 1046528   ;;  %s25042_s0 = inlined_call_operand.vmem [shape: bf16[64,96], index: 0, kind: input, shape index: {}]   ;;  %s25043_s1 = inlined_call_operand.vmem [shape: bf16[3,96,1024], index: 1, kind: input, shape index: {}]   ;;  %s25044_s2 = inlined_call_operand.vmem [shape: f32[1,1024], index: 2, kind: input, shape index: {}]   ;;  %s25045_s3 = inlined_call_operand.vmem [shape: f32[1,1024], index: 3, kind: input, shape index: {}]   ;;  %s25046_s4 = inlined_call_operand.vmem [shape: bf16[3,1024,512], index: 4, kind: input, shape index: {}]   ;;  %s25047_s5 = inlined_call_operand.vmem [shape: f32[1,512], index: 5, kind: input, shape index: {}]   ;;  %s25048_s6 = inlined_call_operand.vmem [shape: f32[1,512], index: 6, kind: input, shape index: {}]   ;;  %s25049_s7 = inlined_call_operand.vmem [shape: bf16[4096,128], index: 7, kind: input, shape index: {}]   ;;  %s25050_s8 = inlined_call_operand.vmem [shape: f32[1,128], index: 8, kind: input, shape index: {}]   ;;  %s25051_s9 = inlined_call_operand.hbm [shape: f32[2,128], index: 9, kind: output, shape index: {}]  }
   0x1   :  { %v235_v0 = vld [vmem:[%s25043_s1 + $0x140] sm:$0xff]  ;;  %v236_v2 = vld [vmem:[%s25043_s1 + $0x148] sm:$0xff]  ;;  %548 = vmatprep.mubr.bf16.mxu0 %v17976_v8  ;;  %621 = vmatprep.mubr.bf16.mxu1 %v17976_v8  ;;  %v237_v47 = vld [vmem:[%s25043_s1 + $0x150] sm:$0xff] }
   0x2   :  { %v239_v1 = vld [vmem:[%s25043_s1 + $0x160] sm:$0xff]  ;;  %v240_v4 = vld [vmem:[%s25043_s1 + $0x168] sm:$0xff]  ;;  %v241_v48 = vld [vmem:[%s25043_s1 + $0x170] sm:$0xff] }
   0x3   :  { %v14348_v3 = vcombine.high %v235_v0, %v239_v1  ;;  %v14347_v5 = vcombine.low %v235_v0, %v239_v1  ;;  %v227_v6 = vld [vmem:[%s25043_s1 + $0x100] sm:$0xff]  ;;  %v14350_v9 = vcombine.high %v236_v2, %v240_v4  ;;  %v14349_v10 = vcombine.low %v236_v2, %v240_v4  ;;  %v228_v12 = vld [vmem:[%s25043_s1 + $0x108] sm:$0xff]  ;;  %v238_v49 = vld [vmem:[%s25043_s1 + $0x158] sm:$0xff] }
   0x4   :  { %v231_v7 = vld [vmem:[%s25043_s1 + $0x120] sm:$0xff]  ;;  %v232_v13 = vld [vmem:[%s25043_s1 + $0x128] sm:$0xff]  ;;  %v242_v50 = vld [vmem:[%s25043_s1 + $0x178] sm:$0xff]  ;;  %v14352_v53 = vcombine.high %v237_v47, %v241_v48  ;;  %v14351_v58 = vcombine.low %v237_v47, %v241_v48 }
   0x5   :  { %v14340_v11 = vcombine.high %v227_v6, %v231_v7  ;;  %v219_v14 = vld [vmem:[%s25043_s1 + $0xc0] sm:$0xff]  ;;  %520 = vmatprep.subr.bf16.mxu0 %v14348_v3  ;;  %v14342_v15 = vcombine.high %v228_v12, %v232_v13  ;;  %v220_v17 = vld [vmem:[%s25043_s1 + $0xc8] sm:$0xff]  ;;  %593 = vmatprep.subr.bf16.mxu1 %v14350_v9  ;;  %v14339_v19 = vcombine.low %v227_v6, %v231_v7  ;;  %v229_v55 = vld [vmem:[%s25043_s1 + $0x110] sm:$0xff] }
   0x6   :  { %v223_v16 = vld [vmem:[%s25043_s1 + $0xe0] sm:$0xff]  ;;  %v224_v18 = vld [vmem:[%s25043_s1 + $0xe8] sm:$0xff]  ;;  %521 = vmatpush1.bf16.msra.mxu0 %v14347_v5  ;;  %594 = vmatpush1.bf16.msra.mxu1 %v14349_v10  ;;  %v14341_v20 = vcombine.low %v228_v12, %v232_v13  ;;  %v14354_v54 = vcombine.high %v238_v49, %v242_v50  ;;  %v233_v56 = vld [vmem:[%s25043_s1 + $0x130] sm:$0xff]  ;;  %v14353_v61 = vcombine.low %v238_v49, %v242_v50 }
   0x7   :  { %522 = vmatprep.subr.bf16.mxu0 %v14340_v11  ;;  %v14332_v21 = vcombine.high %v219_v14, %v223_v16  ;;  %595 = vmatprep.subr.bf16.mxu1 %v14342_v15  ;;  %v14334_v22 = vcombine.high %v220_v17, %v224_v18  ;;  %v211_v23 = vld [vmem:[%s25043_s1 + $0x80] sm:$0xff]  ;;  %v212_v25 = vld [vmem:[%s25043_s1 + $0x88] sm:$0xff]  ;;  %v14331_v27 = vcombine.low %v219_v14, %v223_v16  ;;  %v230_v59 = vld [vmem:[%s25043_s1 + $0x118] sm:$0xff] }
   0x8   :  { %v215_v24 = vld [vmem:[%s25043_s1 + $0xa0] sm:$0xff]  ;;  %v216_v26 = vld [vmem:[%s25043_s1 + $0xa8] sm:$0xff]  ;;  %v14333_v28 = vcombine.low %v220_v17, %v224_v18  ;;  %v234_v60 = vld [vmem:[%s25043_s1 + $0x138] sm:$0xff]  ;;  %v14344_v62 = vcombine.high %v229_v55, %v233_v56  ;;  %v14343_v4 = vcombine.low %v229_v55, %v233_v56 }
   0x9   :  { %v14324_v29 = vcombine.high %v211_v23, %v215_v24  ;;  %v14326_v30 = vcombine.high %v212_v25, %v216_v26  ;;  %v203_v31 = vld [vmem:[%s25043_s1 + $0x40] sm:$0xff]  ;;  %v204_v33 = vld [vmem:[%s25043_s1 + $0x48] sm:$0xff]  ;;  %v14323_v35 = vcombine.low %v211_v23, %v215_v24  ;;  %v14325_v36 = vcombine.low %v212_v25, %v216_v26  ;;  %v221_v63 = vld [vmem:[%s25043_s1 + $0xd0] sm:$0xff] }
   0xa   :  { %523 = vmatpush1.bf16.msra.mxu0 %v14339_v19  ;;  %596 = vmatpush1.bf16.msra.mxu1 %v14341_v20  ;;  %v207_v32 = vld [vmem:[%s25043_s1 + $0x60] sm:$0xff]  ;;  %v208_v34 = vld [vmem:[%s25043_s1 + $0x68] sm:$0xff]  ;;  %v225_v0 = vld [vmem:[%s25043_s1 + $0xf0] sm:$0xff]  ;;  %v14346_v1 = vcombine.high %v230_v59, %v234_v60  ;;  %v14345_v5 = vcombine.low %v230_v59, %v234_v60 }
   0xb   :  { %524 = vmatprep.subr.bf16.mxu0 %v14332_v21  ;;  %597 = vmatprep.subr.bf16.mxu1 %v14334_v22  ;;  %v14316_v37 = vcombine.high %v203_v31, %v207_v32  ;;  %v195_v38 = vld [vmem:[%s25043_s1] sm:$0xff]  ;;  %v14318_v39 = vcombine.high %v204_v33, %v208_v34  ;;  %v196_v41 = vld [vmem:[%s25043_s1 + $0x8] sm:$0xff]  ;;  %v14315_v43 = vcombine.low %v203_v31, %v207_v32  ;;  %v222_v2 = vld [vmem:[%s25043_s1 + $0xd8] sm:$0xff] }
   0xc   :  { %v199_v40 = vld [vmem:[%s25043_s1 + $0x20] sm:$0xff]  ;;  %v200_v42 = vld [vmem:[%s25043_s1 + $0x28] sm:$0xff]  ;;  %v14317_v44 = vcombine.low %v204_v33, %v208_v34  ;;  %v226_v3 = vld [vmem:[%s25043_s1 + $0xf8] sm:$0xff]  ;;  %v14336_v6 = vcombine.high %v221_v63, %v225_v0  ;;  %v14335_v12 = vcombine.low %v221_v63, %v225_v0 }
   0xd   :  { %v14308_v45 = vcombine.high %v195_v38, %v199_v40  ;;  %v14310_v46 = vcombine.high %v196_v41, %v200_v42  ;;  %v14307_v51 = vcombine.low %v195_v38, %v199_v40  ;;  %v14309_v52 = vcombine.low %v196_v41, %v200_v42  ;;  %v18131_v57 = vld [vmem:[%s25042_s0] sm:$0xff]   ;;  %v18160_v9 = vld [vmem:[%s25042_s0 + $0x8] sm:$0xff]   ;;  %v213_v10 = vld [vmem:[%s25043_s1 + $0x90] sm:$0xff] }
   0xe   :  { %525 = vmatpush1.bf16.msra.mxu0 %v14331_v27  ;;  %598 = vmatpush1.bf16.msra.mxu1 %v14333_v28  ;;  %v14338_v7 = vcombine.high %v222_v2, %v226_v3  ;;  %v217_v11 = vld [vmem:[%s25043_s1 + $0xb0] sm:$0xff]  ;;  %v214_v13 = vld [vmem:[%s25043_s1 + $0x98] sm:$0xff]  ;;  %v14337_v15 = vcombine.low %v222_v2, %v226_v3  ;;  %v14464_v38 = vld [vmem:[%s25043_s1 + $0x468] sm:$0xff] }
   0xf   :  { %526 = vmatprep.subr.bf16.mxu0 %v14324_v29  ;;  %599 = vmatprep.subr.bf16.mxu1 %v14326_v30  ;;  %v218_v14 = vld [vmem:[%s25043_s1 + $0xb8] sm:$0xff]  ;;  %v14328_v16 = vcombine.high %v213_v10, %v217_v11  ;;  %v205_v17 = vld [vmem:[%s25043_s1 + $0x50] sm:$0xff]  ;;  %v14327_v20 = vcombine.low %v213_v10, %v217_v11  ;;  %v14456_v47 = vld [vmem:[%s25043_s1 + $0x428] sm:$0xff] }
  0x10   :  { %v209_v18 = vld [vmem:[%s25043_s1 + $0x70] sm:$0xff]  ;;  %v14330_v19 = vcombine.high %v214_v13, %v218_v14  ;;  %v206_v21 = vld [vmem:[%s25043_s1 + $0x58] sm:$0xff]  ;;  %v14329_v24 = vcombine.low %v214_v13, %v218_v14  ;;  %v14443_v49 = vld [vmem:[%s25043_s1 + $0x3c0] sm:$0xff] }
  0x11   :  { %v210_v22 = vld [vmem:[%s25043_s1 + $0x78] sm:$0xff]  ;;  %v14320_v23 = vcombine.high %v205_v17, %v209_v18  ;;  %v18195_v25 = vld [vmem:[%s25042_s0 + $0x10] sm:$0xff]   ;;  %v14319_v31 = vcombine.low %v205_v17, %v209_v18  ;;  %v14447_v50 = vld [vmem:[%s25043_s1 + $0x3e0] sm:$0xff] }
  0x12   :  { %527 = vmatpush1.bf16.msra.mxu0 %v14323_v35  ;;  %600 = vmatpush1.bf16.msra.mxu1 %v14325_v36  ;;  %v14322_v26 = vcombine.high %v206_v21, %v210_v22  ;;  %v197_v27 = vld [vmem:[%s25043_s1 + $0x10] sm:$0xff]  ;;  %v198_v29 = vld [vmem:[%s25043_s1 + $0x18] sm:$0xff]  ;;  %v14321_v32 = vcombine.low %v206_v21, %v210_v22  ;;  %v14459_v35 = vld [vmem:[%s25043_s1 + $0x440] sm:$0xff]  ;;  %v14492_v59 = vcombine.high %v14443_v49, %v14447_v50 }
  0x13   :  { %528 = vmatprep.subr.bf16.mxu0 %v14316_v37  ;;  %601 = vmatprep.subr.bf16.mxu1 %v14318_v39  ;;  %v201_v28 = vld [vmem:[%s25043_s1 + $0x30] sm:$0xff]  ;;  %v202_v30 = vld [vmem:[%s25043_s1 + $0x38] sm:$0xff]  ;;  %v14463_v36 = vld [vmem:[%s25043_s1 + $0x460] sm:$0xff] }
  0x14   :  { %v14312_v33 = vcombine.high %v197_v27, %v201_v28  ;;  %v14314_v34 = vcombine.high %v198_v29, %v202_v30  ;;  %v14460_v37 = vld [vmem:[%s25043_s1 + $0x448] sm:$0xff]  ;;  %v14311_v39 = vcombine.low %v197_v27, %v201_v28  ;;  %v14313_v40 = vcombine.low %v198_v29, %v202_v30  ;;  %v18230_v42 = vld [vmem:[%s25042_s0 + $0x18] sm:$0xff]   ;;  %v14435_v60 = vld [vmem:[%s25043_s1 + $0x380] sm:$0xff] }
  0x15   :  { %v14508_v41 = vcombine.high %v14459_v35, %v14463_v36  ;;  %v14507_v48 = vcombine.low %v14459_v35, %v14463_v36  ;;  %v14436_v63 = vld [vmem:[%s25043_s1 + $0x388] sm:$0xff]  ;;  %v14427_v2 = vld [vmem:[%s25043_s1 + $0x340] sm:$0xff]  ;;  %v14465_v21 = vld [vmem:[%s25043_s1 + $0x470] sm:$0xff] }
  0x16   :  { %529 = vmatpush1.bf16.msra.mxu0 %v14315_v43  ;;  %602 = vmatpush1.bf16.msra.mxu1 %v14317_v44  ;;  %v14510_v43 = vcombine.high %v14460_v37, %v14464_v38  ;;  %v14451_v44 = vld [vmem:[%s25043_s1 + $0x400] sm:$0xff]  ;;  %v14440_v0 = vld [vmem:[%s25043_s1 + $0x3a8] sm:$0xff]  ;;  %v14458_v35 = vld [vmem:[%s25043_s1 + $0x438] sm:$0xff] }
  0x17   :  { %530 = vmatprep.subr.bf16.mxu0 %v14308_v45  ;;  %603 = vmatprep.subr.bf16.mxu1 %v14310_v46  ;;  %v14455_v45 = vld [vmem:[%s25043_s1 + $0x420] sm:$0xff]  ;;  %v14452_v46 = vld [vmem:[%s25043_s1 + $0x408] sm:$0xff]  ;;  %v14486_v10 = vcombine.high %v14436_v63, %v14440_v0 }
  0x18   :  { %v14502_v55 = vcombine.high %v14452_v46, %v14456_v47  ;;  %v14499_v56 = vcombine.low %v14451_v44, %v14455_v45  ;;  %v14431_v3 = vld [vmem:[%s25043_s1 + $0x360] sm:$0xff]  ;;  %v14424_v17 = vld [vmem:[%s25043_s1 + $0x328] sm:$0xff] }
  0x19   :  { %v14419_v13 = vld [vmem:[%s25043_s1 + $0x300] sm:$0xff] }
  0x1a   :  { %531 = vmatpush1.bf16.msra.mxu0 %v14307_v51  ;;  %604 = vmatpush1.bf16.msra.mxu1 %v14309_v52  ;;  %v14509_v51 = vcombine.low %v14460_v37, %v14464_v38  ;;  %v14500_v52 = vcombine.high %v14451_v44, %v14455_v45  ;;  %v14423_v14 = vld [vmem:[%s25043_s1 + $0x320] sm:$0xff]  ;;  %v14445_v37 = vld [vmem:[%s25043_s1 + $0x3d0] sm:$0xff] }
  0x1b   :  { %666 = vmatprep.subr.bf16.mxu0 %v14352_v53  ;;  %739 = vmatprep.subr.bf16.mxu1 %v14354_v54  ;;  %v14444_v53 = vld [vmem:[%s25043_s1 + $0x3c8] sm:$0xff]  ;;  %v14467_v28 = vcombine.low %v14419_v13, %v14423_v14  ;;  %v14449_v38 = vld [vmem:[%s25043_s1 + $0x3f0] sm:$0xff] }
  0x1c   :  { %v14448_v54 = vld [vmem:[%s25043_s1 + $0x3e8] sm:$0xff] }
  0x1d   :  { %14355 = vmatmul.mubr.msk.bf16.vlgmr.msra.gmra.mxu0 %vm503_vm0, %v18131_v57  ;;  %14359 = vmatmul.mubr.msk.bf16.vlgmr.msra.gmra.mxu1 %vm503_vm0, %v18131_v57 }
  0x1e   :  { %667 = vmatpush1.bf16.msra.mxu0 %v14351_v58  ;;  %740 = vmatpush1.bf16.msra.mxu1 %v14353_v61  ;;  %v14501_v58 = vcombine.low %v14452_v46, %v14456_v47  ;;  %v14439_v61 = vld [vmem:[%s25043_s1 + $0x3a0] sm:$0xff]  ;;  %v14496_v47 = vcombine.high %v14445_v37, %v14449_v38 }
  0x1f   :  { %668 = vmatprep.subr.bf16.mxu0 %v14344_v62  ;;  %558 = vmatprep.mubr.bf16.mxu0 %v17976_v8  ;;  %v14494_v62 = vcombine.high %v14444_v53, %v14448_v54  ;;  %v14483_v11 = vcombine.low %v14435_v60, %v14439_v61 }
  0x20   :  { %631 = vmatprep.mubr.bf16.mxu1 %v17976_v8  ;;  %741 = vmatprep.subr.bf16.mxu1 %v14346_v1  ;;  %v14491_v1 = vcombine.low %v14443_v49, %v14447_v50  ;;  %v14441_v49 = vld [vmem:[%s25043_s1 + $0x3b0] sm:$0xff] }
  0x22   :  { %669 = vmatpush1.bf16.msra.mxu0 %v14343_v4  ;;  %742 = vmatpush1.bf16.msra.mxu1 %v14345_v5  ;;  %v14493_v4 = vcombine.low %v14444_v53, %v14448_v54  ;;  %v14484_v5 = vcombine.high %v14435_v60, %v14439_v61  ;;  %v14495_v53 = vcombine.low %v14445_v37, %v14449_v38  ;;  %v14429_v54 = vld [vmem:[%s25043_s1 + $0x350] sm:$0xff]  ;;  %v14434_v60 = vld [vmem:[%s25043_s1 + $0x378] sm:$0xff]  ;;  %v14379_v38 = vld [vmem:[%s25043_s1 + $0x1c0] sm:$0xff] }
  0x23   :  { %670 = vmatprep.subr.bf16.mxu0 %v14336_v6  ;;  %743 = vmatprep.subr.bf16.mxu1 %v14338_v7  ;;  %v14428_v6 = vld [vmem:[%s25043_s1 + $0x348] sm:$0xff] }
  0x24   :  { %v14432_v7 = vld [vmem:[%s25043_s1 + $0x368] sm:$0xff] }
  0x25   :  { %14356 = vmatmul.mubr.msk.bf16.gmra.mxu0 %vm503_vm0, %v18160_v9  ;;  %14360 = vmatmul.mubr.msk.bf16.gmra.mxu1 %vm503_vm0, %v18160_v9  ;;  %v14478_v18 = vcombine.high %v14428_v6, %v14432_v7  ;;  %v14477_v22 = vcombine.low %v14428_v6, %v14432_v7  ;;  %v14411_v6 = vld [vmem:[%s25043_s1 + $0x2c0] sm:$0xff] }
  0x26   :  { %671 = vmatpush1.bf16.msra.mxu0 %v14335_v12  ;;  %568 = vmatprep.mubr.bf16.mxu0 %v17976_v8  ;;  %v14476_v12 = vcombine.high %v14427_v2, %v14431_v3  ;;  %v14415_v7 = vld [vmem:[%s25043_s1 + $0x2e0] sm:$0xff] }
  0x27   :  { %641 = vmatprep.mubr.bf16.mxu1 %v17976_v8  ;;  %672 = vmatprep.subr.bf16.mxu0 %v14328_v16  ;;  %v14420_v16 = vld [vmem:[%s25043_s1 + $0x308] sm:$0xff] }
  0x28   :  { %744 = vmatpush1.bf16.msra.mxu1 %v14337_v15  ;;  %v14485_v15 = vcombine.low %v14436_v63, %v14440_v0  ;;  %v14470_v27 = vcombine.high %v14420_v16, %v14424_v17  ;;  %v14469_v29 = vcombine.low %v14420_v16, %v14424_v17  ;;  %v14421_v0 = vld [vmem:[%s25043_s1 + $0x310] sm:$0xff]  ;;  %v14572_v17 = vcombine.high %v14411_v6, %v14415_v7 }
  0x29   :  { %745 = vmatprep.subr.bf16.mxu1 %v14330_v19  ;;  %v14475_v19 = vcombine.low %v14427_v2, %v14431_v3  ;;  %v14426_v3 = vld [vmem:[%s25043_s1 + $0x338] sm:$0xff] }
  0x2a   :  { %673 = vmatpush1.bf16.msra.mxu0 %v14327_v20  ;;  %v14461_v20 = vld [vmem:[%s25043_s1 + $0x450] sm:$0xff] }
  0x2b   :  { %674 = vmatprep.subr.bf16.mxu0 %v14320_v23  ;;  %v14468_v23 = vcombine.high %v14419_v13, %v14423_v14  ;;  %v14512_v30 = vcombine.high %v14461_v20, %v14465_v21  ;;  %v14511_v36 = vcombine.low %v14461_v20, %v14465_v21  ;;  %v14416_v13 = vld [vmem:[%s25043_s1 + $0x2e8] sm:$0xff]  ;;  %v14571_v21 = vcombine.low %v14411_v6, %v14415_v7  ;;  %v14409_v6 = vld [vmem:[%s25043_s1 + $0x2b0] sm:$0xff]  ;;  %v14406_v7 = vld [vmem:[%s25043_s1 + $0x298] sm:$0xff] }
  0x2c   :  { %746 = vmatpush1.bf16.msra.mxu1 %v14329_v24  ;;  %v14462_v24 = vld [vmem:[%s25043_s1 + $0x458] sm:$0xff]  ;;  %v14404_v20 = vld [vmem:[%s25043_s1 + $0x288] sm:$0xff] }
  0x2d   :  { %14357 = vmatmul.mubr.msk.bf16.gmra.mxu0 %vm503_vm0, %v18195_v25  ;;  %747 = vmatprep.subr.bf16.mxu1 %v14322_v26  ;;  %v14466_v26 = vld [vmem:[%s25043_s1 + $0x478] sm:$0xff] }
  0x2e   :  { %14361 = vmatmul.mubr.msk.bf16.gmra.mxu1 %vm503_vm0, %v18195_v25  ;;  %578 = vmatprep.mubr.bf16.mxu0 %v17976_v8 }
  0x2f   :  { %651 = vmatprep.mubr.bf16.mxu1 %v17976_v8  ;;  %675 = vmatpush1.bf16.msra.mxu0 %v14319_v31  ;;  %v14514_v31 = vcombine.high %v14462_v24, %v14466_v26 }
  0x30   :  { %748 = vmatpush1.bf16.msra.mxu1 %v14321_v32  ;;  %676 = vmatprep.subr.bf16.mxu0 %v14312_v33  ;;  %v14453_v32 = vld [vmem:[%s25043_s1 + $0x410] sm:$0xff] }
  0x31   :  { %749 = vmatprep.subr.bf16.mxu1 %v14314_v34  ;;  %v14457_v33 = vld [vmem:[%s25043_s1 + $0x430] sm:$0xff]  ;;  %v14454_v34 = vld [vmem:[%s25043_s1 + $0x418] sm:$0xff] }
  0x32   :  { %v14506_v44 = vcombine.high %v14454_v34, %v14458_v35  ;;  %v14503_v45 = vcombine.low %v14453_v32, %v14457_v33  ;;  %v14505_v46 = vcombine.low %v14454_v34, %v14458_v35  ;;  %v14391_v34 = vld [vmem:[%s25043_s1 + $0x220] sm:$0xff] }
  0x33   :  { %677 = vmatpush1.bf16.msra.mxu0 %v14311_v39  ;;  %v14513_v39 = vcombine.low %v14462_v24, %v14466_v26 }
  0x34   :  { %750 = vmatpush1.bf16.msra.mxu1 %v14313_v40  ;;  %1150 = vmatprep.subr.bf16.mxu0 %v14508_v41  ;;  %v14504_v40 = vcombine.high %v14453_v32, %v14457_v33  ;;  %v14446_v41 = vld [vmem:[%s25043_s1 + $0x3d8] sm:$0xff]  ;;  %v14387_v33 = vld [vmem:[%s25043_s1 + $0x200] sm:$0xff] }
  0x35   :  { %14358 = vmatmul.mubr.msk.bf16.gmra.mxu0 %vm503_vm0, %v18230_v42  ;;  %1223 = vmatprep.subr.bf16.mxu1 %v14510_v43  ;;  %v14450_v43 = vld [vmem:[%s25043_s1 + $0x3f8] sm:$0xff] }
  0x36   :  { %14362 = vmatmul.mubr.msk.bf16.gmra.mxu1 %vm503_vm0, %v18230_v42  ;;  %694 = vmatprep.mubr.bf16.mxu0 %v17976_v8  ;;  %v14498_v50 = vcombine.high %v14446_v41, %v14450_v43 }
  0x37   :  { %767 = vmatprep.mubr.bf16.mxu1 %v17976_v8 }
  0x3d   :  { %14363 = vmatmul.mubr.msk.bf16.vlgmr.msra.gmra.mxu0 %vm503_vm0, %v18131_v57 }
  0x3e   :  { %14367 = vmatmul.mubr.msk.bf16.vlgmr.msra.gmra.mxu1 %vm503_vm0, %v18131_v57  ;;  %1151 = vmatpush1.bf16.msra.mxu0 %v14507_v48  ;;  %v14437_v48 = vld [vmem:[%s25043_s1 + $0x390] sm:$0xff] }
  0x3f   :  { %1224 = vmatpush1.bf16.msra.mxu1 %v14509_v51  ;;  %1152 = vmatprep.subr.bf16.mxu0 %v14500_v52  ;;  %v14438_v51 = vld [vmem:[%s25043_s1 + $0x398] sm:$0xff] }
  0x40   :  { %704 = vmatprep.mubr.bf16.mxu0 %v17976_v8  ;;  %777 = vmatprep.mubr.bf16.mxu1 %v17976_v8  ;;  %v14442_v52 = vld [vmem:[%s25043_s1 + $0x3b8] sm:$0xff] }
  0x41   :  { %1225 = vmatprep.subr.bf16.mxu1 %v14502_v55  ;;  %v14433_v55 = vld [vmem:[%s25043_s1 + $0x370] sm:$0xff]  ;;  %v14490_v61 = vcombine.high %v14438_v51, %v14442_v52  ;;  %v14489_v2 = vcombine.low %v14438_v51, %v14442_v52  ;;  %v14372_v52 = vld [vmem:[%s25043_s1 + $0x188] sm:$0xff] }
  0x42   :  { %1153 = vmatpush1.bf16.msra.mxu0 %v14499_v56  ;;  %v14497_v56 = vcombine.low %v14446_v41, %v14450_v43  ;;  %v14480_v63 = vcombine.high %v14429_v54, %v14433_v55  ;;  %v14548_v41 = vcombine.high %v14387_v33, %v14391_v34  ;;  %v14380_v43 = vld [vmem:[%s25043_s1 + $0x1c8] sm:$0xff] }
  0x43   :  { %1154 = vmatprep.subr.bf16.mxu0 %v14492_v59  ;;  %1226 = vmatpush1.bf16.msra.mxu1 %v14501_v58  ;;  %v14488_v58 = vcombine.high %v14437_v48, %v14441_v49  ;;  %v14430_v59 = vld [vmem:[%s25043_s1 + $0x358] sm:$0xff] }
  0x44   :  { %1227 = vmatprep.subr.bf16.mxu1 %v14494_v62  ;;  %v14487_v62 = vcombine.low %v14437_v48, %v14441_v49  ;;  %v14371_v49 = vld [vmem:[%s25043_s1 + $0x180] sm:$0xff] }
  0x45   :  { %14364 = vmatmul.mubr.msk.bf16.gmra.mxu0 %vm503_vm0, %v18160_v9 }
  0x46   :  { %14368 = vmatmul.mubr.msk.bf16.gmra.mxu1 %vm503_vm0, %v18160_v9  ;;  %1155 = vmatpush1.bf16.msra.mxu0 %v14491_v1  ;;  %v14425_v1 = vld [vmem:[%s25043_s1 + $0x330] sm:$0xff] }
  0x47   :  { %714 = vmatprep.mubr.bf16.mxu0 %v17976_v8  ;;  %787 = vmatprep.mubr.bf16.mxu1 %v17976_v8 }
  0x48   :  { %1156 = vmatprep.subr.bf16.mxu0 %v14484_v5  ;;  %1228 = vmatpush1.bf16.msra.mxu1 %v14493_v4  ;;  %v14482_v4 = vcombine.high %v14430_v59, %v14434_v60  ;;  %v14479_v5 = vcombine.low %v14429_v54, %v14433_v55 }
  0x49   :  { %1229 = vmatprep.subr.bf16.mxu1 %v14486_v10  ;;  %v14481_v10 = vcombine.low %v14430_v59, %v14434_v60 }
  0x4a   :  { %1157 = vmatpush1.bf16.msra.mxu0 %v14483_v11  ;;  %v14472_v11 = vcombine.high %v14421_v0, %v14425_v1 }
  0x4b   :  { %1158 = vmatprep.subr.bf16.mxu0 %v14476_v12  ;;  %v14412_v12 = vld [vmem:[%s25043_s1 + $0x2c8] sm:$0xff] }
  0x4c   :  { %1230 = vmatpush1.bf16.msra.mxu1 %v14485_v15  ;;  %v14471_v15 = vcombine.low %v14421_v0, %v14425_v1  ;;  %v14573_v24 = vcombine.low %v14412_v12, %v14416_v13 }
  0x4d   :  { %14365 = vmatmul.mubr.msk.bf16.gmra.mxu0 %vm503_vm0, %v18195_v25  ;;  %1231 = vmatprep.subr.bf16.mxu1 %v14478_v18  ;;  %v14574_v18 = vcombine.high %v14412_v12, %v14416_v13  ;;  %v14397_v12 = vld [vmem:[%s25043_s1 + $0x250] sm:$0xff] }
  0x4e   :  { %14369 = vmatmul.mubr.msk.bf16.gmra.mxu1 %vm503_vm0, %v18195_v25  ;;  %724 = vmatprep.mubr.bf16.mxu0 %v17976_v8  ;;  %v14401_v13 = vld [vmem:[%s25043_s1 + $0x270] sm:$0xff] }
  0x4f   :  { %797 = vmatprep.mubr.bf16.mxu1 %v17976_v8  ;;  %1159 = vmatpush1.bf16.msra.mxu0 %v14475_v19  ;;  %v14407_v19 = vld [vmem:[%s25043_s1 + $0x2a0] sm:$0xff] }
  0x50   :  { %1232 = vmatpush1.bf16.msra.mxu1 %v14477_v22  ;;  %1160 = vmatprep.subr.bf16.mxu0 %v14468_v23  ;;  %v14395_v22 = vld [vmem:[%s25043_s1 + $0x240] sm:$0xff] }
  0x51   :  { %1233 = vmatprep.subr.bf16.mxu1 %v14470_v27  ;;  %v14399_v23 = vld [vmem:[%s25043_s1 + $0x260] sm:$0xff]  ;;  %v14396_v27 = vld [vmem:[%s25043_s1 + $0x248] sm:$0xff] }
  0x52   :  { %v14556_v32 = vcombine.high %v14395_v22, %v14399_v23  ;;  %v14555_v37 = vcombine.low %v14395_v22, %v14399_v23  ;;  %v14393_v22 = vld [vmem:[%s25043_s1 + $0x230] sm:$0xff] }
  0x53   :  { %1161 = vmatpush1.bf16.msra.mxu0 %v14467_v28  ;;  %v14400_v28 = vld [vmem:[%s25043_s1 + $0x268] sm:$0xff] }
  0x54   :  { %1234 = vmatpush1.bf16.msra.mxu1 %v14469_v29  ;;  %1296 = vmatprep.subr.bf16.mxu0 %v14512_v30  ;;  %v14558_v35 = vcombine.high %v14396_v27, %v14400_v28 }
  0x55   :  { %14366 = vmatmul.mubr.msk.bf16.gmra.mxu0 %vm503_vm0, %v18230_v42  ;;  %1369 = vmatprep.subr.bf16.mxu1 %v14514_v31 }
  0x56   :  { %14370 = vmatmul.mubr.msk.bf16.gmra.mxu1 %vm503_vm0, %v18230_v42  ;;  %1178 = vmatprep.mubr.bf16.mxu0 %v17976_v8 }
  0x57   :  { %1251 = vmatprep.mubr.bf16.mxu1 %v17976_v8 }
  0x5d   :  { %14515 = vmatmul.mubr.msk.bf16.vlgmr.msra.gmra.mxu0 %vm503_vm0, %v18131_v57 }
  0x5e   :  { %14519 = vmatmul.mubr.msk.bf16.vlgmr.msra.gmra.mxu1 %vm503_vm0, %v18131_v57  ;;  %1297 = vmatpush1.bf16.msra.mxu0 %v14511_v36  ;;  %v14392_v36 = vld [vmem:[%s25043_s1 + $0x228] sm:$0xff] }
  0x5f   :  { %1370 = vmatpush1.bf16.msra.mxu1 %v14513_v39  ;;  %1298 = vmatprep.subr.bf16.mxu0 %v14504_v40  ;;  %v14383_v39 = vld [vmem:[%s25043_s1 + $0x1e0] sm:$0xff]  ;;  %v14557_v40 = vcombine.low %v14396_v27, %v14400_v28  ;;  %v14559_v27 = vcombine.low %v14397_v12, %v14401_v13  ;;  %v14381_v28 = vld [vmem:[%s25043_s1 + $0x1d0] sm:$0xff] }
  0x60   :  { %1188 = vmatprep.mubr.bf16.mxu0 %v17976_v8  ;;  %1261 = vmatprep.mubr.bf16.mxu1 %v17976_v8  ;;  %v14540_v48 = vcombine.high %v14379_v38, %v14383_v39  ;;  %v14539_v55 = vcombine.low %v14379_v38, %v14383_v39  ;;  %v14374_v39 = vld [vmem:[%s25043_s1 + $0x198] sm:$0xff] }
  0x61   :  { %1371 = vmatprep.subr.bf16.mxu1 %v14506_v44  ;;  %v14384_v44 = vld [vmem:[%s25043_s1 + $0x1e8] sm:$0xff] }
  0x62   :  { %1299 = vmatpush1.bf16.msra.mxu0 %v14503_v45  ;;  %v18487_v45 = vld [vmem:[%s25042_s0 + $0x8] sm:$0xff]   ;;  %v14542_v54 = vcombine.high %v14380_v43, %v14384_v44  ;;  %v14541_v59 = vcombine.low %v14380_v43, %v14384_v44 }
  0x63   :  { %1300 = vmatprep.subr.bf16.mxu0 %v14496_v47  ;;  %1372 = vmatpush1.bf16.msra.mxu1 %v14505_v46  ;;  %v14547_v47 = vcombine.low %v14387_v33, %v14391_v34  ;;  %v14386_v33 = vld [vmem:[%s25043_s1 + $0x1f8] sm:$0xff] }
  0x64   :  { %1373 = vmatprep.subr.bf16.mxu1 %v14498_v50  ;;  %v14375_v50 = vld [vmem:[%s25043_s1 + $0x1a0] sm:$0xff] }
  0x65   :  { %14516 = vmatmul.mubr.msk.bf16.gmra.mxu0 %vm503_vm0, %v18160_v9  ;;  %v14532_v60 = vcombine.high %v14371_v49, %v14375_v50  ;;  %v14531_v1 = vcombine.low %v14371_v49, %v14375_v50 }
  0x66   :  { %14520 = vmatmul.mubr.msk.bf16.gmra.mxu1 %vm503_vm0, %v18160_v9  ;;  %1301 = vmatpush1.bf16.msra.mxu0 %v14495_v53  ;;  %v14422_v9 = vld [vmem:[%s25043_s1 + $0x318] sm:$0xff]  ;;  %v14376_v53 = vld [vmem:[%s25043_s1 + $0x1a8] sm:$0xff] }
  0x67   :  { %1198 = vmatprep.mubr.bf16.mxu0 %v17976_v8  ;;  %1271 = vmatprep.mubr.bf16.mxu1 %v17976_v8  ;;  %v14474_v14 = vcombine.high %v14422_v9, %v14426_v3  ;;  %v14473_v16 = vcombine.low %v14422_v9, %v14426_v3  ;;  %v14534_v0 = vcombine.high %v14372_v52, %v14376_v53 }
  0x68   :  { %1302 = vmatprep.subr.bf16.mxu0 %v14488_v58  ;;  %1374 = vmatpush1.bf16.msra.mxu1 %v14497_v56  ;;  %v14413_v56 = vld [vmem:[%s25043_s1 + $0x2d0] sm:$0xff] }
  0x69   :  { %1375 = vmatprep.subr.bf16.mxu1 %v14490_v61  ;;  %v14417_v58 = vld [vmem:[%s25043_s1 + $0x2f0] sm:$0xff]  ;;  %v14414_v61 = vld [vmem:[%s25043_s1 + $0x2d8] sm:$0xff] }
  0x6a   :  { %1303 = vmatpush1.bf16.msra.mxu0 %v14487_v62  ;;  %v14418_v62 = vld [vmem:[%s25043_s1 + $0x2f8] sm:$0xff]  ;;  %v14576_v9 = vcombine.high %v14413_v56, %v14417_v58 }
  0x6b   :  { %1304 = vmatprep.subr.bf16.mxu0 %v14480_v63  ;;  %v18522_v63 = vld [vmem:[%s25042_s0 + $0x10] sm:$0xff]   ;;  %v14578_v3 = vcombine.high %v14414_v61, %v14418_v62 }
  0x6c   :  { %1376 = vmatpush1.bf16.msra.mxu1 %v14489_v2  ;;  %v14533_v2 = vcombine.low %v14372_v52, %v14376_v53 }
  0x6d   :  { %14517 = vmatmul.mubr.msk.bf16.gmra.mxu0 %vm503_vm0, %v18195_v25  ;;  %1377 = vmatprep.subr.bf16.mxu1 %v14482_v4  ;;  %v18533_v4 = vld [vmem:[%s25042_s0 + $0x18] sm:$0xff]  }
  0x6e   :  { %14521 = vmatmul.mubr.msk.bf16.gmra.mxu1 %vm503_vm0, %v18195_v25  ;;  %1208 = vmatprep.mubr.bf16.mxu0 %v17976_v8  ;;  %v14403_v25 = vld [vmem:[%s25043_s1 + $0x280] sm:$0xff] }
  0x6f   :  { %1281 = vmatprep.mubr.bf16.mxu1 %v17976_v8  ;;  %1305 = vmatpush1.bf16.msra.mxu0 %v14479_v5  ;;  %v14564_v26 = vcombine.high %v14403_v25, %v14407_v19  ;;  %v14563_v30 = vcombine.low %v14403_v25, %v14407_v19  ;;  %v14405_v5 = vld [vmem:[%s25043_s1 + $0x290] sm:$0xff] }
  0x70   :  { %1378 = vmatpush1.bf16.msra.mxu1 %v14481_v10  ;;  %1306 = vmatprep.subr.bf16.mxu0 %v14472_v11  ;;  %v14410_v10 = vld [vmem:[%s25043_s1 + $0x2b8] sm:$0xff]  ;;  %v14575_v11 = vcombine.low %v14413_v56, %v14417_v58  ;;  %v14567_v19 = vcombine.low %v14405_v5, %v14409_v6 }
  0x71   :  { %1379 = vmatprep.subr.bf16.mxu1 %v14474_v14  ;;  %v14577_v14 = vcombine.low %v14414_v61, %v14418_v62  ;;  %v14570_v25 = vcombine.high %v14406_v7, %v14410_v10 }
  0x73   :  { %1307 = vmatpush1.bf16.msra.mxu0 %v14471_v15  ;;  %v14568_v15 = vcombine.high %v14405_v5, %v14409_v6 }
  0x74   :  { %1380 = vmatpush1.bf16.msra.mxu1 %v14473_v16  ;;  %2003 = vmatprep.subr.bf16.mxu0 %v14572_v17  ;;  %v14398_v16 = vld [vmem:[%s25043_s1 + $0x258] sm:$0xff] }
  0x75   :  { %14518 = vmatmul.mubr.msk.bf16.gmra.mxu0 %vm503_vm0, %v18230_v42  ;;  %2076 = vmatprep.subr.bf16.mxu1 %v14574_v18  ;;  %v14402_v17 = vld [vmem:[%s25043_s1 + $0x278] sm:$0xff]  ;;  %v18568_v18 = vld [vmem:[%s25042_s0] sm:$0xff]  }
  0x76   :  { %14522 = vmatmul.mubr.msk.bf16.gmra.mxu1 %vm503_vm0, %v18230_v42  ;;  %1324 = vmatprep.mubr.bf16.mxu0 %v17976_v8  ;;  %v14408_v42 = vld [vmem:[%s25043_s1 + $0x2a8] sm:$0xff]  ;;  %v14562_v23 = vcombine.high %v14398_v16, %v14402_v17 }
  0x77   :  { %1397 = vmatprep.mubr.bf16.mxu1 %v17976_v8  ;;  %v14566_v29 = vcombine.high %v14404_v20, %v14408_v42  ;;  %v14565_v31 = vcombine.low %v14404_v20, %v14408_v42  ;;  %v14569_v20 = vcombine.low %v14406_v7, %v14410_v10  ;;  %v14560_v42 = vcombine.high %v14397_v12, %v14401_v13 }
  0x7d   :  { %14523 = vmatmul.mubr.msk.bf16.vlgmr.msra.gmra.mxu0 %vm503_vm0, %v18131_v57 }
  0x7e   :  { %14527 = vmatmul.mubr.msk.bf16.vlgmr.msra.gmra.mxu1 %vm503_vm0, %v18131_v57  ;;  %2004 = vmatpush1.bf16.msra.mxu0 %v14571_v21  ;;  %v14388_v57 = vld [vmem:[%s25043_s1 + $0x208] sm:$0xff]  ;;  %v14389_v21 = vld [vmem:[%s25043_s1 + $0x210] sm:$0xff] }
  0x7f   :  { %2077 = vmatpush1.bf16.msra.mxu1 %v14573_v24  ;;  %2005 = vmatprep.subr.bf16.mxu0 %v14564_v26  ;;  %v14550_v46 = vcombine.high %v14388_v57, %v14392_v36  ;;  %v14549_v51 = vcombine.low %v14388_v57, %v14392_v36  ;;  %v14390_v24 = vld [vmem:[%s25043_s1 + $0x218] sm:$0xff]  ;;  %v14373_v36 = vld [vmem:[%s25043_s1 + $0x190] sm:$0xff] }
  0x80   :  { %1334 = vmatprep.mubr.bf16.mxu0 %v17976_v8  ;;  %1407 = vmatprep.mubr.bf16.mxu1 %v17976_v8  ;;  %v14394_v26 = vld [vmem:[%s25043_s1 + $0x238] sm:$0xff] }
  0x81   :  { %2078 = vmatprep.subr.bf16.mxu1 %v14566_v29  ;;  %v14385_v29 = vld [vmem:[%s25043_s1 + $0x1f0] sm:$0xff]  ;;  %v14554_v34 = vcombine.high %v14390_v24, %v14394_v26  ;;  %v14553_v38 = vcombine.low %v14390_v24, %v14394_v26 }
  0x82   :  { %2006 = vmatpush1.bf16.msra.mxu0 %v14563_v30  ;;  %v14561_v30 = vcombine.low %v14398_v16, %v14402_v17  ;;  %v14544_v57 = vcombine.high %v14381_v28, %v14385_v29  ;;  %v14543_v43 = vcombine.low %v14381_v28, %v14385_v29 }
  0x83   :  { %2007 = vmatprep.subr.bf16.mxu0 %v14556_v32  ;;  %2079 = vmatpush1.bf16.msra.mxu1 %v14565_v31  ;;  %v14552_v31 = vcombine.high %v14389_v21, %v14393_v22  ;;  %v14382_v32 = vld [vmem:[%s25043_s1 + $0x1d8] sm:$0xff] }
  0x84   :  { %2080 = vmatprep.subr.bf16.mxu1 %v14558_v35  ;;  %v14551_v35 = vcombine.low %v14389_v21, %v14393_v22  ;;  %v14545_v44 = vcombine.low %v14382_v32, %v14386_v33 }
  0x85   :  { %14524 = vmatmul.mubr.msk.bf16.gmra.mxu0 %vm503_vm0, %v18487_v45 }
  0x86   :  { %14528 = vmatmul.mubr.msk.bf16.gmra.mxu1 %vm503_vm0, %v18487_v45  ;;  %2008 = vmatpush1.bf16.msra.mxu0 %v14555_v37  ;;  %v14377_v37 = vld [vmem:[%s25043_s1 + $0x1b0] sm:$0xff] }
  0x87   :  { %1344 = vmatprep.mubr.bf16.mxu0 %v17976_v8  ;;  %1417 = vmatprep.mubr.bf16.mxu1 %v17976_v8 }
  0x88   :  { %2009 = vmatprep.subr.bf16.mxu0 %v14548_v41  ;;  %2081 = vmatpush1.bf16.msra.mxu1 %v14557_v40  ;;  %v14378_v40 = vld [vmem:[%s25043_s1 + $0x1b8] sm:$0xff]  ;;  %v14546_v41 = vcombine.high %v14382_v32, %v14386_v33  ;;  %s17978_s1 = smov 32  }
  0x89   :  { %2082 = vmatprep.subr.bf16.mxu1 %v14550_v46  ;;  %v14536_v46 = vcombine.high %v14373_v36, %v14377_v37  ;;  %v14537_v49 = vcombine.low %v14374_v39, %v14378_v40 }
  0x8a   :  { %2010 = vmatpush1.bf16.msra.mxu0 %v14547_v47  ;;  %v14538_v47 = vcombine.high %v14374_v39, %v14378_v40 }
  0x8b   :  { %2011 = vmatprep.subr.bf16.mxu0 %v14540_v48  ;;  %v14535_v48 = vcombine.low %v14373_v36, %v14377_v37 }
  0x8c   :  { %2083 = vmatpush1.bf16.msra.mxu1 %v14549_v51 }
  0x8d   :  { %14525 = vmatmul.mubr.msk.bf16.gmra.mxu0 %vm503_vm0, %v18522_v63  ;;  %2084 = vmatprep.subr.bf16.mxu1 %v14542_v54 }
  0x8e   :  { %14529 = vmatmul.mubr.msk.bf16.gmra.mxu1 %vm503_vm0, %v18522_v63  ;;  %1354 = vmatprep.mubr.bf16.mxu0 %v17976_v8 }
  0x8f   :  { %1427 = vmatprep.mubr.bf16.mxu1 %v17976_v8  ;;  %2012 = vmatpush1.bf16.msra.mxu0 %v14539_v55 }
  0x90   :  { %2085 = vmatpush1.bf16.msra.mxu1 %v14541_v59  ;;  %2013 = vmatprep.subr.bf16.mxu0 %v14532_v60 }
  0x91   :  { %2086 = vmatprep.subr.bf16.mxu1 %v14534_v0 }
  0x93   :  { %2014 = vmatpush1.bf16.msra.mxu0 %v14531_v1 }
  0x94   :  { %2087 = vmatpush1.bf16.msra.mxu1 %v14533_v2  ;;  %2149 = vmatprep.subr.bf16.mxu0 %v14576_v9 }
  0x95   :  { %14526 = vmatmul.mubr.msk.bf16.gmra.mxu0 %vm503_vm0, %v18533_v4  ;;  %2222 = vmatprep.subr.bf16.mxu1 %v14578_v3 }
  0x96   :  { %14530 = vmatmul.mubr.msk.bf16.gmra.mxu1 %vm503_vm0, %v18533_v4  ;;  %2031 = vmatprep.mubr.bf16.mxu0 %v17976_v8 }
  0x97   :  { %2104 = vmatprep.mubr.bf16.mxu1 %v17976_v8 }
  0x9d   :  { %14579 = vmatmul.mubr.msk.bf16.vlgmr.msra.gmra.mxu0 %vm503_vm0, %v18568_v18 }
  0x9e   :  { %14583 = vmatmul.mubr.msk.bf16.vlgmr.msra.gmra.mxu1 %vm503_vm0, %v18568_v18  ;;  %2150 = vmatpush1.bf16.msra.mxu0 %v14575_v11 }
  0x9f   :  { %2223 = vmatpush1.bf16.msra.mxu1 %v14577_v14  ;;  %2151 = vmatprep.subr.bf16.mxu0 %v14568_v15 }
  0xa0   :  { %2041 = vmatprep.mubr.bf16.mxu0 %v17976_v8  ;;  %2114 = vmatprep.mubr.bf16.mxu1 %v17976_v8 }
  0xa1   :  { %2224 = vmatprep.subr.bf16.mxu1 %v14570_v25 }
  0xa2   :  { %2152 = vmatpush1.bf16.msra.mxu0 %v14567_v19 }
  0xa3   :  { %2153 = vmatprep.subr.bf16.mxu0 %v14560_v42  ;;  %2225 = vmatpush1.bf16.msra.mxu1 %v14569_v20 }
  0xa4   :  { %2226 = vmatprep.subr.bf16.mxu1 %v14562_v23 }
  0xa5   :  { %14580 = vmatmul.mubr.msk.bf16.gmra.mxu0 %vm503_vm0, %v18487_v45 }
  0xa6   :  { %14584 = vmatmul.mubr.msk.bf16.gmra.mxu1 %vm503_vm0, %v18487_v45  ;;  %2154 = vmatpush1.bf16.msra.mxu0 %v14559_v27 }
  0xa7   :  { %2051 = vmatprep.mubr.bf16.mxu0 %v17976_v8  ;;  %2124 = vmatprep.mubr.bf16.mxu1 %v17976_v8 }
  0xa8   :  { %2155 = vmatprep.subr.bf16.mxu0 %v14552_v31  ;;  %2227 = vmatpush1.bf16.msra.mxu1 %v14561_v30 }
  0xa9   :  { %2228 = vmatprep.subr.bf16.mxu1 %v14554_v34 }
  0xaa   :  { %2156 = vmatpush1.bf16.msra.mxu0 %v14551_v35 }
  0xab   :  { %2157 = vmatprep.subr.bf16.mxu0 %v14544_v57 }
  0xac   :  { %2229 = vmatpush1.bf16.msra.mxu1 %v14553_v38 }
  0xad   :  { %14581 = vmatmul.mubr.msk.bf16.gmra.mxu0 %vm503_vm0, %v18522_v63  ;;  %2230 = vmatprep.subr.bf16.mxu1 %v14546_v41 }
  0xae   :  { %14585 = vmatmul.mubr.msk.bf16.gmra.mxu1 %vm503_vm0, %v18522_v63  ;;  %2061 = vmatprep.mubr.bf16.mxu0 %v17976_v8 }
  0xaf   :  { %2134 = vmatprep.mubr.bf16.mxu1 %v17976_v8  ;;  %2158 = vmatpush1.bf16.msra.mxu0 %v14543_v43 }
  0xb0   :  { %2231 = vmatpush1.bf16.msra.mxu1 %v14545_v44  ;;  %2159 = vmatprep.subr.bf16.mxu0 %v14536_v46 }
  0xb1   :  { %2232 = vmatprep.subr.bf16.mxu1 %v14538_v47 }
  0xb3   :  { %2160 = vmatpush1.bf16.msra.mxu0 %v14535_v48 }
  0xb4   :  { %2233 = vmatpush1.bf16.msra.mxu1 %v14537_v49 }
  0xb5   :  { %14582 = vmatmul.mubr.msk.bf16.gmra.mxu0 %vm503_vm0, %v18533_v4 }
  0xb6   :  { %14586 = vmatmul.mubr.msk.bf16.gmra.mxu1 %vm503_vm0, %v18533_v4  ;;  %2177 = vmatprep.mubr.bf16.mxu0 %v17976_v8 }
  0xb7   :  { %2250 = vmatprep.mubr.bf16.mxu1 %v17976_v8 }
  0xbd   :  { %14587 = vmatmul.mubr.msk.bf16.vlgmr.msra.gmra.mxu0 %vm503_vm0, %v18568_v18 }
  0xbe   :  { %14591 = vmatmul.mubr.msk.bf16.vlgmr.msra.gmra.mxu1 %vm503_vm0, %v18568_v18  ;;  %2187 = vmatprep.mubr.bf16.mxu0 %v17976_v8 }
  0xbf   :  { %2260 = vmatprep.mubr.bf16.mxu1 %v17976_v8 }
  0xc5   :  { %14588 = vmatmul.mubr.msk.bf16.gmra.mxu0 %vm503_vm0, %v18487_v45 }
  0xc6   :  { %14592 = vmatmul.mubr.msk.bf16.gmra.mxu1 %vm503_vm0, %v18487_v45  ;;  %2197 = vmatprep.mubr.bf16.mxu0 %v17976_v8 }
  0xc7   :  { %2270 = vmatprep.mubr.bf16.mxu1 %v17976_v8 }
  0xcd   :  { %14589 = vmatmul.mubr.msk.bf16.gmra.mxu0 %vm503_vm0, %v18522_v63 }
  0xce   :  { %14593 = vmatmul.mubr.msk.bf16.gmra.mxu1 %vm503_vm0, %v18522_v63  ;;  %2207 = vmatprep.mubr.bf16.mxu0 %v17976_v8 }
  0xcf   :  { %2280 = vmatprep.mubr.bf16.mxu1 %v17976_v8 }
  0xd5   :  { %14590 = vmatmul.mubr.msk.bf16.gmra.mxu0 %vm503_vm0, %v18533_v4 }
  0xd6   :  { %14594 = vmatmul.mubr.msk.bf16.gmra.mxu1 %vm503_vm0, %v18533_v4 }
  0xdd   :  { %v18652_v45 = vpop.f32.mrf.mxu0  ;;  %v18654_v50 = vpop.f32.mrf.mxu1 }
  0xde   :  { %v25054_v53 = vrot.slane %v18654_v50, 7  ;;  %v25055_v55 = vrot.slane %v18652_v45, 7 }
  0xdf   :  { %v18656_v51 = vpop.f32.mrf.mxu0  ;;  %v18658_v52 = vpop.f32.mrf.mxu1 }
  0xe1   :  { %v554_v54 = vpop.f32.mrf.mxu0  ;;  %v627_v56 = vpop.f32.mrf.mxu1 }
  0xe2   :  { %v1511_v8 = vrot.slane %v554_v54, 7  ;;  %v1515_v58 = vrot.slane %v627_v56, 7 }
  0xe3   :  { %v18662_v59 = vpop.f32.mrf.mxu0  ;;  %v18664_v60 = vpop.f32.mrf.mxu1 }
  0xe4   :  { %v18669_v61 = vsel %vm1502_vm1, %v25055_v55, %v1511_v8  ;;  %v18674_v63 = vsel %vm1502_vm1, %v25054_v53, %v1515_v58 }
  0xe5   :  { %25153 = vst [vmem:[#allocation5_spill] sm:$0xff] %v18669_v61  ;;  %v560_v62 = vpop.f32.mrf.mxu0  ;;  %25154 = vst [vmem:[#allocation6_spill] sm:$0xff] %v18674_v63  ;;  %v633_v1 = vpop.f32.mrf.mxu1  ;;  %v17977_v61 = vmov 0.0  }
  0xe6   :  { %v1527_v0 = vrot.slane %v560_v62, 7  ;;  %v1531_v2 = vrot.slane %v633_v1, 7 }
  0xe7   :  { %v18676_v9 = vpop.f32.mrf.mxu0  ;;  %v18678_v3 = vpop.f32.mrf.mxu1 }
  0xe8   :  { %v18681_v4 = vsel %vm1502_vm1, %v1511_v8, %v1527_v0  ;;  %v18684_v6 = vsel %vm1502_vm1, %v1515_v58, %v1531_v2 }
  0xe9   :  { %25155 = vst [vmem:[#allocation7_spill] sm:$0xff] %v18681_v4  ;;  %v564_v5 = vpop.f32.mrf.mxu0  ;;  %25156 = vst [vmem:[#allocation8_spill] sm:$0xff] %v18684_v6  ;;  %v637_v10 = vpop.f32.mrf.mxu1 }
  0xea   :  { %v1543_v7 = vrot.slane %v564_v5, 7  ;;  %v1547_v11 = vrot.slane %v637_v10, 7 }
  0xeb   :  { %v18686_v12 = vpop.f32.mrf.mxu0  ;;  %v18688_v13 = vpop.f32.mrf.mxu1 }
  0xec   :  { %v18691_v14 = vsel %vm1502_vm1, %v1527_v0, %v1543_v7  ;;  %v18694_v16 = vsel %vm1502_vm1, %v1531_v2, %v1547_v11 }
  0xed   :  { %25157 = vst [vmem:[#allocation9_spill] sm:$0xff] %v18691_v14  ;;  %v570_v15 = vpop.f32.mrf.mxu0  ;;  %25158 = vst [vmem:[#allocation10_spill] sm:$0xff] %v18694_v16 }
  0xee   :  { %v1559_v17 = vrot.slane %v570_v15, 7  ;;  %v643_v18 = vpop.f32.mrf.mxu1 }
  0xef   :  { %v1563_v25 = vrot.slane %v643_v18, 7  ;;  %v18696_v19 = vpop.f32.mrf.mxu0 }
  0xf0   :  { %v18698_v20 = vpop.f32.mrf.mxu1  ;;  %v18701_v42 = vsel %vm1502_vm1, %v1543_v7, %v1559_v17 }
  0xf1   :  { %v574_v21 = vpop.f32.mrf.mxu0  ;;  %v18704_v22 = vsel %vm1502_vm1, %v1547_v11, %v1563_v25 }
  0xf2   :  { %v1575_v23 = vrot.slane %v574_v21, 7  ;;  %v647_v24 = vpop.f32.mrf.mxu1 }
  0xf3   :  { %v1579_v26 = vrot.slane %v647_v24, 7  ;;  %v18706_v27 = vpop.f32.mrf.mxu0 }
  0xf4   :  { %v18708_v28 = vpop.f32.mrf.mxu1  ;;  %v18711_v29 = vsel %vm1502_vm1, %v1559_v17, %v1575_v23 }
  0xf5   :  { %25159 = vst [vmem:[#allocation11_spill] sm:$0xff] %v18711_v29  ;;  %v580_v30 = vpop.f32.mrf.mxu0  ;;  %v18714_v31 = vsel %vm1502_vm1, %v1563_v25, %v1579_v26 }
  0xf6   :  { %25160 = vst [vmem:[#allocation12_spill] sm:$0xff] %v18714_v31  ;;  %v1591_v32 = vrot.slane %v580_v30, 7  ;;  %v653_v33 = vpop.f32.mrf.mxu1 }
  0xf7   :  { %v1595_v34 = vrot.slane %v653_v33, 7  ;;  %v18716_v35 = vpop.f32.mrf.mxu0 }
  0xf8   :  { %v18718_v57 = vpop.f32.mrf.mxu1  ;;  %v18721_v36 = vsel %vm1502_vm1, %v1575_v23, %v1591_v32 }
  0xf9   :  { %25161 = vst [vmem:[#allocation13_spill] sm:$0xff] %v18721_v36  ;;  %v584_v37 = vpop.f32.mrf.mxu0  ;;  %v18724_v38 = vsel %vm1502_vm1, %v1579_v26, %v1595_v34 }
  0xfa   :  { %25162 = vst [vmem:[#allocation14_spill] sm:$0xff] %v18724_v38  ;;  %v1607_v39 = vrot.slane %v584_v37, 7  ;;  %v657_v40 = vpop.f32.mrf.mxu1 }
  0xfb   :  { %v1611_v41 = vrot.slane %v657_v40, 7  ;;  %v18726_v43 = vpop.f32.mrf.mxu0 }
  0xfc   :  { %v18728_v44 = vpop.f32.mrf.mxu1  ;;  %v18731_v46 = vsel %vm1502_vm1, %v1591_v32, %v1607_v39 }
  0xfd   :  { %25163 = vst [vmem:[#allocation15_spill] sm:$0xff] %v18731_v46  ;;  %v18733_v47 = vpop.f32.mrf.mxu0  ;;  %v18736_v48 = vsel %vm1502_vm1, %v1595_v34, %v1611_v41 }
  0xfe   :  { %25164 = vst [vmem:[#allocation16_spill] sm:$0xff] %v18736_v48  ;;  %v18738_v49 = vpop.f32.mrf.mxu1  ;;  %v25053_v62 = vrot.slane %v18733_v47, 7 }
  0xff   :  { %v18740_v54 = vpop.f32.mrf.mxu0  ;;  %v25052_v56 = vrot.slane %v18738_v49, 7 }
 0x100   :  { %v18742_v8 = vpop.f32.mrf.mxu1 }
 0x101   :  { %v700_v58 = vpop.f32.mrf.mxu0 }
 0x102   :  { %v1519_v0 = vrot.slane %v700_v58, 7  ;;  %v773_v1 = vpop.f32.mrf.mxu1 }
 0x103   :  { %v1523_v2 = vrot.slane %v773_v1, 7  ;;  %v18746_v5 = vpop.f32.mrf.mxu0 }
 0x104   :  { %v18748_v7 = vpop.f32.mrf.mxu1  ;;  %v18753_v10 = vsel %vm1502_vm1, %v25053_v62, %v1519_v0 }
 0x105   :  { %25165 = vst [vmem:[#allocation17_spill] sm:$0xff] %v18753_v10  ;;  %v706_v11 = vpop.f32.mrf.mxu0  ;;  %v18758_v15 = vsel %vm1502_vm1, %v25052_v56, %v1523_v2 }
 0x106   :  { %25166 = vst [vmem:[#allocation18_spill] sm:$0xff] %v18758_v15  ;;  %v1535_v17 = vrot.slane %v706_v11, 7  ;;  %v779_v18 = vpop.f32.mrf.mxu1  ;;  %v25056_v15 = vlaneseq }
 0x107   :  { %v1539_v25 = vrot.slane %v779_v18, 7  ;;  %v18760_v21 = vpop.f32.mrf.mxu0 }
 0x108   :  { %v18762_v23 = vpop.f32.mrf.mxu1  ;;  %v18765_v24 = vsel %vm1502_vm1, %v1519_v0, %v1535_v17  ;;  %v18818_v46 = vshrl.u32 %v25056_v15, 7 }
 0x109   :  { %25167 = vst [vmem:[#allocation19_spill] sm:$0xff] %v18765_v24  ;;  %v710_v26 = vpop.f32.mrf.mxu0  ;;  %v18768_v30 = vsel %vm1502_vm1, %v1523_v2, %v1539_v25 }
 0x10a   :  { %25168 = vst [vmem:[#allocation20_spill] sm:$0xff] %v18768_v30  ;;  %v1551_v32 = vrot.slane %v710_v26, 7  ;;  %v783_v33 = vpop.f32.mrf.mxu1  ;;  %25176 = vst [vmem:[#allocation28_spill] sm:$0xff] %v18818_v46  ;;  %v38_v38 = vadd.s32 24, %v18818_v46 }
 0x10b   :  { %v1555_v34 = vrot.slane %v783_v33, 7  ;;  %v18770_v37 = vpop.f32.mrf.mxu0 }
 0x10c   :  { %v18772_v39 = vpop.f32.mrf.mxu1  ;;  %v18775_v40 = vsel %vm1502_vm1, %v1535_v17, %v1551_v32  ;;  %v68_v6 = vand.u32 31, %v38_v38  ;;  %v1506_v38 = vrot.slane %v18658_v52, 7  ;;  %v25188_v52 = vrot.slane %v18652_v45, 7 }
 0x10d   :  { %25169 = vst [vmem:[#allocation21_spill] sm:$0xff] %v18775_v40  ;;  %v716_v41 = vpop.f32.mrf.mxu0  ;;  %v18778_v58 = vsel %vm1502_vm1, %v1539_v25, %v1555_v34 }
 0x10e   :  { %25170 = vst [vmem:[#allocation22_spill] sm:$0xff] %v18778_v58  ;;  %v1567_v0 = vrot.slane %v716_v41, 7  ;;  %v789_v1 = vpop.f32.mrf.mxu1  ;;  %vm166_vm6 = vcmp.ne.s32.totalorder %v68_v6, 31  ;;  %v1687_v6 = vsel %vm1502_vm1, 0.0, %v25188_v52 }
 0x10f   :  { %v1571_v11 = vrot.slane %v789_v1, 7  ;;  %v18780_v18 = vpop.f32.mrf.mxu0 }
 0x110   :  { %v18782_v2 = vpop.f32.mrf.mxu1  ;;  %v18785_v26 = vsel %vm1502_vm1, %v1551_v32, %v1567_v0 }
 0x111   :  { %v720_v33 = vpop.f32.mrf.mxu0  ;;  %v18788_v56 = vsel %vm1502_vm1, %v1555_v34, %v1571_v11 }
 0x112   :  { %v1583_v17 = vrot.slane %v720_v33, 7  ;;  %v793_v62 = vpop.f32.mrf.mxu1 }
 0x113   :  { %v1587_v53 = vrot.slane %v793_v62, 7  ;;  %v18790_v55 = vpop.f32.mrf.mxu0 }
 0x114   :  { %v18792_v25 = vpop.f32.mrf.mxu1  ;;  %v18795_v41 = vsel %vm1502_vm1, %v1567_v0, %v1583_v17 }
 0x115   :  { %25171 = vst [vmem:[#allocation23_spill] sm:$0xff] %v18795_v41  ;;  %v726_v1 = vpop.f32.mrf.mxu0  ;;  %v18798_v58 = vsel %vm1502_vm1, %v1571_v11, %v1587_v53 }
 0x116   :  { %25172 = vst [vmem:[#allocation24_spill] sm:$0xff] %v18798_v58  ;;  %v1599_v32 = vrot.slane %v726_v1, 7  ;;  %v799_v40 = vpop.f32.mrf.mxu1 }
 0x117   :  { %v1603_v30 = vrot.slane %v799_v40, 7  ;;  %v18800_v24 = vpop.f32.mrf.mxu0 }
 0x118   :  { %v18802_v34 = vpop.f32.mrf.mxu1  ;;  %v18805_v62 = vsel %vm1502_vm1, %v1583_v17, %v1599_v32 }
 0x119   :  { %25173 = vst [vmem:[#allocation25_spill] sm:$0xff] %v18805_v62  ;;  %v730_v33 = vpop.f32.mrf.mxu0  ;;  %v18808_v10 = vsel %vm1502_vm1, %v1587_v53, %v1603_v30 }
 0x11a   :  { %25174 = vst [vmem:[#allocation26_spill] sm:$0xff] %v18808_v10  ;;  %v1615_v0 = vrot.slane %v730_v33, 7  ;;  %v803_v41 = vpop.f32.mrf.mxu1  ;;  %v39_v33 = vadd.s32 32, %v18818_v46  ;;  %v42_v10 = vadd.s32 56, %v18818_v46 }
 0x11b   :  { %v1619_v48 = vrot.slane %v803_v41, 7  ;;  %v18810_v11 = vpop.f32.mrf.mxu0 }
 0x11c   :  { %v18812_v1 = vpop.f32.mrf.mxu1  ;;  %v18815_v40 = vsel %vm1502_vm1, %v1599_v32, %v1615_v0  ;;  %v96_v16 = vand.u32 31, %v42_v10 }
 0x11d   :  { %25175 = vst [vmem:[#allocation27_spill] sm:$0xff] %v18815_v40  ;;  %v1180_v58 = vpop.f32.mrf.mxu0  ;;  %v18821_v17 = vsel %vm1502_vm1, %v1603_v30, %v1619_v48  ;;  %v47_v30 = vand.u32 31, %v18818_v46 }
 0x11e   :  { %25177 = vst [vmem:[#allocation29_spill] sm:$0xff] %v18821_v17  ;;  %v1253_v62 = vpop.f32.mrf.mxu1  ;;  %v2356_v40 = vrot.slane %v1180_v58, 1  ;;  %v75_v17 = vand.u32 31, %v39_v33  ;;  %v1504_v33 = vrot.slane %v18656_v51, 7  ;;  %vm170_vm5 = vcmp.ne.s32.totalorder %v96_v16, 31 }
 0x11f   :  { %v18823_v53 = vpop.f32.mrf.mxu0  ;;  %v2362_v32 = vrot.slane %v1253_v62, 1  ;;  %vm139_vm3 = vcmp.ne.s32.totalorder %v47_v30, 0  ;;  %v18859_v16 = vsel %vm170_vm5, 1.0, %v17977_v61 }
 0x120   :  { %v18826_v41 = vpop.f32.mrf.mxu1  ;;  %vm143_vm4 = vcmp.ne.s32.totalorder %v75_v17, 0  ;;  %v18853_v30 = vsel %vm139_vm3, 1.0, %v17977_v61  ;;  %25186 = vst [vmem:[#allocation38_spill] sm:$0xff] %v18859_v16  ;;  %v1517_v16 = vrot.slane %v18664_v60, 7 }
 0x121   :  { %v1184_v0 = vpop.f32.mrf.mxu0  ;;  %25183 = vst [vmem:[#allocation35_spill] sm:$0xff] %v18853_v30  ;;  %v18855_v17 = vsel %vm143_vm4, 1.0, %v17977_v61 }
 0x122   :  { %v2357_v15 = vrot.slane %v1184_v0, 1  ;;  %v1257_v36 = vpop.f32.mrf.mxu1  ;;  %25184 = vst [vmem:[#allocation36_spill] sm:$0xff] %v18855_v17 }
 0x123   :  { %v2363_v31 = vrot.slane %v1257_v36, 1  ;;  %v18830_v48 = vpop.f32.mrf.mxu0 }
 0x124   :  { %v18833_v29 = vpop.f32.mrf.mxu1  ;;  %v18836_v14 = vsel %vm2355_vm2, %v2356_v40, %v2357_v15 }
 0x125   :  { %25178 = vst [vmem:[#allocation30_spill] sm:$0xff] %v18836_v14  ;;  %v1190_v4 = vpop.f32.mrf.mxu0  ;;  %v18839_v62 = vsel %vm2355_vm2, %v2362_v32, %v2363_v31  ;;  %v1690_v14 = vsel %vm1502_vm1, 0.0, %v1506_v38 }
 0x126   :  { %25179 = vst [vmem:[#allocation31_spill] sm:$0xff] %v18839_v62  ;;  %v2380_v58 = vrot.slane %v1190_v4, 1  ;;  %v1263_v0 = vpop.f32.mrf.mxu1 }
 0x127   :  { %v2384_v63 = vrot.slane %v1263_v0, 1  ;;  %v18841_v36 = vpop.f32.mrf.mxu0 }
 0x128   :  { %v18844_v46 = vpop.f32.mrf.mxu1  ;;  %v18847_v10 = vsel %vm2355_vm2, %v2357_v15, %v2380_v58  ;;  %v18861_v15 = vsel %vm166_vm6, 1.0, %v17977_v61  ;;  %v1513_v61 = vrot.slane %v18662_v59, 7  ;;  %v1565_v59 = vrot.slane %v18698_v20, 7 }
 0x129   :  { %25180 = vst [vmem:[#allocation32_spill] sm:$0xff] %v18844_v46  ;;  %25181 = vst [vmem:[#allocation33_spill] sm:$0xff] %v18847_v10  ;;  %v1194_v40 = vpop.f32.mrf.mxu0  ;;  %v18851_v4 = vsel %vm2355_vm2, %v2363_v31, %v2384_v63  ;;  %v25189_v31 = vrot.slane %v18654_v50, 7  ;;  %v1529_v50 = vrot.slane %v18676_v9, 7  ;;  %v18894_v9 = vmul.f32 %v18853_v30, %v1687_v6 }
 0x12a   :  { %25182 = vst [vmem:[#allocation34_spill] sm:$0xff] %v18851_v4  ;;  %v2396_v32 = vrot.slane %v1194_v40, 1  ;;  %v1267_v0 = vpop.f32.mrf.mxu1  ;;  %25187 = vst [vmem:[#allocation39_spill] sm:$0xff] %v18861_v15  ;;  %v1688_v4 = vsel %vm1502_vm1, 0.0, %v1504_v33  ;;  %v18906_v20 = vmul.f32 %v18853_v30, %v1690_v14 }
 0x12b   :  { %v2400_v51 = vrot.slane %v1267_v0, 1  ;;  %v18857_v62 = vpop.f32.mrf.mxu0  ;;  %v1689_v40 = vsel %vm1502_vm1, 0.0, %v25189_v31  ;;  %v1533_v31 = vrot.slane %v18678_v3, 7 }
 0x12c   :  { %25185 = vst [vmem:[#allocation37_spill] sm:$0xff] %v18857_v62  ;;  %v18870_v10 = vpop.f32.mrf.mxu1  ;;  %v18873_v0 = vsel %vm2355_vm2, %v2380_v58, %v2396_v32  ;;  %v1561_v58 = vrot.slane %v18696_v19, 7  ;;  %v18897_v3 = vmul.f32 %v18853_v30, %v1689_v40  ;;  %v18915_v40 = vsel %vm1502_vm1, %v1506_v38, %v1517_v16 }
 0x12d   :  { %25190 = vst [vmem:[#allocation40_spill] sm:$0xff] %v18870_v10  ;;  %25191 = vst [vmem:[#allocation41_spill] sm:$0xff] %v18873_v0  ;;  %v1200_v45 = vpop.f32.mrf.mxu0  ;;  %v18879_v52 = vsel %vm2355_vm2, %v2384_v63, %v2400_v51  ;;  %v1545_v10 = vrot.slane %v18686_v12, 7  ;;  %v18924_v14 = vsel %vm1502_vm1, %v1517_v16, %v1533_v31  ;;  %v1581_v38 = vrot.slane %v18708_v28, 7 }
 0x12e   :  { %25192 = vst [vmem:[#allocation42_spill] sm:$0xff] %v18879_v52  ;;  %v2412_v15 = vrot.slane %v1200_v45, 1  ;;  %v1273_v62 = vpop.f32.mrf.mxu1  ;;  %v1549_v45 = vrot.slane %v18688_v13, 7  ;;  %25195 = vst [vmem:[#allocation45_spill] sm:$0xff] %v18915_v40  ;;  %v1508_v16 = vrot.slane %v18740_v54, 7  ;;  %v1597_v28 = vrot.slane %v18718_v57, 7 }
 0x12f   :  { %v2416_v0 = vrot.slane %v1273_v62, 1  ;;  %v18885_v46 = vpop.f32.mrf.mxu0  ;;  %v18903_v62 = vmul.f32 %v18853_v30, %v1688_v4  ;;  %25197 = vst [vmem:[#allocation47_spill] sm:$0xff] %v18924_v14  ;;  %v1562_v13 = vsel %vm1502_vm1, %v1545_v10, %v1561_v58  ;;  %v1609_v54 = vrot.slane %v18726_v43, 7 }
 0x130   :  { %v18889_v60 = vsel %vm2355_vm2, %v2396_v32, %v2412_v15  ;;  %v18891_v63 = vpop.f32.mrf.mxu1  ;;  %v18909_v32 = vsel %vm1502_vm1, %v1504_v33, %v1513_v61  ;;  %v18927_v33 = vsel %vm1502_vm1, %v1529_v50, %v1545_v10  ;;  %v1566_v4 = vsel %vm1502_vm1, %v1549_v45, %v1565_v59 }
 0x131   :  { %v18900_v12 = vsel %vm2355_vm2, %v2400_v51, %v2416_v0  ;;  %v1204_v19 = vpop.f32.mrf.mxu0  ;;  %25193 = vst [vmem:[#allocation43_spill] sm:$0xff] %v18903_v62  ;;  %25194 = vst [vmem:[#allocation44_spill] sm:$0xff] %v18909_v32  ;;  %v18918_v51 = vsel %vm1502_vm1, %v1513_v61, %v1529_v50  ;;  %v1510_v50 = vrot.slane %v18742_v8, 7  ;;  %v1613_v8 = vrot.slane %v18728_v44, 7 }
 0x132   :  { %v2428_v6 = vrot.slane %v1204_v19, 1  ;;  %v18912_v52 = vpop.f32.mrf.mxu1  ;;  %25196 = vst [vmem:[#allocation46_spill] sm:$0xff] %v18918_v51  ;;  %25198 = vst [vmem:[#allocation48_spill] sm:$0xff] %v18927_v33  ;;  %v1577_v19 = vrot.slane %v18706_v27, 7  ;;  %v1593_v51 = vrot.slane %v18716_v35, 7  ;;  %v18954_v35 = vmul.f32 %v18855_v17, %v18701_v42 }
 0x133   :  { %v18921_v62 = vpop.f32.mrf.mxu0  ;;  %v25200_v10 = vrot.slane %v18912_v52, 1  ;;  %v18965_v57 = vmul.f32 %v18855_v17, %v1562_v13  ;;  %v25203_v42 = vrot.slane %v18738_v49, 7  ;;  %v18976_v44 = vmul.f32 %v18855_v17, %v1566_v4 }
 0x134   :  { %v18932_v40 = vpop.f32.mrf.mxu1  ;;  %v18935_v61 = vsel %vm2355_vm2, %v2412_v15, %v2428_v6  ;;  %v18950_v15 = vsel %vm1502_vm1, %v1533_v31, %v1549_v45  ;;  %v25202_v31 = vrot.slane %v18733_v47, 7  ;;  %v1694_v13 = vsel %vm1502_vm1, 0.0, %v1510_v50 }
 0x135   :  { %25199 = vst [vmem:[#allocation49_spill] sm:$0xff] %v18935_v61  ;;  %v1210_v33 = vpop.f32.mrf.mxu0  ;;  %v18944_v27 = vsel %vm2355_vm2, %v2416_v0, %v25200_v10  ;;  %v18962_v0 = vmul.f32 %v18855_v17, %v18704_v22  ;;  %25204 = vst [vmem:[#allocation51_spill] sm:$0xff] %v18976_v44  ;;  %v1692_v22 = vsel %vm1502_vm1, 0.0, %v1508_v16  ;;  %v18986_v47 = vsel %vm1502_vm1, %v1561_v58, %v1577_v19 }
 0x136   :  { %25201 = vst [vmem:[#allocation50_spill] sm:$0xff] %v18944_v27  ;;  %v2444_v14 = vrot.slane %v1210_v33, 1  ;;  %v18947_v32 = vpop.f32.mrf.mxu1  ;;  %v1691_v45 = vsel %vm1502_vm1, 0.0, %v25202_v31  ;;  %v1693_v33 = vsel %vm1502_vm1, 0.0, %v25203_v42  ;;  %25206 = vst [vmem:[#allocation53_spill] sm:$0xff] %v18986_v47  ;;  %v18989_v49 = vsel %vm1502_vm1, %v1565_v59, %v1581_v38 }
 0x137   :  { %v18958_v61 = vpop.f32.mrf.mxu0  ;;  %v1521_v31 = vrot.slane %v18746_v5, 7  ;;  %v1525_v44 = vrot.slane %v18748_v7, 7  ;;  %v1537_v58 = vrot.slane %v18760_v21, 7  ;;  %v19006_v59 = vsel %vm1502_vm1, %v1593_v51, %v1609_v54 }
 0x138   :  { %v18973_v43 = vpop.f32.mrf.mxu1  ;;  %v18979_v10 = vsel %vm2355_vm2, %v2428_v6, %v2444_v14  ;;  %v18996_v6 = vsel %vm1502_vm1, %v1577_v19, %v1593_v51  ;;  %25208 = vst [vmem:[#allocation55_spill] sm:$0xff] %v19006_v59  ;;  %v19009_v5 = vsel %vm1502_vm1, %v1597_v28, %v1613_v8  ;;  %v1541_v4 = vrot.slane %v18762_v23, 7 }
 0x139   :  { %25205 = vst [vmem:[#allocation52_spill] sm:$0xff] %v18979_v10  ;;  %v18983_v27 = vpop.f32.mrf.mxu0  ;;  %25207 = vst [vmem:[#allocation54_spill] sm:$0xff] %v18996_v6  ;;  %v18999_v10 = vsel %vm1502_vm1, %v1581_v38, %v1597_v28  ;;  %v1569_v19 = vrot.slane %v18780_v18, 7  ;;  %v19021_v21 = vmul.f32 %v18853_v30, %v1691_v45  ;;  %v1553_v51 = vrot.slane %v18770_v37, 7 }
 0x13a   :  { %v18993_v42 = vpop.f32.mrf.mxu1  ;;  %25209 = vst [vmem:[#allocation56_spill] sm:$0xff] %v19009_v5  ;;  %v25210_v38 = vrot.slane %v18983_v27, 1  ;;  %v1573_v54 = vrot.slane %v18782_v2, 7  ;;  %v19026_v8 = vmul.f32 %v18853_v30, %v1693_v33  ;;  %v19029_v23 = vmul.f32 %v18853_v30, %v1692_v22 }
 0x13b   :  { %v19003_v47 = vpop.f32.mrf.mxu0  ;;  %25211 = vst [vmem:[#allocation57_spill] sm:$0xff] %v19021_v21  ;;  %v1557_v18 = vrot.slane %v18772_v39, 7  ;;  %v1585_v5 = vrot.slane %v18790_v55, 7  ;;  %v19037_v45 = vsel %vm1502_vm1, %v1508_v16, %v1521_v31  ;;  %v1589_v37 = vrot.slane %v18792_v25, 7 }
 0x13c   :  { %v19013_v6 = vpop.f32.mrf.mxu1  ;;  %v19018_v7 = vsel %vm2355_vm2, %v2444_v14, %v25210_v38  ;;  %25212 = vst [vmem:[#allocation58_spill] sm:$0xff] %v19026_v8  ;;  %25213 = vst [vmem:[#allocation59_spill] sm:$0xff] %v19029_v23  ;;  %v19034_v38 = vmul.f32 %v18853_v30, %v1694_v13  ;;  %v1601_v2 = vrot.slane %v18800_v24, 7  ;;  %v19044_v22 = vsel %vm1502_vm1, %v1510_v50, %v1525_v44 }
 0x13d   :  { %v1326_v28 = vpop.f32.mrf.mxu0  ;;  %25215 = vst [vmem:[#allocation61_spill] sm:$0xff] %v19037_v45  ;;  %25216 = vst [vmem:[#allocation62_spill] sm:$0xff] %v19044_v22  ;;  %v19047_v39 = vsel %vm1502_vm1, %v1521_v31, %v1537_v58  ;;  %v1605_v55 = vrot.slane %v18802_v34, 7  ;;  %v1617_v13 = vrot.slane %v18810_v11, 7  ;;  %v19054_v16 = vsel %vm1502_vm1, %v1525_v44, %v1541_v4 }
 0x13e   :  { %v1399_v14 = vpop.f32.mrf.mxu1  ;;  %25214 = vst [vmem:[#allocation60_spill] sm:$0xff] %v19034_v38  ;;  %25217 = vst [vmem:[#allocation63_spill] sm:$0xff] %v19047_v39  ;;  %v1570_v25 = vsel %vm1502_vm1, %v1553_v51, %v1569_v19  ;;  %v1621_v24 = vrot.slane %v18812_v1, 7  ;;  %v19059_v50 = vsel %vm1502_vm1, %v1537_v58, %v1553_v51  ;;  %v1574_v31 = vsel %vm1502_vm1, %v1557_v18, %v1573_v54 }
 0x13f   :  { %v19041_v33 = vpop.f32.mrf.mxu0  ;;  %25218 = vst [vmem:[#allocation64_spill] sm:$0xff] %v19054_v16  ;;  %v2374_v45 = vrot.slane %v1399_v14, 1  ;;  %25219 = vst [vmem:[#allocation65_spill] sm:$0xff] %v19059_v50  ;;  %v2368_v39 = vrot.slane %v1326_v28, 1  ;;  %v19063_v11 = vsel %vm1502_vm1, %v1541_v4, %v1557_v18  ;;  %v19067_v44 = vmul.f32 %v18855_v17, %v18785_v26 }
 0x140   :  { %v19051_v30 = vpop.f32.mrf.mxu1  ;;  %25220 = vst [vmem:[#allocation66_spill] sm:$0xff] %v19063_v11  ;;  %v2359_v16 = vrot.slane %v18823_v53, 1  ;;  %v19074_v58 = vmul.f32 %v18855_v17, %v18788_v56  ;;  %v19077_v51 = vmul.f32 %v18855_v17, %v1570_v25  ;;  %v2365_v28 = vrot.slane %v18826_v41, 1 }
 0x141   :  { %v1330_v38 = vpop.f32.mrf.mxu0  ;;  %25221 = vst [vmem:[#allocation67_spill] sm:$0xff] %v19067_v44  ;;  %v2360_v4 = vrot.slane %v18830_v48, 1  ;;  %v19087_v53 = vmul.f32 %v18855_v17, %v1574_v31  ;;  %v2382_v56 = vrot.slane %v18841_v36, 1  ;;  %v19095_v41 = vsel %vm1502_vm1, %v1569_v19, %v1585_v5  ;;  %v25228_v48 = vld [vmem:[#allocation32_spill] sm:$0xff] }
 0x142   :  { %v2369_v34 = vrot.slane %v1330_v38, 1  ;;  %v1403_v22 = vpop.f32.mrf.mxu1  ;;  %25222 = vst [vmem:[#allocation68_spill] sm:$0xff] %v19074_v58  ;;  %25223 = vst [vmem:[#allocation69_spill] sm:$0xff] %v19077_v51  ;;  %v2366_v38 = vrot.slane %v18833_v29, 1  ;;  %v2386_v51 = vrot.slane %v25228_v48, 1  ;;  %v19102_v31 = vsel %vm1502_vm1, %v1585_v5, %v1601_v2  ;;  %v25231_v29 = vld [vmem:[#allocation37_spill] sm:$0xff] }
 0x143   :  { %v2375_v1 = vrot.slane %v1403_v22, 1  ;;  %v19070_v14 = vpop.f32.mrf.mxu0  ;;  %25225 = vst [vmem:[#allocation71_spill] sm:$0xff] %v19087_v53  ;;  %25227 = vst [vmem:[#allocation73_spill] sm:$0xff] %v19095_v41  ;;  %v2398_v17 = vrot.slane %v25231_v29, 1  ;;  %v19111_v19 = vsel %vm1502_vm1, %v1601_v2, %v1617_v13  ;;  %v25234_v48 = vld [vmem:[#allocation40_spill] sm:$0xff]  ;;  %v2414_v41 = vrot.slane %v18885_v46, 1 }
 0x144   :  { %v19081_v18 = vpop.f32.mrf.mxu1  ;;  %v19084_v26 = vsel %vm2355_vm2, %v2368_v39, %v2369_v34  ;;  %v19099_v39 = vsel %vm1502_vm1, %v1573_v54, %v1589_v37  ;;  %25230 = vst [vmem:[#allocation74_spill] sm:$0xff] %v19102_v31  ;;  %25233 = vst [vmem:[#allocation75_spill] sm:$0xff] %v19111_v19  ;;  %v19121_v29 = vsel %vm1502_vm1, %v1605_v55, %v1621_v24  ;;  %v2434_v46 = vrot.slane %v18932_v40, 1 }
 0x145   :  { %25224 = vst [vmem:[#allocation70_spill] sm:$0xff] %v19084_v26  ;;  %v1336_v22 = vpop.f32.mrf.mxu0  ;;  %v19092_v25 = vsel %vm2355_vm2, %v2374_v45, %v2375_v1  ;;  %25229 = vst [vmem:[#allocation32_spill] sm:$0xff] %v19099_v39  ;;  %v19108_v45 = vsel %vm1502_vm1, %v1589_v37, %v1605_v55  ;;  %v2430_v37 = vrot.slane %v18921_v62, 1  ;;  %v19126_v2 = vsel %vm2355_vm2, %v2359_v16, %v2360_v4 }
 0x146   :  { %25226 = vst [vmem:[#allocation72_spill] sm:$0xff] %v19092_v25  ;;  %v2388_v58 = vrot.slane %v1336_v22, 1  ;;  %v1409_v44 = vpop.f32.mrf.mxu1  ;;  %25232 = vst [vmem:[#allocation37_spill] sm:$0xff] %v19108_v45  ;;  %v2402_v22 = vrot.slane %v25234_v48, 1  ;;  %v19136_v55 = vsel %vm2355_vm2, %v2360_v4, %v2382_v56  ;;  %v19142_v16 = vsel %vm2355_vm2, %v2366_v38, %v2386_v51 }
 0x147   :  { %v2392_v36 = vrot.slane %v1409_v44, 1  ;;  %v19105_v53 = vpop.f32.mrf.mxu0  ;;  %25236 = vst [vmem:[#allocation76_spill] sm:$0xff] %v19121_v29  ;;  %v2418_v44 = vrot.slane %v18891_v63, 1  ;;  %v2448_v63 = vrot.slane %v18947_v32, 1  ;;  %v2415_v40 = vsel %vm2355_vm2, %v2398_v17, %v2414_v41 }
 0x148   :  { %v19115_v54 = vpop.f32.mrf.mxu1  ;;  %v19118_v5 = vsel %vm2355_vm2, %v2369_v34, %v2388_v58  ;;  %v19133_v34 = vsel %vm2355_vm2, %v2365_v28, %v2366_v38  ;;  %v2462_v28 = vrot.slane %v19003_v47, 1  ;;  %v2466_v38 = vrot.slane %v19013_v6, 1 }
 0x149   :  { %25235 = vst [vmem:[#allocation40_spill] sm:$0xff] %v19118_v5  ;;  %v1340_v45 = vpop.f32.mrf.mxu0  ;;  %v19129_v13 = vsel %vm2355_vm2, %v2375_v1, %v2392_v36  ;;  %v19145_v1 = vsel %vm2355_vm2, %v2382_v56, %v2398_v17  ;;  %v2419_v32 = vsel %vm2355_vm2, %v2402_v22, %v2418_v44  ;;  %v2450_v17 = vrot.slane %v18973_v43, 1 }
 0x14a   :  { %25237 = vst [vmem:[#allocation77_spill] sm:$0xff] %v19129_v13  ;;  %v2404_v48 = vrot.slane %v1340_v45, 1  ;;  %v1413_v19 = vpop.f32.mrf.mxu1  ;;  %v2464_v45 = vrot.slane %v18993_v42, 1  ;;  %v19163_v47 = vsel %vm2355_vm2, %v2386_v51, %v2402_v22  ;;  %v25241_v50 = vrot.slane %v18983_v27, 1 }
 0x14b   :  { %v2408_v62 = vrot.slane %v1413_v19, 1  ;;  %v19139_v24 = vpop.f32.mrf.mxu0  ;;  %v2446_v19 = vrot.slane %v18958_v61, 1  ;;  %v2377_v13 = vrot.slane %v19051_v30, 1  ;;  %v19200_v23 = vsel %vm2355_vm2, %v2418_v44, %v2434_v46 }
 0x14c   :  { %v19150_v29 = vpop.f32.mrf.mxu1  ;;  %v19153_v4 = vsel %vm2355_vm2, %v2388_v58, %v2404_v48  ;;  %v25240_v58 = vld [vmem:[#allocation39_spill] sm:$0xff]  ;;  %v2540_v61 = vsel %vm2355_vm2, %v25241_v50, 0.0  ;;  %v2542_v51 = vsel %vm2355_vm2, %v2464_v45, 0.0  ;;  %v2543_v50 = vsel %vm2355_vm2, %v2466_v38, 0.0 }
 0x14d   :  { %25238 = vst [vmem:[#allocation78_spill] sm:$0xff] %v19153_v4  ;;  %v1346_v31 = vpop.f32.mrf.mxu0  ;;  %v19159_v56 = vsel %vm2355_vm2, %v2392_v36, %v2408_v62  ;;  %v19167_v11 = vmul.f32 %v25240_v58, %v18889_v60  ;;  %v19176_v36 = vmul.f32 %v25240_v58, %v18900_v12  ;;  %v19179_v43 = vmul.f32 %v25240_v58, %v2415_v40 }
 0x14e   :  { %25239 = vst [vmem:[#allocation79_spill] sm:$0xff] %v19159_v56  ;;  %v2420_v42 = vrot.slane %v1346_v31, 1  ;;  %v1419_v39 = vpop.f32.mrf.mxu1  ;;  %v2541_v31 = vsel %vm2355_vm2, %v2462_v28, 0.0  ;;  %v19187_v27 = vmul.f32 %v25240_v58, %v2419_v32  ;;  %v19195_v40 = vsel %vm2355_vm2, %v2414_v41, %v2430_v37 }
 0x14f   :  { %v2424_v6 = vrot.slane %v1419_v39, 1  ;;  %v19172_v4 = vpop.f32.mrf.mxu0  ;;  %v2371_v39 = vrot.slane %v19041_v33, 1  ;;  %v25242_v32 = vrot.slane %v18912_v52, 1  ;;  %v2372_v33 = vrot.slane %v19070_v14, 1 }
 0x150   :  { %v2421_v60 = vsel %vm2355_vm2, %v2404_v48, %v2420_v42  ;;  %v19184_v22 = vpop.f32.mrf.mxu1  ;;  %v19211_v41 = vsel %vm2355_vm2, %v2430_v37, %v2446_v19  ;;  %v19214_v30 = vsel %vm2355_vm2, %v2434_v46, %v2450_v17  ;;  %v25243_v48 = vld [vmem:[#allocation38_spill] sm:$0xff]  ;;  %v2378_v44 = vrot.slane %v19081_v18, 1 }
 0x151   :  { %v2425_v12 = vsel %vm2355_vm2, %v2408_v62, %v2424_v6  ;;  %v19192_v56 = vpop.f32.mrf.mxu0  ;;  %v19205_v25 = vsel %vm2355_vm2, %v25242_v32, %v2448_v63  ;;  %v19217_v26 = vmul.f32 %v25243_v48, %v2540_v61  ;;  %v2390_v52 = vrot.slane %v19105_v53, 1 }
 0x152   :  { %v1423_v5 = vpop.f32.mrf.mxu1  ;;  %v25244_v14 = vrot.slane %v19192_v56, 1  ;;  %v2394_v37 = vrot.slane %v19115_v54, 1  ;;  %v2406_v21 = vrot.slane %v19139_v24, 1  ;;  %v19233_v61 = vsel %vm2355_vm2, %v2448_v63, %v2464_v45 }
 0x153   :  { %v2440_v62 = vrot.slane %v1423_v5, 1  ;;  %v19208_v8 = vpop.f32.mrf.mxu0  ;;  %v19239_v53 = vmul.f32 %v25243_v48, %v2542_v51  ;;  %v2422_v59 = vrot.slane %v19172_v4, 1  ;;  %v19246_v54 = vsel %vm2355_vm2, %v2446_v19, %v2462_v28 }
 0x154   :  { %v19221_v32 = vpop.f32.mrf.mxu1  ;;  %v19226_v5 = vsel %vm2355_vm2, %v2420_v42, %v25244_v14  ;;  %v2426_v42 = vrot.slane %v19184_v22, 1  ;;  %v19249_v24 = vmul.f32 %v25243_v48, %v2541_v31  ;;  %v2410_v63 = vrot.slane %v19150_v29, 1 }
 0x155   :  { %25245 = vst [vmem:[#allocation80_spill] sm:$0xff] %v19226_v5  ;;  %v19230_v46 = vpop.f32.mrf.mxu0  ;;  %v19236_v18 = vsel %vm2355_vm2, %v2424_v6, %v2440_v62  ;;  %v19256_v51 = vsel %vm2355_vm2, %v2450_v17, %v2466_v38  ;;  %v19259_v4 = vmul.f32 %v25243_v48, %v2543_v50  ;;  %v19264_v28 = vsel %vm2355_vm2, %v2371_v39, %v2372_v33 }
 0x156   :  { %25246 = vst [vmem:[#allocation81_spill] sm:$0xff] %v19236_v18  ;;  %v19243_v14 = vpop.f32.mrf.mxu1  ;;  %25247 = vst [vmem:[#allocation82_spill] sm:$0xff] %v19264_v28  ;;  %v19267_v19 = vsel %vm2355_vm2, %v2377_v13, %v2378_v44  ;;  %v19270_v29 = vsel %vm2355_vm2, %v2372_v33, %v2390_v52  ;;  %v2438_v31 = vrot.slane %v19208_v8, 1  ;;  %v19275_v17 = vsel %vm2355_vm2, %v2378_v44, %v2394_v37 }
 0x157   :  { %v2456_v45 = vrot.slane %v19243_v14, 1  ;;  %v19253_v6 = vpop.f32.mrf.mxu0  ;;  %25248 = vst [vmem:[#allocation83_spill] sm:$0xff] %v19267_v19  ;;  %25249 = vst [vmem:[#allocation84_spill] sm:$0xff] %v19270_v29  ;;  %v2442_v14 = vrot.slane %v19221_v32, 1  ;;  %v2423_v39 = vsel %vm2355_vm2, %v2406_v21, %v2422_v59  ;;  %v2427_v18 = vsel %vm2355_vm2, %v2410_v63, %v2426_v42 }
 0x158   :  { %v19261_v22 = vpop.f32.mrf.mxu1  ;;  %25250 = vst [vmem:[#allocation85_spill] sm:$0xff] %v19275_v17  ;;  %v2452_v13 = vrot.slane %v19230_v46, 1  ;;  %v2454_v29 = vrot.slane %v19253_v6, 1  ;;  %v19285_v32 = vsel %vm2355_vm2, %v2390_v52, %v2406_v21  ;;  %v19288_v44 = vsel %vm2355_vm2, %v2394_v37, %v2410_v63 }
 0x159   :  { %v1360_v38 = vpop.f32.mrf.mxu0  ;;  %v19278_v50 = vsel %vm2355_vm2, %v2440_v62, %v2456_v45  ;;  %v2458_v62 = vrot.slane %v19261_v22, 1  ;;  %v19292_v28 = vmul.f32 %v25240_v58, %v2421_v60  ;;  %v19295_v46 = vmul.f32 %v25240_v58, %v2425_v12 }
 0x15a   :  { %25251 = vst [vmem:[#allocation86_spill] sm:$0xff] %v19278_v50  ;;  %v2468_v5 = vrot.slane %v1360_v38, 1  ;;  %v1433_v33 = vpop.f32.mrf.mxu1  ;;  %v19301_v21 = vmul.f32 %v25240_v58, %v2427_v18  ;;  %v19304_v52 = vsel %vm2355_vm2, %v2422_v59, %v2438_v31  ;;  %v19310_v12 = vsel %vm2355_vm2, %v2426_v42, %v2442_v14 }
 0x15b   :  { %v2472_v8 = vrot.slane %v1433_v33, 1  ;;  %v1362_v19 = vpop.f32.mrf.mxu0  ;;  %v19298_v33 = vmul.f32 %v25240_v58, %v2423_v39  ;;  %25254 = vst [vmem:[#allocation89_spill] sm:$0xff] %v19304_v52  ;;  %25255 = vst [vmem:[#allocation90_spill] sm:$0xff] %v19310_v12  ;;  %v25256_v59 = vrot.slane %v19192_v56, 1  ;;  %v25258_v52 = vld [vmem:[#allocation30_spill] sm:$0xff]  ;;  %v19325_v42 = vsel %vm2355_vm2, %v2438_v31, %v2454_v29 }
 0x15c   :  { %v2470_v50 = vrot.slane %v1362_v19, 1  ;;  %v1435_v17 = vpop.f32.mrf.mxu1  ;;  %25253 = vst [vmem:[#allocation88_spill] sm:$0xff] %v19301_v21  ;;  %v2544_v37 = vsel %vm2355_vm2, %v2468_v5, 0.0  ;;  %v19328_v12 = vsel %vm2355_vm2, %v2442_v14, %v2458_v62  ;;  %v25266_v14 = vld [vmem:[#allocation5_spill] sm:$0xff] }
 0x15d   :  { %v2474_v38 = vrot.slane %v1435_v17, 1  ;;  %v2033_v6 = vpop.f32.mrf.mxu0  ;;  %25252 = vst [vmem:[#allocation87_spill] sm:$0xff] %v19298_v33  ;;  %v2546_v63 = vsel %vm2355_vm2, %v2472_v8, 0.0  ;;  %v19318_v58 = vsel %vm2355_vm2, %v25256_v59, %v2452_v13 }
 0x15e   :  { %v2034_v60 = vadd.f32 %v2033_v6, %v18894_v9  ;;  %v2106_v22 = vpop.f32.mrf.mxu1  ;;  %v2545_v19 = vsel %vm2355_vm2, %v2470_v50, 0.0  ;;  %25257 = vst [vmem:[#allocation91_spill] sm:$0xff] %v19318_v58  ;;  %v25260_v9 = vld [vmem:[#allocation43_spill] sm:$0xff] }
 0x15f   :  { %v2547_v17 = vsel %vm2355_vm2, %v2474_v38, 0.0  ;;  %v2107_v18 = vadd.f32 %v2106_v22, %v18897_v3  ;;  %v2035_v39 = vpop.f32.mrf.mxu0  ;;  %v19331_v3 = vmul.f32 %v25243_v48, %v2544_v37  ;;  %v25262_v22 = vld [vmem:[#allocation31_spill] sm:$0xff]  ;;  %v19348_v37 = vsel %vm2355_vm2, %v2456_v45, %v2472_v8  ;;  %v25275_v45 = vld [vmem:[#allocation44_spill] sm:$0xff] }
 0x160   :  { %v19321_v21 = vadd.f32 %v25258_v52, %v2034_v60  ;;  %v2036_v6 = vadd.f32 %v2035_v39, %v25260_v9  ;;  %v2108_v33 = vpop.f32.mrf.mxu1  ;;  %v19338_v52 = vsel %vm2355_vm2, %v2452_v13, %v2468_v5  ;;  %v19341_v60 = vmul.f32 %v25243_v48, %v2546_v63  ;;  %25267 = vst [vmem:[#allocation5_spill] sm:$0xff] %v19348_v37  ;;  %v25270_v5 = vld [vmem:[#allocation6_spill] sm:$0xff] }
 0x161   :  { %25261 = vst [vmem:[#allocation43_spill] sm:$0xff] %v19331_v3  ;;  %v19334_v56 = vadd.f32 %v25262_v22, %v2107_v18  ;;  %v2109_v59 = vadd.f32 %v2108_v33, %v18906_v20  ;;  %v2037_v58 = vpop.f32.mrf.mxu0  ;;  %v19351_v18 = vmul.f32 %v25243_v48, %v2545_v19  ;;  %v19358_v63 = vsel %vm2355_vm2, %v2454_v29, %v2470_v50  ;;  %v25277_v29 = vld [vmem:[#allocation34_spill] sm:$0xff]  ;;  %v25287_v3 = vld [vmem:[#allocation47_spill] sm:$0xff] }
 0x162   :  { %25259 = vst [vmem:[#allocation30_spill] sm:$0xff] %v19321_v21  ;;  %25264 = vst [vmem:[#allocation92_spill] sm:$0xff] %v19341_v60  ;;  %v19344_v31 = vadd.f32 %v19126_v2, %v2036_v6  ;;  %v2038_v39 = vadd.f32 %v2037_v58, %v25266_v14  ;;  %v2110_v9 = vpop.f32.mrf.mxu1  ;;  %v19361_v2 = vmul.f32 %v25243_v48, %v2547_v17  ;;  %v25273_v58 = vld [vmem:[#allocation33_spill] sm:$0xff] }
 0x163   :  { %25263 = vst [vmem:[#allocation31_spill] sm:$0xff] %v19334_v56  ;;  %25268 = vst [vmem:[#allocation94_spill] sm:$0xff] %v19351_v18  ;;  %v19354_v20 = vadd.f32 %v19133_v34, %v2109_v59  ;;  %v2111_v13 = vadd.f32 %v2110_v9, %v25270_v5  ;;  %v2039_v33 = vpop.f32.mrf.mxu0  ;;  %v19368_v19 = vsel %vm2355_vm2, %v2458_v62, %v2474_v38  ;;  %v25279_v17 = vld [vmem:[#allocation45_spill] sm:$0xff]  ;;  %v25281_v38 = vld [vmem:[#allocation7_spill] sm:$0xff] }
 0x164   :  { %25265 = vst [vmem:[#allocation93_spill] sm:$0xff] %v19344_v31  ;;  %25271 = vst [vmem:[#allocation6_spill] sm:$0xff] %v19358_v63  ;;  %v19364_v6 = vadd.f32 %v25273_v58, %v2038_v39  ;;  %v2040_v8 = vadd.f32 %v2039_v33, %v25275_v45  ;;  %v2112_v22 = vpop.f32.mrf.mxu1  ;;  %v2782_v34 = vmul.f32 %v19321_v21, %v19321_v21 }
 0x165   :  { %25269 = vst [vmem:[#allocation95_spill] sm:$0xff] %v19354_v20  ;;  %25272 = vst [vmem:[#allocation96_spill] sm:$0xff] %v19361_v2  ;;  %v2784_v59 = vmul.f32 %v19334_v56, %v19334_v56  ;;  %v19375_v50 = vadd.f32 %v25277_v29, %v2111_v13  ;;  %v2113_v14 = vadd.f32 %v2112_v22, %v25279_v17  ;;  %v2043_v9 = vpop.f32.mrf.mxu0  ;;  %v25283_v29 = vld [vmem:[#allocation8_spill] sm:$0xff] }
 0x166   :  { %25274 = vst [vmem:[#allocation33_spill] sm:$0xff] %v19364_v6  ;;  %25276 = vst [vmem:[#allocation44_spill] sm:$0xff] %v19368_v19  ;;  %v2783_v39 = vmul.f32 %v19344_v31, %v19344_v31  ;;  %v2790_v5 = vmul.f32 %v19364_v6, %v19364_v6  ;;  %v19383_v62 = vadd.f32 %v19136_v55, %v2040_v8  ;;  %v2116_v58 = vpop.f32.mrf.mxu1 }
 0x167   :  { %25278 = vst [vmem:[#allocation34_spill] sm:$0xff] %v19375_v50  ;;  %v2044_v33 = vadd.f32 %v2043_v9, %v25281_v38  ;;  %v2785_v45 = vmul.f32 %v19354_v20, %v19354_v20  ;;  %v2792_v13 = vmul.f32 %v19375_v50, %v19375_v50  ;;  %v19391_v22 = vadd.f32 %v19142_v16, %v2113_v14  ;;  %v2045_v48 = vpop.f32.mrf.mxu0  ;;  %v25284_v9 = vld [vmem:[#allocation41_spill] sm:$0xff] }
 0x168   :  { %25280 = vst [vmem:[#allocation45_spill] sm:$0xff] %v19383_v62  ;;  %v2117_v17 = vadd.f32 %v2116_v58, %v25283_v29  ;;  %v2678_v2 = vadd.f32 %v19364_v6, %v19321_v21  ;;  %v2704_v55 = vadd.f32 %v19375_v50, %v19334_v56  ;;  %v2791_v8 = vmul.f32 %v19383_v62, %v19383_v62  ;;  %v2118_v18 = vpop.f32.mrf.mxu1  ;;  %v25285_v58 = vld [vmem:[#allocation42_spill] sm:$0xff] }
 0x169   :  { %25282 = vst [vmem:[#allocation7_spill] sm:$0xff] %v19391_v22  ;;  %v19401_v38 = vadd.f32 %v25284_v9, %v2044_v33  ;;  %v2846_v60 = vadd.f32 %v2790_v5, %v2782_v34  ;;  %v2691_v16 = vadd.f32 %v19383_v62, %v19344_v31  ;;  %v2793_v14 = vmul.f32 %v19391_v22, %v19391_v22  ;;  %v2047_v6 = vpop.f32.mrf.mxu0  ;;  %v25286_v9 = vld [vmem:[#allocation46_spill] sm:$0xff] }
 0x16a   :  { %v19408_v29 = vadd.f32 %v25285_v58, %v2117_v17  ;;  %v2872_v21 = vadd.f32 %v2792_v13, %v2784_v59  ;;  %v2717_v50 = vadd.f32 %v19391_v22, %v19354_v20  ;;  %v2046_v56 = vadd.f32 %v2045_v48, %v25286_v9  ;;  %v2120_v34 = vpop.f32.mrf.mxu1  ;;  %v25288_v13 = vld [vmem:[#allocation9_spill] sm:$0xff]  ;;  %v25289_v20 = vld [vmem:[#allocation10_spill] sm:$0xff] }
 0x16b   :  { %v2798_v33 = vmul.f32 %v19401_v38, %v19401_v38  ;;  %v2859_v5 = vadd.f32 %v2791_v8, %v2783_v39  ;;  %v2679_v62 = vadd.f32 %v2678_v2, %v19401_v38  ;;  %v2119_v17 = vadd.f32 %v2118_v18, %v25287_v3  ;;  %v2049_v58 = vpop.f32.mrf.mxu0  ;;  %v25290_v2 = vld [vmem:[#allocation48_spill] sm:$0xff] }
 0x16c   :  { %v2800_v31 = vmul.f32 %v19408_v29, %v19408_v29  ;;  %v2885_v19 = vadd.f32 %v2793_v14, %v2785_v45  ;;  %v19420_v59 = vadd.f32 %v19145_v1, %v2046_v56  ;;  %v2048_v22 = vadd.f32 %v2047_v6, %v25288_v13  ;;  %v2122_v37 = vpop.f32.mrf.mxu1 }
 0x16d   :  { %v2121_v63 = vadd.f32 %v2120_v34, %v25289_v20  ;;  %v2705_v48 = vadd.f32 %v2704_v55, %v19408_v29  ;;  %v19426_v39 = vadd.f32 %v19163_v47, %v2119_v17  ;;  %v2050_v8 = vadd.f32 %v2049_v58, %v25290_v2  ;;  %v2053_v3 = vpop.f32.mrf.mxu0 }
 0x16e   :  { %v2123_v9 = vadd.f32 %v2122_v37, %v18950_v15  ;;  %v2847_v18 = vadd.f32 %v2846_v60, %v2798_v33  ;;  %v2799_v1 = vmul.f32 %v19420_v59, %v19420_v59  ;;  %v19433_v56 = vadd.f32 %v19167_v11, %v2048_v22  ;;  %v2126_v6 = vpop.f32.mrf.mxu1 }
 0x16f   :  { %v19436_v20 = vadd.f32 %v19176_v36, %v2121_v63  ;;  %v2873_v45 = vadd.f32 %v2872_v21, %v2800_v31  ;;  %v2801_v47 = vmul.f32 %v19426_v39, %v19426_v39  ;;  %v19441_v55 = vadd.f32 %v19179_v43, %v2050_v8  ;;  %v2055_v60 = vpop.f32.mrf.mxu0  ;;  %v25291_v8 = vld [vmem:[#allocation49_spill] sm:$0xff] }
 0x170   :  { %v19444_v15 = vadd.f32 %v19187_v27, %v2123_v9  ;;  %v2692_v37 = vadd.f32 %v2691_v16, %v19420_v59  ;;  %v2860_v14 = vadd.f32 %v2859_v5, %v2799_v1  ;;  %v2718_v11 = vadd.f32 %v2717_v50, %v19426_v39  ;;  %v2128_v63 = vpop.f32.mrf.mxu1  ;;  %v25293_v1 = vld [vmem:[#allocation11_spill] sm:$0xff] }
 0x171   :  { %v2806_v36 = vmul.f32 %v19433_v56, %v19433_v56  ;;  %v2680_v21 = vadd.f32 %v2679_v62, %v19433_v56  ;;  %v2706_v31 = vadd.f32 %v2705_v48, %v19436_v20  ;;  %v2808_v43 = vmul.f32 %v19436_v20, %v19436_v20  ;;  %v2057_v22 = vpop.f32.mrf.mxu0 }
 0x172   :  { %v2807_v27 = vmul.f32 %v19441_v55, %v19441_v55  ;;  %v2886_v33 = vadd.f32 %v2885_v19, %v2801_v47  ;;  %v2693_v34 = vadd.f32 %v2692_v37, %v19441_v55  ;;  %v2054_v50 = vadd.f32 %v2053_v3, %v18954_v35  ;;  %v2130_v5 = vpop.f32.mrf.mxu1  ;;  %v25292_v19 = vld [vmem:[#allocation51_spill] sm:$0xff]  ;;  %v25294_v37 = vld [vmem:[#allocation50_spill] sm:$0xff] }
 0x173   :  { %v2848_v16 = vadd.f32 %v2847_v18, %v2806_v36  ;;  %v2719_v17 = vadd.f32 %v2718_v11, %v19444_v15  ;;  %v2809_v62 = vmul.f32 %v19444_v15, %v19444_v15  ;;  %v2127_v58 = vadd.f32 %v2126_v6, %v18962_v0  ;;  %v2059_v48 = vpop.f32.mrf.mxu0  ;;  %v25296_v0 = vld [vmem:[#allocation12_spill] sm:$0xff] }
 0x174   :  { %v2056_v13 = vadd.f32 %v2055_v60, %v18965_v57  ;;  %v2874_v2 = vadd.f32 %v2873_v45, %v2808_v43  ;;  %v19464_v9 = vadd.f32 %v25291_v8, %v2054_v50  ;;  %v2129_v18 = vadd.f32 %v2128_v63, %v25292_v19  ;;  %v2132_v35 = vpop.f32.mrf.mxu1  ;;  %v25297_v63 = vld [vmem:[#allocation52_spill] sm:$0xff] }
 0x175   :  { %v2058_v47 = vadd.f32 %v2057_v22, %v25293_v1  ;;  %v2861_v3 = vadd.f32 %v2860_v14, %v2807_v27  ;;  %v19469_v11 = vadd.f32 %v25294_v37, %v2127_v58  ;;  %v2131_v6 = vadd.f32 %v2130_v5, %v25296_v0  ;;  %v2063_v57 = vpop.f32.mrf.mxu0  ;;  %v25299_v22 = vld [vmem:[#allocation53_spill] sm:$0xff] }
 0x176   :  { %v19472_v36 = vadd.f32 %v19195_v40, %v2056_v13  ;;  %v2814_v45 = vmul.f32 %v19464_v9, %v19464_v9  ;;  %v19478_v60 = vadd.f32 %v19200_v23, %v2129_v18  ;;  %v2060_v14 = vadd.f32 %v2059_v48, %v25299_v22  ;;  %v2136_v27 = vpop.f32.mrf.mxu1  ;;  %v25300_v37 = vld [vmem:[#allocation13_spill] sm:$0xff] }
 0x177   :  { %25295 = vst [vmem:[#allocation8_spill] sm:$0xff] %v19469_v11  ;;  %v19481_v43 = vadd.f32 %v25297_v63, %v2058_v47  ;;  %v2887_v50 = vadd.f32 %v2886_v33, %v2809_v62  ;;  %v2681_v58 = vadd.f32 %v2680_v21, %v19464_v9  ;;  %v2816_v40 = vmul.f32 %v19469_v11, %v19469_v11  ;;  %v2065_v13 = vpop.f32.mrf.mxu0 }
 0x178   :  { %v2815_v5 = vmul.f32 %v19472_v36, %v19472_v36  ;;  %v2849_v8 = vadd.f32 %v2848_v16, %v2814_v45  ;;  %v2707_v23 = vadd.f32 %v2706_v31, %v19469_v11  ;;  %v2694_v19 = vadd.f32 %v2693_v34, %v19472_v36  ;;  %v2138_v48 = vpop.f32.mrf.mxu1 }
 0x179   :  { %25298 = vst [vmem:[#allocation41_spill] sm:$0xff] %v19481_v43  ;;  %v2817_v18 = vmul.f32 %v19478_v60, %v19478_v60  ;;  %v2720_v33 = vadd.f32 %v2719_v17, %v19478_v60  ;;  %v2682_v21 = vadd.f32 %v2681_v58, %v19481_v43  ;;  %v2822_v62 = vmul.f32 %v19481_v43, %v19481_v43  ;;  %v2067_v47 = vpop.f32.mrf.mxu0  ;;  %v25301_v58 = vld [vmem:[#allocation14_spill] sm:$0xff] }
 0x17a   :  { %v19498_v1 = vadd.f32 %v19205_v25, %v2131_v6  ;;  %v2875_v16 = vadd.f32 %v2874_v2, %v2816_v40  ;;  %v19501_v31 = vadd.f32 %v19211_v41, %v2060_v14  ;;  %v2133_v34 = vadd.f32 %v2132_v35, %v18989_v49  ;;  %v2140_v45 = vpop.f32.mrf.mxu1 }
 0x17b   :  { %v2064_v0 = vadd.f32 %v2063_v57, %v25300_v37  ;;  %v2862_v63 = vadd.f32 %v2861_v3, %v2815_v5  ;;  %v2888_v17 = vadd.f32 %v2887_v50, %v2817_v18  ;;  %v2137_v11 = vadd.f32 %v2136_v27, %v25301_v58  ;;  %v2069_v43 = vpop.f32.mrf.mxu0  ;;  %v25304_v57 = vld [vmem:[#allocation54_spill] sm:$0xff] }
 0x17c   :  { %v2824_v22 = vmul.f32 %v19498_v1, %v19498_v1  ;;  %v2850_v25 = vadd.f32 %v2849_v8, %v2822_v62  ;;  %v2823_v2 = vmul.f32 %v19501_v31, %v19501_v31  ;;  %v19511_v41 = vadd.f32 %v19214_v30, %v2133_v34  ;;  %v2142_v35 = vpop.f32.mrf.mxu1 }
 0x17d   :  { %v19514_v49 = vadd.f32 %v19018_v7, %v2064_v0  ;;  %v2708_v3 = vadd.f32 %v2707_v23, %v19498_v1  ;;  %v19518_v6 = vadd.f32 %v19233_v61, %v2137_v11  ;;  %v2066_v14 = vadd.f32 %v2065_v13, %v25304_v57  ;;  %v2179_v50 = vpop.f32.mrf.mxu0 }
 0x17e   :  { %v2139_v27 = vadd.f32 %v2138_v48, %v18999_v10  ;;  %v2876_v40 = vadd.f32 %v2875_v16, %v2824_v22  ;;  %v2695_v5 = vadd.f32 %v2694_v19, %v19501_v31  ;;  %v2863_v8 = vadd.f32 %v2862_v63, %v2823_v2  ;;  %v2252_v7 = vpop.f32.mrf.mxu1  ;;  %v25306_v48 = vld [vmem:[#allocation15_spill] sm:$0xff]  ;;  %v25307_v16 = vld [vmem:[#allocation16_spill] sm:$0xff] }
 0x17f   :  { %25302 = vst [vmem:[#allocation42_spill] sm:$0xff] %v19514_v49  ;;  %25303 = vst [vmem:[#allocation46_spill] sm:$0xff] %v19518_v6  ;;  %v2825_v30 = vmul.f32 %v19511_v41, %v19511_v41  ;;  %v2721_v18 = vadd.f32 %v2720_v33, %v19511_v41  ;;  %v2830_v23 = vmul.f32 %v19514_v49, %v19514_v49  ;;  %v2181_v10 = vpop.f32.mrf.mxu0 }
 0x180   :  { %v2832_v61 = vmul.f32 %v19518_v6, %v19518_v6  ;;  %v19531_v11 = vadd.f32 %v19246_v54, %v2066_v14  ;;  %v2683_v13 = vadd.f32 %v2682_v21, %v19514_v49  ;;  %v19535_v19 = vadd.f32 %v19256_v51, %v2139_v27  ;;  %v2254_v33 = vpop.f32.mrf.mxu1  ;;  %v25312_v14 = vld [vmem:[#allocation57_spill] sm:$0xff] }
 0x181   :  { %v2068_v62 = vadd.f32 %v2067_v47, %v25306_v48  ;;  %v2141_v34 = vadd.f32 %v2140_v45, %v25307_v16  ;;  %v2889_v37 = vadd.f32 %v2888_v17, %v2825_v30  ;;  %v2851_v0 = vadd.f32 %v2850_v25, %v2830_v23  ;;  %v2183_v58 = vpop.f32.mrf.mxu0  ;;  %v25310_v17 = vld [vmem:[#allocation55_spill] sm:$0xff] }
 0x182   :  { %25305 = vst [vmem:[#allocation47_spill] sm:$0xff] %v19535_v19  ;;  %v2709_v63 = vadd.f32 %v2708_v3, %v19518_v6  ;;  %v2877_v22 = vadd.f32 %v2876_v40, %v2832_v61  ;;  %v2696_v54 = vadd.f32 %v2695_v5, %v19531_v11  ;;  %v2831_v2 = vmul.f32 %v19531_v11, %v19531_v11  ;;  %v2256_v47 = vpop.f32.mrf.mxu1  ;;  %v25311_v3 = vld [vmem:[#allocation56_spill] sm:$0xff]  ;;  %v25328_v6 = vld [vmem:[#allocation61_spill] sm:$0xff] }
 0x183   :  { %v19544_v21 = vadd.f32 %v19217_v26, %v2068_v62  ;;  %v19547_v51 = vadd.f32 %v19239_v53, %v2141_v34  ;;  %v2833_v45 = vmul.f32 %v19535_v19, %v19535_v19  ;;  %v2070_v25 = vadd.f32 %v2069_v43, %v25310_v17  ;;  %v2185_v40 = vpop.f32.mrf.mxu0  ;;  %v25317_v34 = vld [vmem:[#allocation58_spill] sm:$0xff] }
 0x184   :  { %v2143_v57 = vadd.f32 %v2142_v35, %v25311_v3  ;;  %v2180_v27 = vadd.f32 %v2179_v50, %v25312_v14  ;;  %v2722_v5 = vadd.f32 %v2721_v18, %v19535_v19  ;;  %v2258_v23 = vpop.f32.mrf.mxu1  ;;  %v25315_v18 = vld [vmem:[#allocation70_spill] sm:$0xff]  ;;  %v2864_v48 = vadd.f32 %v2863_v8, %v2831_v2  ;;  %v25318_v2 = vld [vmem:[#allocation72_spill] sm:$0xff] }
 0x185   :  { %25308 = vst [vmem:[#allocation9_spill] sm:$0xff] %v19544_v21  ;;  %25309 = vst [vmem:[#allocation10_spill] sm:$0xff] %v19547_v51  ;;  %v19556_v30 = vadd.f32 %v2683_v13, %v19544_v21  ;;  %v2838_v26 = vmul.f32 %v19544_v21, %v19544_v21  ;;  %v19561_v53 = vadd.f32 %v2709_v63, %v19547_v51  ;;  %v2189_v13 = vpop.f32.mrf.mxu0  ;;  %v25329_v21 = vld [vmem:[#allocation62_spill] sm:$0xff] }
 0x186   :  { %v2840_v43 = vmul.f32 %v19547_v51, %v19547_v51  ;;  %v19566_v35 = vadd.f32 %v19249_v24, %v2070_v25  ;;  %v19569_v50 = vadd.f32 %v19259_v4, %v2143_v57  ;;  %v19572_v61 = vadd.f32 %v25315_v18, %v2180_v27  ;;  %v2262_v17 = vpop.f32.mrf.mxu1 }
 0x187   :  { %v2253_v63 = vadd.f32 %v2252_v7, %v25317_v34  ;;  %v2890_v3 = vadd.f32 %v2889_v37, %v2833_v45  ;;  %v2191_v25 = vpop.f32.mrf.mxu0  ;;  %v19585_v57 = vadd.f32 %v2851_v0, %v2838_v26  ;;  %v25320_v7 = vld [vmem:[#allocation59_spill] sm:$0xff]  ;;  %v25322_v26 = vld [vmem:[#allocation82_spill] sm:$0xff]  ;;  %v2186_v34 = vadd.f32 %v2185_v40, %v25328_v6 }
 0x188   :  { %25313 = vst [vmem:[#allocation48_spill] sm:$0xff] %v19566_v35  ;;  %25314 = vst [vmem:[#allocation49_spill] sm:$0xff] %v19569_v50  ;;  %v19578_v14 = vadd.f32 %v2696_v54, %v19566_v35  ;;  %v2839_v24 = vmul.f32 %v19566_v35, %v19566_v35  ;;  %v19583_v4 = vadd.f32 %v2722_v5, %v19569_v50  ;;  %v2264_v45 = vpop.f32.mrf.mxu1  ;;  %v25321_v5 = vld [vmem:[#allocation60_spill] sm:$0xff] }
 0x189   :  { %25316 = vst [vmem:[#allocation51_spill] sm:$0xff] %v19572_v61  ;;  %v2841_v8 = vmul.f32 %v19569_v50, %v19569_v50  ;;  %v19590_v27 = vadd.f32 %v25318_v2, %v2253_v63  ;;  %v2182_v37 = vadd.f32 %v2181_v10, %v25320_v7  ;;  %v19593_v54 = vadd.f32 %v2877_v22, %v2840_v43  ;;  %v25324_v63 = vld [vmem:[#allocation17_spill] sm:$0xff]  ;;  %v2193_v10 = vpop.f32.mrf.mxu0  ;;  %v25325_v7 = vld [vmem:[#allocation83_spill] sm:$0xff]  ;;  %v25327_v43 = vld [vmem:[#allocation18_spill] sm:$0xff] }
 0x18a   :  { %v2255_v62 = vadd.f32 %v2254_v33, %v25321_v5  ;;  %v19598_v16 = vadd.f32 %v2864_v48, %v2839_v24  ;;  %v2786_v0 = vmul.f32 %v19572_v61, %v19572_v61  ;;  %v2184_v2 = vadd.f32 %v2183_v58, %v25324_v63  ;;  %v2266_v48 = vpop.f32.mrf.mxu1  ;;  %v25330_v5 = vld [vmem:[#allocation40_spill] sm:$0xff]  ;;  %v25334_v63 = vld [vmem:[#allocation77_spill] sm:$0xff] }
 0x18b   :  { %25319 = vst [vmem:[#allocation11_spill] sm:$0xff] %v19590_v27  ;;  %v19603_v51 = vadd.f32 %v25322_v26, %v2182_v37  ;;  %v2257_v18 = vadd.f32 %v2256_v47, %v25327_v43  ;;  %v2259_v33 = vadd.f32 %v2258_v23, %v25329_v21  ;;  %v19612_v24 = vadd.f32 %v2890_v3, %v2841_v8  ;;  %v25332_v37 = vld [vmem:[#allocation19_spill] sm:$0xff]  ;;  %v25333_v50 = vld [vmem:[#allocation20_spill] sm:$0xff]  ;;  %v25338_v21 = vld [vmem:[#allocation85_spill] sm:$0xff] }
 0x18c   :  { %v19607_v22 = vadd.f32 %v25325_v7, %v2255_v62  ;;  %v19615_v49 = vadd.f32 %v25330_v5, %v2184_v2  ;;  %v2190_v26 = vadd.f32 %v2189_v13, %v25332_v37  ;;  %v2263_v58 = vadd.f32 %v2262_v17, %v25333_v50  ;;  %v25336_v47 = vld [vmem:[#allocation84_spill] sm:$0xff]  ;;  %v25340_v3 = vld [vmem:[#allocation78_spill] sm:$0xff]  ;;  %v25342_v17 = vld [vmem:[#allocation79_spill] sm:$0xff]  ;;  %v2268_v5 = vpop.f32.mrf.mxu1 }
 0x18d   :  { %25323 = vst [vmem:[#allocation50_spill] sm:$0xff] %v19603_v51  ;;  %v2788_v62 = vmul.f32 %v19590_v27, %v19590_v27  ;;  %v19622_v7 = vadd.f32 %v25334_v63, %v2257_v18  ;;  %v19625_v6 = vadd.f32 %v25336_v47, %v2186_v34  ;;  %v19628_v40 = vadd.f32 %v25338_v21, %v2259_v33  ;;  %v2195_v18 = vpop.f32.mrf.mxu0 }
 0x18e   :  { %25326 = vst [vmem:[#allocation12_spill] sm:$0xff] %v19607_v22  ;;  %25331 = vst [vmem:[#allocation52_spill] sm:$0xff] %v19615_v49  ;;  %v2787_v23 = vmul.f32 %v19603_v51, %v19603_v51  ;;  %v2794_v13 = vmul.f32 %v19615_v49, %v19615_v49  ;;  %v19635_v50 = vadd.f32 %v25340_v3, %v2190_v26 }
 0x18f   :  { %25335 = vst [vmem:[#allocation53_spill] sm:$0xff] %v19622_v7  ;;  %25337 = vst [vmem:[#allocation13_spill] sm:$0xff] %v19625_v6  ;;  %v19638_v8 = vadd.f32 %v25342_v17, %v2263_v58  ;;  %v2789_v34 = vmul.f32 %v19607_v22, %v19607_v22  ;;  %v2730_v2 = vadd.f32 %v19615_v49, %v19572_v61 }
 0x190   :  { %25339 = vst [vmem:[#allocation14_spill] sm:$0xff] %v19628_v40  ;;  %25341 = vst [vmem:[#allocation54_spill] sm:$0xff] %v19635_v50  ;;  %v2796_v43 = vmul.f32 %v19622_v7, %v19622_v7  ;;  %v2795_v33 = vmul.f32 %v19625_v6, %v19625_v6  ;;  %v2898_v37 = vadd.f32 %v2794_v13, %v2786_v0  ;;  %v25343_v13 = vld [vmem:[#allocation63_spill] sm:$0xff] }
 0x191   :  { %v2756_v26 = vadd.f32 %v19622_v7, %v19590_v27  ;;  %v2743_v58 = vadd.f32 %v19625_v6, %v19603_v51  ;;  %v2797_v63 = vmul.f32 %v19628_v40, %v19628_v40  ;;  %v2769_v3 = vadd.f32 %v19628_v40, %v19607_v22  ;;  %v25344_v27 = vld [vmem:[#allocation64_spill] sm:$0xff]  ;;  %v2199_v6 = vpop.f32.mrf.mxu0  ;;  %v25347_v40 = vld [vmem:[#allocation65_spill] sm:$0xff] }
 0x192   :  { %v2924_v47 = vadd.f32 %v2796_v43, %v2788_v62  ;;  %v2911_v21 = vadd.f32 %v2795_v33, %v2787_v23  ;;  %v2731_v17 = vadd.f32 %v2730_v2, %v19635_v50  ;;  %v2802_v49 = vmul.f32 %v19635_v50, %v19635_v50  ;;  %v25345_v62 = vld [vmem:[#allocation21_spill] sm:$0xff]  ;;  %v25346_v43 = vld [vmem:[#allocation22_spill] sm:$0xff]  ;;  %v2272_v2 = vpop.f32.mrf.mxu1 }
 0x193   :  { %v2804_v0 = vmul.f32 %v19638_v8, %v19638_v8  ;;  %v2192_v7 = vadd.f32 %v2191_v25, %v25343_v13  ;;  %v2265_v61 = vadd.f32 %v2264_v45, %v25344_v27  ;;  %v2757_v51 = vadd.f32 %v2756_v26, %v19638_v8  ;;  %v25350_v25 = vld [vmem:[#allocation66_spill] sm:$0xff] }
 0x194   :  { %v2194_v23 = vadd.f32 %v2193_v10, %v25345_v62  ;;  %v2267_v33 = vadd.f32 %v2266_v48, %v25346_v43  ;;  %v2196_v22 = vadd.f32 %v2195_v18, %v25347_v40  ;;  %v2937_v19 = vadd.f32 %v2797_v63, %v2789_v34  ;;  %v25352_v10 = vld [vmem:[#allocation87_spill] sm:$0xff]  ;;  %v25357_v62 = vld [vmem:[#allocation80_spill] sm:$0xff] }
 0x195   :  { %v19668_v50 = vadd.f32 %v19285_v32, %v2192_v7  ;;  %v19671_v35 = vadd.f32 %v19288_v44, %v2265_v61  ;;  %v2269_v13 = vadd.f32 %v2268_v5, %v25350_v25  ;;  %v25354_v40 = vld [vmem:[#allocation67_spill] sm:$0xff]  ;;  %v2899_v34 = vadd.f32 %v2898_v37, %v2802_v49  ;;  %v2201_v7 = vpop.f32.mrf.mxu0 }
 0x196   :  { %v19675_v27 = vadd.f32 %v19292_v28, %v2194_v23  ;;  %v19678_v45 = vadd.f32 %v19295_v46, %v2267_v33  ;;  %v19681_v48 = vadd.f32 %v25352_v10, %v2196_v22  ;;  %v2200_v18 = vadd.f32 %v2199_v6, %v25354_v40  ;;  %v2274_v6 = vpop.f32.mrf.mxu1  ;;  %v25359_v33 = vld [vmem:[#allocation68_spill] sm:$0xff] }
 0x197   :  { %25348 = vst [vmem:[#allocation15_spill] sm:$0xff] %v19668_v50  ;;  %25349 = vst [vmem:[#allocation16_spill] sm:$0xff] %v19671_v35  ;;  %v2925_v26 = vadd.f32 %v2924_v47, %v2804_v0  ;;  %v2803_v32 = vmul.f32 %v19668_v50, %v19668_v50  ;;  %v2805_v44 = vmul.f32 %v19671_v35, %v19671_v35 }
 0x198   :  { %25351 = vst [vmem:[#allocation55_spill] sm:$0xff] %v19678_v45  ;;  %25353 = vst [vmem:[#allocation56_spill] sm:$0xff] %v19681_v48  ;;  %v2744_v61 = vadd.f32 %v2743_v58, %v19668_v50  ;;  %v2770_v28 = vadd.f32 %v2769_v3, %v19671_v35  ;;  %v2810_v46 = vmul.f32 %v19675_v27, %v19675_v27  ;;  %v25355_v3 = vld [vmem:[#allocation88_spill] sm:$0xff]  ;;  %v25373_v50 = vld [vmem:[#allocation91_spill] sm:$0xff] }
 0x199   :  { %v2812_v22 = vmul.f32 %v19678_v45, %v19678_v45  ;;  %v2912_v49 = vadd.f32 %v2911_v21, %v2803_v32  ;;  %v2732_v5 = vadd.f32 %v2731_v17, %v19675_v27  ;;  %v2758_v37 = vadd.f32 %v2757_v51, %v19678_v45  ;;  %v25360_v21 = vld [vmem:[#allocation69_spill] sm:$0xff]  ;;  %v25361_v17 = vld [vmem:[#allocation71_spill] sm:$0xff] }
 0x19a   :  { %v2811_v63 = vmul.f32 %v19681_v48, %v19681_v48  ;;  %v2938_v47 = vadd.f32 %v2937_v19, %v2805_v44  ;;  %v2745_v58 = vadd.f32 %v2744_v61, %v19681_v48  ;;  %v19700_v0 = vadd.f32 %v25355_v3, %v2269_v13  ;;  %v2203_v13 = vpop.f32.mrf.mxu0  ;;  %v25362_v61 = vld [vmem:[#allocation81_spill] sm:$0xff] }
 0x19b   :  { %v19703_v23 = vadd.f32 %v25357_v62, %v2200_v18  ;;  %v2900_v43 = vadd.f32 %v2899_v34, %v2810_v46  ;;  %v2273_v25 = vadd.f32 %v2272_v2, %v25359_v33  ;;  %v2202_v10 = vadd.f32 %v2201_v7, %v25360_v21  ;;  %v25364_v18 = vld [vmem:[#allocation89_spill] sm:$0xff]  ;;  %v25366_v2 = vld [vmem:[#allocation90_spill] sm:$0xff]  ;;  %v2276_v7 = vpop.f32.mrf.mxu1 }
 0x19c   :  { %25356 = vst [vmem:[#allocation57_spill] sm:$0xff] %v19700_v0  ;;  %v2275_v40 = vadd.f32 %v2274_v6, %v25361_v17  ;;  %v2926_v51 = vadd.f32 %v2925_v26, %v2812_v22  ;;  %v2913_v32 = vadd.f32 %v2912_v49, %v2811_v63  ;;  %v2813_v19 = vmul.f32 %v19700_v0, %v19700_v0 }
 0x19d   :  { %25358 = vst [vmem:[#allocation70_spill] sm:$0xff] %v19703_v23  ;;  %v2818_v44 = vmul.f32 %v19703_v23, %v19703_v23  ;;  %v19713_v3 = vadd.f32 %v25362_v61, %v2273_v25  ;;  %v19716_v34 = vadd.f32 %v25364_v18, %v2202_v10  ;;  %v25368_v26 = vrot.slane %v19561_v53, 4  ;;  %v2205_v61 = vpop.f32.mrf.mxu0 }
 0x19e   :  { %v19719_v46 = vadd.f32 %v25366_v2, %v2275_v40  ;;  %v2771_v6 = vadd.f32 %v2770_v28, %v19700_v0  ;;  %v2733_v49 = vadd.f32 %v2732_v5, %v19703_v23  ;;  %v2879_v63 = vrot.slane %v19593_v54, 4  ;;  %v25370_v2 = vld [vmem:[#allocation23_spill] sm:$0xff]  ;;  %v25372_v0 = vld [vmem:[#allocation73_spill] sm:$0xff] }
 0x19f   :  { %25363 = vst [vmem:[#allocation58_spill] sm:$0xff] %v19713_v3  ;;  %25365 = vst [vmem:[#allocation72_spill] sm:$0xff] %v19716_v34  ;;  %v2712_v22 = vadd.f32 %v25368_v26, %v19561_v53  ;;  %v25369_v62 = vrot.slane %v19556_v30, 4  ;;  %v2939_v25 = vadd.f32 %v2938_v47, %v2813_v19  ;;  %v2901_v21 = vadd.f32 %v2900_v43, %v2818_v44  ;;  %v2278_v43 = vpop.f32.mrf.mxu1 }
 0x1a0   :  { %25367 = vst [vmem:[#allocation59_spill] sm:$0xff] %v19719_v46  ;;  %v2759_v10 = vadd.f32 %v2758_v37, %v19713_v3  ;;  %v2820_v17 = vmul.f32 %v19713_v3, %v19713_v3  ;;  %v2746_v53 = vadd.f32 %v2745_v58, %v19716_v34  ;;  %v2819_v28 = vmul.f32 %v19716_v34, %v19716_v34  ;;  %v25374_v3 = vld [vmem:[#allocation32_spill] sm:$0xff] }
 0x1a1   :  { %v2686_v33 = vadd.f32 %v25369_v62, %v19556_v30  ;;  %v2713_v40 = vrot.slane %v2712_v22, 2  ;;  %v2880_v5 = vadd.f32 %v2879_v63, %v19593_v54  ;;  %v19738_v18 = vadd.f32 %v2771_v6, %v19719_v46  ;;  %v25371_v54 = vld [vmem:[#allocation24_spill] sm:$0xff] }
 0x1a2   :  { %v2821_v30 = vmul.f32 %v19719_v46, %v19719_v46  ;;  %v2853_v37 = vrot.slane %v19585_v57, 4  ;;  %v2927_v19 = vadd.f32 %v2926_v51, %v2820_v17  ;;  %v2204_v26 = vadd.f32 %v2203_v13, %v25370_v2 }
 0x1a3   :  { %v2687_v47 = vrot.slane %v2686_v33, 2  ;;  %v2714_v44 = vadd.f32 %v2713_v40, %v2712_v22  ;;  %v2881_v58 = vrot.slane %v2880_v5, 2  ;;  %v2277_v63 = vadd.f32 %v2276_v7, %v25371_v54  ;;  %v25375_v22 = vld [vmem:[#allocation86_spill] sm:$0xff] }
 0x1a4   :  { %v2854_v34 = vadd.f32 %v2853_v37, %v19585_v57  ;;  %v2206_v6 = vadd.f32 %v2205_v61, %v25372_v0  ;;  %v19748_v46 = vadd.f32 %v25373_v50, %v2204_v26  ;;  %v2279_v23 = vadd.f32 %v2278_v43, %v25374_v3  ;;  %v2209_v61 = vpop.f32.mrf.mxu0 }
 0x1a5   :  { %v2688_v62 = vadd.f32 %v2687_v47, %v2686_v33  ;;  %v2715_v35 = vrot.slane %v2714_v44, 1  ;;  %v2882_v48 = vadd.f32 %v2881_v58, %v2880_v5  ;;  %v19752_v17 = vadd.f32 %v25375_v22, %v2277_v63  ;;  %v25381_v22 = vld [vmem:[#allocation26_spill] sm:$0xff] }
 0x1a6   :  { %v2855_v51 = vrot.slane %v2854_v34, 2  ;;  %v19755_v13 = vadd.f32 %v19325_v42, %v2206_v6  ;;  %v2914_v57 = vadd.f32 %v2913_v32, %v2819_v28  ;;  %v2940_v33 = vadd.f32 %v2939_v25, %v2821_v30  ;;  %v2282_v32 = vpop.f32.mrf.mxu1 }
 0x1a7   :  { %v2689_v45 = vrot.slane %v2688_v62, 1  ;;  %v2883_v7 = vrot.slane %v2882_v48, 1  ;;  %v2826_v0 = vmul.f32 %v19748_v46, %v19748_v46  ;;  %v2716_v40 = vadd.f32 %v2715_v35, %v2714_v44 }
 0x1a8   :  { %25376 = vst [vmem:[#allocation60_spill] sm:$0xff] %v19755_v13  ;;  %v2856_v5 = vadd.f32 %v2855_v51, %v2854_v34  ;;  %v2734_v50 = vadd.f32 %v2733_v49, %v19748_v46  ;;  %v2828_v3 = vmul.f32 %v19752_v17, %v19752_v17  ;;  %v2760_v43 = vadd.f32 %v2759_v10, %v19752_v17  ;;  %v2284_v63 = vpop.f32.mrf.mxu1 }
 0x1a9   :  { %v2884_v47 = vadd.f32 %v2883_v7, %v2882_v48  ;;  %v2690_v37 = vadd.f32 %v2689_v45, %v2688_v62  ;;  %v2827_v42 = vmul.f32 %v19755_v13, %v19755_v13  ;;  %v2902_v28 = vadd.f32 %v2901_v21, %v2826_v0  ;;  %v25380_v62 = vld [vmem:[#allocation25_spill] sm:$0xff] }
 0x1aa   :  { %v2857_v25 = vrot.slane %v2856_v5, 1  ;;  %v19766_v30 = vadd.f32 %v19328_v12, %v2279_v23  ;;  %v25378_v35 = vrot.slane %v19583_v4, 4  ;;  %v2747_v45 = vadd.f32 %v2746_v53, %v19755_v13 }
 0x1ab   :  { %v19772_v49 = vsel %vm1502_vm1, %v2716_v40, %v2884_v47  ;;  %v2892_v48 = vrot.slane %v19612_v24, 4  ;;  %v25379_v10 = vrot.slane %v19578_v14, 4  ;;  %v2928_v23 = vadd.f32 %v2927_v19, %v2828_v3 }
 0x1ac   :  { %25377 = vst [vmem:[#allocation82_spill] sm:$0xff] %v19766_v30  ;;  %v2725_v34 = vadd.f32 %v25378_v35, %v19583_v4  ;;  %2962 = vrot.lane.b32.xlu1 %v19772_v49, %s17978_s1  ;;  %v2858_v12 = vadd.f32 %v2857_v25, %v2856_v5  ;;  %v2915_v21 = vadd.f32 %v2914_v57, %v2827_v42  ;;  %v2211_v4 = vpop.f32.mrf.mxu0  ;;  %v2866_v53 = vrot.slane %v19598_v16, 4  ;;  %v25382_v5 = vld [vmem:[#allocation5_spill] sm:$0xff] }
 0x1ad   :  { %v2699_v44 = vadd.f32 %v25379_v10, %v19578_v14  ;;  %v2893_v2 = vadd.f32 %v2892_v48, %v19612_v24  ;;  %v2210_v54 = vadd.f32 %v2209_v61, %v25380_v62  ;;  %v2829_v14 = vmul.f32 %v19766_v30, %v19766_v30  ;;  %v25384_v61 = vld [vmem:[#allocation74_spill] sm:$0xff] }
 0x1ae   :  { %v2726_v58 = vrot.slane %v2725_v34, 2  ;;  %v19785_v6 = vsel %vm1502_vm1, %v2690_v37, %v2858_v12  ;;  %v2283_v19 = vadd.f32 %v2282_v32, %v25381_v22  ;;  %v2867_v7 = vadd.f32 %v2866_v53, %v19598_v16  ;;  %v25385_v37 = vld [vmem:[#allocation37_spill] sm:$0xff]  ;;  %v2213_v25 = vpop.f32.mrf.mxu0  ;;  %v2286_v12 = vpop.f32.mrf.mxu1  ;;  %v25386_v53 = vld [vmem:[#allocation6_spill] sm:$0xff] }
 0x1af   :  { %v2700_v26 = vrot.slane %v2699_v44, 2  ;;  %2958 = vrot.lane.b32.xlu0 %v19785_v6, %s17978_s1  ;;  %v2894_v57 = vrot.slane %v2893_v2, 2  ;;  %v19794_v0 = vadd.f32 %v19338_v52, %v2210_v54  ;;  %v2212_v47 = vadd.f32 %v2211_v4, %v25384_v61  ;;  %v25388_v54 = vld [vmem:[#allocation44_spill] sm:$0xff] }
 0x1b0   :  { %v2727_v51 = vadd.f32 %v2726_v58, %v2725_v34  ;;  %v19797_v3 = vadd.f32 %v25382_v5, %v2283_v19  ;;  %v2285_v42 = vadd.f32 %v2284_v63, %v25385_v37  ;;  %v2773_v32 = vadd.f32 %v19738_v18, %v19766_v30  ;;  %v25391_v5 = vld [vmem:[#allocation43_spill] sm:$0xff] }
 0x1b1   :  { %v2701_v24 = vadd.f32 %v2700_v26, %v2699_v44  ;;  %v2895_v35 = vadd.f32 %v2894_v57, %v2893_v2  ;;  %v2868_v48 = vrot.slane %v2867_v7, 2  ;;  %v2941_v10 = vadd.f32 %v2940_v33, %v2829_v14  ;;  %v2215_v14 = vpop.f32.mrf.mxu0 }
 0x1b2   :  { %v2728_v40 = vrot.slane %v2727_v51, 1  ;;  %25383 = vst [vmem:[#allocation17_spill] sm:$0xff] %v19797_v3  ;;  %v2735_v16 = vadd.f32 %v2734_v50, %v19794_v0  ;;  %v2834_v52 = vmul.f32 %v19794_v0, %v19794_v0  ;;  %v2836_v44 = vmul.f32 %v19797_v3, %v19797_v3  ;;  %v25390_v50 = vld [vmem:[#allocation27_spill] sm:$0xff] }
 0x1b3   :  { %v2702_v34 = vrot.slane %v2701_v24, 1  ;;  %v2896_v4 = vrot.slane %v2895_v35, 1  ;;  %v2869_v26 = vadd.f32 %v2868_v48, %v2867_v7  ;;  %v19809_v62 = vadd.f32 %v25386_v53, %v2212_v47  ;;  %v2288_v47 = vpop.f32.mrf.mxu1  ;;  %v25395_v48 = vld [vmem:[#allocation92_spill] sm:$0xff] }
 0x1b4   :  { %v2729_v58 = vadd.f32 %v2728_v40, %v2727_v51  ;;  %v2761_v2 = vadd.f32 %v2760_v43, %v19797_v3  ;;  %v19813_v33 = vadd.f32 %v25388_v54, %v2285_v42  ;;  %v2214_v63 = vadd.f32 %v2213_v25, %v25390_v50 }
 0x1b5   :  { %25387 = vst [vmem:[#allocation83_spill] sm:$0xff] %v19809_v62  ;;  %v2703_v18 = vadd.f32 %v2702_v34, %v2701_v24  ;;  %v2897_v22 = vadd.f32 %v2896_v4, %v2895_v35  ;;  %v2870_v19 = vrot.slane %v2869_v26, 1  ;;  %v2903_v57 = vadd.f32 %v2902_v28, %v2834_v52  ;;  %v25393_v24 = vld [vmem:[#allocation29_spill] sm:$0xff]  ;;  %v25394_v28 = vld [vmem:[#allocation75_spill] sm:$0xff] }
 0x1b6   :  { %25389 = vst [vmem:[#allocation18_spill] sm:$0xff] %v19813_v33  ;;  %v2835_v51 = vmul.f32 %v19809_v62, %v19809_v62  ;;  %v2929_v40 = vadd.f32 %v2928_v23, %v2836_v44  ;;  %v2748_v7 = vadd.f32 %v2747_v45, %v19809_v62  ;;  %v19820_v61 = vadd.f32 %v25391_v5, %v2214_v63 }
 0x1b7   :  { %v2287_v43 = vadd.f32 %v2286_v12, %v25393_v24  ;;  %v19824_v37 = vsel %vm1502_vm1, %v2729_v58, %v2897_v22  ;;  %v2871_v42 = vadd.f32 %v2870_v19, %v2869_v26  ;;  %v2837_v25 = vmul.f32 %v19813_v33, %v19813_v33  ;;  %v25397_v58 = vld [vmem:[#allocation94_spill] sm:$0xff]  ;;  %v25399_v26 = vld [vmem:[#allocation76_spill] sm:$0xff] }
 0x1b8   :  { %25392 = vst [vmem:[#allocation61_spill] sm:$0xff] %v19820_v61  ;;  %v2216_v35 = vadd.f32 %v2215_v14, %v25394_v28  ;;  %2964 = vrot.lane.b32.xlu1 %v19824_v37, %s17978_s1  ;;  %v2774_v45 = vadd.f32 %v2773_v32, %v19813_v33  ;;  %v2736_v23 = vadd.f32 %v2735_v16, %v19820_v61  ;;  %v25400_v14 = vld [vmem:[#allocation96_spill] sm:$0xff] }
 0x1b9   :  { %v2842_v34 = vmul.f32 %v19820_v61, %v19820_v61  ;;  %v19836_v52 = vadd.f32 %v25395_v48, %v2287_v43  ;;  %v19839_v44 = vsel %vm1502_vm1, %v2703_v18, %v2871_v42  ;;  %v2916_v12 = vadd.f32 %v2915_v21, %v2835_v51 }
 0x1ba   :  { %v19842_v4 = vadd.f32 %v25397_v58, %v2216_v35  ;;  %v2289_v53 = vadd.f32 %v2288_v47, %v25399_v26  ;;  %2960 = vrot.lane.b32.xlu0 %v19839_v44, %s17978_s1  ;;  %v2737_v32 = vrot.slane %v2736_v23, 4  ;;  %v2942_v63 = vadd.f32 %v2941_v10, %v2837_v25 }
 0x1bb   :  { %25396 = vst [vmem:[#allocation62_spill] sm:$0xff] %v19836_v52  ;;  %v2904_v16 = vadd.f32 %v2903_v57, %v2842_v34  ;;  %v2762_v54 = vadd.f32 %v2761_v2, %v19836_v52  ;;  %v2844_v50 = vmul.f32 %v19836_v52, %v19836_v52 }
 0x1bc   :  { %25398 = vst [vmem:[#allocation40_spill] sm:$0xff] %v19842_v4  ;;  %v2749_v18 = vadd.f32 %v2748_v7, %v19842_v4  ;;  %v2843_v21 = vmul.f32 %v19842_v4, %v19842_v4  ;;  %v19854_v22 = vadd.f32 %v25400_v14, %v2289_v53  ;;  %v2738_v19 = vadd.f32 %v2737_v32, %v2736_v23 }
 0x1bd   :  { %v2905_v51 = vrot.slane %v2904_v16, 4  ;;  %v2763_v5 = vrot.slane %v2762_v54, 4  ;;  %v2930_v24 = vadd.f32 %v2929_v40, %v2844_v50 }
 0x1be   :  { %25401 = vst [vmem:[#allocation19_spill] sm:$0xff] %v19854_v22  ;;  %v2750_v43 = vrot.slane %v2749_v18, 4  ;;  %v2917_v57 = vadd.f32 %v2916_v12, %v2843_v21  ;;  %v2775_v2 = vadd.f32 %v2774_v45, %v19854_v22  ;;  %v2845_v47 = vmul.f32 %v19854_v22, %v19854_v22 }
 0x1bf   :  { %v2764_v10 = vadd.f32 %v2763_v5, %v2762_v54  ;;  %v2931_v42 = vrot.slane %v2930_v24, 4  ;;  %v2739_v7 = vrot.slane %v2738_v19, 2  ;;  %v2906_v25 = vadd.f32 %v2905_v51, %v2904_v16 }
 0x1c0   :  { %v2776_v28 = vrot.slane %v2775_v2, 4  ;;  %v2943_v35 = vadd.f32 %v2942_v63, %v2845_v47  ;;  %v2751_v34 = vadd.f32 %v2750_v43, %v2749_v18  ;;  %v2918_v48 = vrot.slane %v2917_v57, 4 }
 0x1c1   :  { %v2740_v58 = vadd.f32 %v2739_v7, %v2738_v19  ;;  %v2907_v23 = vrot.slane %v2906_v25, 2  ;;  %v2765_v26 = vrot.slane %v2764_v10, 2  ;;  %v2932_v53 = vadd.f32 %v2931_v42, %v2930_v24 }
 0x1c2   :  { %v2752_v40 = vrot.slane %v2751_v34, 2  ;;  %v2919_v32 = vadd.f32 %v2918_v48, %v2917_v57  ;;  %v2777_v12 = vadd.f32 %v2776_v28, %v2775_v2  ;;  %v2944_v50 = vrot.slane %v2943_v35, 4 }
 0x1c3   :  { %v2741_v45 = vrot.slane %v2740_v58, 1  ;;  %v2908_v21 = vadd.f32 %v2907_v23, %v2906_v25  ;;  %v2766_v14 = vadd.f32 %v2765_v26, %v2764_v10  ;;  %v2933_v22 = vrot.slane %v2932_v53, 2 }
 0x1c4   :  { %v2753_v54 = vadd.f32 %v2752_v40, %v2751_v34  ;;  %v2920_v5 = vrot.slane %v2919_v32, 2  ;;  %v2778_v33 = vrot.slane %v2777_v12, 2  ;;  %v2945_v16 = vadd.f32 %v2944_v50, %v2943_v35 }
 0x1c5   :  { %v2909_v51 = vrot.slane %v2908_v21, 1  ;;  %v2934_v63 = vadd.f32 %v2933_v22, %v2932_v53  ;;  %v2742_v7 = vadd.f32 %v2741_v45, %v2740_v58  ;;  %v2767_v42 = vrot.slane %v2766_v14, 1 }
 0x1c6   :  { %v2754_v18 = vrot.slane %v2753_v54, 1  ;;  %v2921_v43 = vadd.f32 %v2920_v5, %v2919_v32  ;;  %v2779_v19 = vadd.f32 %v2778_v33, %v2777_v12  ;;  %v2946_v47 = vrot.slane %v2945_v16, 2 }
 0x1c7   :  { %v2910_v24 = vadd.f32 %v2909_v51, %v2908_v21  ;;  %v2935_v57 = vrot.slane %v2934_v63, 1  ;;  %v2768_v22 = vadd.f32 %v2767_v42, %v2766_v14 }
 0x1c8   :  { %v2922_v2 = vrot.slane %v2921_v43, 1  ;;  %v2947_v28 = vadd.f32 %v2946_v47, %v2945_v16  ;;  %v2755_v34 = vadd.f32 %v2754_v18, %v2753_v54  ;;  %v2780_v35 = vrot.slane %v2779_v19, 1 }
 0x1c9   :  { %v2954_v25 = vsel %vm1502_vm1, %v2742_v7, %v2910_v24  ;;  %v2936_v10 = vadd.f32 %v2935_v57, %v2934_v63 }
 0x1ca   :  { %2966 = vrot.lane.b32.xlu0 %v2954_v25, %s17978_s1  ;;  %v2923_v48 = vadd.f32 %v2922_v2, %v2921_v43  ;;  %v2948_v23 = vrot.slane %v2947_v28, 1  ;;  %v2781_v53 = vadd.f32 %v2780_v35, %v2779_v19 }
 0x1cb   :  { %v2956_v58 = vsel %vm1502_vm1, %v2768_v22, %v2936_v10 }
 0x1cc   :  { %v2955_v26 = vsel %vm1502_vm1, %v2755_v34, %v2923_v48  ;;  %v2949_v33 = vadd.f32 %v2948_v23, %v2947_v28 }
 0x1cd   :  { %2968 = vrot.lane.b32.xlu1 %v2955_v26, %s17978_s1 }
 0x1ce   :  { %2970 = vrot.lane.b32.xlu0 %v2956_v58, %s17978_s1  ;;  %v2957_v40 = vsel %vm1502_vm1, %v2781_v53, %v2949_v33 }
 0x1d1   :  { %2972 = vrot.lane.b32.xlu1 %v2957_v40, %s17978_s1 }
 0x1d2   :  { %14 = vsyncpa [#allocation3], 0  ;;  %v25402_v50 = vlaneseq  ;;  %s17979_s18 = smov 64   ;;  %v16535_v34 = vld [vmem:[%s25046_s4 + $0x2e4] ss:$16 sps:$4 sm:$0xff]   ;;  %vm11199_vm10 = vcmask 1041409  }
 0x1d3   :  { %v16530_v48 = vld [vmem:[%s25046_s4 + $0xe0] ss:$16 sps:$4 sm:$0xff]   ;;  %5095 = vmatprep.subr.bf16.mxu1 %v16535_v34  ;;  %v16538_v23 = vld [vmem:[%s25046_s4 + $0xc4] ss:$16 sps:$4 sm:$0xff]   ;;  %vm11201_vm11 = vcmask 1045509   ;;  %vm11203_vm12 = vcmask 1042434  }
 0x1d4   :  { %v19868_v45 = vand.u32 127, %v25402_v50  ;;  %v16533_v35 = vld [vmem:[%s25046_s4 + $0x2e0] ss:$16 sps:$4 sm:$0xff]   ;;  %v16541_v22 = vld [vmem:[%s25046_s4 + $0x2c4] ss:$16 sps:$4 sm:$0xff]   ;;  %vm11205_vm13 = vcmask 1046534  }
 0x1d5   :  { %5096 = vmatpush1.bf16.msra.mxu1 %v16533_v35  ;;  %v16539_v33 = vld [vmem:[%s25046_s4 + $0x2c0] ss:$16 sps:$4 sm:$0xff]   ;;  %v16547_v53 = vld [vmem:[%s25046_s4 + $0x2a4] ss:$16 sps:$4 sm:$0xff]   ;;  %vm11207_vm14 = vcmask 1043459   ;;  %vm11209_vm15 = vcmask 1047559  }
 0x1d6   :  { %25403 = vst [vmem:[#allocation20_spill] sm:$0xff] %v19868_v45  ;;  %vm2976_vm7 = vcmp.lt.s32.totalorder %v19868_v45, 32  ;;  %5097 = vmatprep.subr.bf16.mxu1 %v16541_v22  ;;  %v16553_v50 = vld [vmem:[%s25046_s4 + $0x284] ss:$16 sps:$4 sm:$0xff]   ;;  %v16575_v35 = vld [vmem:[%s25046_s4 + $0x200] ss:$16 sps:$4 sm:$0xff]  }
 0x1d7   :  { %v16577_v34 = vld [vmem:[%s25046_s4 + $0x204] ss:$16 sps:$4 sm:$0xff]   ;;  %vm3009_vm8 = vcmp.lt.s32.totalorder %v19868_v45, 64 }
 0x1d8   :  { %v16583_v22 = vld [vmem:[%s25046_s4 + $0x3e4] ss:$16 sps:$4 sm:$0xff]  }
 0x1d9   :  { %5098 = vmatpush1.bf16.msra.mxu1 %v16539_v33  ;;  %v16581_v33 = vld [vmem:[%s25046_s4 + $0x3e0] ss:$16 sps:$4 sm:$0xff]  }
 0x1da   :  { %5099 = vmatprep.subr.bf16.mxu1 %v16547_v53  ;;  %v16589_v53 = vld [vmem:[%s25046_s4 + $0x3c4] ss:$16 sps:$4 sm:$0xff]  }
 0x1db   :  { %v25412_v45 = vld [vmem:[#allocation95_spill] sm:$0xff] }
 0x21e   :  { %v2963_v32 = vpop.permute.xlu1 %2962 }
 0x221   :  { %v2959_v12 = vpop.permute.xlu0 %2958 }
 0x22a   :  { %v2965_v21 = vpop.permute.xlu1 %2964 }
 0x22b   :  { %v2981_v63 = vsel %vm2976_vm7, %v2963_v32, %v2965_v21 }
 0x22c   :  { %v2961_v14 = vpop.permute.xlu0 %2960  ;;  %v19888_v18 = vadd.f32 %v2981_v63, %v19824_v37  ;;  %v16554_v63 = vld [vmem:[%s25046_s4 + $0x60] ss:$16 sps:$4 sm:$0xff]  }
 0x22d   :  { %v2982_v54 = vsel %vm2976_vm7, %v2961_v14, %v2963_v32  ;;  %v2983_v5 = vsel %vm2976_vm7, %v2959_v12, %v2961_v14  ;;  %v16545_v32 = vld [vmem:[%s25046_s4 + $0x2a0] ss:$16 sps:$4 sm:$0xff]  }
 0x22e   :  { %v19876_v16 = vadd.f32 %v2983_v5, %v19839_v44  ;;  %v19879_v51 = vadd.f32 %v2982_v54, %v19772_v49  ;;  %5100 = vmatpush1.bf16.msra.mxu1 %v16545_v32  ;;  %v16551_v14 = vld [vmem:[%s25046_s4 + $0x280] ss:$16 sps:$4 sm:$0xff]   ;;  %v16556_v54 = vld [vmem:[%s25046_s4 + $0x64] ss:$16 sps:$4 sm:$0xff]  }
 0x22f   :  { %5101 = vmatprep.subr.bf16.mxu1 %v16553_v50  ;;  %v16559_v5 = vld [vmem:[%s25046_s4 + $0x264] ss:$16 sps:$4 sm:$0xff]   ;;  %v16587_v32 = vld [vmem:[%s25046_s4 + $0x3c0] ss:$16 sps:$4 sm:$0xff]  }
 0x230   :  { %2995 = vrot.lane.b32.xlu1 %v19876_v16, %s17979_s18  ;;  %2997 = vrot.lane.b32.xlu0 %v19879_v51, %s17979_s18  ;;  %v16595_v50 = vld [vmem:[%s25046_s4 + $0x3a4] ss:$16 sps:$4 sm:$0xff]  }
 0x232   :  { %5102 = vmatpush1.bf16.msra.mxu1 %v16551_v14  ;;  %v16593_v14 = vld [vmem:[%s25046_s4 + $0x3a0] ss:$16 sps:$4 sm:$0xff]  }
 0x233   :  { %5103 = vmatprep.subr.bf16.mxu1 %v16559_v5  ;;  %v16601_v5 = vld [vmem:[%s25046_s4 + $0x384] ss:$16 sps:$4 sm:$0xff]  }
 0x234   :  { %2999 = vrot.lane.b32.xlu1 %v19888_v18, %s17979_s18 }
 0x23c   :  { %v2967_v44 = vpop.permute.xlu0 %2966 }
 0x23d   :  { %v2980_v49 = vsel %vm2976_vm7, %v2965_v21, %v2967_v44  ;;  %v16548_v21 = vld [vmem:[%s25046_s4 + $0x80] ss:$16 sps:$4 sm:$0xff]  }
 0x23e   :  { %v19894_v43 = vadd.f32 %v2980_v49, %v2954_v25  ;;  %v16562_v49 = vld [vmem:[%s25046_s4 + $0x44] ss:$16 sps:$4 sm:$0xff]  }
 0x23f   :  { %v2969_v19 = vpop.permute.xlu1 %2968 }
 0x240   :  { %v2979_v47 = vsel %vm2976_vm7, %v2967_v44, %v2969_v19  ;;  %3001 = vrot.lane.b32.xlu0 %v19894_v43, %s17979_s18  ;;  %v2971_v37 = vpop.permute.xlu0 %2970  ;;  %v16557_v44 = vld [vmem:[%s25046_s4 + $0x260] ss:$16 sps:$4 sm:$0xff]  }
 0x241   :  { %v19900_v7 = vadd.f32 %v2979_v47, %v2955_v26  ;;  %v2978_v25 = vsel %vm2976_vm7, %v2969_v19, %v2971_v37  ;;  %v16536_v26 = vld [vmem:[%s25046_s4 + $0xc0] ss:$16 sps:$4 sm:$0xff]   ;;  %5104 = vmatpush1.bf16.msra.mxu1 %v16557_v44  ;;  %v16565_v19 = vld [vmem:[%s25046_s4 + $0x244] ss:$16 sps:$4 sm:$0xff]  }
 0x242   :  { %v19919_v10 = vadd.f32 %v2978_v25, %v2956_v58  ;;  %v16544_v58 = vld [vmem:[%s25046_s4 + $0xa4] ss:$16 sps:$4 sm:$0xff]   ;;  %v16560_v47 = vld [vmem:[%s25046_s4 + $0x40] ss:$16 sps:$4 sm:$0xff]   ;;  %5105 = vmatprep.subr.bf16.mxu1 %v16565_v19 }
 0x243   :  { %v2973_v24 = vpop.permute.xlu1 %2972  ;;  %3003 = vrot.lane.b32.xlu1 %v19900_v7, %s17979_s18  ;;  %v16569_v25 = vld [vmem:[%s25046_s4 + $0x220] ss:$16 sps:$4 sm:$0xff]  }
 0x244   :  { %v2977_v42 = vsel %vm2976_vm7, %v2971_v37, %v2973_v24  ;;  %v2984_v57 = vsel %vm2976_vm7, %v2973_v24, %v2959_v12  ;;  %v16550_v12 = vld [vmem:[%s25046_s4 + $0x84] ss:$16 sps:$4 sm:$0xff]   ;;  %v16563_v37 = vld [vmem:[%s25046_s4 + $0x240] ss:$16 sps:$4 sm:$0xff]  }
 0x245   :  { %v19909_v2 = vadd.f32 %v2984_v57, %v19785_v6  ;;  %v19911_v28 = vadd.f32 %v2977_v42, %v2957_v40  ;;  %v16532_v6 = vld [vmem:[%s25046_s4 + $0xe4] ss:$16 sps:$4 sm:$0xff]   ;;  %v16542_v40 = vld [vmem:[%s25046_s4 + $0xa0] ss:$16 sps:$4 sm:$0xff]   ;;  %5106 = vmatpush1.bf16.msra.mxu1 %v16563_v37 }
 0x246   :  { %5022 = vmatprep.subr.bf16.mxu0 %v16532_v6  ;;  %v16568_v24 = vld [vmem:[%s25046_s4 + $0x24] ss:$16 sps:$4 sm:$0xff]   ;;  %v16566_v57 = vld [vmem:[%s25046_s4 + $0x20] ss:$16 sps:$4 sm:$0xff]  }
 0x247   :  { %2993 = vrot.lane.b32.xlu0 %v19909_v2, %s17979_s18  ;;  %3007 = vrot.lane.b32.xlu1 %v19911_v28, %s17979_s18  ;;  %v16571_v42 = vld [vmem:[%s25046_s4 + $0x224] ss:$16 sps:$4 sm:$0xff]   ;;  %v16599_v44 = vld [vmem:[%s25046_s4 + $0x380] ss:$16 sps:$4 sm:$0xff]  }
 0x248   :  { %5023 = vmatpush1.bf16.msra.mxu0 %v16530_v48  ;;  %5107 = vmatprep.subr.bf16.mxu1 %v16571_v42  ;;  %v16574_v6 = vld [vmem:[%s25046_s4 + $0x4] ss:$16 sps:$4 sm:$0xff]   ;;  %v16572_v48 = vld [vmem:[%s25046_s4] ss:$16 sps:$4 sm:$0xff]  }
 0x249   :  { %5024 = vmatprep.subr.bf16.mxu0 %v16538_v23  ;;  %5108 = vmatpush1.bf16.msra.mxu1 %v16569_v25  ;;  %v16580_v23 = vld [vmem:[%s25046_s4 + $0x1e4] ss:$16 sps:$4 sm:$0xff]   ;;  %v16602_v19 = vld [vmem:[%s25046_s4 + $0x160] ss:$16 sps:$4 sm:$0xff]  }
 0x24a   :  { %5109 = vmatprep.subr.bf16.mxu1 %v16577_v34  ;;  %v16607_v37 = vld [vmem:[%s25046_s4 + $0x364] ss:$16 sps:$4 sm:$0xff]   ;;  %v16611_v25 = vld [vmem:[%s25046_s4 + $0x340] ss:$16 sps:$4 sm:$0xff]  }
 0x24b   :  { %3005 = vrot.lane.b32.xlu0 %v19919_v10, %s17979_s18  ;;  %v16613_v42 = vld [vmem:[%s25046_s4 + $0x344] ss:$16 sps:$4 sm:$0xff]  }
 0x24c   :  { %5025 = vmatpush1.bf16.msra.mxu0 %v16536_v26  ;;  %v16578_v26 = vld [vmem:[%s25046_s4 + $0x1e0] ss:$16 sps:$4 sm:$0xff]   ;;  %v16619_v34 = vld [vmem:[%s25046_s4 + $0x324] ss:$16 sps:$4 sm:$0xff]  }
 0x24d   :  { %5026 = vmatprep.subr.bf16.mxu0 %v16544_v58  ;;  %5110 = vmatpush1.bf16.msra.mxu1 %v16575_v35  ;;  %v16586_v58 = vld [vmem:[%s25046_s4 + $0x1c4] ss:$16 sps:$4 sm:$0xff]   ;;  %v16617_v35 = vld [vmem:[%s25046_s4 + $0x320] ss:$16 sps:$4 sm:$0xff]  }
 0x24e   :  { %5111 = vmatprep.subr.bf16.mxu1 %v16583_v22  ;;  %v16625_v22 = vld [vmem:[%s25046_s4 + $0x304] ss:$16 sps:$4 sm:$0xff]  }
 0x250   :  { %5027 = vmatpush1.bf16.msra.mxu0 %v16542_v40  ;;  %v16584_v40 = vld [vmem:[%s25046_s4 + $0x1c0] ss:$16 sps:$4 sm:$0xff]  }
 0x251   :  { %5028 = vmatprep.subr.bf16.mxu0 %v16550_v12  ;;  %5112 = vmatpush2.bf16.msra.mxu1 %v16581_v33  ;;  %v16592_v12 = vld [vmem:[%s25046_s4 + $0x1a4] ss:$16 sps:$4 sm:$0xff]   ;;  %v16623_v33 = vld [vmem:[%s25046_s4 + $0x300] ss:$16 sps:$4 sm:$0xff]  }
 0x252   :  { %5113 = vmatprep.subr.bf16.mxu1 %v16589_v53  ;;  %v16631_v53 = vld [vmem:[%s25046_s4 + $0x6e4] ss:$16 sps:$4 sm:$0xff]  }
 0x254   :  { %5029 = vmatpush1.bf16.msra.mxu0 %v16548_v21  ;;  %v16590_v21 = vld [vmem:[%s25046_s4 + $0x1a0] ss:$16 sps:$4 sm:$0xff]  }
 0x255   :  { %5030 = vmatprep.subr.bf16.mxu0 %v16556_v54  ;;  %5114 = vmatpush2.bf16.msra.mxu1 %v16587_v32  ;;  %v16598_v54 = vld [vmem:[%s25046_s4 + $0x184] ss:$16 sps:$4 sm:$0xff]  }
 0x256   :  { %5115 = vmatprep.subr.bf16.mxu1 %v16595_v50 }
 0x258   :  { %5031 = vmatpush1.bf16.msra.mxu0 %v16554_v63  ;;  %v16596_v63 = vld [vmem:[%s25046_s4 + $0x180] ss:$16 sps:$4 sm:$0xff]  }
 0x259   :  { %5032 = vmatprep.subr.bf16.mxu0 %v16562_v49  ;;  %5116 = vmatpush2.bf16.msra.mxu1 %v16593_v14  ;;  %v16604_v49 = vld [vmem:[%s25046_s4 + $0x164] ss:$16 sps:$4 sm:$0xff]  }
 0x25a   :  { %5117 = vmatprep.subr.bf16.mxu1 %v16601_v5 }
 0x25c   :  { %5033 = vmatpush1.bf16.msra.mxu0 %v16560_v47  ;;  %v16605_v47 = vld [vmem:[%s25046_s4 + $0x360] ss:$16 sps:$4 sm:$0xff]  }
 0x25d   :  { %5034 = vmatprep.subr.bf16.mxu0 %v16568_v24  ;;  %5118 = vmatpush2.bf16.msra.mxu1 %v16599_v44  ;;  %v16610_v24 = vld [vmem:[%s25046_s4 + $0x144] ss:$16 sps:$4 sm:$0xff]  }
 0x25e   :  { %5119 = vmatprep.subr.bf16.mxu1 %v16607_v37 }
 0x260   :  { %5035 = vmatpush1.bf16.msra.mxu0 %v16566_v57  ;;  %v16608_v57 = vld [vmem:[%s25046_s4 + $0x140] ss:$16 sps:$4 sm:$0xff]  }
 0x261   :  { %5036 = vmatprep.subr.bf16.mxu0 %v16574_v6  ;;  %5120 = vmatpush2.bf16.msra.mxu1 %v16605_v47  ;;  %v16616_v6 = vld [vmem:[%s25046_s4 + $0x124] ss:$16 sps:$4 sm:$0xff]  }
 0x262   :  { %5121 = vmatprep.subr.bf16.mxu1 %v16613_v42 }
 0x264   :  { %5037 = vmatpush1.bf16.msra.mxu0 %v16572_v48  ;;  %v16614_v48 = vld [vmem:[%s25046_s4 + $0x120] ss:$16 sps:$4 sm:$0xff]  }
 0x265   :  { %5038 = vmatprep.subr.bf16.mxu0 %v16580_v23  ;;  %5122 = vmatpush2.bf16.msra.mxu1 %v16611_v25  ;;  %v16622_v23 = vld [vmem:[%s25046_s4 + $0x104] ss:$16 sps:$4 sm:$0xff]  }
 0x266   :  { %5123 = vmatprep.subr.bf16.mxu1 %v16619_v34 }
 0x268   :  { %5039 = vmatpush2.bf16.msra.mxu0 %v16578_v26  ;;  %v16620_v26 = vld [vmem:[%s25046_s4 + $0x100] ss:$16 sps:$4 sm:$0xff]  }
 0x269   :  { %5040 = vmatprep.subr.bf16.mxu0 %v16586_v58  ;;  %5124 = vmatpush2.bf16.msra.mxu1 %v16617_v35  ;;  %v16628_v58 = vld [vmem:[%s25046_s4 + $0x4e4] ss:$16 sps:$4 sm:$0xff]  }
 0x26a   :  { %5125 = vmatprep.subr.bf16.mxu1 %v16625_v22 }
 0x26c   :  { %5041 = vmatpush2.bf16.msra.mxu0 %v16584_v40 }
 0x26d   :  { %5042 = vmatprep.subr.bf16.mxu0 %v16592_v12  ;;  %5126 = vmatpush2.bf16.msra.mxu1 %v16623_v33 }
 0x26e   :  { %5241 = vmatprep.subr.bf16.mxu1 %v16631_v53 }
 0x270   :  { %5043 = vmatpush2.bf16.msra.mxu0 %v16590_v21 }
 0x271   :  { %5044 = vmatprep.subr.bf16.mxu0 %v16598_v54 }
 0x274   :  { %5045 = vmatpush2.bf16.msra.mxu0 %v16596_v63 }
 0x275   :  { %5046 = vmatprep.subr.bf16.mxu0 %v16604_v49 }
 0x278   :  { %5047 = vmatpush2.bf16.msra.mxu0 %v16602_v19 }
 0x279   :  { %5048 = vmatprep.subr.bf16.mxu0 %v16610_v24 }
 0x27c   :  { %5049 = vmatpush2.bf16.msra.mxu0 %v16608_v57 }
 0x27d   :  { %5050 = vmatprep.subr.bf16.mxu0 %v16616_v6 }
 0x280   :  { %5051 = vmatpush2.bf16.msra.mxu0 %v16614_v48 }
 0x281   :  { %5052 = vmatprep.subr.bf16.mxu0 %v16622_v23 }
 0x284   :  { %5053 = vmatpush2.bf16.msra.mxu0 %v16620_v26 }
 0x285   :  { %5168 = vmatprep.subr.bf16.mxu0 %v16628_v58 }
 0x2a2   :  { %v2996_v40 = vpop.permute.xlu1 %2995  ;;  %v2998_v32 = vpop.permute.xlu0 %2997 }
 0x2a3   :  { %v3015_v54 = vsel %vm3009_vm8, %v2996_v40, %v2998_v32 }
 0x2a4   :  { %v3020_v42 = vadd.f32 %v3015_v54, %v19879_v51 }
 0x2a6   :  { %v3000_v12 = vpop.permute.xlu1 %2999 }
 0x2a7   :  { %v3014_v5 = vsel %vm3009_vm8, %v2998_v32, %v3000_v12 }
 0x2a8   :  { %v3021_v57 = vadd.f32 %v3014_v5, %v19888_v18 }
 0x2aa   :  { %v3029_v51 = vadd.f32 %v3021_v57, %v3020_v42 }
 0x2b2   :  { %v3002_v50 = vpop.permute.xlu0 %3001 }
 0x2b3   :  { %v3013_v63 = vsel %vm3009_vm8, %v3000_v12, %v3002_v50 }
 0x2b4   :  { %v3022_v25 = vadd.f32 %v3013_v63, %v19894_v43 }
 0x2b5   :  { %v3004_v21 = vpop.permute.xlu1 %3003 }
 0x2b6   :  { %v3012_v14 = vsel %vm3009_vm8, %v3002_v50, %v3004_v21  ;;  %v3030_v26 = vadd.f32 %v3022_v25, %v3021_v57 }
 0x2b7   :  { %v3023_v19 = vadd.f32 %v3012_v14, %v19900_v7 }
 0x2b9   :  { %v3008_v44 = vpop.permute.xlu1 %3007  ;;  %v2994_v49 = vpop.permute.xlu0 %2993  ;;  %v3031_v48 = vadd.f32 %v3023_v19, %v3022_v25 }
 0x2ba   :  { %v3016_v47 = vsel %vm3009_vm8, %v2994_v49, %v2996_v40  ;;  %v3017_v37 = vsel %vm3009_vm8, %v3008_v44, %v2994_v49 }
 0x2bb   :  { %v3019_v24 = vadd.f32 %v3016_v47, %v19876_v16  ;;  %v3018_v6 = vadd.f32 %v3017_v37, %v19909_v2  ;;  %v3039_v2 = vadd.f32 %v3031_v48, %v3029_v51 }
 0x2bd   :  { %v3006_v34 = vpop.permute.xlu0 %3005  ;;  %v3028_v35 = vadd.f32 %v3020_v42, %v3019_v24  ;;  %v3027_v18 = vadd.f32 %v3019_v24, %v3018_v6 }
 0x2be   :  { %v3010_v7 = vsel %vm3009_vm8, %v3006_v34, %v3008_v44  ;;  %v3011_v23 = vsel %vm3009_vm8, %v3004_v21, %v3006_v34 }
 0x2bf   :  { %v3024_v22 = vadd.f32 %v3011_v23, %v19919_v10  ;;  %v3025_v16 = vadd.f32 %v3010_v7, %v19911_v28  ;;  %v3038_v53 = vadd.f32 %v3030_v26, %v3028_v35  ;;  %v3037_v14 = vadd.f32 %v3029_v51, %v3027_v18 }
 0x2c1   :  { %v3026_v33 = vadd.f32 %v3025_v16, %v3018_v6  ;;  %v3032_v43 = vadd.f32 %v3024_v22, %v3023_v19  ;;  %v3033_v58 = vadd.f32 %v3025_v16, %v3024_v22 }
 0x2c3   :  { %v3034_v40 = vadd.f32 %v3032_v43, %v3026_v33  ;;  %v3035_v32 = vadd.f32 %v3033_v58, %v3027_v18  ;;  %v3036_v12 = vadd.f32 %v3028_v35, %v3026_v33  ;;  %v3040_v50 = vadd.f32 %v3032_v43, %v3030_v26 }
 0x2c4   :  { %v3041_v54 = vadd.f32 %v3033_v58, %v3031_v48 }
 0x2c5   :  { %v3042_v5 = vadd.f32 %v3038_v53, %v3034_v40  ;;  %v3043_v21 = vadd.f32 %v3039_v2, %v3035_v32  ;;  %v3044_v63 = vadd.f32 %v3040_v50, %v3036_v12  ;;  %v17980_v2 = vmov 1966171168   ;;  %v25404_v12 = vld [vmem:[#allocation28_spill] sm:$0xff] }
 0x2c6   :  { %v3045_v10 = vadd.f32 %v3041_v54, %v3037_v14  ;;  %v3089_v53 = vunpack.c.l.s4 %v17980_v2 }
 0x2c7   :  { %v20146_v44 = vmul.f32 0.00048828125, %v3042_v5  ;;  %v20148_v28 = vmul.f32 0.00048828125, %v3043_v21  ;;  %v20150_v49 = vmul.f32 0.00048828125, %v3044_v63 }
 0x2c8   :  { %v20152_v19 = vmul.f32 0.00048828125, %v3045_v10  ;;  %v3090_v40 = vunpack.c.0.s8 %v3089_v53 }
 0x2c9   :  { %v3050_v47 = vmul.f32 %v20146_v44, %v20146_v44  ;;  %v3051_v37 = vmul.f32 %v20148_v28, %v20148_v28  ;;  %v3052_v24 = vmul.f32 %v20150_v49, %v20150_v49 }
 0x2ca   :  { %v3053_v42 = vmul.f32 %v20152_v19, %v20152_v19  ;;  %v20167_v50 = vsub.s32 %v3090_v40, %v25404_v12 }
 0x2cb   :  { %v3058_v57 = vrot.slane %v3050_v47, 7  ;;  %v3059_v25 = vrot.slane %v3051_v37, 7  ;;  %v3060_v6 = vrot.slane %v3052_v24, 7 }
 0x2cc   :  { %v3061_v34 = vrot.slane %v3053_v42, 7  ;;  %25405 = vst [vmem:[#allocation77_spill] sm:$0xff] %v20167_v50  ;;  %v2676_v42 = vld [vmem:[%s25044_s2] sm:$0xff] }
 0x2cd   :  { %v3066_v48 = vsub.f32 %v20146_v44, %v3058_v57  ;;  %v3067_v35 = vsub.f32 %v20148_v28, %v3059_v25  ;;  %v3068_v7 = vsub.f32 %v20150_v49, %v3060_v6  ;;  %v20176_v57 = vsub.s32 0, %v25404_v12 }
 0x2ce   :  { %v3069_v23 = vsub.f32 %v20152_v19, %v3061_v34  ;;  %v20179_v25 = vsub.s32 1, %v25404_v12  ;;  %v20182_v6 = vsub.s32 2, %v25404_v12  ;;  %v20185_v34 = vsub.s32 3, %v25404_v12 }
 0x2cf   :  { %v3070_v22 = vmax.f32 %v3066_v48, 0.0  ;;  %v3071_v16 = vmax.f32 %v3067_v35, 0.0  ;;  %v3072_v51 = vmax.f32 %v3068_v7, 0.0  ;;  %25406 = vst [vmem:[#allocation84_spill] sm:$0xff] %v20176_v57  ;;  %v25107_v35 = vsub.s32 4, %v25404_v12 }
 0x2d0   :  { %v3073_v26 = vmax.f32 %v3069_v23, 0.0  ;;  %25407 = vst [vmem:[#allocation85_spill] sm:$0xff] %v20179_v25  ;;  %25408 = vst [vmem:[#allocation78_spill] sm:$0xff] %v20182_v6  ;;  %v25106_v7 = vsub.s32 5, %v25404_v12  ;;  %v25104_v23 = vsub.s32 6, %v25404_v12 }
 0x2d1   :  { %v3074_v18 = vadd.f32 1e-05, %v3070_v22  ;;  %v3075_v33 = vadd.f32 1e-05, %v3071_v16  ;;  %v3076_v43 = vadd.f32 1e-05, %v3072_v51 }
 0x2d2   :  { %v3077_v58 = vadd.f32 1e-05, %v3073_v26  ;;  %25409 = vst [vmem:[#allocation79_spill] sm:$0xff] %v20185_v34  ;;  %v25105_v22 = vsub.s32 7, %v25404_v12 }
 0x2d3   :  { %17938 = vrsqrt.f32 %v3074_v18 }
 0x2d4   :  { %17940 = vrsqrt.f32 %v3075_v33 }
 0x2d5   :  { %17942 = vrsqrt.f32 %v3076_v43 }
 0x2d6   :  { %17944 = vrsqrt.f32 %v3077_v58 }
 0x2e0   :  { %v17939_v32 = vpop.eup %17938 }
 0x2e1   :  { %v17941_v14 = vpop.eup %17940 }
 0x2e2   :  { %v17943_v54 = vpop.eup %17942  ;;  %v3086_v5 = vcombine.low %v17939_v32, %v17941_v14 }
 0x2e3   :  { %v17945_v21 = vpop.eup %17944 }
 0x2e4   :  { %v3087_v63 = vcombine.low %v17943_v54, %v17945_v21  ;;  %v3094_v10 = vrot.slane %v3086_v5, %v20167_v50 }
 0x2e6   :  { %v3101_v47 = vrot.slane %v3087_v63, %v20167_v50 }
 0x2e8   :  { %v3102_v37 = vcombine.high %v3094_v10, %v3101_v47 }
 0x2ea   :  { %v3109_v24 = vrot.slane %v3102_v37, %v20167_v50 }
 0x2ec   :  { %v3110_v48 = vcombine.low %v3109_v24, %v3109_v24 }
 0x2ee   :  { %v3112_v16 = vmul.f32 %v3110_v48, %v2676_v42 }
 0x2f0   :  { %v3117_v51 = vrot.slane %v3112_v16, %v20176_v57  ;;  %v3121_v26 = vrot.slane %v3112_v16, %v20179_v25  ;;  %v20194_v18 = vrot.slane %v3112_v16, %v20182_v6  ;;  %v3129_v33 = vrot.slane %v3112_v16, %v20185_v34 }
 0x2f1   :  { %v20199_v43 = vrot.slane %v3112_v16, %v25107_v35  ;;  %v20203_v58 = vrot.slane %v3112_v16, %v25106_v7  ;;  %v20207_v2 = vrot.slane %v3112_v16, %v25104_v23  ;;  %v20211_v53 = vrot.slane %v3112_v16, %v25105_v22  ;;  %v25411_v35 = vld [vmem:[#allocation45_spill] sm:$0xff] }
 0x2f2   :  { %v3154_v40 = vmul.f32 %v3117_v51, %v20146_v44  ;;  %v3155_v32 = vmul.f32 %v3121_v26, %v20148_v28  ;;  %v3156_v14 = vmul.f32 %v20194_v18, %v20150_v49  ;;  %v3157_v54 = vmul.f32 %v3129_v33, %v20152_v19 }
 0x2f3   :  { %v3158_v5 = vmul.f32 %v20199_v43, %v20146_v44  ;;  %v3159_v21 = vmul.f32 %v20203_v58, %v20148_v28  ;;  %v3160_v63 = vmul.f32 %v20207_v2, %v20150_v49  ;;  %v3161_v10 = vmul.f32 %v20211_v53, %v20152_v19  ;;  %v25410_v28 = vld [vmem:[#allocation93_spill] sm:$0xff] }
 0x2f4   :  { %v3170_v47 = vcombine.low %v3154_v40, %v3155_v32  ;;  %v3171_v37 = vcombine.low %v3156_v14, %v3157_v54  ;;  %v3222_v7 = vmul.f32 %v3121_v26, %v25410_v28  ;;  %v3230_v49 = vmul.f32 %v3121_v26, %v25411_v35  ;;  %v25413_v40 = vld [vmem:[#allocation7_spill] sm:$0xff]  ;;  %v25414_v14 = vld [vmem:[#allocation30_spill] sm:$0xff] }
 0x2f5   :  { %v3172_v24 = vcombine.low %v3158_v5, %v3159_v21  ;;  %v3173_v42 = vcombine.low %v3160_v63, %v3161_v10  ;;  %v3224_v4 = vmul.f32 %v3129_v33, %v25412_v45  ;;  %v3232_v32 = vmul.f32 %v3129_v33, %v25413_v40  ;;  %v25415_v5 = vld [vmem:[#allocation33_spill] sm:$0xff]  ;;  %v25416_v10 = vld [vmem:[#allocation31_spill] sm:$0xff] }
 0x2f6   :  { %v3180_v48 = vrot.slane %v3170_v47, %v20167_v50  ;;  %v3187_v16 = vrot.slane %v3171_v37, %v20167_v50  ;;  %v3221_v54 = vmul.f32 %v3117_v51, %v25414_v14  ;;  %v3229_v21 = vmul.f32 %v3117_v51, %v25415_v5  ;;  %v25417_v37 = vld [vmem:[#allocation34_spill] sm:$0xff] }
 0x2f7   :  { %v3194_v23 = vrot.slane %v3172_v24, %v20167_v50  ;;  %v3201_v44 = vrot.slane %v3173_v42, %v20167_v50  ;;  %v3223_v47 = vmul.f32 %v20194_v18, %v25416_v10  ;;  %v3231_v24 = vmul.f32 %v20194_v18, %v25417_v37  ;;  %v25422_v10 = vld [vmem:[#allocation49_spill] sm:$0xff] }
 0x2f8   :  { %v3202_v22 = vcombine.low %v3180_v48, %v3187_v16  ;;  %v3238_v42 = vmul.f32 %v3121_v26, %v19420_v59  ;;  %v3246_v45 = vmul.f32 %v3121_v26, %v19441_v55  ;;  %v3248_v48 = vmul.f32 %v3129_v33, %v19444_v15 }
 0x2f9   :  { %v3203_v19 = vcombine.low %v3194_v23, %v3201_v44  ;;  %v3240_v23 = vmul.f32 %v3129_v33, %v19426_v39  ;;  %v3237_v16 = vmul.f32 %v3117_v51, %v19401_v38  ;;  %v3245_v44 = vmul.f32 %v3117_v51, %v19433_v56  ;;  %v25418_v56 = vld [vmem:[#allocation41_spill] sm:$0xff] }
 0x2fa   :  { %v3210_v63 = vrot.slane %v3202_v22, %v20167_v50  ;;  %v2677_v22 = vld [vmem:[%s25045_s3] sm:$0xff]  ;;  %v20253_v28 = vmul.f32 %v20194_v18, %v19408_v29  ;;  %v20257_v59 = vmul.f32 %v20194_v18, %v19436_v20  ;;  %v20260_v39 = vmul.f32 %v3121_v26, %v19472_v36 }
 0x2fb   :  { %v3217_v35 = vrot.slane %v3203_v19, %v20167_v50  ;;  %v20263_v15 = vmul.f32 %v3121_v26, %v19501_v31  ;;  %v20266_v19 = vmul.f32 %v3129_v33, %v19478_v60  ;;  %v20269_v38 = vmul.f32 %v3129_v33, %v19511_v41  ;;  %v25419_v20 = vld [vmem:[#allocation8_spill] sm:$0xff] }
 0x2fc   :  { %v20272_v29 = vmul.f32 %v3117_v51, %v19464_v9  ;;  %v20275_v40 = vmul.f32 %v3117_v51, %v25418_v56  ;;  %v20279_v14 = vmul.f32 %v20194_v18, %v25419_v20  ;;  %v20285_v31 = vmul.f32 %v20194_v18, %v19498_v1  ;;  %v25420_v41 = vld [vmem:[#allocation48_spill] sm:$0xff]  ;;  %v25421_v9 = vld [vmem:[#allocation47_spill] sm:$0xff]  ;;  %v25425_v20 = vld [vmem:[#allocation46_spill] sm:$0xff] }
 0x2fd   :  { %v3218_v55 = vcombine.low %v3210_v63, %v3217_v35  ;;  %v20288_v60 = vmul.f32 %v3121_v26, %v19531_v11  ;;  %v20291_v5 = vmul.f32 %v3121_v26, %v25420_v41  ;;  %v20294_v63 = vmul.f32 %v3129_v33, %v25421_v9  ;;  %v25423_v35 = vld [vmem:[#allocation42_spill] sm:$0xff] }
 0x2fe   :  { %v20297_v37 = vmul.f32 %v3129_v33, %v25422_v10  ;;  %v20300_v56 = vmul.f32 %v3117_v51, %v25423_v35  ;;  %v25426_v41 = vld [vmem:[#allocation10_spill] sm:$0xff] }
 0x2ff   :  { %v20281_v36 = vsub.f32 %v2677_v22, %v3218_v55  ;;  %v25424_v22 = vld [vmem:[#allocation9_spill] sm:$0xff]  ;;  %v20327_v9 = vmul.f32 %v20194_v18, %v25426_v41  ;;  %v25427_v10 = vld [vmem:[#allocation50_spill] sm:$0xff] }
 0x300   :  { %v20303_v55 = vmul.f32 %v3117_v51, %v25424_v22  ;;  %v20323_v51 = vmul.f32 %v20194_v18, %v25425_v20  ;;  %v20331_v35 = vmul.f32 %v20203_v58, %v25427_v10  ;;  %v25428_v22 = vsub.s32 4, %v25404_v12 }
 0x301   :  { %v20307_v1 = vrot.slane %v20281_v36, %v20179_v25  ;;  %v20311_v11 = vrot.slane %v20281_v36, %v20185_v34  ;;  %v20315_v26 = vrot.slane %v20281_v36, %v20176_v57  ;;  %v20319_v33 = vrot.slane %v20281_v36, %v20182_v6 }
 0x302   :  { %v20336_v34 = vrot.slane %v20281_v36, %v25428_v22 }
 0x303   :  { %v3327_v6 = vadd.f32 %v20307_v1, %v3222_v7  ;;  %v3335_v25 = vadd.f32 %v20307_v1, %v3230_v49  ;;  %v3329_v20 = vadd.f32 %v20311_v11, %v3224_v4  ;;  %v3337_v57 = vadd.f32 %v20311_v11, %v3232_v32  ;;  %v16626_v32 = vld [vmem:[%s25046_s4 + $0x4e0] ss:$16 sps:$4 sm:$0xff]  }
 0x304   :  { %v3326_v18 = vadd.f32 %v20315_v26, %v3221_v54  ;;  %v3334_v41 = vadd.f32 %v20315_v26, %v3229_v21  ;;  %v3328_v10 = vadd.f32 %v20319_v33, %v3223_v47  ;;  %v3336_v50 = vadd.f32 %v20319_v33, %v3231_v24  ;;  %v16629_v54 = vld [vmem:[%s25046_s4 + $0x6e0] ss:$16 sps:$4 sm:$0xff]  }
 0x305   :  { %v3391_v62 = vmax.f32 %v3327_v6, 0.0  ;;  %v3399_v30 = vmax.f32 %v3335_v25, 0.0  ;;  %v3393_v22 = vmax.f32 %v3329_v20, 0.0  ;;  %v3401_v13 = vmax.f32 %v3337_v57, 0.0 }
 0x306   :  { %v3390_v52 = vmax.f32 %v3326_v18, 0.0  ;;  %v3398_v7 = vmax.f32 %v3334_v41, 0.0  ;;  %v3392_v3 = vmax.f32 %v3328_v10, 0.0  ;;  %v3400_v49 = vmax.f32 %v3336_v50, 0.0  ;;  %v16637_v50 = vld [vmem:[%s25046_s4 + $0x6c4] ss:$16 sps:$4 sm:$0xff]  }
 0x307   :  { %v20346_v61 = vpack.c.bf16 %v3399_v30, %v3391_v62  ;;  %v20348_v4 = vpack.c.bf16 %v3401_v13, %v3393_v22  ;;  %v3343_v25 = vadd.f32 %v20307_v1, %v3238_v42  ;;  %v3351_v57 = vadd.f32 %v20307_v1, %v3246_v45  ;;  %v16634_v62 = vld [vmem:[%s25046_s4 + $0x4c4] ss:$16 sps:$4 sm:$0xff]  }
 0x308   :  { %v20358_v6 = vpack.c.bf16 %v3398_v7, %v3390_v52  ;;  %v20360_v21 = vpack.c.bf16 %v3400_v49, %v3392_v3  ;;  %v3345_v30 = vadd.f32 %v20311_v11, %v3240_v23  ;;  %v3353_v13 = vadd.f32 %v20311_v11, %v3248_v48  ;;  %v16643_v22 = vld [vmem:[%s25046_s4 + $0x6a4] ss:$16 sps:$4 sm:$0xff]  }
 0x309   :  { %5054 = vmatprep.mubr.bf16.mxu0 %v20346_v61  ;;  %5127 = vmatprep.mubr.bf16.mxu1 %v20348_v4  ;;  %v3407_v52 = vmax.f32 %v3343_v25, 0.0  ;;  %v3415_v47 = vmax.f32 %v3351_v57, 0.0  ;;  %v3342_v3 = vadd.f32 %v20315_v26, %v3237_v16  ;;  %v3350_v24 = vadd.f32 %v20315_v26, %v3245_v44  ;;  %v16632_v16 = vld [vmem:[%s25046_s4 + $0x4c0] ss:$16 sps:$4 sm:$0xff]  }
 0x30a   :  { %5055 = vmatmul.mubr.bf16.vlgmr.msra.gmra.mxu0 %v20358_v6  ;;  %5128 = vmatmul.mubr.bf16.vlgmr.msra.gmra.mxu1 %v20360_v21  ;;  %v3409_v42 = vmax.f32 %v3345_v30, 0.0  ;;  %v3417_v45 = vmax.f32 %v3353_v13, 0.0  ;;  %v3344_v23 = vadd.f32 %v20319_v33, %v20253_v28  ;;  %v3352_v48 = vadd.f32 %v20319_v33, %v20257_v59  ;;  %v16635_v44 = vld [vmem:[%s25046_s4 + $0x6c0] ss:$16 sps:$4 sm:$0xff]   ;;  %v16640_v59 = vld [vmem:[%s25046_s4 + $0x4a4] ss:$16 sps:$4 sm:$0xff]  }
 0x30b   :  { %5169 = vmatpush1.bf16.msra.mxu0 %v16626_v32  ;;  %5242 = vmatpush1.bf16.msra.mxu1 %v16629_v54  ;;  %v20380_v20 = vpack.c.bf16 %v3415_v47, %v3407_v52  ;;  %v3406_v18 = vmax.f32 %v3342_v3, 0.0  ;;  %v3414_v41 = vmax.f32 %v3350_v24, 0.0  ;;  %v3359_v28 = vadd.f32 %v20307_v1, %v20260_v39  ;;  %v25429_v57 = vld [vmem:[#allocation13_spill] sm:$0xff] }
 0x30c   :  { %v20390_v10 = vpack.c.bf16 %v3417_v45, %v3409_v42  ;;  %5170 = vmatprep.subr.bf16.mxu0 %v16634_v62  ;;  %5243 = vmatprep.subr.bf16.mxu1 %v16637_v50  ;;  %v3408_v7 = vmax.f32 %v3344_v23, 0.0  ;;  %v3416_v49 = vmax.f32 %v3352_v48, 0.0  ;;  %v3367_v32 = vadd.f32 %v20307_v1, %v20263_v15  ;;  %v16646_v23 = vld [vmem:[%s25046_s4 + $0x484] ss:$16 sps:$4 sm:$0xff]  }
 0x30d   :  { %5064 = vmatprep.mubr.bf16.mxu0 %v20380_v20  ;;  %v3423_v39 = vmax.f32 %v3359_v28, 0.0  ;;  %v3361_v54 = vadd.f32 %v20311_v11, %v20266_v19  ;;  %v3369_v25 = vadd.f32 %v20311_v11, %v20269_v38  ;;  %v20407_v30 = vmul.f32 %v20203_v58, %v25429_v57  ;;  %v16638_v19 = vld [vmem:[%s25046_s4 + $0x4a0] ss:$16 sps:$4 sm:$0xff]  }
 0x30e   :  { %5137 = vmatprep.mubr.bf16.mxu1 %v20390_v10  ;;  %v20410_v13 = vpack.c.bf16 %v3414_v41, %v3406_v18  ;;  %v3431_v62 = vmax.f32 %v3367_v32, 0.0  ;;  %v3358_v15 = vadd.f32 %v20315_v26, %v20272_v29  ;;  %v3366_v50 = vadd.f32 %v20315_v26, %v20275_v40  ;;  %v16641_v38 = vld [vmem:[%s25046_s4 + $0x6a0] ss:$16 sps:$4 sm:$0xff]  }
 0x30f   :  { %5171 = vmatpush1.bf16.msra.mxu0 %v16632_v16  ;;  %5244 = vmatpush1.bf16.msra.mxu1 %v16635_v44  ;;  %v3425_v52 = vmax.f32 %v3361_v54, 0.0  ;;  %v3433_v47 = vmax.f32 %v3369_v25, 0.0  ;;  %v3360_v3 = vadd.f32 %v20319_v33, %v20279_v14  ;;  %v3368_v29 = vadd.f32 %v20319_v33, %v20285_v31  ;;  %v16649_v14 = vld [vmem:[%s25046_s4 + $0x684] ss:$16 sps:$4 sm:$0xff]   ;;  %v16644_v28 = vld [vmem:[%s25046_s4 + $0x480] ss:$16 sps:$4 sm:$0xff]  }
 0x310   :  { %5172 = vmatprep.subr.bf16.mxu0 %v16640_v59  ;;  %5245 = vmatprep.subr.bf16.mxu1 %v16643_v22  ;;  %v20426_v40 = vpack.c.bf16 %v3416_v49, %v3408_v7  ;;  %v20428_v24 = vpack.c.bf16 %v3431_v62, %v3423_v39  ;;  %v3375_v42 = vadd.f32 %v20307_v1, %v20288_v60  ;;  %v3422_v31 = vmax.f32 %v3358_v15, 0.0  ;;  %v25432_v39 = vld [vmem:[#allocation14_spill] sm:$0xff]  ;;  %v25433_v62 = vld [vmem:[#allocation51_spill] sm:$0xff] }
 0x311   :  { %v20432_v45 = vpack.c.bf16 %v3433_v47, %v3425_v52  ;;  %v3430_v48 = vmax.f32 %v3366_v50, 0.0  ;;  %v3383_v16 = vadd.f32 %v20307_v1, %v20291_v5  ;;  %v3424_v60 = vmax.f32 %v3360_v3, 0.0  ;;  %v16647_v5 = vld [vmem:[%s25046_s4 + $0x680] ss:$16 sps:$4 sm:$0xff]  }
 0x312   :  { %5065 = vmatmul.mubr.bf16.gmra.mxu0 %v20410_v13  ;;  %5138 = vmatmul.mubr.bf16.gmra.mxu1 %v20426_v40  ;;  %v3432_v44 = vmax.f32 %v3368_v29, 0.0  ;;  %v3377_v18 = vadd.f32 %v20311_v11, %v20294_v63  ;;  %v3385_v41 = vadd.f32 %v20311_v11, %v20297_v37  ;;  %v3439_v1 = vmax.f32 %v3375_v42, 0.0  ;;  %v25430_v63 = vld [vmem:[#allocation12_spill] sm:$0xff]  ;;  %v16652_v37 = vld [vmem:[%s25046_s4 + $0x464] ss:$16 sps:$4 sm:$0xff]  }
 0x313   :  { %5173 = vmatpush1.bf16.msra.mxu0 %v16638_v19  ;;  %5246 = vmatpush1.bf16.msra.mxu1 %v16641_v38  ;;  %v3447_v59 = vmax.f32 %v3383_v16, 0.0  ;;  %v20456_v22 = vadd.f32 %v20315_v26, %v20300_v56  ;;  %v3228_v7 = vmul.f32 %v20211_v53, %v25430_v63  ;;  %v16655_v11 = vld [vmem:[%s25046_s4 + $0x664] ss:$16 sps:$4 sm:$0xff]   ;;  %v20470_v49 = vadd.f32 %v20315_v26, %v20303_v55  ;;  %v25434_v50 = vld [vmem:[#allocation52_spill] sm:$0xff] }
 0x314   :  { %5074 = vmatprep.mubr.bf16.mxu0 %v20428_v24  ;;  %5147 = vmatprep.mubr.bf16.mxu1 %v20432_v45  ;;  %v25431_v56 = vsub.s32 5, %v25404_v12  ;;  %v3236_v54 = vmul.f32 %v20211_v53, %v25432_v39  ;;  %v3441_v25 = vmax.f32 %v3377_v18, 0.0  ;;  %v3449_v57 = vmax.f32 %v3385_v41, 0.0  ;;  %v25436_v47 = vld [vmem:[#allocation11_spill] sm:$0xff] }
 0x315   :  { %5174 = vmatprep.subr.bf16.mxu0 %v16646_v23  ;;  %5247 = vmatprep.subr.bf16.mxu1 %v16649_v14  ;;  %v3225_v15 = vmul.f32 %v20199_v43, %v25433_v62  ;;  %v3233_v19 = vmul.f32 %v20199_v43, %v25434_v50  ;;  %v20483_v55 = vpack.c.bf16 %v3430_v48, %v3422_v31  ;;  %v25435_v38 = vsub.s32 7, %v25404_v12  ;;  %v16650_v29 = vld [vmem:[%s25046_s4 + $0x460] ss:$16 sps:$4 sm:$0xff]   ;;  %v16664_v39 = vld [vmem:[%s25046_s4 + $0x424] ss:$16 sps:$4 sm:$0xff]  }
 0x316   :  { %v20475_v32 = vrot.slane %v20281_v36, %v25431_v56  ;;  %v20485_v26 = vpack.c.bf16 %v3432_v44, %v3424_v60  ;;  %v3227_v3 = vmul.f32 %v20207_v2, %v25436_v47  ;;  %v16653_v42 = vld [vmem:[%s25046_s4 + $0x660] ss:$16 sps:$4 sm:$0xff]   ;;  %v20500_v23 = vpack.c.bf16 %v3447_v59, %v3439_v1 }
 0x317   :  { %v20490_v52 = vrot.slane %v20281_v36, %v25435_v38  ;;  %5175 = vmatpush1.bf16.msra.mxu0 %v16644_v28  ;;  %5248 = vmatpush1.bf16.msra.mxu1 %v16647_v5  ;;  %v3438_v14 = vmax.f32 %v20456_v22, 0.0  ;;  %v3376_v31 = vadd.f32 %v20319_v33, %v20323_v51  ;;  %v3384_v48 = vadd.f32 %v20319_v33, %v20327_v9  ;;  %v16658_v51 = vld [vmem:[%s25046_s4 + $0x444] ss:$16 sps:$4 sm:$0xff]   ;;  %v25439_v47 = vld [vmem:[#allocation54_spill] sm:$0xff] }
 0x318   :  { %5176 = vmatprep.subr.bf16.mxu0 %v16652_v37  ;;  %5249 = vmatprep.subr.bf16.mxu1 %v16655_v11  ;;  %v3446_v16 = vmax.f32 %v20470_v49, 0.0  ;;  %v3331_v60 = vadd.f32 %v20475_v32, %v20331_v35  ;;  %v3330_v44 = vadd.f32 %v20336_v34, %v3225_v15  ;;  %v3338_v18 = vadd.f32 %v20336_v34, %v3233_v19  ;;  %v16661_v33 = vld [vmem:[%s25046_s4 + $0x644] ss:$16 sps:$4 sm:$0xff]  }
 0x319   :  { %v20512_v41 = vpack.c.bf16 %v3449_v57, %v3441_v25  ;;  %v3339_v9 = vadd.f32 %v20475_v32, %v20407_v30  ;;  %v25437_v28 = vld [vmem:[#allocation53_spill] sm:$0xff]  ;;  %v25438_v5 = vsub.s32 6, %v25404_v12  ;;  %v3333_v59 = vadd.f32 %v20490_v52, %v3228_v7 }
 0x31a   :  { %v3235_v35 = vmul.f32 %v20207_v2, %v25437_v28  ;;  %5075 = vmatmul.mubr.bf16.gmra.mxu0 %v20483_v55  ;;  %5148 = vmatmul.mubr.bf16.gmra.mxu1 %v20485_v26  ;;  %v3341_v22 = vadd.f32 %v20490_v52, %v3236_v54  ;;  %v3394_v63 = vmax.f32 %v3330_v44, 0.0  ;;  %v3402_v37 = vmax.f32 %v3338_v18, 0.0  ;;  %v16656_v30 = vld [vmem:[%s25046_s4 + $0x440] ss:$16 sps:$4 sm:$0xff]   ;;  %v16667_v54 = vld [vmem:[%s25046_s4 + $0x624] ss:$16 sps:$4 sm:$0xff]  }
 0x31b   :  { %v20527_v1 = vrot.slane %v20281_v36, %v25438_v5  ;;  %5177 = vmatpush1.bf16.msra.mxu0 %v16650_v29  ;;  %5250 = vmatpush1.bf16.msra.mxu1 %v16653_v42  ;;  %v16659_v36 = vld [vmem:[%s25046_s4 + $0x640] ss:$16 sps:$4 sm:$0xff]   ;;  %v3440_v11 = vmax.f32 %v3376_v31, 0.0  ;;  %v3448_v49 = vmax.f32 %v3384_v48, 0.0  ;;  %v3395_v57 = vmax.f32 %v3331_v60, 0.0 }
 0x31c   :  { %5084 = vmatprep.mubr.bf16.mxu0 %v20500_v23  ;;  %5157 = vmatprep.mubr.bf16.mxu1 %v20512_v41  ;;  %v20549_v25 = vpack.c.bf16 %v3402_v37, %v3394_v63  ;;  %v3403_v62 = vmax.f32 %v3339_v9, 0.0  ;;  %v3397_v19 = vmax.f32 %v3333_v59, 0.0  ;;  %v3405_v38 = vmax.f32 %v3341_v22, 0.0  ;;  %v16662_v42 = vld [vmem:[%s25046_s4 + $0x420] ss:$16 sps:$4 sm:$0xff]  }
 0x31d   :  { %v3332_v56 = vadd.f32 %v20527_v1, %v3227_v3  ;;  %v3340_v7 = vadd.f32 %v20527_v1, %v3235_v35  ;;  %5178 = vmatprep.subr.bf16.mxu0 %v16658_v51  ;;  %5251 = vmatprep.subr.bf16.mxu1 %v16661_v33  ;;  %v3241_v3 = vmul.f32 %v20199_v43, %v25439_v47  ;;  %v16665_v31 = vld [vmem:[%s25046_s4 + $0x620] ss:$16 sps:$4 sm:$0xff]   ;;  %v16685_v47 = vld [vmem:[%s25046_s4 + $0x7c4] ss:$16 sps:$4 sm:$0xff]  }
 0x31e   :  { %v3249_v29 = vmul.f32 %v20199_v43, %v19675_v27  ;;  %v20561_v48 = vpack.c.bf16 %v3446_v16, %v3438_v14  ;;  %v20563_v60 = vpack.c.bf16 %v3448_v49, %v3440_v11  ;;  %v3243_v51 = vmul.f32 %v20207_v2, %v19638_v8  ;;  %v16670_v14 = vld [vmem:[%s25046_s4 + $0x404] ss:$16 sps:$4 sm:$0xff]   ;;  %v16668_v22 = vld [vmem:[%s25046_s4 + $0x400] ss:$16 sps:$4 sm:$0xff]  }
 0x31f   :  { %v3396_v15 = vmax.f32 %v3332_v56, 0.0  ;;  %v3404_v50 = vmax.f32 %v3340_v7, 0.0  ;;  %5179 = vmatpush1.bf16.msra.mxu0 %v16656_v30  ;;  %5252 = vmatpush1.bf16.msra.mxu1 %v16659_v36  ;;  %v3346_v27 = vadd.f32 %v20336_v34, %v3241_v3  ;;  %v20571_v33 = vpack.c.bf16 %v3403_v62, %v3395_v57  ;;  %v16673_v16 = vld [vmem:[%s25046_s4 + $0x604] ss:$16 sps:$4 sm:$0xff]   ;;  %v16671_v63 = vld [vmem:[%s25046_s4 + $0x600] ss:$16 sps:$4 sm:$0xff]  }
 0x320   :  { %5180 = vmatprep.subr.bf16.mxu0 %v16664_v39  ;;  %5253 = vmatprep.subr.bf16.mxu1 %v16667_v54  ;;  %v3354_v18 = vadd.f32 %v20336_v34, %v3249_v29  ;;  %v25440_v9 = vld [vmem:[#allocation55_spill] sm:$0xff]  ;;  %v20583_v35 = vpack.c.bf16 %v3405_v38, %v3397_v19  ;;  %v3348_v59 = vadd.f32 %v20527_v1, %v3243_v51  ;;  %v25441_v7 = vld [vmem:[#allocation70_spill] sm:$0xff] }
 0x321   :  { %v20565_v44 = vpack.c.bf16 %v3404_v50, %v3396_v15  ;;  %v3251_v28 = vmul.f32 %v20207_v2, %v25440_v9  ;;  %v3410_v8 = vmax.f32 %v3346_v27, 0.0  ;;  %v16676_v30 = vld [vmem:[%s25046_s4 + $0x5e4] ss:$16 sps:$4 sm:$0xff]   ;;  %v3257_v39 = vmul.f32 %v20199_v43, %v25441_v7  ;;  %v25442_v57 = vld [vmem:[#allocation58_spill] sm:$0xff] }
 0x322   :  { %5085 = vmatmul.mubr.bf16.gmra.mxu0 %v20561_v48  ;;  %5158 = vmatmul.mubr.bf16.gmra.mxu1 %v20563_v60  ;;  %v3418_v5 = vmax.f32 %v3354_v18, 0.0  ;;  %v16679_v36 = vld [vmem:[%s25046_s4 + $0x7e4] ss:$16 sps:$4 sm:$0xff]   ;;  %v3412_v49 = vmax.f32 %v3348_v59, 0.0  ;;  %v3265_v54 = vmul.f32 %v20199_v43, %v19748_v46  ;;  %v3259_v62 = vmul.f32 %v20207_v2, %v25442_v57  ;;  %v16674_v15 = vld [vmem:[%s25046_s4 + $0x5e0] ss:$16 sps:$4 sm:$0xff]  }
 0x323   :  { %5181 = vmatpush1.bf16.msra.mxu0 %v16662_v42  ;;  %5254 = vmatpush1.bf16.msra.mxu1 %v16665_v31  ;;  %v3356_v37 = vadd.f32 %v20527_v1, %v3251_v28  ;;  %v16677_v50 = vld [vmem:[%s25046_s4 + $0x7e0] ss:$16 sps:$4 sm:$0xff]   ;;  %v3362_v38 = vadd.f32 %v20336_v34, %v3257_v39  ;;  %v16682_v46 = vld [vmem:[%s25046_s4 + $0x5c4] ss:$16 sps:$4 sm:$0xff]   ;;  %v3267_v29 = vmul.f32 %v20207_v2, %v19752_v17 }
 0x324   :  { %5200 = vmatprep.mubr.bf16.mxu0 %v20571_v33  ;;  %5273 = vmatprep.mubr.bf16.mxu1 %v20583_v35  ;;  %v20601_v11 = vpack.c.bf16 %v3418_v5, %v3410_v8  ;;  %v3370_v3 = vadd.f32 %v20336_v34, %v3265_v54  ;;  %v3364_v42 = vadd.f32 %v20527_v1, %v3259_v62  ;;  %v16688_v17 = vld [vmem:[%s25046_s4 + $0x5a4] ss:$16 sps:$4 sm:$0xff]  }
 0x325   :  { %5182 = vmatprep.subr.bf16.mxu0 %v16670_v14  ;;  %5255 = vmatprep.subr.bf16.mxu1 %v16673_v16  ;;  %v3420_v56 = vmax.f32 %v3356_v37, 0.0  ;;  %v3426_v31 = vmax.f32 %v3362_v38, 0.0  ;;  %v3372_v18 = vadd.f32 %v20527_v1, %v3267_v29  ;;  %v16680_v14 = vld [vmem:[%s25046_s4 + $0x5c0] ss:$16 sps:$4 sm:$0xff]   ;;  %v16691_v9 = vld [vmem:[%s25046_s4 + $0x7a4] ss:$16 sps:$4 sm:$0xff]   ;;  %v3273_v5 = vmul.f32 %v20199_v43, %v19794_v0 }
 0x326   :  { %v3434_v27 = vmax.f32 %v3370_v3, 0.0  ;;  %v3428_v51 = vmax.f32 %v3364_v42, 0.0  ;;  %v16683_v16 = vld [vmem:[%s25046_s4 + $0x7c0] ss:$16 sps:$4 sm:$0xff]   ;;  %v16694_v39 = vld [vmem:[%s25046_s4 + $0x584] ss:$16 sps:$4 sm:$0xff]  }
 0x327   :  { %5183 = vmatpush1.bf16.msra.mxu0 %v16668_v22  ;;  %5256 = vmatpush1.bf16.msra.mxu1 %v16671_v63  ;;  %v20615_v19 = vpack.c.bf16 %v3420_v56, %v3412_v49  ;;  %v3436_v8 = vmax.f32 %v3372_v18, 0.0  ;;  %v25443_v59 = vld [vmem:[#allocation61_spill] sm:$0xff]  ;;  %v3378_v0 = vadd.f32 %v20336_v34, %v3273_v5 }
 0x328   :  { %5184 = vmatprep.subr.bf16.mxu0 %v16676_v30  ;;  %5257 = vmatprep.subr.bf16.mxu1 %v16679_v36  ;;  %v20641_v28 = vpack.c.bf16 %v3434_v27, %v3426_v31  ;;  %v3281_v22 = vmul.f32 %v20199_v43, %v25443_v59  ;;  %v25444_v37 = vld [vmem:[#allocation17_spill] sm:$0xff]  ;;  %v25445_v43 = vld [vmem:[#allocation62_spill] sm:$0xff] }
 0x329   :  { %v20647_v63 = vpack.c.bf16 %v3436_v8, %v3428_v51  ;;  %v3275_v30 = vmul.f32 %v20207_v2, %v25444_v37  ;;  %v16686_v36 = vld [vmem:[%s25046_s4 + $0x5a0] ss:$16 sps:$4 sm:$0xff]   ;;  %v3283_v7 = vmul.f32 %v20207_v2, %v25445_v43  ;;  %v16697_v54 = vld [vmem:[%s25046_s4 + $0x784] ss:$16 sps:$4 sm:$0xff]   ;;  %v3442_v62 = vmax.f32 %v3378_v0, 0.0 }
 0x32a   :  { %v16689_v49 = vld [vmem:[%s25046_s4 + $0x7a0] ss:$16 sps:$4 sm:$0xff]   ;;  %v3386_v56 = vadd.f32 %v20336_v34, %v3281_v22  ;;  %v16703_v3 = vld [vmem:[%s25046_s4 + $0x764] ss:$16 sps:$4 sm:$0xff]  }
 0x32b   :  { %5185 = vmatpush2.bf16.msra.mxu0 %v16674_v15  ;;  %5258 = vmatpush2.bf16.msra.mxu1 %v16677_v50  ;;  %v3380_v57 = vadd.f32 %v20527_v1, %v3275_v30  ;;  %v3388_v50 = vadd.f32 %v20527_v1, %v3283_v7  ;;  %v16692_v2 = vld [vmem:[%s25046_s4 + $0x580] ss:$16 sps:$4 sm:$0xff]   ;;  %v16700_v1 = vld [vmem:[%s25046_s4 + $0x564] ss:$16 sps:$4 sm:$0xff]  }
 0x32c   :  { %5186 = vmatprep.subr.bf16.mxu0 %v16682_v46  ;;  %5259 = vmatprep.subr.bf16.mxu1 %v16685_v47  ;;  %v3450_v15 = vmax.f32 %v3386_v56, 0.0  ;;  %v16695_v38 = vld [vmem:[%s25046_s4 + $0x780] ss:$16 sps:$4 sm:$0xff]   ;;  %v16706_v27 = vld [vmem:[%s25046_s4 + $0x544] ss:$16 sps:$4 sm:$0xff]  }
 0x32d   :  { %v3444_v34 = vmax.f32 %v3380_v57, 0.0  ;;  %v3452_v47 = vmax.f32 %v3388_v50, 0.0  ;;  %v16698_v42 = vld [vmem:[%s25046_s4 + $0x560] ss:$16 sps:$4 sm:$0xff]   ;;  %v16709_v18 = vld [vmem:[%s25046_s4 + $0x744] ss:$16 sps:$4 sm:$0xff]  }
 0x32e   :  { %v20675_v46 = vpack.c.bf16 %v3450_v15, %v3442_v62  ;;  %v16701_v31 = vld [vmem:[%s25046_s4 + $0x760] ss:$16 sps:$4 sm:$0xff]   ;;  %v16718_v56 = vld [vmem:[%s25046_s4 + $0x504] ss:$16 sps:$4 sm:$0xff]   ;;  %v16724_v50 = vld [vmem:[%s25046_s4 + $0xec] ss:$16 sps:$4 sm:$0xff]  }
 0x32f   :  { %5187 = vmatpush2.bf16.msra.mxu0 %v16680_v14  ;;  %5260 = vmatpush2.bf16.msra.mxu1 %v16683_v16  ;;  %v20683_v29 = vpack.c.bf16 %v3452_v47, %v3444_v34  ;;  %v16704_v51 = vld [vmem:[%s25046_s4 + $0x540] ss:$16 sps:$4 sm:$0xff]   ;;  %v16712_v16 = vld [vmem:[%s25046_s4 + $0x524] ss:$16 sps:$4 sm:$0xff]   ;;  %v16727_v34 = vld [vmem:[%s25046_s4 + $0x2ec] ss:$16 sps:$4 sm:$0xff]  }
 0x330   :  { %5188 = vmatprep.subr.bf16.mxu0 %v16688_v17  ;;  %5261 = vmatprep.subr.bf16.mxu1 %v16691_v9  ;;  %v16707_v14 = vld [vmem:[%s25046_s4 + $0x740] ss:$16 sps:$4 sm:$0xff]   ;;  %v16715_v17 = vld [vmem:[%s25046_s4 + $0x724] ss:$16 sps:$4 sm:$0xff]  }
 0x331   :  { %v25446_v9 = vld [vmem:[#allocation15_spill] sm:$0xff]  ;;  %v25447_v22 = vld [vmem:[#allocation56_spill] sm:$0xff] }
 0x332   :  { %v3242_v8 = vmul.f32 %v20203_v58, %v25446_v9  ;;  %v16710_v5 = vld [vmem:[%s25046_s4 + $0x520] ss:$16 sps:$4 sm:$0xff]   ;;  %v3250_v37 = vmul.f32 %v20203_v58, %v25447_v22  ;;  %v16721_v43 = vld [vmem:[%s25046_s4 + $0x704] ss:$16 sps:$4 sm:$0xff]   ;;  %v16722_v9 = vld [vmem:[%s25046_s4 + $0xe8] ss:$16 sps:$4 sm:$0xff]  }
 0x333   :  { %5189 = vmatpush2.bf16.msra.mxu0 %v16686_v36  ;;  %5262 = vmatpush2.bf16.msra.mxu1 %v16689_v49  ;;  %v16713_v59 = vld [vmem:[%s25046_s4 + $0x720] ss:$16 sps:$4 sm:$0xff]  }
 0x334   :  { %5190 = vmatprep.subr.bf16.mxu0 %v16694_v39  ;;  %5263 = vmatprep.subr.bf16.mxu1 %v16697_v54  ;;  %v25448_v30 = vld [vmem:[#allocation16_spill] sm:$0xff]  ;;  %v25449_v49 = vld [vmem:[#allocation57_spill] sm:$0xff]  ;;  %v3347_v7 = vadd.f32 %v20475_v32, %v3242_v8  ;;  %v3355_v39 = vadd.f32 %v20475_v32, %v3250_v37 }
 0x335   :  { %v3244_v36 = vmul.f32 %v20211_v53, %v25448_v30  ;;  %v3252_v0 = vmul.f32 %v20211_v53, %v25449_v49  ;;  %v16716_v62 = vld [vmem:[%s25046_s4 + $0x500] ss:$16 sps:$4 sm:$0xff]   ;;  %v16725_v8 = vld [vmem:[%s25046_s4 + $0x2e8] ss:$16 sps:$4 sm:$0xff]   ;;  %v16733_v49 = vld [vmem:[%s25046_s4 + $0x2cc] ss:$16 sps:$4 sm:$0xff]  }
 0x336   :  { %v16719_v15 = vld [vmem:[%s25046_s4 + $0x700] ss:$16 sps:$4 sm:$0xff]  }
 0x337   :  { %5191 = vmatpush2.bf16.msra.mxu0 %v16692_v2  ;;  %5264 = vmatpush2.bf16.msra.mxu1 %v16695_v38  ;;  %v3349_v54 = vadd.f32 %v20490_v52, %v3244_v36  ;;  %v3357_v57 = vadd.f32 %v20490_v52, %v3252_v0  ;;  %v3411_v2 = vmax.f32 %v3347_v7, 0.0  ;;  %v3419_v38 = vmax.f32 %v3355_v39, 0.0  ;;  %v16730_v36 = vld [vmem:[%s25046_s4 + $0xcc] ss:$16 sps:$4 sm:$0xff]   ;;  %v16728_v0 = vld [vmem:[%s25046_s4 + $0xc8] ss:$16 sps:$4 sm:$0xff]  }
 0x338   :  { %5192 = vmatprep.subr.bf16.mxu0 %v16700_v1  ;;  %5265 = vmatprep.subr.bf16.mxu1 %v16703_v3  ;;  %v25450_v3 = vld [vmem:[#allocation72_spill] sm:$0xff] }
 0x339   :  { %v3413_v47 = vmax.f32 %v3349_v54, 0.0  ;;  %v3421_v1 = vmax.f32 %v3357_v57, 0.0  ;;  %v20763_v37 = vpack.c.bf16 %v3419_v38, %v3411_v2  ;;  %v16736_v57 = vld [vmem:[%s25046_s4 + $0xac] ss:$16 sps:$4 sm:$0xff]  }
 0x33a   :  { %v25456_v38 = vld [vmem:[#allocation18_spill] sm:$0xff] }
 0x33b   :  { %5193 = vmatpush2.bf16.msra.mxu0 %v16698_v42  ;;  %5266 = vmatpush2.bf16.msra.mxu1 %v16701_v31  ;;  %v3258_v42 = vmul.f32 %v20203_v58, %v25450_v3  ;;  %v25451_v31 = vld [vmem:[#allocation60_spill] sm:$0xff]  ;;  %v20765_v30 = vpack.c.bf16 %v3421_v1, %v3413_v47  ;;  %v3276_v47 = vmul.f32 %v20211_v53, %v25456_v38  ;;  %v25457_v1 = vld [vmem:[#allocation19_spill] sm:$0xff] }
 0x33c   :  { %5194 = vmatprep.subr.bf16.mxu0 %v16706_v27  ;;  %5267 = vmatprep.subr.bf16.mxu1 %v16709_v18  ;;  %v3266_v27 = vmul.f32 %v20203_v58, %v25451_v31  ;;  %v25452_v18 = vld [vmem:[#allocation59_spill] sm:$0xff]  ;;  %v3284_v3 = vmul.f32 %v20211_v53, %v25457_v1  ;;  %v16769_v38 = vld [vmem:[%s25046_s4 + $0x20c] ss:$16 sps:$4 sm:$0xff]  }
 0x33d   :  { %v16737_v31 = vld [vmem:[%s25046_s4 + $0x2a8] ss:$16 sps:$4 sm:$0xff]  }
 0x33e   :  { %v16767_v1 = vld [vmem:[%s25046_s4 + $0x208] ss:$16 sps:$4 sm:$0xff]  }
 0x33f   :  { %5195 = vmatpush2.bf16.msra.mxu0 %v16704_v51  ;;  %5268 = vmatpush2.bf16.msra.mxu1 %v16707_v14  ;;  %v3260_v51 = vmul.f32 %v20211_v53, %v25452_v18  ;;  %v25453_v14 = vld [vmem:[#allocation82_spill] sm:$0xff] }
 0x340   :  { %5196 = vmatprep.subr.bf16.mxu0 %v16712_v16  ;;  %5269 = vmatprep.subr.bf16.mxu1 %v16715_v17  ;;  %v3268_v16 = vmul.f32 %v20211_v53, %v25453_v14  ;;  %v3363_v17 = vadd.f32 %v20475_v32, %v3258_v42  ;;  %v16734_v42 = vld [vmem:[%s25046_s4 + $0xa8] ss:$16 sps:$4 sm:$0xff]   ;;  %v16742_v53 = vld [vmem:[%s25046_s4 + $0x8c] ss:$16 sps:$4 sm:$0xff]  }
 0x342   :  { %v3373_v22 = vadd.f32 %v20490_v52, %v3268_v16  ;;  %v3381_v16 = vadd.f32 %v20490_v52, %v3276_v47  ;;  %v16764_v47 = vld [vmem:[%s25046_s4 + $0x8] ss:$16 sps:$4 sm:$0xff]  }
 0x343   :  { %5197 = vmatpush2.bf16.msra.mxu0 %v16710_v5  ;;  %5270 = vmatpush2.bf16.msra.mxu1 %v16713_v59  ;;  %v3371_v5 = vadd.f32 %v20475_v32, %v3266_v27  ;;  %v3365_v59 = vadd.f32 %v20490_v52, %v3260_v51  ;;  %v16745_v51 = vld [vmem:[%s25046_s4 + $0x28c] ss:$16 sps:$4 sm:$0xff]  }
 0x344   :  { %5198 = vmatprep.subr.bf16.mxu0 %v16718_v56  ;;  %5271 = vmatprep.subr.bf16.mxu1 %v16721_v43  ;;  %v16731_v56 = vld [vmem:[%s25046_s4 + $0x2c8] ss:$16 sps:$4 sm:$0xff]   ;;  %v3427_v43 = vmax.f32 %v3363_v17, 0.0  ;;  %v3437_v54 = vmax.f32 %v3373_v22, 0.0  ;;  %v3389_v17 = vadd.f32 %v20490_v52, %v3284_v3  ;;  %v16748_v52 = vld [vmem:[%s25046_s4 + $0x6c] ss:$16 sps:$4 sm:$0xff]  }
 0x345   :  { %v3435_v7 = vmax.f32 %v3371_v5, 0.0  ;;  %v3429_v39 = vmax.f32 %v3365_v59, 0.0  ;;  %v3445_v22 = vmax.f32 %v3381_v16, 0.0  ;;  %v16772_v3 = vld [vmem:[%s25046_s4 + $0x1ec] ss:$16 sps:$4 sm:$0xff]  }
 0x346   :  { %v16779_v16 = vld [vmem:[%s25046_s4 + $0x3c8] ss:$16 sps:$4 sm:$0xff]  }
 0x347   :  { %5199 = vmatpush2.bf16.msra.mxu0 %v16716_v62  ;;  %5272 = vmatpush2.bf16.msra.mxu1 %v16719_v15  ;;  %v16739_v62 = vld [vmem:[%s25046_s4 + $0x2ac] ss:$16 sps:$4 sm:$0xff]   ;;  %v25454_v15 = vld [vmem:[#allocation83_spill] sm:$0xff]  ;;  %v20803_v27 = vpack.c.bf16 %v3435_v7, %v3427_v43  ;;  %v20805_v18 = vpack.c.bf16 %v3437_v54, %v3429_v39 }
 0x348   :  { %5314 = vmatprep.subr.bf16.mxu0 %v16724_v50  ;;  %5387 = vmatprep.subr.bf16.mxu1 %v16727_v34  ;;  %v3274_v50 = vmul.f32 %v20203_v58, %v25454_v15  ;;  %v25455_v34 = vld [vmem:[#allocation40_spill] sm:$0xff] }
 0x349   :  { %v3282_v2 = vmul.f32 %v20203_v58, %v25455_v34  ;;  %v16754_v7 = vld [vmem:[%s25046_s4 + $0x4c] ss:$16 sps:$4 sm:$0xff]   ;;  %v16752_v54 = vld [vmem:[%s25046_s4 + $0x48] ss:$16 sps:$4 sm:$0xff]  }
 0x34a   :  { %5201 = vmatmul.mubr.bf16.vlgmr.msra.gmra.mxu0 %v20549_v25  ;;  %5274 = vmatmul.mubr.bf16.vlgmr.msra.gmra.mxu1 %v20565_v44  ;;  %v3379_v58 = vadd.f32 %v20475_v32, %v3274_v50  ;;  %v16757_v39 = vld [vmem:[%s25046_s4 + $0x24c] ss:$16 sps:$4 sm:$0xff]   ;;  %v16758_v50 = vld [vmem:[%s25046_s4 + $0x28] ss:$16 sps:$4 sm:$0xff]  }
 0x34b   :  { %5210 = vmatprep.mubr.bf16.mxu0 %v20763_v37  ;;  %5283 = vmatprep.mubr.bf16.mxu1 %v20765_v30  ;;  %v3387_v14 = vadd.f32 %v20475_v32, %v3282_v2  ;;  %v16743_v32 = vld [vmem:[%s25046_s4 + $0x288] ss:$16 sps:$4 sm:$0xff]   ;;  %v16763_v15 = vld [vmem:[%s25046_s4 + $0x22c] ss:$16 sps:$4 sm:$0xff]  }
 0x34c   :  { %5315 = vmatpush1.bf16.msra.mxu0 %v16722_v9  ;;  %5388 = vmatpush1.bf16.msra.mxu1 %v16725_v8  ;;  %v16740_v9 = vld [vmem:[%s25046_s4 + $0x88] ss:$16 sps:$4 sm:$0xff]   ;;  %v16751_v8 = vld [vmem:[%s25046_s4 + $0x26c] ss:$16 sps:$4 sm:$0xff]   ;;  %v3443_v5 = vmax.f32 %v3379_v58, 0.0 }
 0x34d   :  { %5316 = vmatprep.subr.bf16.mxu0 %v16730_v36  ;;  %5389 = vmatprep.subr.bf16.mxu1 %v16733_v49  ;;  %v3451_v59 = vmax.f32 %v3387_v14, 0.0  ;;  %v3453_v36 = vmax.f32 %v3389_v17, 0.0  ;;  %v16746_v49 = vld [vmem:[%s25046_s4 + $0x68] ss:$16 sps:$4 sm:$0xff]   ;;  %v16766_v2 = vld [vmem:[%s25046_s4 + $0xc] ss:$16 sps:$4 sm:$0xff]  }
 0x34e   :  { %v16761_v34 = vld [vmem:[%s25046_s4 + $0x228] ss:$16 sps:$4 sm:$0xff]   ;;  %v16784_v17 = vld [vmem:[%s25046_s4 + $0x1ac] ss:$16 sps:$4 sm:$0xff]  }
 0x34f   :  { %v20841_v43 = vpack.c.bf16 %v3453_v36, %v3445_v22  ;;  %v16773_v58 = vld [vmem:[%s25046_s4 + $0x3e8] ss:$16 sps:$4 sm:$0xff]   ;;  %v16796_v36 = vld [vmem:[%s25046_s4 + $0x16c] ss:$16 sps:$4 sm:$0xff]  }
 0x350   :  { %5317 = vmatpush1.bf16.msra.mxu0 %v16728_v0  ;;  %5390 = vmatpush1.bf16.msra.mxu1 %v16731_v56  ;;  %v16749_v0 = vld [vmem:[%s25046_s4 + $0x268] ss:$16 sps:$4 sm:$0xff]   ;;  %v20839_v56 = vpack.c.bf16 %v3451_v59, %v3443_v5  ;;  %v16793_v5 = vld [vmem:[%s25046_s4 + $0x38c] ss:$16 sps:$4 sm:$0xff]  }
 0x351   :  { %5318 = vmatprep.subr.bf16.mxu0 %v16736_v57  ;;  %5391 = vmatprep.subr.bf16.mxu1 %v16739_v62  ;;  %v16755_v57 = vld [vmem:[%s25046_s4 + $0x248] ss:$16 sps:$4 sm:$0xff]   ;;  %v16760_v62 = vld [vmem:[%s25046_s4 + $0x2c] ss:$16 sps:$4 sm:$0xff]  }
 0x352   :  { %5211 = vmatmul.mubr.bf16.gmra.mxu0 %v20601_v11  ;;  %5284 = vmatmul.mubr.bf16.gmra.mxu1 %v20615_v19  ;;  %v16776_v14 = vld [vmem:[%s25046_s4 + $0x1c8] ss:$16 sps:$4 sm:$0xff]  }
 0x353   :  { %5220 = vmatprep.mubr.bf16.mxu0 %v20803_v27  ;;  %5293 = vmatprep.mubr.bf16.mxu1 %v20805_v18  ;;  %v16788_v59 = vld [vmem:[%s25046_s4 + $0x188] ss:$16 sps:$4 sm:$0xff]  }
 0x354   :  { %5319 = vmatpush1.bf16.msra.mxu0 %v16734_v42  ;;  %5392 = vmatpush1.bf16.msra.mxu1 %v16737_v31  ;;  %v16775_v42 = vld [vmem:[%s25046_s4 + $0x3ec] ss:$16 sps:$4 sm:$0xff]   ;;  %v16770_v31 = vld [vmem:[%s25046_s4 + $0x1e8] ss:$16 sps:$4 sm:$0xff]  }
 0x355   :  { %5320 = vmatprep.subr.bf16.mxu0 %v16742_v53  ;;  %5393 = vmatprep.subr.bf16.mxu1 %v16745_v51  ;;  %v16778_v53 = vld [vmem:[%s25046_s4 + $0x1cc] ss:$16 sps:$4 sm:$0xff]   ;;  %v16791_v22 = vld [vmem:[%s25046_s4 + $0x388] ss:$16 sps:$4 sm:$0xff]  }
 0x356   :  { %v16781_v51 = vld [vmem:[%s25046_s4 + $0x3cc] ss:$16 sps:$4 sm:$0xff]  }
 0x358   :  { %5321 = vmatpush1.bf16.msra.mxu0 %v16740_v9  ;;  %5394 = vmatpush1.bf16.msra.mxu1 %v16743_v32  ;;  %v16787_v9 = vld [vmem:[%s25046_s4 + $0x3ac] ss:$16 sps:$4 sm:$0xff]   ;;  %v16782_v32 = vld [vmem:[%s25046_s4 + $0x1a8] ss:$16 sps:$4 sm:$0xff]  }
 0x359   :  { %5322 = vmatprep.subr.bf16.mxu0 %v16748_v52  ;;  %5395 = vmatprep.subr.bf16.mxu1 %v16751_v8  ;;  %v16785_v52 = vld [vmem:[%s25046_s4 + $0x3a8] ss:$16 sps:$4 sm:$0xff]   ;;  %v16790_v8 = vld [vmem:[%s25046_s4 + $0x18c] ss:$16 sps:$4 sm:$0xff]  }
 0x35a   :  { %5221 = vmatmul.mubr.bf16.gmra.mxu0 %v20641_v28  ;;  %5294 = vmatmul.mubr.bf16.gmra.mxu1 %v20647_v63 }
 0x35b   :  { %5230 = vmatprep.mubr.bf16.mxu0 %v20839_v56  ;;  %5303 = vmatprep.mubr.bf16.mxu1 %v20841_v43 }
 0x35c   :  { %5323 = vmatpush1.bf16.msra.mxu0 %v16746_v49  ;;  %5396 = vmatpush1.bf16.msra.mxu1 %v16749_v0  ;;  %v16799_v49 = vld [vmem:[%s25046_s4 + $0x36c] ss:$16 sps:$4 sm:$0xff]   ;;  %v16794_v0 = vld [vmem:[%s25046_s4 + $0x168] ss:$16 sps:$4 sm:$0xff]  }
 0x35d   :  { %5324 = vmatprep.subr.bf16.mxu0 %v16754_v7  ;;  %5397 = vmatprep.subr.bf16.mxu1 %v16757_v39  ;;  %v16797_v7 = vld [vmem:[%s25046_s4 + $0x368] ss:$16 sps:$4 sm:$0xff]   ;;  %v16802_v39 = vld [vmem:[%s25046_s4 + $0x14c] ss:$16 sps:$4 sm:$0xff]  }
 0x360   :  { %5325 = vmatpush1.bf16.msra.mxu0 %v16752_v54  ;;  %5398 = vmatpush1.bf16.msra.mxu1 %v16755_v57  ;;  %v16805_v54 = vld [vmem:[%s25046_s4 + $0x34c] ss:$16 sps:$4 sm:$0xff]   ;;  %v16800_v57 = vld [vmem:[%s25046_s4 + $0x148] ss:$16 sps:$4 sm:$0xff]  }
 0x361   :  { %5326 = vmatprep.subr.bf16.mxu0 %v16760_v62  ;;  %5399 = vmatprep.subr.bf16.mxu1 %v16763_v15  ;;  %v16803_v62 = vld [vmem:[%s25046_s4 + $0x348] ss:$16 sps:$4 sm:$0xff]   ;;  %v16808_v15 = vld [vmem:[%s25046_s4 + $0x12c] ss:$16 sps:$4 sm:$0xff]  }
 0x362   :  { %5231 = vmatmul.mubr.bf16.gmra.mxu0 %v20675_v46  ;;  %5304 = vmatmul.mubr.bf16.gmra.mxu1 %v20683_v29 }
 0x363   :  { %5346 = vmatprep.mubr.bf16.mxu0 %v20346_v61  ;;  %5419 = vmatprep.mubr.bf16.mxu1 %v20348_v4 }
 0x364   :  { %5327 = vmatpush1.bf16.msra.mxu0 %v16758_v50  ;;  %5400 = vmatpush1.bf16.msra.mxu1 %v16761_v34  ;;  %v16811_v50 = vld [vmem:[%s25046_s4 + $0x32c] ss:$16 sps:$4 sm:$0xff]   ;;  %v16806_v34 = vld [vmem:[%s25046_s4 + $0x128] ss:$16 sps:$4 sm:$0xff]  }
 0x365   :  { %5328 = vmatprep.subr.bf16.mxu0 %v16766_v2  ;;  %5401 = vmatprep.subr.bf16.mxu1 %v16769_v38  ;;  %v16809_v2 = vld [vmem:[%s25046_s4 + $0x328] ss:$16 sps:$4 sm:$0xff]   ;;  %v16814_v38 = vld [vmem:[%s25046_s4 + $0x10c] ss:$16 sps:$4 sm:$0xff]  }
 0x368   :  { %5329 = vmatpush1.bf16.msra.mxu0 %v16764_v47  ;;  %5402 = vmatpush1.bf16.msra.mxu1 %v16767_v1  ;;  %v16817_v47 = vld [vmem:[%s25046_s4 + $0x30c] ss:$16 sps:$4 sm:$0xff]   ;;  %v16812_v1 = vld [vmem:[%s25046_s4 + $0x108] ss:$16 sps:$4 sm:$0xff]  }
 0x369   :  { %5330 = vmatprep.subr.bf16.mxu0 %v16772_v3  ;;  %5403 = vmatprep.subr.bf16.mxu1 %v16775_v42  ;;  %v16815_v3 = vld [vmem:[%s25046_s4 + $0x308] ss:$16 sps:$4 sm:$0xff]   ;;  %v16820_v42 = vld [vmem:[%s25046_s4 + $0x4ec] ss:$16 sps:$4 sm:$0xff]  }
 0x36c   :  { %5331 = vmatpush2.bf16.msra.mxu0 %v16770_v31  ;;  %5404 = vmatpush2.bf16.msra.mxu1 %v16773_v58  ;;  %v16823_v31 = vld [vmem:[%s25046_s4 + $0x6ec] ss:$16 sps:$4 sm:$0xff]   ;;  %v16818_v58 = vld [vmem:[%s25046_s4 + $0x4e8] ss:$16 sps:$4 sm:$0xff]  }
 0x36d   :  { %5332 = vmatprep.subr.bf16.mxu0 %v16778_v53  ;;  %5405 = vmatprep.subr.bf16.mxu1 %v16781_v51  ;;  %v16821_v53 = vld [vmem:[%s25046_s4 + $0x6e8] ss:$16 sps:$4 sm:$0xff]   ;;  %v16826_v51 = vld [vmem:[%s25046_s4 + $0x4cc] ss:$16 sps:$4 sm:$0xff]  }
 0x370   :  { %5333 = vmatpush2.bf16.msra.mxu0 %v16776_v14  ;;  %5406 = vmatpush2.bf16.msra.mxu1 %v16779_v16  ;;  %v16829_v14 = vld [vmem:[%s25046_s4 + $0x6cc] ss:$16 sps:$4 sm:$0xff]   ;;  %v16824_v16 = vld [vmem:[%s25046_s4 + $0x4c8] ss:$16 sps:$4 sm:$0xff]  }
 0x371   :  { %5334 = vmatprep.subr.bf16.mxu0 %v16784_v17  ;;  %5407 = vmatprep.subr.bf16.mxu1 %v16787_v9  ;;  %v16827_v17 = vld [vmem:[%s25046_s4 + $0x6c8] ss:$16 sps:$4 sm:$0xff]   ;;  %v16832_v9 = vld [vmem:[%s25046_s4 + $0x4ac] ss:$16 sps:$4 sm:$0xff]  }
 0x374   :  { %5335 = vmatpush2.bf16.msra.mxu0 %v16782_v32  ;;  %5408 = vmatpush2.bf16.msra.mxu1 %v16785_v52  ;;  %v16835_v32 = vld [vmem:[%s25046_s4 + $0x6ac] ss:$16 sps:$4 sm:$0xff]   ;;  %v16830_v52 = vld [vmem:[%s25046_s4 + $0x4a8] ss:$16 sps:$4 sm:$0xff]  }
 0x375   :  { %5336 = vmatprep.subr.bf16.mxu0 %v16790_v8  ;;  %5409 = vmatprep.subr.bf16.mxu1 %v16793_v5  ;;  %v16833_v8 = vld [vmem:[%s25046_s4 + $0x6a8] ss:$16 sps:$4 sm:$0xff]   ;;  %v16838_v5 = vld [vmem:[%s25046_s4 + $0x48c] ss:$16 sps:$4 sm:$0xff]  }
 0x378   :  { %5337 = vmatpush2.bf16.msra.mxu0 %v16788_v59  ;;  %5410 = vmatpush2.bf16.msra.mxu1 %v16791_v22  ;;  %v16841_v59 = vld [vmem:[%s25046_s4 + $0x68c] ss:$16 sps:$4 sm:$0xff]   ;;  %v16836_v22 = vld [vmem:[%s25046_s4 + $0x488] ss:$16 sps:$4 sm:$0xff]  }
 0x379   :  { %5338 = vmatprep.subr.bf16.mxu0 %v16796_v36  ;;  %5411 = vmatprep.subr.bf16.mxu1 %v16799_v49  ;;  %v16839_v36 = vld [vmem:[%s25046_s4 + $0x688] ss:$16 sps:$4 sm:$0xff]   ;;  %v16844_v49 = vld [vmem:[%s25046_s4 + $0x46c] ss:$16 sps:$4 sm:$0xff]  }
 0x37c   :  { %5339 = vmatpush2.bf16.msra.mxu0 %v16794_v0  ;;  %5412 = vmatpush2.bf16.msra.mxu1 %v16797_v7  ;;  %v16847_v0 = vld [vmem:[%s25046_s4 + $0x66c] ss:$16 sps:$4 sm:$0xff]   ;;  %v16842_v7 = vld [vmem:[%s25046_s4 + $0x468] ss:$16 sps:$4 sm:$0xff]  }
 0x37d   :  { %5340 = vmatprep.subr.bf16.mxu0 %v16802_v39  ;;  %5413 = vmatprep.subr.bf16.mxu1 %v16805_v54  ;;  %v16845_v39 = vld [vmem:[%s25046_s4 + $0x668] ss:$16 sps:$4 sm:$0xff]   ;;  %v16850_v54 = vld [vmem:[%s25046_s4 + $0x44c] ss:$16 sps:$4 sm:$0xff]  }
 0x380   :  { %5341 = vmatpush2.bf16.msra.mxu0 %v16800_v57  ;;  %5414 = vmatpush2.bf16.msra.mxu1 %v16803_v62  ;;  %v16853_v57 = vld [vmem:[%s25046_s4 + $0x64c] ss:$16 sps:$4 sm:$0xff]   ;;  %v16848_v62 = vld [vmem:[%s25046_s4 + $0x448] ss:$16 sps:$4 sm:$0xff]  }
 0x381   :  { %5342 = vmatprep.subr.bf16.mxu0 %v16808_v15  ;;  %5415 = vmatprep.subr.bf16.mxu1 %v16811_v50  ;;  %v16851_v15 = vld [vmem:[%s25046_s4 + $0x648] ss:$16 sps:$4 sm:$0xff]   ;;  %v16856_v50 = vld [vmem:[%s25046_s4 + $0x42c] ss:$16 sps:$4 sm:$0xff]  }
 0x384   :  { %5343 = vmatpush2.bf16.msra.mxu0 %v16806_v34  ;;  %5416 = vmatpush2.bf16.msra.mxu1 %v16809_v2  ;;  %v16859_v34 = vld [vmem:[%s25046_s4 + $0x62c] ss:$16 sps:$4 sm:$0xff]   ;;  %v16854_v2 = vld [vmem:[%s25046_s4 + $0x428] ss:$16 sps:$4 sm:$0xff]  }
 0x385   :  { %5344 = vmatprep.subr.bf16.mxu0 %v16814_v38  ;;  %5417 = vmatprep.subr.bf16.mxu1 %v16817_v47  ;;  %v16857_v38 = vld [vmem:[%s25046_s4 + $0x628] ss:$16 sps:$4 sm:$0xff]   ;;  %v16862_v47 = vld [vmem:[%s25046_s4 + $0x40c] ss:$16 sps:$4 sm:$0xff]  }
 0x388   :  { %5345 = vmatpush2.bf16.msra.mxu0 %v16812_v1  ;;  %5418 = vmatpush2.bf16.msra.mxu1 %v16815_v3  ;;  %v16865_v1 = vld [vmem:[%s25046_s4 + $0x60c] ss:$16 sps:$4 sm:$0xff]   ;;  %v16860_v3 = vld [vmem:[%s25046_s4 + $0x408] ss:$16 sps:$4 sm:$0xff]  }
 0x389   :  { %5460 = vmatprep.subr.bf16.mxu0 %v16820_v42  ;;  %5533 = vmatprep.subr.bf16.mxu1 %v16823_v31  ;;  %v16863_v42 = vld [vmem:[%s25046_s4 + $0x608] ss:$16 sps:$4 sm:$0xff]   ;;  %v16868_v31 = vld [vmem:[%s25046_s4 + $0x5ec] ss:$16 sps:$4 sm:$0xff]  }
 0x38b   :  { %5347 = vmatmul.mubr.bf16.vlgmr.msra.gmra.mxu0 %v20358_v6  ;;  %5420 = vmatmul.mubr.bf16.vlgmr.msra.gmra.mxu1 %v20360_v21 }
 0x38c   :  { %5356 = vmatprep.mubr.bf16.mxu0 %v20380_v20  ;;  %5429 = vmatprep.mubr.bf16.mxu1 %v20390_v10 }
 0x38d   :  { %5461 = vmatpush1.bf16.msra.mxu0 %v16818_v58  ;;  %5534 = vmatpush1.bf16.msra.mxu1 %v16821_v53  ;;  %v16871_v58 = vld [vmem:[%s25046_s4 + $0x7ec] ss:$16 sps:$4 sm:$0xff]   ;;  %v16866_v53 = vld [vmem:[%s25046_s4 + $0x5e8] ss:$16 sps:$4 sm:$0xff]  }
 0x38e   :  { %5462 = vmatprep.subr.bf16.mxu0 %v16826_v51  ;;  %5535 = vmatprep.subr.bf16.mxu1 %v16829_v14  ;;  %v16869_v51 = vld [vmem:[%s25046_s4 + $0x7e8] ss:$16 sps:$4 sm:$0xff]   ;;  %v16874_v14 = vld [vmem:[%s25046_s4 + $0x5cc] ss:$16 sps:$4 sm:$0xff]  }
 0x391   :  { %5463 = vmatpush1.bf16.msra.mxu0 %v16824_v16  ;;  %5536 = vmatpush1.bf16.msra.mxu1 %v16827_v17  ;;  %v16877_v16 = vld [vmem:[%s25046_s4 + $0x7cc] ss:$16 sps:$4 sm:$0xff]   ;;  %v16872_v17 = vld [vmem:[%s25046_s4 + $0x5c8] ss:$16 sps:$4 sm:$0xff]  }
 0x392   :  { %5464 = vmatprep.subr.bf16.mxu0 %v16832_v9  ;;  %5537 = vmatprep.subr.bf16.mxu1 %v16835_v32  ;;  %v16875_v9 = vld [vmem:[%s25046_s4 + $0x7c8] ss:$16 sps:$4 sm:$0xff]   ;;  %v16880_v32 = vld [vmem:[%s25046_s4 + $0x5ac] ss:$16 sps:$4 sm:$0xff]  }
 0x393   :  { %5357 = vmatmul.mubr.bf16.gmra.mxu0 %v20410_v13  ;;  %5430 = vmatmul.mubr.bf16.gmra.mxu1 %v20426_v40 }
 0x394   :  { %5366 = vmatprep.mubr.bf16.mxu0 %v20428_v24  ;;  %5439 = vmatprep.mubr.bf16.mxu1 %v20432_v45 }
 0x395   :  { %5465 = vmatpush1.bf16.msra.mxu0 %v16830_v52  ;;  %5538 = vmatpush1.bf16.msra.mxu1 %v16833_v8  ;;  %v16883_v52 = vld [vmem:[%s25046_s4 + $0x7ac] ss:$16 sps:$4 sm:$0xff]   ;;  %v16878_v8 = vld [vmem:[%s25046_s4 + $0x5a8] ss:$16 sps:$4 sm:$0xff]  }
 0x396   :  { %5466 = vmatprep.subr.bf16.mxu0 %v16838_v5  ;;  %5539 = vmatprep.subr.bf16.mxu1 %v16841_v59  ;;  %v16881_v5 = vld [vmem:[%s25046_s4 + $0x7a8] ss:$16 sps:$4 sm:$0xff]   ;;  %v16886_v59 = vld [vmem:[%s25046_s4 + $0x58c] ss:$16 sps:$4 sm:$0xff]  }
 0x399   :  { %5467 = vmatpush1.bf16.msra.mxu0 %v16836_v22  ;;  %5540 = vmatpush1.bf16.msra.mxu1 %v16839_v36  ;;  %v16889_v22 = vld [vmem:[%s25046_s4 + $0x78c] ss:$16 sps:$4 sm:$0xff]   ;;  %v16884_v36 = vld [vmem:[%s25046_s4 + $0x588] ss:$16 sps:$4 sm:$0xff]  }
 0x39a   :  { %5468 = vmatprep.subr.bf16.mxu0 %v16844_v49  ;;  %5541 = vmatprep.subr.bf16.mxu1 %v16847_v0  ;;  %v16887_v49 = vld [vmem:[%s25046_s4 + $0x788] ss:$16 sps:$4 sm:$0xff]   ;;  %v16892_v0 = vld [vmem:[%s25046_s4 + $0x56c] ss:$16 sps:$4 sm:$0xff]  }
 0x39b   :  { %5367 = vmatmul.mubr.bf16.gmra.mxu0 %v20483_v55  ;;  %5440 = vmatmul.mubr.bf16.gmra.mxu1 %v20485_v26 }
 0x39c   :  { %5376 = vmatprep.mubr.bf16.mxu0 %v20500_v23  ;;  %5449 = vmatprep.mubr.bf16.mxu1 %v20512_v41 }
 0x39d   :  { %5469 = vmatpush1.bf16.msra.mxu0 %v16842_v7  ;;  %5542 = vmatpush1.bf16.msra.mxu1 %v16845_v39  ;;  %v16895_v7 = vld [vmem:[%s25046_s4 + $0x76c] ss:$16 sps:$4 sm:$0xff]   ;;  %v16890_v39 = vld [vmem:[%s25046_s4 + $0x568] ss:$16 sps:$4 sm:$0xff]  }
 0x39e   :  { %5470 = vmatprep.subr.bf16.mxu0 %v16850_v54  ;;  %5543 = vmatprep.subr.bf16.mxu1 %v16853_v57  ;;  %v16893_v54 = vld [vmem:[%s25046_s4 + $0x768] ss:$16 sps:$4 sm:$0xff]   ;;  %v16898_v57 = vld [vmem:[%s25046_s4 + $0x54c] ss:$16 sps:$4 sm:$0xff]  }
 0x3a1   :  { %5471 = vmatpush1.bf16.msra.mxu0 %v16848_v62  ;;  %5544 = vmatpush1.bf16.msra.mxu1 %v16851_v15  ;;  %v16901_v62 = vld [vmem:[%s25046_s4 + $0x74c] ss:$16 sps:$4 sm:$0xff]   ;;  %v16896_v15 = vld [vmem:[%s25046_s4 + $0x548] ss:$16 sps:$4 sm:$0xff]  }
 0x3a2   :  { %5472 = vmatprep.subr.bf16.mxu0 %v16856_v50  ;;  %5545 = vmatprep.subr.bf16.mxu1 %v16859_v34  ;;  %v16899_v50 = vld [vmem:[%s25046_s4 + $0x748] ss:$16 sps:$4 sm:$0xff]   ;;  %v16904_v34 = vld [vmem:[%s25046_s4 + $0x52c] ss:$16 sps:$4 sm:$0xff]  }
 0x3a3   :  { %5377 = vmatmul.mubr.bf16.gmra.mxu0 %v20561_v48  ;;  %5450 = vmatmul.mubr.bf16.gmra.mxu1 %v20563_v60 }
 0x3a4   :  { %5492 = vmatprep.mubr.bf16.mxu0 %v20571_v33  ;;  %5565 = vmatprep.mubr.bf16.mxu1 %v20583_v35 }
 0x3a5   :  { %5473 = vmatpush1.bf16.msra.mxu0 %v16854_v2  ;;  %5546 = vmatpush1.bf16.msra.mxu1 %v16857_v38  ;;  %v16907_v2 = vld [vmem:[%s25046_s4 + $0x72c] ss:$16 sps:$4 sm:$0xff]   ;;  %v16902_v38 = vld [vmem:[%s25046_s4 + $0x528] ss:$16 sps:$4 sm:$0xff]  }
 0x3a6   :  { %5474 = vmatprep.subr.bf16.mxu0 %v16862_v47  ;;  %5547 = vmatprep.subr.bf16.mxu1 %v16865_v1  ;;  %v16905_v47 = vld [vmem:[%s25046_s4 + $0x728] ss:$16 sps:$4 sm:$0xff]   ;;  %v16910_v1 = vld [vmem:[%s25046_s4 + $0x50c] ss:$16 sps:$4 sm:$0xff]  }
 0x3a9   :  { %5475 = vmatpush1.bf16.msra.mxu0 %v16860_v3  ;;  %5548 = vmatpush1.bf16.msra.mxu1 %v16863_v42  ;;  %v16913_v3 = vld [vmem:[%s25046_s4 + $0x70c] ss:$16 sps:$4 sm:$0xff]   ;;  %v16908_v42 = vld [vmem:[%s25046_s4 + $0x508] ss:$16 sps:$4 sm:$0xff]  }
 0x3aa   :  { %5476 = vmatprep.subr.bf16.mxu0 %v16868_v31  ;;  %5549 = vmatprep.subr.bf16.mxu1 %v16871_v58  ;;  %v16911_v31 = vld [vmem:[%s25046_s4 + $0x708] ss:$16 sps:$4 sm:$0xff]   ;;  %v16916_v58 = vld [vmem:[%s25046_s4 + $0x10e4] ss:$16 sps:$4 sm:$0xff]  }
 0x3ad   :  { %5477 = vmatpush2.bf16.msra.mxu0 %v16866_v53  ;;  %5550 = vmatpush2.bf16.msra.mxu1 %v16869_v51  ;;  %v16919_v53 = vld [vmem:[%s25046_s4 + $0x12e4] ss:$16 sps:$4 sm:$0xff]   ;;  %v16914_v51 = vld [vmem:[%s25046_s4 + $0x10e0] ss:$16 sps:$4 sm:$0xff]  }
 0x3ae   :  { %5478 = vmatprep.subr.bf16.mxu0 %v16874_v14  ;;  %5551 = vmatprep.subr.bf16.mxu1 %v16877_v16  ;;  %v16917_v14 = vld [vmem:[%s25046_s4 + $0x12e0] ss:$16 sps:$4 sm:$0xff]  }
 0x3b1   :  { %5479 = vmatpush2.bf16.msra.mxu0 %v16872_v17  ;;  %5552 = vmatpush2.bf16.msra.mxu1 %v16875_v9 }
 0x3b2   :  { %5480 = vmatprep.subr.bf16.mxu0 %v16880_v32  ;;  %5553 = vmatprep.subr.bf16.mxu1 %v16883_v52  ;;  %v16922_v32 = vld [vmem:[%s25046_s4 + $0x10c4] ss:$16 sps:$4 sm:$0xff]  }
 0x3b3   :  { %v16925_v52 = vld [vmem:[%s25046_s4 + $0x12c4] ss:$16 sps:$4 sm:$0xff]  }
 0x3b5   :  { %5481 = vmatpush2.bf16.msra.mxu0 %v16878_v8  ;;  %5554 = vmatpush2.bf16.msra.mxu1 %v16881_v5 }
 0x3b6   :  { %5482 = vmatprep.subr.bf16.mxu0 %v16886_v59  ;;  %5555 = vmatprep.subr.bf16.mxu1 %v16889_v22  ;;  %v16920_v22 = vld [vmem:[%s25046_s4 + $0x10c0] ss:$16 sps:$4 sm:$0xff]  }
 0x3b9   :  { %5483 = vmatpush2.bf16.msra.mxu0 %v16884_v36  ;;  %5556 = vmatpush2.bf16.msra.mxu1 %v16887_v49  ;;  %v16923_v36 = vld [vmem:[%s25046_s4 + $0x12c0] ss:$16 sps:$4 sm:$0xff]  }
 0x3ba   :  { %5484 = vmatprep.subr.bf16.mxu0 %v16892_v0  ;;  %5557 = vmatprep.subr.bf16.mxu1 %v16895_v7 }
 0x3bd   :  { %5485 = vmatpush2.bf16.msra.mxu0 %v16890_v39  ;;  %5558 = vmatpush2.bf16.msra.mxu1 %v16893_v54  ;;  %v16928_v39 = vld [vmem:[%s25046_s4 + $0x10a4] ss:$16 sps:$4 sm:$0xff]  }
 0x3be   :  { %5486 = vmatprep.subr.bf16.mxu0 %v16898_v57  ;;  %5559 = vmatprep.subr.bf16.mxu1 %v16901_v62  ;;  %v16931_v54 = vld [vmem:[%s25046_s4 + $0x12a4] ss:$16 sps:$4 sm:$0xff]  }
 0x3c1   :  { %5487 = vmatpush2.bf16.msra.mxu0 %v16896_v15  ;;  %5560 = vmatpush2.bf16.msra.mxu1 %v16899_v50  ;;  %v16926_v15 = vld [vmem:[%s25046_s4 + $0x10a0] ss:$16 sps:$4 sm:$0xff]  }
 0x3c2   :  { %5488 = vmatprep.subr.bf16.mxu0 %v16904_v34  ;;  %5561 = vmatprep.subr.bf16.mxu1 %v16907_v2  ;;  %v16929_v50 = vld [vmem:[%s25046_s4 + $0x12a0] ss:$16 sps:$4 sm:$0xff]  }
 0x3c5   :  { %5489 = vmatpush2.bf16.msra.mxu0 %v16902_v38  ;;  %5562 = vmatpush2.bf16.msra.mxu1 %v16905_v47  ;;  %v16934_v47 = vld [vmem:[%s25046_s4 + $0x1084] ss:$16 sps:$4 sm:$0xff]  }
 0x3c6   :  { %5490 = vmatprep.subr.bf16.mxu0 %v16910_v1  ;;  %5563 = vmatprep.subr.bf16.mxu1 %v16913_v3  ;;  %v16937_v1 = vld [vmem:[%s25046_s4 + $0x1284] ss:$16 sps:$4 sm:$0xff]  }
 0x3c9   :  { %5491 = vmatpush2.bf16.msra.mxu0 %v16908_v42  ;;  %5564 = vmatpush2.bf16.msra.mxu1 %v16911_v31 }
 0x3ca   :  { %7400 = vmatprep.subr.bf16.mxu0 %v16916_v58  ;;  %7473 = vmatprep.subr.bf16.mxu1 %v16919_v53  ;;  %v5056_v16 = vpop.f32.mrf.mxu0  ;;  %v5129_v17 = vpop.f32.mrf.mxu1  ;;  %v16932_v58 = vld [vmem:[%s25046_s4 + $0x1080] ss:$16 sps:$4 sm:$0xff]  }
 0x3cb   :  { %v21203_v9 = vadd.f32 %v5129_v17, %v5056_v16  ;;  %v16935_v53 = vld [vmem:[%s25046_s4 + $0x1280] ss:$16 sps:$4 sm:$0xff]   ;;  %v16940_v17 = vld [vmem:[%s25046_s4 + $0x1064] ss:$16 sps:$4 sm:$0xff]  }
 0x3cc   :  { %5493 = vmatmul.mubr.bf16.vlgmr.msra.gmra.mxu0 %v20549_v25  ;;  %5566 = vmatmul.mubr.bf16.vlgmr.msra.gmra.mxu1 %v20565_v44  ;;  %v5058_v8 = vpop.f32.mrf.mxu0  ;;  %v5131_v5 = vpop.f32.mrf.mxu1 }
 0x3cd   :  { %5502 = vmatprep.mubr.bf16.mxu0 %v20763_v37  ;;  %5575 = vmatprep.mubr.bf16.mxu1 %v20765_v30  ;;  %v21215_v59 = vadd.f32 %v5131_v5, %v5058_v8  ;;  %v16938_v5 = vld [vmem:[%s25046_s4 + $0x1060] ss:$16 sps:$4 sm:$0xff]  }
 0x3ce   :  { %7401 = vmatpush1.bf16.msra.mxu0 %v16914_v51  ;;  %7474 = vmatpush1.bf16.msra.mxu1 %v16917_v14  ;;  %v5060_v49 = vpop.f32.mrf.mxu0  ;;  %v5133_v0 = vpop.f32.mrf.mxu1 }
 0x3cf   :  { %7402 = vmatprep.subr.bf16.mxu0 %v16922_v32  ;;  %7475 = vmatprep.subr.bf16.mxu1 %v16925_v52  ;;  %v21223_v7 = vadd.f32 %v5133_v0, %v5060_v49  ;;  %v16943_v32 = vld [vmem:[%s25046_s4 + $0x1264] ss:$16 sps:$4 sm:$0xff]  }
 0x3d0   :  { %v21231_v57 = vpop.f32.mrf.mxu0  ;;  %v21233_v62 = vpop.f32.mrf.mxu1 }
 0x3d1   :  { %25458 = vst [vmem:[#allocation63_spill] sm:$0xff] %v21233_v62 }
 0x3d2   :  { %7403 = vmatpush1.bf16.msra.mxu0 %v16920_v22  ;;  %7476 = vmatpush1.bf16.msra.mxu1 %v16923_v36  ;;  %v5066_v34 = vpop.f32.mrf.mxu0  ;;  %v5139_v2 = vpop.f32.mrf.mxu1  ;;  %v16941_v22 = vld [vmem:[%s25046_s4 + $0x1260] ss:$16 sps:$4 sm:$0xff]  }
 0x3d3   :  { %7404 = vmatprep.subr.bf16.mxu0 %v16928_v39  ;;  %7477 = vmatprep.subr.bf16.mxu1 %v16931_v54  ;;  %v21241_v38 = vadd.f32 %v5139_v2, %v5066_v34  ;;  %v16946_v39 = vld [vmem:[%s25046_s4 + $0x1044] ss:$16 sps:$4 sm:$0xff]   ;;  %v16944_v2 = vld [vmem:[%s25046_s4 + $0x1040] ss:$16 sps:$4 sm:$0xff]  }
 0x3d4   :  { %5503 = vmatmul.mubr.bf16.gmra.mxu0 %v20601_v11  ;;  %5576 = vmatmul.mubr.bf16.gmra.mxu1 %v20615_v19  ;;  %v5068_v3 = vpop.f32.mrf.mxu0  ;;  %v5141_v42 = vpop.f32.mrf.mxu1  ;;  %v16949_v54 = vld [vmem:[%s25046_s4 + $0x1244] ss:$16 sps:$4 sm:$0xff]  }
 0x3d5   :  { %5512 = vmatprep.mubr.bf16.mxu0 %v20803_v27  ;;  %5585 = vmatprep.mubr.bf16.mxu1 %v20805_v18  ;;  %v21253_v31 = vadd.f32 %v5141_v42, %v5068_v3 }
 0x3d6   :  { %7405 = vmatpush1.bf16.msra.mxu0 %v16926_v15  ;;  %7478 = vmatpush1.bf16.msra.mxu1 %v16929_v50  ;;  %v5070_v51 = vpop.f32.mrf.mxu0  ;;  %v5143_v14 = vpop.f32.mrf.mxu1 }
 0x3d7   :  { %7406 = vmatprep.subr.bf16.mxu0 %v16934_v47  ;;  %7479 = vmatprep.subr.bf16.mxu1 %v16937_v1  ;;  %v21261_v16 = vadd.f32 %v5143_v14, %v5070_v51  ;;  %v16947_v47 = vld [vmem:[%s25046_s4 + $0x1240] ss:$16 sps:$4 sm:$0xff]  }
 0x3d8   :  { %v21269_v52 = vpop.f32.mrf.mxu0  ;;  %v21271_v8 = vpop.f32.mrf.mxu1 }
 0x3d9   :  { %25459 = vst [vmem:[#allocation64_spill] sm:$0xff] %v21269_v52  ;;  %25460 = vst [vmem:[#allocation21_spill] sm:$0xff] %v21271_v8 }
 0x3da   :  { %7407 = vmatpush1.bf16.msra.mxu0 %v16932_v58  ;;  %7480 = vmatpush1.bf16.msra.mxu1 %v16935_v53  ;;  %v5076_v36 = vpop.f32.mrf.mxu0  ;;  %v5149_v49 = vpop.f32.mrf.mxu1  ;;  %v16952_v58 = vld [vmem:[%s25046_s4 + $0x1024] ss:$16 sps:$4 sm:$0xff]  }
 0x3db   :  { %7408 = vmatprep.subr.bf16.mxu0 %v16940_v17  ;;  %7481 = vmatprep.subr.bf16.mxu1 %v16943_v32  ;;  %v21279_v0 = vadd.f32 %v5149_v49, %v5076_v36  ;;  %v16955_v53 = vld [vmem:[%s25046_s4 + $0x1224] ss:$16 sps:$4 sm:$0xff]   ;;  %v16950_v17 = vld [vmem:[%s25046_s4 + $0x1020] ss:$16 sps:$4 sm:$0xff]  }
 0x3dc   :  { %5513 = vmatmul.mubr.bf16.gmra.mxu0 %v20641_v28  ;;  %5586 = vmatmul.mubr.bf16.gmra.mxu1 %v20647_v63  ;;  %v5078_v15 = vpop.f32.mrf.mxu0  ;;  %v5151_v50 = vpop.f32.mrf.mxu1  ;;  %v16953_v32 = vld [vmem:[%s25046_s4 + $0x1220] ss:$16 sps:$4 sm:$0xff]   ;;  %v16958_v49 = vld [vmem:[%s25046_s4 + $0x1004] ss:$16 sps:$4 sm:$0xff]  }
 0x3dd   :  { %5522 = vmatprep.mubr.bf16.mxu0 %v20839_v56  ;;  %5595 = vmatprep.mubr.bf16.mxu1 %v20841_v43  ;;  %v21291_v34 = vadd.f32 %v5151_v50, %v5078_v15 }
 0x3de   :  { %7409 = vmatpush1.bf16.msra.mxu0 %v16938_v5  ;;  %7482 = vmatpush1.bf16.msra.mxu1 %v16941_v22  ;;  %v5080_v1 = vpop.f32.mrf.mxu0  ;;  %v5153_v3 = vpop.f32.mrf.mxu1 }
 0x3df   :  { %7410 = vmatprep.subr.bf16.mxu0 %v16946_v39  ;;  %7483 = vmatprep.subr.bf16.mxu1 %v16949_v54  ;;  %v21299_v42 = vadd.f32 %v5153_v3, %v5080_v1  ;;  %v16961_v39 = vld [vmem:[%s25046_s4 + $0x1204] ss:$16 sps:$4 sm:$0xff]  }
 0x3e0   :  { %v21307_v51 = vpop.f32.mrf.mxu0  ;;  %v21309_v14 = vpop.f32.mrf.mxu1 }
 0x3e1   :  { %25461 = vst [vmem:[#allocation22_spill] sm:$0xff] %v21307_v51  ;;  %25462 = vst [vmem:[#allocation65_spill] sm:$0xff] %v21309_v14  ;;  %v17534_v51 = vld [vmem:[%s25046_s4 + $0x80c] ss:$16 sps:$4 sm:$0xff]  }
 0x3e2   :  { %7411 = vmatpush1.bf16.msra.mxu0 %v16944_v2  ;;  %7484 = vmatpush1.bf16.msra.mxu1 %v16947_v47  ;;  %v5086_v5 = vpop.f32.mrf.mxu0  ;;  %v5159_v22 = vpop.f32.mrf.mxu1  ;;  %v16956_v2 = vld [vmem:[%s25046_s4 + $0x1000] ss:$16 sps:$4 sm:$0xff]  }
 0x3e3   :  { %7412 = vmatprep.subr.bf16.mxu0 %v16952_v58  ;;  %7485 = vmatprep.subr.bf16.mxu1 %v16955_v53  ;;  %v21317_v36 = vadd.f32 %v5159_v22, %v5086_v5  ;;  %v16959_v47 = vld [vmem:[%s25046_s4 + $0x1200] ss:$16 sps:$4 sm:$0xff]   ;;  %v16964_v53 = vld [vmem:[%s25046_s4 + $0x11e4] ss:$16 sps:$4 sm:$0xff]  }
 0x3e4   :  { %5523 = vmatmul.mubr.bf16.gmra.mxu0 %v20675_v46  ;;  %5596 = vmatmul.mubr.bf16.gmra.mxu1 %v20683_v29  ;;  %v5088_v54 = vpop.f32.mrf.mxu0  ;;  %v5161_v15 = vpop.f32.mrf.mxu1  ;;  %v16965_v5 = vld [vmem:[%s25046_s4 + $0x13e0] ss:$16 sps:$4 sm:$0xff]   ;;  %v16970_v22 = vld [vmem:[%s25046_s4 + $0x11c4] ss:$16 sps:$4 sm:$0xff]  }
 0x3e5   :  { %7432 = vmatprep.mubr.bf16.mxu0 %v20346_v61  ;;  %7505 = vmatprep.mubr.bf16.mxu1 %v20348_v4  ;;  %v21329_v50 = vadd.f32 %v5161_v15, %v5088_v54  ;;  %v16971_v54 = vld [vmem:[%s25046_s4 + $0x13c0] ss:$16 sps:$4 sm:$0xff]   ;;  %v16976_v15 = vld [vmem:[%s25046_s4 + $0x11a4] ss:$16 sps:$4 sm:$0xff]  }
 0x3e6   :  { %7413 = vmatpush1.bf16.msra.mxu0 %v16950_v17  ;;  %7486 = vmatpush1.bf16.msra.mxu1 %v16953_v32  ;;  %v5090_v1 = vpop.f32.mrf.mxu0  ;;  %v5163_v3 = vpop.f32.mrf.mxu1  ;;  %v16967_v17 = vld [vmem:[%s25046_s4 + $0x13e4] ss:$16 sps:$4 sm:$0xff]   ;;  %v16962_v32 = vld [vmem:[%s25046_s4 + $0x11e0] ss:$16 sps:$4 sm:$0xff]  }
 0x3e7   :  { %7414 = vmatprep.subr.bf16.mxu0 %v16958_v49  ;;  %7487 = vmatprep.subr.bf16.mxu1 %v16961_v39  ;;  %v21337_v58 = vadd.f32 %v5163_v3, %v5090_v1  ;;  %v16973_v49 = vld [vmem:[%s25046_s4 + $0x13c4] ss:$16 sps:$4 sm:$0xff]   ;;  %v16968_v39 = vld [vmem:[%s25046_s4 + $0x11c0] ss:$16 sps:$4 sm:$0xff]  }
 0x3e8   :  { %v16977_v1 = vld [vmem:[%s25046_s4 + $0x13a0] ss:$16 sps:$4 sm:$0xff]   ;;  %v16982_v3 = vld [vmem:[%s25046_s4 + $0x1184] ss:$16 sps:$4 sm:$0xff]  }
 0x3ea   :  { %7415 = vmatpush1.bf16.msra.mxu0 %v16956_v2  ;;  %7488 = vmatpush1.bf16.msra.mxu1 %v16959_v47  ;;  %v16979_v2 = vld [vmem:[%s25046_s4 + $0x13a4] ss:$16 sps:$4 sm:$0xff]   ;;  %v16974_v47 = vld [vmem:[%s25046_s4 + $0x11a0] ss:$16 sps:$4 sm:$0xff]  }
 0x3eb   :  { %7416 = vmatprep.subr.bf16.mxu0 %v16964_v53  ;;  %7489 = vmatprep.subr.bf16.mxu1 %v16967_v17  ;;  %v16985_v53 = vld [vmem:[%s25046_s4 + $0x1384] ss:$16 sps:$4 sm:$0xff]   ;;  %v16980_v17 = vld [vmem:[%s25046_s4 + $0x1180] ss:$16 sps:$4 sm:$0xff]  }
 0x3ee   :  { %7417 = vmatpush2.bf16.msra.mxu0 %v16962_v32  ;;  %7490 = vmatpush2.bf16.msra.mxu1 %v16965_v5  ;;  %v16983_v32 = vld [vmem:[%s25046_s4 + $0x1380] ss:$16 sps:$4 sm:$0xff]   ;;  %v16988_v5 = vld [vmem:[%s25046_s4 + $0x1164] ss:$16 sps:$4 sm:$0xff]  }
 0x3ef   :  { %7418 = vmatprep.subr.bf16.mxu0 %v16970_v22  ;;  %7491 = vmatprep.subr.bf16.mxu1 %v16973_v49  ;;  %v16991_v22 = vld [vmem:[%s25046_s4 + $0x1364] ss:$16 sps:$4 sm:$0xff]   ;;  %v16986_v49 = vld [vmem:[%s25046_s4 + $0x1160] ss:$16 sps:$4 sm:$0xff]  }
 0x3f2   :  { %7419 = vmatpush2.bf16.msra.mxu0 %v16968_v39  ;;  %7492 = vmatpush2.bf16.msra.mxu1 %v16971_v54  ;;  %v16989_v39 = vld [vmem:[%s25046_s4 + $0x1360] ss:$16 sps:$4 sm:$0xff]   ;;  %v16994_v54 = vld [vmem:[%s25046_s4 + $0x1144] ss:$16 sps:$4 sm:$0xff]  }
 0x3f3   :  { %7420 = vmatprep.subr.bf16.mxu0 %v16976_v15  ;;  %7493 = vmatprep.subr.bf16.mxu1 %v16979_v2  ;;  %v16997_v15 = vld [vmem:[%s25046_s4 + $0x1344] ss:$16 sps:$4 sm:$0xff]   ;;  %v16992_v2 = vld [vmem:[%s25046_s4 + $0x1140] ss:$16 sps:$4 sm:$0xff]  }
 0x3f6   :  { %7421 = vmatpush2.bf16.msra.mxu0 %v16974_v47  ;;  %7494 = vmatpush2.bf16.msra.mxu1 %v16977_v1  ;;  %v16995_v47 = vld [vmem:[%s25046_s4 + $0x1340] ss:$16 sps:$4 sm:$0xff]   ;;  %v17000_v1 = vld [vmem:[%s25046_s4 + $0x1124] ss:$16 sps:$4 sm:$0xff]  }
 0x3f7   :  { %7422 = vmatprep.subr.bf16.mxu0 %v16982_v3  ;;  %7495 = vmatprep.subr.bf16.mxu1 %v16985_v53  ;;  %v17003_v3 = vld [vmem:[%s25046_s4 + $0x1324] ss:$16 sps:$4 sm:$0xff]   ;;  %v16998_v53 = vld [vmem:[%s25046_s4 + $0x1120] ss:$16 sps:$4 sm:$0xff]  }
 0x3fa   :  { %7423 = vmatpush2.bf16.msra.mxu0 %v16980_v17  ;;  %7496 = vmatpush2.bf16.msra.mxu1 %v16983_v32  ;;  %v17001_v17 = vld [vmem:[%s25046_s4 + $0x1320] ss:$16 sps:$4 sm:$0xff]   ;;  %v17006_v32 = vld [vmem:[%s25046_s4 + $0x1104] ss:$16 sps:$4 sm:$0xff]  }
 0x3fb   :  { %7424 = vmatprep.subr.bf16.mxu0 %v16988_v5  ;;  %7497 = vmatprep.subr.bf16.mxu1 %v16991_v22  ;;  %v17009_v5 = vld [vmem:[%s25046_s4 + $0x1304] ss:$16 sps:$4 sm:$0xff]   ;;  %v17004_v22 = vld [vmem:[%s25046_s4 + $0x1100] ss:$16 sps:$4 sm:$0xff]  }
 0x3fe   :  { %7425 = vmatpush2.bf16.msra.mxu0 %v16986_v49  ;;  %7498 = vmatpush2.bf16.msra.mxu1 %v16989_v39  ;;  %v17007_v49 = vld [vmem:[%s25046_s4 + $0x1300] ss:$16 sps:$4 sm:$0xff]   ;;  %v17012_v39 = vld [vmem:[%s25046_s4 + $0x14e4] ss:$16 sps:$4 sm:$0xff]  }
 0x3ff   :  { %7426 = vmatprep.subr.bf16.mxu0 %v16994_v54  ;;  %7499 = vmatprep.subr.bf16.mxu1 %v16997_v15  ;;  %v17015_v54 = vld [vmem:[%s25046_s4 + $0x16e4] ss:$16 sps:$4 sm:$0xff]   ;;  %v21441_v15 = vpop.f32.mrf.mxu0 }
 0x400   :  { %25463 = vst [vmem:[#allocation66_spill] sm:$0xff] %v21441_v15 }
 0x402   :  { %7427 = vmatpush2.bf16.msra.mxu0 %v16992_v2  ;;  %7500 = vmatpush2.bf16.msra.mxu1 %v16995_v47  ;;  %v21443_v2 = vpop.f32.mrf.mxu1 }
 0x403   :  { %7428 = vmatprep.subr.bf16.mxu0 %v17000_v1  ;;  %7501 = vmatprep.subr.bf16.mxu1 %v17003_v3  ;;  %25464 = vst [vmem:[#allocation87_spill] sm:$0xff] %v21443_v2 }
 0x406   :  { %7429 = vmatpush2.bf16.msra.mxu0 %v16998_v53  ;;  %7502 = vmatpush2.bf16.msra.mxu1 %v17001_v17  ;;  %v17010_v53 = vld [vmem:[%s25046_s4 + $0x14e0] ss:$16 sps:$4 sm:$0xff]  }
 0x407   :  { %7430 = vmatprep.subr.bf16.mxu0 %v17006_v32  ;;  %7503 = vmatprep.subr.bf16.mxu1 %v17009_v5  ;;  %v17013_v17 = vld [vmem:[%s25046_s4 + $0x16e0] ss:$16 sps:$4 sm:$0xff]  }
 0x40a   :  { %7431 = vmatpush2.bf16.msra.mxu0 %v17004_v22  ;;  %7504 = vmatpush2.bf16.msra.mxu1 %v17007_v49  ;;  %v5202_v47 = vpop.f32.mrf.mxu0  ;;  %v5275_v1 = vpop.f32.mrf.mxu1  ;;  %v17018_v22 = vld [vmem:[%s25046_s4 + $0x14c4] ss:$16 sps:$4 sm:$0xff]  }
 0x40b   :  { %v5203_v3 = vadd.f32 %v5202_v47, %v21203_v9  ;;  %7546 = vmatprep.subr.bf16.mxu0 %v17012_v39  ;;  %7619 = vmatprep.subr.bf16.mxu1 %v17015_v54  ;;  %v17021_v9 = vld [vmem:[%s25046_s4 + $0x16c4] ss:$16 sps:$4 sm:$0xff]  }
 0x40c   :  { %v5204_v32 = vpop.f32.mrf.mxu0  ;;  %v5277_v5 = vpop.f32.mrf.mxu1 }
 0x40d   :  { %v21458_v49 = vadd.f32 %v5275_v1, %v5203_v3  ;;  %7433 = vmatmul.mubr.bf16.vlgmr.msra.gmra.mxu0 %v20358_v6  ;;  %7506 = vmatmul.mubr.bf16.vlgmr.msra.gmra.mxu1 %v20360_v21  ;;  %v5205_v39 = vadd.f32 %v5204_v32, %v21215_v59  ;;  %v17016_v1 = vld [vmem:[%s25046_s4 + $0x14c0] ss:$16 sps:$4 sm:$0xff]  }
 0x40e   :  { %7442 = vmatprep.mubr.bf16.mxu0 %v20380_v20  ;;  %7515 = vmatprep.mubr.bf16.mxu1 %v20390_v10  ;;  %v5206_v54 = vpop.f32.mrf.mxu0  ;;  %v5279_v47 = vpop.f32.mrf.mxu1  ;;  %v17019_v59 = vld [vmem:[%s25046_s4 + $0x16c0] ss:$16 sps:$4 sm:$0xff]  }
 0x40f   :  { %25465 = vst [vmem:[#allocation67_spill] sm:$0xff] %v21458_v49  ;;  %7547 = vmatpush1.bf16.msra.mxu0 %v17010_v53  ;;  %7620 = vmatpush1.bf16.msra.mxu1 %v17013_v17  ;;  %v21465_v12 = vadd.f32 %v5277_v5, %v5205_v39  ;;  %v5207_v2 = vadd.f32 %v5206_v54, %v21223_v7  ;;  %v17024_v53 = vld [vmem:[%s25046_s4 + $0x14a4] ss:$16 sps:$4 sm:$0xff]   ;;  %v25128_v54 = vrot.slane %v21458_v49, 7  ;;  %v17151_v49 = vld [vmem:[%s25046_s4 + $0x1208] ss:$16 sps:$4 sm:$0xff]  }
 0x410   :  { %7548 = vmatprep.subr.bf16.mxu0 %v17018_v22  ;;  %7621 = vmatprep.subr.bf16.mxu1 %v17021_v9  ;;  %v21474_v3 = vpop.f32.mrf.mxu0  ;;  %v21476_v32 = vpop.f32.mrf.mxu1  ;;  %v17027_v7 = vld [vmem:[%s25046_s4 + $0x16a4] ss:$16 sps:$4 sm:$0xff]   ;;  %v17022_v9 = vld [vmem:[%s25046_s4 + $0x14a0] ss:$16 sps:$4 sm:$0xff]  }
 0x411   :  { %25466 = vst [vmem:[#allocation88_spill] sm:$0xff] %v21465_v12  ;;  %25467 = vst [vmem:[#allocation80_spill] sm:$0xff] %v21474_v3  ;;  %v5280_v17 = vadd.f32 %v5279_v47, %v5207_v2  ;;  %v17535_v3 = vld [vmem:[%s25046_s4 + $0xa08] ss:$16 sps:$4 sm:$0xff]  }
 0x412   :  { %25468 = vst [vmem:[#allocation68_spill] sm:$0xff] %v21476_v32  ;;  %v5212_v5 = vpop.f32.mrf.mxu0  ;;  %v5285_v39 = vpop.f32.mrf.mxu1  ;;  %v17025_v32 = vld [vmem:[%s25046_s4 + $0x16a0] ss:$16 sps:$4 sm:$0xff]  }
 0x413   :  { %v8020_v12 = vrot.slane %v5280_v17, 7  ;;  %7549 = vmatpush1.bf16.msra.mxu0 %v17016_v1  ;;  %7622 = vmatpush1.bf16.msra.mxu1 %v17019_v59  ;;  %v5213_v22 = vadd.f32 %v5212_v5, %v21241_v38  ;;  %v17030_v17 = vld [vmem:[%s25046_s4 + $0x1484] ss:$16 sps:$4 sm:$0xff]  }
 0x414   :  { %7550 = vmatprep.subr.bf16.mxu0 %v17024_v53  ;;  %7623 = vmatprep.subr.bf16.mxu1 %v17027_v7  ;;  %v5214_v2 = vpop.f32.mrf.mxu0  ;;  %v5287_v47 = vpop.f32.mrf.mxu1  ;;  %v17033_v38 = vld [vmem:[%s25046_s4 + $0x1684] ss:$16 sps:$4 sm:$0xff]  }
 0x415   :  { %v5286_v1 = vadd.f32 %v5285_v39, %v5213_v22  ;;  %7443 = vmatmul.mubr.bf16.gmra.mxu0 %v20410_v13  ;;  %7516 = vmatmul.mubr.bf16.gmra.mxu1 %v20426_v40  ;;  %v5215_v59 = vadd.f32 %v5214_v2, %v21253_v31  ;;  %v21504_v53 = vsel %vm1502_vm1, %v25128_v54, %v8020_v12  ;;  %v17028_v31 = vld [vmem:[%s25046_s4 + $0x1480] ss:$16 sps:$4 sm:$0xff]  }
 0x416   :  { %25469 = vst [vmem:[#allocation69_spill] sm:$0xff] %v21504_v53  ;;  %7452 = vmatprep.mubr.bf16.mxu0 %v20428_v24  ;;  %7525 = vmatprep.mubr.bf16.mxu1 %v20432_v45  ;;  %v5216_v7 = vpop.f32.mrf.mxu0  ;;  %v5289_v5 = vpop.f32.mrf.mxu1  ;;  %v17031_v2 = vld [vmem:[%s25046_s4 + $0x1680] ss:$16 sps:$4 sm:$0xff]  }
 0x417   :  { %v8028_v15 = vrot.slane %v5286_v1, 7  ;;  %7551 = vmatpush1.bf16.msra.mxu0 %v17022_v9  ;;  %7624 = vmatpush1.bf16.msra.mxu1 %v17025_v32  ;;  %v21508_v39 = vadd.f32 %v5287_v47, %v5215_v59  ;;  %v5217_v22 = vadd.f32 %v5216_v7, %v21261_v16  ;;  %v17036_v32 = vld [vmem:[%s25046_s4 + $0x1464] ss:$16 sps:$4 sm:$0xff]   ;;  %v17034_v7 = vld [vmem:[%s25046_s4 + $0x1460] ss:$16 sps:$4 sm:$0xff]  }
 0x418   :  { %7552 = vmatprep.subr.bf16.mxu0 %v17030_v17  ;;  %7625 = vmatprep.subr.bf16.mxu1 %v17033_v38  ;;  %v21517_v54 = vpop.f32.mrf.mxu0  ;;  %v21519_v53 = vpop.f32.mrf.mxu1  ;;  %v17039_v16 = vld [vmem:[%s25046_s4 + $0x1664] ss:$16 sps:$4 sm:$0xff]  }
 0x419   :  { %25470 = vst [vmem:[#allocation71_spill] sm:$0xff] %v21508_v39  ;;  %25471 = vst [vmem:[#allocation81_spill] sm:$0xff] %v21517_v54  ;;  %v5290_v9 = vadd.f32 %v5289_v5, %v5217_v22  ;;  %v21528_v47 = vsel %vm1502_vm1, %v8020_v12, %v8028_v15  ;;  %v17037_v39 = vld [vmem:[%s25046_s4 + $0x1660] ss:$16 sps:$4 sm:$0xff]   ;;  %v17042_v22 = vld [vmem:[%s25046_s4 + $0x1444] ss:$16 sps:$4 sm:$0xff]  }
 0x41a   :  { %25472 = vst [vmem:[#allocation89_spill] sm:$0xff] %v21519_v53  ;;  %25473 = vst [vmem:[#allocation90_spill] sm:$0xff] %v21528_v47  ;;  %v5222_v1 = vpop.f32.mrf.mxu0  ;;  %v5295_v59 = vpop.f32.mrf.mxu1  ;;  %v17150_v53 = vld [vmem:[%s25046_s4 + $0x100c] ss:$16 sps:$4 sm:$0xff]  }
 0x41b   :  { %v8036_v17 = vrot.slane %v5290_v9, 7  ;;  %7553 = vmatpush1.bf16.msra.mxu0 %v17028_v31  ;;  %7626 = vmatpush1.bf16.msra.mxu1 %v17031_v2  ;;  %v5223_v38 = vadd.f32 %v5222_v1, %v21279_v0  ;;  %v17045_v0 = vld [vmem:[%s25046_s4 + $0x1644] ss:$16 sps:$4 sm:$0xff]  }
 0x41c   :  { %7554 = vmatprep.subr.bf16.mxu0 %v17036_v32  ;;  %7627 = vmatprep.subr.bf16.mxu1 %v17039_v16  ;;  %v5224_v5 = vpop.f32.mrf.mxu0  ;;  %v5297_v12 = vpop.f32.mrf.mxu1 }
 0x41d   :  { %v5296_v31 = vadd.f32 %v5295_v59, %v5223_v38  ;;  %7453 = vmatmul.mubr.bf16.gmra.mxu0 %v20483_v55  ;;  %7526 = vmatmul.mubr.bf16.gmra.mxu1 %v20485_v26  ;;  %v5225_v2 = vadd.f32 %v5224_v5, %v21291_v34  ;;  %v21547_v32 = vsel %vm1502_vm1, %v8028_v15, %v8036_v17  ;;  %v17040_v34 = vld [vmem:[%s25046_s4 + $0x1440] ss:$16 sps:$4 sm:$0xff]  }
 0x41e   :  { %25474 = vst [vmem:[#allocation23_spill] sm:$0xff] %v21547_v32  ;;  %7462 = vmatprep.mubr.bf16.mxu0 %v20500_v23  ;;  %7535 = vmatprep.mubr.bf16.mxu1 %v20512_v41  ;;  %v5226_v16 = vpop.f32.mrf.mxu0  ;;  %v5299_v9 = vpop.f32.mrf.mxu1  ;;  %v17043_v15 = vld [vmem:[%s25046_s4 + $0x1640] ss:$16 sps:$4 sm:$0xff]  }
 0x41f   :  { %v8044_v1 = vrot.slane %v5296_v31, 7  ;;  %7555 = vmatpush1.bf16.msra.mxu0 %v17034_v7  ;;  %7628 = vmatpush1.bf16.msra.mxu1 %v17037_v39  ;;  %v21551_v47 = vadd.f32 %v5297_v12, %v5225_v2  ;;  %v5227_v59 = vadd.f32 %v5226_v16, %v21299_v42  ;;  %v17048_v39 = vld [vmem:[%s25046_s4 + $0x1424] ss:$16 sps:$4 sm:$0xff]   ;;  %v17046_v16 = vld [vmem:[%s25046_s4 + $0x1420] ss:$16 sps:$4 sm:$0xff]  }
 0x420   :  { %7556 = vmatprep.subr.bf16.mxu0 %v17042_v22  ;;  %7629 = vmatprep.subr.bf16.mxu1 %v17045_v0  ;;  %v21560_v38 = vpop.f32.mrf.mxu0  ;;  %v21562_v5 = vpop.f32.mrf.mxu1  ;;  %v17051_v42 = vld [vmem:[%s25046_s4 + $0x1624] ss:$16 sps:$4 sm:$0xff]   ;;  %v17049_v32 = vld [vmem:[%s25046_s4 + $0x1620] ss:$16 sps:$4 sm:$0xff]  }
 0x421   :  { %25475 = vst [vmem:[#allocation24_spill] sm:$0xff] %v21551_v47  ;;  %25476 = vst [vmem:[#allocation73_spill] sm:$0xff] %v21560_v38  ;;  %v5300_v7 = vadd.f32 %v5299_v9, %v5227_v59  ;;  %v21571_v12 = vsel %vm1502_vm1, %v8036_v17, %v8044_v1  ;;  %v17054_v59 = vld [vmem:[%s25046_s4 + $0x1404] ss:$16 sps:$4 sm:$0xff]   ;;  %v17139_v47 = vld [vmem:[%s25046_s4 + $0x1248] ss:$16 sps:$4 sm:$0xff]  }
 0x422   :  { %25477 = vst [vmem:[#allocation91_spill] sm:$0xff] %v21562_v5  ;;  %25478 = vst [vmem:[#allocation32_spill] sm:$0xff] %v21571_v12  ;;  %v5232_v31 = vpop.f32.mrf.mxu0  ;;  %v5305_v2 = vpop.f32.mrf.mxu1  ;;  %v17127_v12 = vld [vmem:[%s25046_s4 + $0x1288] ss:$16 sps:$4 sm:$0xff]  }
 0x423   :  { %v8052_v22 = vrot.slane %v5300_v7, 7  ;;  %7557 = vmatpush1.bf16.msra.mxu0 %v17040_v34  ;;  %7630 = vmatpush1.bf16.msra.mxu1 %v17043_v15  ;;  %v5233_v0 = vadd.f32 %v5232_v31, %v21317_v36  ;;  %v17057_v36 = vld [vmem:[%s25046_s4 + $0x1604] ss:$16 sps:$4 sm:$0xff]  }
 0x424   :  { %7558 = vmatprep.subr.bf16.mxu0 %v17048_v39  ;;  %7631 = vmatprep.subr.bf16.mxu1 %v17051_v42  ;;  %v5234_v9 = vpop.f32.mrf.mxu0  ;;  %v5307_v17 = vpop.f32.mrf.mxu1 }
 0x425   :  { %v5306_v34 = vadd.f32 %v5305_v2, %v5233_v0  ;;  %7463 = vmatmul.mubr.bf16.gmra.mxu0 %v20561_v48  ;;  %7536 = vmatmul.mubr.bf16.gmra.mxu1 %v20563_v60  ;;  %v5235_v15 = vadd.f32 %v5234_v9, %v21329_v50  ;;  %v21590_v39 = vsel %vm1502_vm1, %v8044_v1, %v8052_v22  ;;  %v17052_v0 = vld [vmem:[%s25046_s4 + $0x1400] ss:$16 sps:$4 sm:$0xff]  }
 0x426   :  { %25479 = vst [vmem:[#allocation86_spill] sm:$0xff] %v21590_v39  ;;  %7578 = vmatprep.mubr.bf16.mxu0 %v20571_v33  ;;  %7651 = vmatprep.mubr.bf16.mxu1 %v20583_v35  ;;  %v5236_v42 = vpop.f32.mrf.mxu0  ;;  %v17055_v50 = vld [vmem:[%s25046_s4 + $0x1600] ss:$16 sps:$4 sm:$0xff]   ;;  %v5309_v1 = vpop.f32.mrf.mxu1  ;;  %v17126_v39 = vld [vmem:[%s25046_s4 + $0x108c] ss:$16 sps:$4 sm:$0xff]  }
 0x427   :  { %v8060_v7 = vrot.slane %v5306_v34, 7  ;;  %7559 = vmatpush1.bf16.msra.mxu0 %v17046_v16  ;;  %7632 = vmatpush1.bf16.msra.mxu1 %v17049_v32  ;;  %v21594_v31 = vadd.f32 %v5307_v17, %v5235_v15  ;;  %v5237_v2 = vadd.f32 %v5236_v42, %v21337_v58  ;;  %v17060_v16 = vld [vmem:[%s25046_s4 + $0x15e4] ss:$16 sps:$4 sm:$0xff]   ;;  %v17064_v42 = vld [vmem:[%s25046_s4 + $0x15c0] ss:$16 sps:$4 sm:$0xff]  }
 0x428   :  { %7560 = vmatprep.subr.bf16.mxu0 %v17054_v59  ;;  %7633 = vmatprep.subr.bf16.mxu1 %v17057_v36  ;;  %v17063_v32 = vld [vmem:[%s25046_s4 + $0x17e4] ss:$16 sps:$4 sm:$0xff]   ;;  %v17058_v59 = vld [vmem:[%s25046_s4 + $0x15e0] ss:$16 sps:$4 sm:$0xff]  }
 0x429   :  { %25480 = vst [vmem:[#allocation25_spill] sm:$0xff] %v21594_v31  ;;  %v5310_v58 = vadd.f32 %v5309_v1, %v5237_v2  ;;  %v21610_v9 = vsel %vm1502_vm1, %v8052_v22, %v8060_v7  ;;  %v17061_v36 = vld [vmem:[%s25046_s4 + $0x17e0] ss:$16 sps:$4 sm:$0xff]   ;;  %v17066_v34 = vld [vmem:[%s25046_s4 + $0x15c4] ss:$16 sps:$4 sm:$0xff]  }
 0x42a   :  { %25481 = vst [vmem:[#allocation26_spill] sm:$0xff] %v21610_v9  ;;  %v17069_v22 = vld [vmem:[%s25046_s4 + $0x17c4] ss:$16 sps:$4 sm:$0xff]   ;;  %v17067_v2 = vld [vmem:[%s25046_s4 + $0x17c0] ss:$16 sps:$4 sm:$0xff]  }
 0x42b   :  { %v8068_v17 = vrot.slane %v5310_v58, 7  ;;  %7561 = vmatpush1.bf16.msra.mxu0 %v17052_v0  ;;  %7634 = vmatpush1.bf16.msra.mxu1 %v17055_v50  ;;  %v17072_v0 = vld [vmem:[%s25046_s4 + $0x15a4] ss:$16 sps:$4 sm:$0xff]   ;;  %v17070_v50 = vld [vmem:[%s25046_s4 + $0x15a0] ss:$16 sps:$4 sm:$0xff]  }
 0x42c   :  { %7562 = vmatprep.subr.bf16.mxu0 %v17060_v16  ;;  %7635 = vmatprep.subr.bf16.mxu1 %v17063_v32  ;;  %v17073_v1 = vld [vmem:[%s25046_s4 + $0x17a0] ss:$16 sps:$4 sm:$0xff]   ;;  %v17078_v16 = vld [vmem:[%s25046_s4 + $0x1584] ss:$16 sps:$4 sm:$0xff]  }
 0x42d   :  { %v21625_v15 = vsel %vm1502_vm1, %v8060_v7, %v8068_v17  ;;  %v17075_v7 = vld [vmem:[%s25046_s4 + $0x17a4] ss:$16 sps:$4 sm:$0xff]   ;;  %v17076_v58 = vld [vmem:[%s25046_s4 + $0x1580] ss:$16 sps:$4 sm:$0xff]  }
 0x42e   :  { %25482 = vst [vmem:[#allocation5_spill] sm:$0xff] %v21625_v15  ;;  %v17081_v32 = vld [vmem:[%s25046_s4 + $0x1784] ss:$16 sps:$4 sm:$0xff]   ;;  %v17079_v17 = vld [vmem:[%s25046_s4 + $0x1780] ss:$16 sps:$4 sm:$0xff]  }
 0x42f   :  { %7563 = vmatpush2.bf16.msra.mxu0 %v17058_v59  ;;  %7636 = vmatpush2.bf16.msra.mxu1 %v17061_v36  ;;  %v17084_v59 = vld [vmem:[%s25046_s4 + $0x1564] ss:$16 sps:$4 sm:$0xff]   ;;  %v17115_v15 = vld [vmem:[%s25046_s4 + $0x12c8] ss:$16 sps:$4 sm:$0xff]  }
 0x430   :  { %7564 = vmatprep.subr.bf16.mxu0 %v17066_v34  ;;  %7637 = vmatprep.subr.bf16.mxu1 %v17069_v22  ;;  %v17087_v36 = vld [vmem:[%s25046_s4 + $0x1764] ss:$16 sps:$4 sm:$0xff]   ;;  %v17082_v34 = vld [vmem:[%s25046_s4 + $0x1560] ss:$16 sps:$4 sm:$0xff]  }
 0x431   :  { %v17085_v22 = vld [vmem:[%s25046_s4 + $0x1760] ss:$16 sps:$4 sm:$0xff]  }
 0x433   :  { %7565 = vmatpush2.bf16.msra.mxu0 %v17064_v42  ;;  %7638 = vmatpush2.bf16.msra.mxu1 %v17067_v2  ;;  %v17090_v42 = vld [vmem:[%s25046_s4 + $0x1544] ss:$16 sps:$4 sm:$0xff]  }
 0x434   :  { %7566 = vmatprep.subr.bf16.mxu0 %v17072_v0  ;;  %7639 = vmatprep.subr.bf16.mxu1 %v17075_v7  ;;  %v17093_v2 = vld [vmem:[%s25046_s4 + $0x1744] ss:$16 sps:$4 sm:$0xff]   ;;  %v17088_v0 = vld [vmem:[%s25046_s4 + $0x1540] ss:$16 sps:$4 sm:$0xff]  }
 0x435   :  { %v17091_v7 = vld [vmem:[%s25046_s4 + $0x1740] ss:$16 sps:$4 sm:$0xff]  }
 0x437   :  { %7567 = vmatpush2.bf16.msra.mxu0 %v17070_v50  ;;  %7640 = vmatpush2.bf16.msra.mxu1 %v17073_v1  ;;  %v17096_v50 = vld [vmem:[%s25046_s4 + $0x1524] ss:$16 sps:$4 sm:$0xff]  }
 0x438   :  { %7568 = vmatprep.subr.bf16.mxu0 %v17078_v16  ;;  %7641 = vmatprep.subr.bf16.mxu1 %v17081_v32  ;;  %v17099_v1 = vld [vmem:[%s25046_s4 + $0x1724] ss:$16 sps:$4 sm:$0xff]   ;;  %v17094_v16 = vld [vmem:[%s25046_s4 + $0x1520] ss:$16 sps:$4 sm:$0xff]  }
 0x439   :  { %v17097_v32 = vld [vmem:[%s25046_s4 + $0x1720] ss:$16 sps:$4 sm:$0xff]  }
 0x43b   :  { %7569 = vmatpush2.bf16.msra.mxu0 %v17076_v58  ;;  %7642 = vmatpush2.bf16.msra.mxu1 %v17079_v17  ;;  %v17102_v58 = vld [vmem:[%s25046_s4 + $0x1504] ss:$16 sps:$4 sm:$0xff]  }
 0x43c   :  { %7570 = vmatprep.subr.bf16.mxu0 %v17084_v59  ;;  %7643 = vmatprep.subr.bf16.mxu1 %v17087_v36  ;;  %v17105_v17 = vld [vmem:[%s25046_s4 + $0x1704] ss:$16 sps:$4 sm:$0xff]   ;;  %v17100_v59 = vld [vmem:[%s25046_s4 + $0x1500] ss:$16 sps:$4 sm:$0xff]  }
 0x43d   :  { %v17103_v36 = vld [vmem:[%s25046_s4 + $0x1700] ss:$16 sps:$4 sm:$0xff]  }
 0x43f   :  { %7571 = vmatpush2.bf16.msra.mxu0 %v17082_v34  ;;  %7644 = vmatpush2.bf16.msra.mxu1 %v17085_v22  ;;  %v17108_v34 = vld [vmem:[%s25046_s4 + $0x10ec] ss:$16 sps:$4 sm:$0xff]  }
 0x440   :  { %7572 = vmatprep.subr.bf16.mxu0 %v17090_v42  ;;  %7645 = vmatprep.subr.bf16.mxu1 %v17093_v2  ;;  %v17111_v22 = vld [vmem:[%s25046_s4 + $0x12ec] ss:$16 sps:$4 sm:$0xff]   ;;  %v21711_v42 = vpop.f32.mrf.mxu0  ;;  %v21713_v2 = vpop.f32.mrf.mxu1 }
 0x441   :  { %25483 = vst [vmem:[#allocation74_spill] sm:$0xff] %v21711_v42  ;;  %25484 = vst [vmem:[#allocation37_spill] sm:$0xff] %v21713_v2  ;;  %v17138_v2 = vld [vmem:[%s25046_s4 + $0x104c] ss:$16 sps:$4 sm:$0xff]  }
 0x443   :  { %7573 = vmatpush2.bf16.msra.mxu0 %v17088_v0  ;;  %7646 = vmatpush2.bf16.msra.mxu1 %v17091_v7 }
 0x444   :  { %7574 = vmatprep.subr.bf16.mxu0 %v17096_v50  ;;  %7647 = vmatprep.subr.bf16.mxu1 %v17099_v1  ;;  %v17106_v1 = vld [vmem:[%s25046_s4 + $0x10e8] ss:$16 sps:$4 sm:$0xff]  }
 0x447   :  { %7575 = vmatpush2.bf16.msra.mxu0 %v17094_v16  ;;  %7648 = vmatpush2.bf16.msra.mxu1 %v17097_v32  ;;  %v17109_v16 = vld [vmem:[%s25046_s4 + $0x12e8] ss:$16 sps:$4 sm:$0xff]  }
 0x448   :  { %7576 = vmatprep.subr.bf16.mxu0 %v17102_v58  ;;  %7649 = vmatprep.subr.bf16.mxu1 %v17105_v17  ;;  %v17114_v17 = vld [vmem:[%s25046_s4 + $0x10cc] ss:$16 sps:$4 sm:$0xff]  }
 0x44b   :  { %7577 = vmatpush2.bf16.msra.mxu0 %v17100_v59  ;;  %7650 = vmatpush2.bf16.msra.mxu1 %v17103_v36  ;;  %v5348_v0 = vpop.f32.mrf.mxu0  ;;  %v5421_v7 = vpop.f32.mrf.mxu1  ;;  %v17117_v59 = vld [vmem:[%s25046_s4 + $0x12cc] ss:$16 sps:$4 sm:$0xff]  }
 0x44c   :  { %v21715_v50 = vadd.f32 %v5421_v7, %v5348_v0  ;;  %7692 = vmatprep.subr.bf16.mxu0 %v17108_v34  ;;  %7765 = vmatprep.subr.bf16.mxu1 %v17111_v22  ;;  %v17112_v7 = vld [vmem:[%s25046_s4 + $0x10c8] ss:$16 sps:$4 sm:$0xff]  }
 0x44d   :  { %v5350_v32 = vpop.f32.mrf.mxu0  ;;  %v5423_v58 = vpop.f32.mrf.mxu1 }
 0x44e   :  { %7579 = vmatmul.mubr.bf16.vlgmr.msra.gmra.mxu0 %v20549_v25  ;;  %7652 = vmatmul.mubr.bf16.vlgmr.msra.gmra.mxu1 %v20565_v44  ;;  %v21731_v36 = vadd.f32 %v5423_v58, %v5350_v32 }
 0x44f   :  { %7588 = vmatprep.mubr.bf16.mxu0 %v20763_v37  ;;  %7661 = vmatprep.mubr.bf16.mxu1 %v20765_v30  ;;  %v5352_v34 = vpop.f32.mrf.mxu0  ;;  %v5425_v22 = vpop.f32.mrf.mxu1 }
 0x450   :  { %7693 = vmatpush1.bf16.msra.mxu0 %v17106_v1  ;;  %7766 = vmatpush1.bf16.msra.mxu1 %v17109_v16  ;;  %v21735_v0 = vadd.f32 %v5425_v22, %v5352_v34  ;;  %v17120_v1 = vld [vmem:[%s25046_s4 + $0x10ac] ss:$16 sps:$4 sm:$0xff]  }
 0x451   :  { %7694 = vmatprep.subr.bf16.mxu0 %v17114_v17  ;;  %7767 = vmatprep.subr.bf16.mxu1 %v17117_v59  ;;  %v21743_v32 = vpop.f32.mrf.mxu0  ;;  %v21745_v58 = vpop.f32.mrf.mxu1  ;;  %v17123_v16 = vld [vmem:[%s25046_s4 + $0x12ac] ss:$16 sps:$4 sm:$0xff]   ;;  %v17118_v17 = vld [vmem:[%s25046_s4 + $0x10a8] ss:$16 sps:$4 sm:$0xff]  }
 0x452   :  { %25485 = vst [vmem:[#allocation6_spill] sm:$0xff] %v21743_v32  ;;  %25486 = vst [vmem:[#allocation44_spill] sm:$0xff] %v21745_v58  ;;  %v17121_v59 = vld [vmem:[%s25046_s4 + $0x12a8] ss:$16 sps:$4 sm:$0xff]  }
 0x453   :  { %v5358_v34 = vpop.f32.mrf.mxu0  ;;  %v5431_v22 = vpop.f32.mrf.mxu1 }
 0x454   :  { %7695 = vmatpush1.bf16.msra.mxu0 %v17112_v7  ;;  %7768 = vmatpush1.bf16.msra.mxu1 %v17115_v15  ;;  %v21753_v9 = vadd.f32 %v5431_v22, %v5358_v34  ;;  %v17129_v15 = vld [vmem:[%s25046_s4 + $0x128c] ss:$16 sps:$4 sm:$0xff]   ;;  %v17124_v22 = vld [vmem:[%s25046_s4 + $0x1088] ss:$16 sps:$4 sm:$0xff]  }
 0x455   :  { %7696 = vmatprep.subr.bf16.mxu0 %v17120_v1  ;;  %7769 = vmatprep.subr.bf16.mxu1 %v17123_v16  ;;  %v5360_v58 = vpop.f32.mrf.mxu0  ;;  %v5433_v32 = vpop.f32.mrf.mxu1 }
 0x456   :  { %7589 = vmatmul.mubr.bf16.gmra.mxu0 %v20601_v11  ;;  %7662 = vmatmul.mubr.bf16.gmra.mxu1 %v20615_v19  ;;  %v21769_v7 = vadd.f32 %v5433_v32, %v5360_v58 }
 0x457   :  { %7598 = vmatprep.mubr.bf16.mxu0 %v20803_v27  ;;  %7671 = vmatprep.mubr.bf16.mxu1 %v20805_v18  ;;  %v5362_v1 = vpop.f32.mrf.mxu0  ;;  %v5435_v16 = vpop.f32.mrf.mxu1 }
 0x458   :  { %7697 = vmatpush1.bf16.msra.mxu0 %v17118_v17  ;;  %7770 = vmatpush1.bf16.msra.mxu1 %v17121_v59  ;;  %v21773_v34 = vadd.f32 %v5435_v16, %v5362_v1  ;;  %v17132_v17 = vld [vmem:[%s25046_s4 + $0x106c] ss:$16 sps:$4 sm:$0xff]  }
 0x459   :  { %7698 = vmatprep.subr.bf16.mxu0 %v17126_v39  ;;  %7771 = vmatprep.subr.bf16.mxu1 %v17129_v15  ;;  %v21781_v32 = vpop.f32.mrf.mxu0  ;;  %v21783_v58 = vpop.f32.mrf.mxu1  ;;  %v17135_v59 = vld [vmem:[%s25046_s4 + $0x126c] ss:$16 sps:$4 sm:$0xff]   ;;  %v17130_v39 = vld [vmem:[%s25046_s4 + $0x1068] ss:$16 sps:$4 sm:$0xff]  }
 0x45a   :  { %25487 = vst [vmem:[#allocation27_spill] sm:$0xff] %v21781_v32  ;;  %25488 = vst [vmem:[#allocation43_spill] sm:$0xff] %v21783_v58  ;;  %v17133_v15 = vld [vmem:[%s25046_s4 + $0x1268] ss:$16 sps:$4 sm:$0xff]  }
 0x45b   :  { %v5368_v1 = vpop.f32.mrf.mxu0  ;;  %v5441_v16 = vpop.f32.mrf.mxu1 }
 0x45c   :  { %7699 = vmatpush1.bf16.msra.mxu0 %v17124_v22  ;;  %7772 = vmatpush1.bf16.msra.mxu1 %v17127_v12  ;;  %v21791_v31 = vadd.f32 %v5441_v16, %v5368_v1  ;;  %v17141_v12 = vld [vmem:[%s25046_s4 + $0x124c] ss:$16 sps:$4 sm:$0xff]   ;;  %v17136_v16 = vld [vmem:[%s25046_s4 + $0x1048] ss:$16 sps:$4 sm:$0xff]  }
 0x45d   :  { %7700 = vmatprep.subr.bf16.mxu0 %v17132_v17  ;;  %7773 = vmatprep.subr.bf16.mxu1 %v17135_v59  ;;  %v5370_v58 = vpop.f32.mrf.mxu0  ;;  %v5443_v32 = vpop.f32.mrf.mxu1 }
 0x45e   :  { %7599 = vmatmul.mubr.bf16.gmra.mxu0 %v20641_v28  ;;  %7672 = vmatmul.mubr.bf16.gmra.mxu1 %v20647_v63  ;;  %v21807_v22 = vadd.f32 %v5443_v32, %v5370_v58 }
 0x45f   :  { %7608 = vmatprep.mubr.bf16.mxu0 %v20839_v56  ;;  %7681 = vmatprep.mubr.bf16.mxu1 %v20841_v43  ;;  %v5372_v17 = vpop.f32.mrf.mxu0  ;;  %v5445_v59 = vpop.f32.mrf.mxu1 }
 0x460   :  { %7701 = vmatpush1.bf16.msra.mxu0 %v17130_v39  ;;  %7774 = vmatpush1.bf16.msra.mxu1 %v17133_v15  ;;  %v21811_v1 = vadd.f32 %v5445_v59, %v5372_v17  ;;  %v17144_v39 = vld [vmem:[%s25046_s4 + $0x102c] ss:$16 sps:$4 sm:$0xff]  }
 0x461   :  { %7702 = vmatprep.subr.bf16.mxu0 %v17138_v2  ;;  %7775 = vmatprep.subr.bf16.mxu1 %v17141_v12  ;;  %v21819_v32 = vpop.f32.mrf.mxu0  ;;  %v21821_v58 = vpop.f32.mrf.mxu1  ;;  %v17147_v15 = vld [vmem:[%s25046_s4 + $0x122c] ss:$16 sps:$4 sm:$0xff]   ;;  %v17142_v2 = vld [vmem:[%s25046_s4 + $0x1028] ss:$16 sps:$4 sm:$0xff]  }
 0x462   :  { %25489 = vst [vmem:[#allocation29_spill] sm:$0xff] %v21819_v32  ;;  %25490 = vst [vmem:[#allocation75_spill] sm:$0xff] %v21821_v58  ;;  %v17145_v12 = vld [vmem:[%s25046_s4 + $0x1228] ss:$16 sps:$4 sm:$0xff]  }
 0x463   :  { %v5378_v17 = vpop.f32.mrf.mxu0  ;;  %v5451_v59 = vpop.f32.mrf.mxu1 }
 0x464   :  { %7703 = vmatpush1.bf16.msra.mxu0 %v17136_v16  ;;  %7776 = vmatpush1.bf16.msra.mxu1 %v17139_v47  ;;  %v21829_v5 = vadd.f32 %v5451_v59, %v5378_v17  ;;  %v17153_v47 = vld [vmem:[%s25046_s4 + $0x120c] ss:$16 sps:$4 sm:$0xff]   ;;  %v17148_v59 = vld [vmem:[%s25046_s4 + $0x1008] ss:$16 sps:$4 sm:$0xff]  }
 0x465   :  { %7704 = vmatprep.subr.bf16.mxu0 %v17144_v39  ;;  %7777 = vmatprep.subr.bf16.mxu1 %v17147_v15  ;;  %v5380_v58 = vpop.f32.mrf.mxu0  ;;  %v5453_v32 = vpop.f32.mrf.mxu1 }
 0x466   :  { %7609 = vmatmul.mubr.bf16.gmra.mxu0 %v20675_v46  ;;  %7682 = vmatmul.mubr.bf16.gmra.mxu1 %v20683_v29  ;;  %v21845_v16 = vadd.f32 %v5453_v32, %v5380_v58  ;;  %v17156_v32 = vld [vmem:[%s25046_s4 + $0x11ec] ss:$16 sps:$4 sm:$0xff]  }
 0x467   :  { %7724 = vmatprep.mubr.bf16.mxu0 %v20346_v61  ;;  %7797 = vmatprep.mubr.bf16.mxu1 %v20348_v4  ;;  %v5382_v39 = vpop.f32.mrf.mxu0  ;;  %v5455_v15 = vpop.f32.mrf.mxu1  ;;  %v17159_v58 = vld [vmem:[%s25046_s4 + $0x13ec] ss:$16 sps:$4 sm:$0xff]  }
 0x468   :  { %7705 = vmatpush1.bf16.msra.mxu0 %v17142_v2  ;;  %7778 = vmatpush1.bf16.msra.mxu1 %v17145_v12  ;;  %v21849_v17 = vadd.f32 %v5455_v15, %v5382_v39  ;;  %v17154_v2 = vld [vmem:[%s25046_s4 + $0x11e8] ss:$16 sps:$4 sm:$0xff]   ;;  %v17168_v15 = vld [vmem:[%s25046_s4 + $0x11ac] ss:$16 sps:$4 sm:$0xff]  }
 0x469   :  { %7706 = vmatprep.subr.bf16.mxu0 %v17150_v53  ;;  %7779 = vmatprep.subr.bf16.mxu1 %v17153_v47  ;;  %v17157_v12 = vld [vmem:[%s25046_s4 + $0x13e8] ss:$16 sps:$4 sm:$0xff]   ;;  %v17162_v53 = vld [vmem:[%s25046_s4 + $0x11cc] ss:$16 sps:$4 sm:$0xff]  }
 0x46a   :  { %v17165_v47 = vld [vmem:[%s25046_s4 + $0x13cc] ss:$16 sps:$4 sm:$0xff]   ;;  %v17163_v39 = vld [vmem:[%s25046_s4 + $0x13c8] ss:$16 sps:$4 sm:$0xff]  }
 0x46c   :  { %7707 = vmatpush1.bf16.msra.mxu0 %v17148_v59  ;;  %7780 = vmatpush1.bf16.msra.mxu1 %v17151_v49  ;;  %v17160_v49 = vld [vmem:[%s25046_s4 + $0x11c8] ss:$16 sps:$4 sm:$0xff]   ;;  %v17171_v59 = vld [vmem:[%s25046_s4 + $0x13ac] ss:$16 sps:$4 sm:$0xff]  }
 0x46d   :  { %7708 = vmatprep.subr.bf16.mxu0 %v17156_v32  ;;  %7781 = vmatprep.subr.bf16.mxu1 %v17159_v58  ;;  %v17166_v32 = vld [vmem:[%s25046_s4 + $0x11a8] ss:$16 sps:$4 sm:$0xff]  }
 0x46e   :  { %v17169_v58 = vld [vmem:[%s25046_s4 + $0x13a8] ss:$16 sps:$4 sm:$0xff]  }
 0x470   :  { %7709 = vmatpush2.bf16.msra.mxu0 %v17154_v2  ;;  %7782 = vmatpush2.bf16.msra.mxu1 %v17157_v12  ;;  %v17174_v2 = vld [vmem:[%s25046_s4 + $0x118c] ss:$16 sps:$4 sm:$0xff]  }
 0x471   :  { %7710 = vmatprep.subr.bf16.mxu0 %v17162_v53  ;;  %7783 = vmatprep.subr.bf16.mxu1 %v17165_v47  ;;  %v17177_v12 = vld [vmem:[%s25046_s4 + $0x138c] ss:$16 sps:$4 sm:$0xff]   ;;  %v17172_v53 = vld [vmem:[%s25046_s4 + $0x1188] ss:$16 sps:$4 sm:$0xff]  }
 0x472   :  { %v17175_v47 = vld [vmem:[%s25046_s4 + $0x1388] ss:$16 sps:$4 sm:$0xff]  }
 0x474   :  { %7711 = vmatpush2.bf16.msra.mxu0 %v17160_v49  ;;  %7784 = vmatpush2.bf16.msra.mxu1 %v17163_v39  ;;  %v17180_v49 = vld [vmem:[%s25046_s4 + $0x116c] ss:$16 sps:$4 sm:$0xff]  }
 0x475   :  { %7712 = vmatprep.subr.bf16.mxu0 %v17168_v15  ;;  %7785 = vmatprep.subr.bf16.mxu1 %v17171_v59  ;;  %v17183_v39 = vld [vmem:[%s25046_s4 + $0x136c] ss:$16 sps:$4 sm:$0xff]   ;;  %v17178_v15 = vld [vmem:[%s25046_s4 + $0x1168] ss:$16 sps:$4 sm:$0xff]  }
 0x476   :  { %v17181_v59 = vld [vmem:[%s25046_s4 + $0x1368] ss:$16 sps:$4 sm:$0xff]  }
 0x478   :  { %7713 = vmatpush2.bf16.msra.mxu0 %v17166_v32  ;;  %7786 = vmatpush2.bf16.msra.mxu1 %v17169_v58  ;;  %v17186_v32 = vld [vmem:[%s25046_s4 + $0x114c] ss:$16 sps:$4 sm:$0xff]  }
 0x479   :  { %7714 = vmatprep.subr.bf16.mxu0 %v17174_v2  ;;  %7787 = vmatprep.subr.bf16.mxu1 %v17177_v12  ;;  %v17189_v58 = vld [vmem:[%s25046_s4 + $0x134c] ss:$16 sps:$4 sm:$0xff]   ;;  %v17184_v2 = vld [vmem:[%s25046_s4 + $0x1148] ss:$16 sps:$4 sm:$0xff]  }
 0x47a   :  { %v17187_v12 = vld [vmem:[%s25046_s4 + $0x1348] ss:$16 sps:$4 sm:$0xff]  }
 0x47c   :  { %7715 = vmatpush2.bf16.msra.mxu0 %v17172_v53  ;;  %7788 = vmatpush2.bf16.msra.mxu1 %v17175_v47  ;;  %v17192_v53 = vld [vmem:[%s25046_s4 + $0x112c] ss:$16 sps:$4 sm:$0xff]  }
 0x47d   :  { %7716 = vmatprep.subr.bf16.mxu0 %v17180_v49  ;;  %7789 = vmatprep.subr.bf16.mxu1 %v17183_v39  ;;  %v17195_v47 = vld [vmem:[%s25046_s4 + $0x132c] ss:$16 sps:$4 sm:$0xff]   ;;  %v17190_v49 = vld [vmem:[%s25046_s4 + $0x1128] ss:$16 sps:$4 sm:$0xff]  }
 0x47e   :  { %v17193_v39 = vld [vmem:[%s25046_s4 + $0x1328] ss:$16 sps:$4 sm:$0xff]  }
 0x480   :  { %7717 = vmatpush2.bf16.msra.mxu0 %v17178_v15  ;;  %7790 = vmatpush2.bf16.msra.mxu1 %v17181_v59  ;;  %v17198_v15 = vld [vmem:[%s25046_s4 + $0x110c] ss:$16 sps:$4 sm:$0xff]  }
 0x481   :  { %7718 = vmatprep.subr.bf16.mxu0 %v17186_v32  ;;  %7791 = vmatprep.subr.bf16.mxu1 %v17189_v58  ;;  %v17201_v59 = vld [vmem:[%s25046_s4 + $0x130c] ss:$16 sps:$4 sm:$0xff]   ;;  %v17196_v32 = vld [vmem:[%s25046_s4 + $0x1108] ss:$16 sps:$4 sm:$0xff]  }
 0x482   :  { %v17199_v58 = vld [vmem:[%s25046_s4 + $0x1308] ss:$16 sps:$4 sm:$0xff]  }
 0x484   :  { %7719 = vmatpush2.bf16.msra.mxu0 %v17184_v2  ;;  %7792 = vmatpush2.bf16.msra.mxu1 %v17187_v12  ;;  %v17204_v2 = vld [vmem:[%s25046_s4 + $0x14ec] ss:$16 sps:$4 sm:$0xff]  }
 0x485   :  { %7720 = vmatprep.subr.bf16.mxu0 %v17192_v53  ;;  %7793 = vmatprep.subr.bf16.mxu1 %v17195_v47  ;;  %v17207_v12 = vld [vmem:[%s25046_s4 + $0x16ec] ss:$16 sps:$4 sm:$0xff]   ;;  %v21959_v53 = vpop.f32.mrf.mxu0  ;;  %v21961_v47 = vpop.f32.mrf.mxu1 }
 0x486   :  { %25491 = vst [vmem:[#allocation92_spill] sm:$0xff] %v21959_v53  ;;  %25492 = vst [vmem:[#allocation94_spill] sm:$0xff] %v21961_v47 }
 0x488   :  { %7721 = vmatpush2.bf16.msra.mxu0 %v17190_v49  ;;  %7794 = vmatpush2.bf16.msra.mxu1 %v17193_v39 }
 0x489   :  { %7722 = vmatprep.subr.bf16.mxu0 %v17198_v15  ;;  %7795 = vmatprep.subr.bf16.mxu1 %v17201_v59  ;;  %v17202_v15 = vld [vmem:[%s25046_s4 + $0x14e8] ss:$16 sps:$4 sm:$0xff]  }
 0x48a   :  { %v17205_v59 = vld [vmem:[%s25046_s4 + $0x16e8] ss:$16 sps:$4 sm:$0xff]  }
 0x48c   :  { %7723 = vmatpush2.bf16.msra.mxu0 %v17196_v32  ;;  %7796 = vmatpush2.bf16.msra.mxu1 %v17199_v58  ;;  %v5494_v49 = vpop.f32.mrf.mxu0  ;;  %v5567_v39 = vpop.f32.mrf.mxu1  ;;  %v17210_v32 = vld [vmem:[%s25046_s4 + $0x14cc] ss:$16 sps:$4 sm:$0xff]  }
 0x48d   :  { %v5495_v42 = vadd.f32 %v5494_v49, %v21715_v50  ;;  %7838 = vmatprep.subr.bf16.mxu0 %v17204_v2  ;;  %7911 = vmatprep.subr.bf16.mxu1 %v17207_v12  ;;  %v17213_v50 = vld [vmem:[%s25046_s4 + $0x16cc] ss:$16 sps:$4 sm:$0xff]  }
 0x48e   :  { %v5496_v38 = vpop.f32.mrf.mxu0  ;;  %v5569_v53 = vpop.f32.mrf.mxu1 }
 0x48f   :  { %v21976_v58 = vadd.f32 %v5567_v39, %v5495_v42  ;;  %7725 = vmatmul.mubr.bf16.vlgmr.msra.gmra.mxu0 %v20358_v6  ;;  %7798 = vmatmul.mubr.bf16.vlgmr.msra.gmra.mxu1 %v20360_v21  ;;  %v5497_v2 = vadd.f32 %v5496_v38, %v21731_v36  ;;  %v17208_v42 = vld [vmem:[%s25046_s4 + $0x14c8] ss:$16 sps:$4 sm:$0xff]  }
 0x490   :  { %7734 = vmatprep.mubr.bf16.mxu0 %v20380_v20  ;;  %7807 = vmatprep.mubr.bf16.mxu1 %v20390_v10  ;;  %v5498_v12 = vpop.f32.mrf.mxu0  ;;  %v5571_v49 = vpop.f32.mrf.mxu1  ;;  %v17211_v38 = vld [vmem:[%s25046_s4 + $0x16c8] ss:$16 sps:$4 sm:$0xff]  }
 0x491   :  { %25493 = vst [vmem:[#allocation76_spill] sm:$0xff] %v21976_v58  ;;  %7839 = vmatpush1.bf16.msra.mxu0 %v17202_v15  ;;  %7912 = vmatpush1.bf16.msra.mxu1 %v17205_v59  ;;  %v21983_v47 = vadd.f32 %v5569_v53, %v5497_v2  ;;  %v5499_v54 = vadd.f32 %v5498_v12, %v21735_v0  ;;  %v17216_v53 = vld [vmem:[%s25046_s4 + $0x14ac] ss:$16 sps:$4 sm:$0xff]   ;;  %v25130_v12 = vrot.slane %v21976_v58, 7 }
 0x492   :  { %7840 = vmatprep.subr.bf16.mxu0 %v17210_v32  ;;  %7913 = vmatprep.subr.bf16.mxu1 %v17213_v50  ;;  %v21992_v36 = vpop.f32.mrf.mxu0  ;;  %v21994_v39 = vpop.f32.mrf.mxu1  ;;  %v17219_v0 = vld [vmem:[%s25046_s4 + $0x16ac] ss:$16 sps:$4 sm:$0xff]   ;;  %v17214_v50 = vld [vmem:[%s25046_s4 + $0x14a8] ss:$16 sps:$4 sm:$0xff]  }
 0x493   :  { %25494 = vst [vmem:[#allocation96_spill] sm:$0xff] %v21983_v47  ;;  %25495 = vst [vmem:[#allocation93_spill] sm:$0xff] %v21992_v36  ;;  %v5572_v15 = vadd.f32 %v5571_v49, %v5499_v54 }
 0x494   :  { %25496 = vst [vmem:[#allocation45_spill] sm:$0xff] %v21994_v39  ;;  %v5504_v59 = vpop.f32.mrf.mxu0  ;;  %v5577_v2 = vpop.f32.mrf.mxu1  ;;  %v17217_v39 = vld [vmem:[%s25046_s4 + $0x16a8] ss:$16 sps:$4 sm:$0xff]  }
 0x495   :  { %v8024_v47 = vrot.slane %v5572_v15, 7  ;;  %7841 = vmatpush1.bf16.msra.mxu0 %v17208_v42  ;;  %7914 = vmatpush1.bf16.msra.mxu1 %v17211_v38  ;;  %v5505_v32 = vadd.f32 %v5504_v59, %v21753_v9  ;;  %v17222_v15 = vld [vmem:[%s25046_s4 + $0x148c] ss:$16 sps:$4 sm:$0xff]  }
 0x496   :  { %7842 = vmatprep.subr.bf16.mxu0 %v17216_v53  ;;  %7915 = vmatprep.subr.bf16.mxu1 %v17219_v0  ;;  %v5506_v54 = vpop.f32.mrf.mxu0  ;;  %v5579_v49 = vpop.f32.mrf.mxu1  ;;  %v17225_v9 = vld [vmem:[%s25046_s4 + $0x168c] ss:$16 sps:$4 sm:$0xff]  }
 0x497   :  { %v5578_v42 = vadd.f32 %v5577_v2, %v5505_v32  ;;  %7735 = vmatmul.mubr.bf16.gmra.mxu0 %v20410_v13  ;;  %7808 = vmatmul.mubr.bf16.gmra.mxu1 %v20426_v40  ;;  %v5507_v38 = vadd.f32 %v5506_v54, %v21769_v7  ;;  %v22022_v53 = vsel %vm1502_vm1, %v25130_v12, %v8024_v47  ;;  %v17220_v7 = vld [vmem:[%s25046_s4 + $0x1488] ss:$16 sps:$4 sm:$0xff]  }
 0x498   :  { %25497 = vst [vmem:[#allocation95_spill] sm:$0xff] %v22022_v53  ;;  %7744 = vmatprep.mubr.bf16.mxu0 %v20428_v24  ;;  %7817 = vmatprep.mubr.bf16.mxu1 %v20432_v45  ;;  %v5508_v0 = vpop.f32.mrf.mxu0  ;;  %v5581_v59 = vpop.f32.mrf.mxu1  ;;  %v17223_v54 = vld [vmem:[%s25046_s4 + $0x1688] ss:$16 sps:$4 sm:$0xff]  }
 0x499   :  { %v8032_v36 = vrot.slane %v5578_v42, 7  ;;  %7843 = vmatpush1.bf16.msra.mxu0 %v17214_v50  ;;  %7916 = vmatpush1.bf16.msra.mxu1 %v17217_v39  ;;  %v22026_v2 = vadd.f32 %v5579_v49, %v5507_v38  ;;  %v5509_v32 = vadd.f32 %v5508_v0, %v21773_v34  ;;  %v17228_v39 = vld [vmem:[%s25046_s4 + $0x146c] ss:$16 sps:$4 sm:$0xff]   ;;  %v17226_v0 = vld [vmem:[%s25046_s4 + $0x1468] ss:$16 sps:$4 sm:$0xff]  }
 0x49a   :  { %7844 = vmatprep.subr.bf16.mxu0 %v17222_v15  ;;  %7917 = vmatprep.subr.bf16.mxu1 %v17225_v9  ;;  %v22035_v12 = vpop.f32.mrf.mxu0  ;;  %v22037_v53 = vpop.f32.mrf.mxu1  ;;  %v17231_v34 = vld [vmem:[%s25046_s4 + $0x166c] ss:$16 sps:$4 sm:$0xff]  }
 0x49b   :  { %25498 = vst [vmem:[#allocation7_spill] sm:$0xff] %v22026_v2  ;;  %25499 = vst [vmem:[#allocation30_spill] sm:$0xff] %v22035_v12  ;;  %v5582_v50 = vadd.f32 %v5581_v59, %v5509_v32  ;;  %v22046_v49 = vsel %vm1502_vm1, %v8024_v47, %v8032_v36  ;;  %v17229_v2 = vld [vmem:[%s25046_s4 + $0x1668] ss:$16 sps:$4 sm:$0xff]   ;;  %v17234_v32 = vld [vmem:[%s25046_s4 + $0x144c] ss:$16 sps:$4 sm:$0xff]  }
 0x49c   :  { %25500 = vst [vmem:[#allocation33_spill] sm:$0xff] %v22037_v53  ;;  %25501 = vst [vmem:[#allocation31_spill] sm:$0xff] %v22046_v49  ;;  %v5514_v42 = vpop.f32.mrf.mxu0  ;;  %v5587_v38 = vpop.f32.mrf.mxu1  ;;  %v17331_v53 = vld [vmem:[%s25046_s4 + $0xa40] ss:$16 sps:$4 sm:$0xff]  }
 0x49d   :  { %v8040_v15 = vrot.slane %v5582_v50, 7  ;;  %7845 = vmatpush1.bf16.msra.mxu0 %v17220_v7  ;;  %7918 = vmatpush1.bf16.msra.mxu1 %v17223_v54  ;;  %v5515_v9 = vadd.f32 %v5514_v42, %v21791_v31  ;;  %v17237_v31 = vld [vmem:[%s25046_s4 + $0x164c] ss:$16 sps:$4 sm:$0xff]  }
 0x49e   :  { %7846 = vmatprep.subr.bf16.mxu0 %v17228_v39  ;;  %7919 = vmatprep.subr.bf16.mxu1 %v17231_v34  ;;  %v5516_v59 = vpop.f32.mrf.mxu0  ;;  %v5589_v47 = vpop.f32.mrf.mxu1 }
 0x49f   :  { %v5588_v7 = vadd.f32 %v5587_v38, %v5515_v9  ;;  %7745 = vmatmul.mubr.bf16.gmra.mxu0 %v20483_v55  ;;  %7818 = vmatmul.mubr.bf16.gmra.mxu1 %v20485_v26  ;;  %v5517_v54 = vadd.f32 %v5516_v59, %v21807_v22  ;;  %v22065_v39 = vsel %vm1502_vm1, %v8032_v36, %v8040_v15  ;;  %v17232_v22 = vld [vmem:[%s25046_s4 + $0x1448] ss:$16 sps:$4 sm:$0xff]  }
 0x4a0   :  { %25502 = vst [vmem:[#allocation34_spill] sm:$0xff] %v22065_v39  ;;  %7754 = vmatprep.mubr.bf16.mxu0 %v20500_v23  ;;  %7827 = vmatprep.mubr.bf16.mxu1 %v20512_v41  ;;  %v5518_v34 = vpop.f32.mrf.mxu0  ;;  %v5591_v50 = vpop.f32.mrf.mxu1  ;;  %v17235_v36 = vld [vmem:[%s25046_s4 + $0x1648] ss:$16 sps:$4 sm:$0xff]  }
 0x4a1   :  { %v8048_v42 = vrot.slane %v5588_v7, 7  ;;  %7847 = vmatpush1.bf16.msra.mxu0 %v17226_v0  ;;  %7920 = vmatpush1.bf16.msra.mxu1 %v17229_v2  ;;  %v22069_v49 = vadd.f32 %v5589_v47, %v5517_v54  ;;  %v5519_v38 = vadd.f32 %v5518_v34, %v21811_v1  ;;  %v17240_v2 = vld [vmem:[%s25046_s4 + $0x142c] ss:$16 sps:$4 sm:$0xff]   ;;  %v17238_v34 = vld [vmem:[%s25046_s4 + $0x1428] ss:$16 sps:$4 sm:$0xff]  }
 0x4a2   :  { %7848 = vmatprep.subr.bf16.mxu0 %v17234_v32  ;;  %7921 = vmatprep.subr.bf16.mxu1 %v17237_v31  ;;  %v22078_v9 = vpop.f32.mrf.mxu0  ;;  %v22080_v59 = vpop.f32.mrf.mxu1  ;;  %v17243_v1 = vld [vmem:[%s25046_s4 + $0x162c] ss:$16 sps:$4 sm:$0xff]   ;;  %v17241_v39 = vld [vmem:[%s25046_s4 + $0x1628] ss:$16 sps:$4 sm:$0xff]  }
 0x4a3   :  { %25503 = vst [vmem:[#allocation41_spill] sm:$0xff] %v22069_v49  ;;  %25504 = vst [vmem:[#allocation8_spill] sm:$0xff] %v22078_v9  ;;  %v5592_v0 = vadd.f32 %v5591_v50, %v5519_v38  ;;  %v22089_v47 = vsel %vm1502_vm1, %v8040_v15, %v8048_v42  ;;  %v17246_v38 = vld [vmem:[%s25046_s4 + $0x140c] ss:$16 sps:$4 sm:$0xff]   ;;  %v17330_v9 = vld [vmem:[%s25046_s4 + $0x844] ss:$16 sps:$4 sm:$0xff]  }
 0x4a4   :  { %25505 = vst [vmem:[#allocation48_spill] sm:$0xff] %v22080_v59  ;;  %25506 = vst [vmem:[#allocation47_spill] sm:$0xff] %v22089_v47  ;;  %v5524_v7 = vpop.f32.mrf.mxu0  ;;  %v5597_v54 = vpop.f32.mrf.mxu1 }
 0x4a5   :  { %v8056_v32 = vrot.slane %v5592_v0, 7  ;;  %7849 = vmatpush1.bf16.msra.mxu0 %v17232_v22  ;;  %7922 = vmatpush1.bf16.msra.mxu1 %v17235_v36  ;;  %v5525_v31 = vadd.f32 %v5524_v7, %v21829_v5  ;;  %v17249_v5 = vld [vmem:[%s25046_s4 + $0x160c] ss:$16 sps:$4 sm:$0xff]  }
 0x4a6   :  { %7850 = vmatprep.subr.bf16.mxu0 %v17240_v2  ;;  %7923 = vmatprep.subr.bf16.mxu1 %v17243_v1  ;;  %v5526_v50 = vpop.f32.mrf.mxu0  ;;  %v5599_v15 = vpop.f32.mrf.mxu1 }
 0x4a7   :  { %v5598_v22 = vadd.f32 %v5597_v54, %v5525_v31  ;;  %7755 = vmatmul.mubr.bf16.gmra.mxu0 %v20561_v48  ;;  %7828 = vmatmul.mubr.bf16.gmra.mxu1 %v20563_v60  ;;  %v5527_v36 = vadd.f32 %v5526_v50, %v21845_v16  ;;  %v22108_v2 = vsel %vm1502_vm1, %v8048_v42, %v8056_v32  ;;  %v17244_v31 = vld [vmem:[%s25046_s4 + $0x1408] ss:$16 sps:$4 sm:$0xff]  }
 0x4a8   :  { %25507 = vst [vmem:[#allocation49_spill] sm:$0xff] %v22108_v2  ;;  %7870 = vmatprep.mubr.bf16.mxu0 %v20571_v33  ;;  %7943 = vmatprep.mubr.bf16.mxu1 %v20583_v35  ;;  %v5528_v1 = vpop.f32.mrf.mxu0  ;;  %v17247_v16 = vld [vmem:[%s25046_s4 + $0x1608] ss:$16 sps:$4 sm:$0xff]   ;;  %v5601_v42 = vpop.f32.mrf.mxu1 }
 0x4a9   :  { %v8064_v0 = vrot.slane %v5598_v22, 7  ;;  %7851 = vmatpush1.bf16.msra.mxu0 %v17238_v34  ;;  %7924 = vmatpush1.bf16.msra.mxu1 %v17241_v39  ;;  %v22112_v7 = vadd.f32 %v5599_v15, %v5527_v36  ;;  %v5529_v54 = vadd.f32 %v5528_v1, %v21849_v17  ;;  %v17252_v34 = vld [vmem:[%s25046_s4 + $0x15ec] ss:$16 sps:$4 sm:$0xff]   ;;  %v17256_v1 = vld [vmem:[%s25046_s4 + $0x15c8] ss:$16 sps:$4 sm:$0xff]  }
 0x4aa   :  { %7852 = vmatprep.subr.bf16.mxu0 %v17246_v38  ;;  %7925 = vmatprep.subr.bf16.mxu1 %v17249_v5  ;;  %v17255_v39 = vld [vmem:[%s25046_s4 + $0x17ec] ss:$16 sps:$4 sm:$0xff]   ;;  %v17250_v38 = vld [vmem:[%s25046_s4 + $0x15e8] ss:$16 sps:$4 sm:$0xff]  }
 0x4ab   :  { %25508 = vst [vmem:[#allocation42_spill] sm:$0xff] %v22112_v7  ;;  %v5602_v17 = vadd.f32 %v5601_v42, %v5529_v54  ;;  %v22128_v50 = vsel %vm1502_vm1, %v8056_v32, %v8064_v0  ;;  %v17253_v5 = vld [vmem:[%s25046_s4 + $0x17e8] ss:$16 sps:$4 sm:$0xff]   ;;  %v17258_v22 = vld [vmem:[%s25046_s4 + $0x15cc] ss:$16 sps:$4 sm:$0xff]  }
 0x4ac   :  { %25509 = vst [vmem:[#allocation9_spill] sm:$0xff] %v22128_v50  ;;  %v17261_v32 = vld [vmem:[%s25046_s4 + $0x17cc] ss:$16 sps:$4 sm:$0xff]   ;;  %v17259_v54 = vld [vmem:[%s25046_s4 + $0x17c8] ss:$16 sps:$4 sm:$0xff]  }
 0x4ad   :  { %v8072_v15 = vrot.slane %v5602_v17, 7  ;;  %7853 = vmatpush1.bf16.msra.mxu0 %v17244_v31  ;;  %7926 = vmatpush1.bf16.msra.mxu1 %v17247_v16  ;;  %v17264_v31 = vld [vmem:[%s25046_s4 + $0x15ac] ss:$16 sps:$4 sm:$0xff]   ;;  %v17262_v16 = vld [vmem:[%s25046_s4 + $0x15a8] ss:$16 sps:$4 sm:$0xff]  }
 0x4ae   :  { %7854 = vmatprep.subr.bf16.mxu0 %v17252_v34  ;;  %7927 = vmatprep.subr.bf16.mxu1 %v17255_v39  ;;  %v17265_v42 = vld [vmem:[%s25046_s4 + $0x17a8] ss:$16 sps:$4 sm:$0xff]   ;;  %v17270_v34 = vld [vmem:[%s25046_s4 + $0x158c] ss:$16 sps:$4 sm:$0xff]   ;;  %v17318_v7 = vld [vmem:[%s25046_s4 + $0x884] ss:$16 sps:$4 sm:$0xff]  }
 0x4af   :  { %v22143_v36 = vsel %vm1502_vm1, %v8064_v0, %v8072_v15  ;;  %v17267_v0 = vld [vmem:[%s25046_s4 + $0x17ac] ss:$16 sps:$4 sm:$0xff]   ;;  %v17268_v17 = vld [vmem:[%s25046_s4 + $0x1588] ss:$16 sps:$4 sm:$0xff]  }
 0x4b0   :  { %25510 = vst [vmem:[#allocation46_spill] sm:$0xff] %v22143_v36  ;;  %v17273_v39 = vld [vmem:[%s25046_s4 + $0x178c] ss:$16 sps:$4 sm:$0xff]   ;;  %v17271_v15 = vld [vmem:[%s25046_s4 + $0x1788] ss:$16 sps:$4 sm:$0xff]  }
 0x4b1   :  { %7855 = vmatpush2.bf16.msra.mxu0 %v17250_v38  ;;  %7928 = vmatpush2.bf16.msra.mxu1 %v17253_v5  ;;  %v17276_v38 = vld [vmem:[%s25046_s4 + $0x156c] ss:$16 sps:$4 sm:$0xff]   ;;  %v17307_v36 = vld [vmem:[%s25046_s4 + $0xac0] ss:$16 sps:$4 sm:$0xff]  }
 0x4b2   :  { %7856 = vmatprep.subr.bf16.mxu0 %v17258_v22  ;;  %7929 = vmatprep.subr.bf16.mxu1 %v17261_v32  ;;  %v17279_v5 = vld [vmem:[%s25046_s4 + $0x176c] ss:$16 sps:$4 sm:$0xff]   ;;  %v17274_v22 = vld [vmem:[%s25046_s4 + $0x1568] ss:$16 sps:$4 sm:$0xff]  }
 0x4b3   :  { %v17277_v32 = vld [vmem:[%s25046_s4 + $0x1768] ss:$16 sps:$4 sm:$0xff]  }
 0x4b5   :  { %7857 = vmatpush2.bf16.msra.mxu0 %v17256_v1  ;;  %7930 = vmatpush2.bf16.msra.mxu1 %v17259_v54  ;;  %v17282_v1 = vld [vmem:[%s25046_s4 + $0x154c] ss:$16 sps:$4 sm:$0xff]  }
 0x4b6   :  { %7858 = vmatprep.subr.bf16.mxu0 %v17264_v31  ;;  %7931 = vmatprep.subr.bf16.mxu1 %v17267_v0  ;;  %v17285_v54 = vld [vmem:[%s25046_s4 + $0x174c] ss:$16 sps:$4 sm:$0xff]   ;;  %v17280_v31 = vld [vmem:[%s25046_s4 + $0x1548] ss:$16 sps:$4 sm:$0xff]  }
 0x4b7   :  { %v17283_v0 = vld [vmem:[%s25046_s4 + $0x1748] ss:$16 sps:$4 sm:$0xff]  }
 0x4b9   :  { %7859 = vmatpush2.bf16.msra.mxu0 %v17262_v16  ;;  %7932 = vmatpush2.bf16.msra.mxu1 %v17265_v42  ;;  %v17288_v16 = vld [vmem:[%s25046_s4 + $0x152c] ss:$16 sps:$4 sm:$0xff]  }
 0x4ba   :  { %7860 = vmatprep.subr.bf16.mxu0 %v17270_v34  ;;  %7933 = vmatprep.subr.bf16.mxu1 %v17273_v39  ;;  %v17291_v42 = vld [vmem:[%s25046_s4 + $0x172c] ss:$16 sps:$4 sm:$0xff]   ;;  %v17286_v34 = vld [vmem:[%s25046_s4 + $0x1528] ss:$16 sps:$4 sm:$0xff]  }
 0x4bb   :  { %v17289_v39 = vld [vmem:[%s25046_s4 + $0x1728] ss:$16 sps:$4 sm:$0xff]  }
 0x4bd   :  { %7861 = vmatpush2.bf16.msra.mxu0 %v17268_v17  ;;  %7934 = vmatpush2.bf16.msra.mxu1 %v17271_v15  ;;  %v17294_v17 = vld [vmem:[%s25046_s4 + $0x150c] ss:$16 sps:$4 sm:$0xff]  }
 0x4be   :  { %7862 = vmatprep.subr.bf16.mxu0 %v17276_v38  ;;  %7935 = vmatprep.subr.bf16.mxu1 %v17279_v5  ;;  %v17297_v15 = vld [vmem:[%s25046_s4 + $0x170c] ss:$16 sps:$4 sm:$0xff]   ;;  %v17292_v38 = vld [vmem:[%s25046_s4 + $0x1508] ss:$16 sps:$4 sm:$0xff]  }
 0x4bf   :  { %v17295_v5 = vld [vmem:[%s25046_s4 + $0x1708] ss:$16 sps:$4 sm:$0xff]  }
 0x4c1   :  { %7863 = vmatpush2.bf16.msra.mxu0 %v17274_v22  ;;  %7936 = vmatpush2.bf16.msra.mxu1 %v17277_v32  ;;  %v17300_v22 = vld [vmem:[%s25046_s4 + $0x8e4] ss:$16 sps:$4 sm:$0xff]  }
 0x4c2   :  { %7864 = vmatprep.subr.bf16.mxu0 %v17282_v1  ;;  %7937 = vmatprep.subr.bf16.mxu1 %v17285_v54  ;;  %v17303_v32 = vld [vmem:[%s25046_s4 + $0xae4] ss:$16 sps:$4 sm:$0xff]   ;;  %v22229_v1 = vpop.f32.mrf.mxu0  ;;  %v22231_v54 = vpop.f32.mrf.mxu1 }
 0x4c3   :  { %25511 = vst [vmem:[#allocation10_spill] sm:$0xff] %v22229_v1  ;;  %25512 = vst [vmem:[#allocation50_spill] sm:$0xff] %v22231_v54  ;;  %v17319_v54 = vld [vmem:[%s25046_s4 + $0xa80] ss:$16 sps:$4 sm:$0xff]  }
 0x4c5   :  { %7865 = vmatpush2.bf16.msra.mxu0 %v17280_v31  ;;  %7938 = vmatpush2.bf16.msra.mxu1 %v17283_v0 }
 0x4c6   :  { %7866 = vmatprep.subr.bf16.mxu0 %v17288_v16  ;;  %7939 = vmatprep.subr.bf16.mxu1 %v17291_v42  ;;  %v17298_v42 = vld [vmem:[%s25046_s4 + $0x8e0] ss:$16 sps:$4 sm:$0xff]  }
 0x4c9   :  { %7867 = vmatpush2.bf16.msra.mxu0 %v17286_v34  ;;  %7940 = vmatpush2.bf16.msra.mxu1 %v17289_v39  ;;  %v17301_v34 = vld [vmem:[%s25046_s4 + $0xae0] ss:$16 sps:$4 sm:$0xff]  }
 0x4ca   :  { %7868 = vmatprep.subr.bf16.mxu0 %v17294_v17  ;;  %7941 = vmatprep.subr.bf16.mxu1 %v17297_v15  ;;  %v17306_v15 = vld [vmem:[%s25046_s4 + $0x8c4] ss:$16 sps:$4 sm:$0xff]  }
 0x4cd   :  { %7869 = vmatpush2.bf16.msra.mxu0 %v17292_v38  ;;  %7942 = vmatpush2.bf16.msra.mxu1 %v17295_v5  ;;  %v7434_v31 = vpop.f32.mrf.mxu0  ;;  %v7507_v0 = vpop.f32.mrf.mxu1  ;;  %v17309_v38 = vld [vmem:[%s25046_s4 + $0xac4] ss:$16 sps:$4 sm:$0xff]  }
 0x4ce   :  { %v22233_v16 = vadd.f32 %v7507_v0, %v7434_v31  ;;  %9424 = vmatprep.subr.bf16.mxu0 %v17300_v22  ;;  %9497 = vmatprep.subr.bf16.mxu1 %v17303_v32  ;;  %v17304_v0 = vld [vmem:[%s25046_s4 + $0x8c0] ss:$16 sps:$4 sm:$0xff]  }
 0x4cf   :  { %v7436_v39 = vpop.f32.mrf.mxu0  ;;  %v7509_v17 = vpop.f32.mrf.mxu1 }
 0x4d0   :  { %7871 = vmatmul.mubr.bf16.vlgmr.msra.gmra.mxu0 %v20549_v25  ;;  %7944 = vmatmul.mubr.bf16.vlgmr.msra.gmra.mxu1 %v20565_v44  ;;  %v22249_v5 = vadd.f32 %v7509_v17, %v7436_v39 }
 0x4d1   :  { %7880 = vmatprep.mubr.bf16.mxu0 %v20763_v37  ;;  %7953 = vmatprep.mubr.bf16.mxu1 %v20765_v30  ;;  %v7438_v22 = vpop.f32.mrf.mxu0  ;;  %v7511_v32 = vpop.f32.mrf.mxu1 }
 0x4d2   :  { %9425 = vmatpush1.bf16.msra.mxu0 %v17298_v42  ;;  %9498 = vmatpush1.bf16.msra.mxu1 %v17301_v34  ;;  %v22253_v31 = vadd.f32 %v7511_v32, %v7438_v22  ;;  %v17312_v42 = vld [vmem:[%s25046_s4 + $0x8a4] ss:$16 sps:$4 sm:$0xff]  }
 0x4d3   :  { %9426 = vmatprep.subr.bf16.mxu0 %v17306_v15  ;;  %9499 = vmatprep.subr.bf16.mxu1 %v17309_v38  ;;  %v22261_v39 = vpop.f32.mrf.mxu0  ;;  %v22263_v17 = vpop.f32.mrf.mxu1  ;;  %v17315_v34 = vld [vmem:[%s25046_s4 + $0xaa4] ss:$16 sps:$4 sm:$0xff]   ;;  %v17310_v15 = vld [vmem:[%s25046_s4 + $0x8a0] ss:$16 sps:$4 sm:$0xff]  }
 0x4d4   :  { %25513 = vst [vmem:[#allocation13_spill] sm:$0xff] %v22261_v39  ;;  %25514 = vst [vmem:[#allocation12_spill] sm:$0xff] %v22263_v17  ;;  %v17313_v38 = vld [vmem:[%s25046_s4 + $0xaa0] ss:$16 sps:$4 sm:$0xff]  }
 0x4d5   :  { %v7444_v22 = vpop.f32.mrf.mxu0  ;;  %v7517_v32 = vpop.f32.mrf.mxu1 }
 0x4d6   :  { %9427 = vmatpush1.bf16.msra.mxu0 %v17304_v0  ;;  %9500 = vmatpush1.bf16.msra.mxu1 %v17307_v36  ;;  %v22271_v50 = vadd.f32 %v7517_v32, %v7444_v22  ;;  %v17321_v36 = vld [vmem:[%s25046_s4 + $0xa84] ss:$16 sps:$4 sm:$0xff]   ;;  %v17316_v32 = vld [vmem:[%s25046_s4 + $0x880] ss:$16 sps:$4 sm:$0xff]  }
 0x4d7   :  { %9428 = vmatprep.subr.bf16.mxu0 %v17312_v42  ;;  %9501 = vmatprep.subr.bf16.mxu1 %v17315_v34  ;;  %v7446_v2 = vpop.f32.mrf.mxu0  ;;  %v7519_v47 = vpop.f32.mrf.mxu1 }
 0x4d8   :  { %7881 = vmatmul.mubr.bf16.gmra.mxu0 %v20601_v11  ;;  %7954 = vmatmul.mubr.bf16.gmra.mxu1 %v20615_v19  ;;  %v22287_v0 = vadd.f32 %v7519_v47, %v7446_v2 }
 0x4d9   :  { %7890 = vmatprep.mubr.bf16.mxu0 %v20803_v27  ;;  %7963 = vmatprep.mubr.bf16.mxu1 %v20805_v18  ;;  %v7448_v42 = vpop.f32.mrf.mxu0  ;;  %v7521_v34 = vpop.f32.mrf.mxu1 }
 0x4da   :  { %9429 = vmatpush1.bf16.msra.mxu0 %v17310_v15  ;;  %9502 = vmatpush1.bf16.msra.mxu1 %v17313_v38  ;;  %v22291_v22 = vadd.f32 %v7521_v34, %v7448_v42  ;;  %v17324_v15 = vld [vmem:[%s25046_s4 + $0x864] ss:$16 sps:$4 sm:$0xff]  }
 0x4db   :  { %9430 = vmatprep.subr.bf16.mxu0 %v17318_v7  ;;  %9503 = vmatprep.subr.bf16.mxu1 %v17321_v36  ;;  %v22299_v47 = vpop.f32.mrf.mxu0  ;;  %v22301_v2 = vpop.f32.mrf.mxu1  ;;  %v17327_v38 = vld [vmem:[%s25046_s4 + $0xa64] ss:$16 sps:$4 sm:$0xff]   ;;  %v17322_v7 = vld [vmem:[%s25046_s4 + $0x860] ss:$16 sps:$4 sm:$0xff]  }
 0x4dc   :  { %25515 = vst [vmem:[#allocation14_spill] sm:$0xff] %v22299_v47  ;;  %25516 = vst [vmem:[#allocation51_spill] sm:$0xff] %v22301_v2  ;;  %v17325_v36 = vld [vmem:[%s25046_s4 + $0xa60] ss:$16 sps:$4 sm:$0xff]  }
 0x4dd   :  { %v7454_v42 = vpop.f32.mrf.mxu0  ;;  %v7527_v34 = vpop.f32.mrf.mxu1  ;;  %v17343_v2 = vld [vmem:[%s25046_s4 + $0xa00] ss:$16 sps:$4 sm:$0xff]  }
 0x4de   :  { %9431 = vmatpush1.bf16.msra.mxu0 %v17316_v32  ;;  %9504 = vmatpush1.bf16.msra.mxu1 %v17319_v54  ;;  %v22309_v59 = vadd.f32 %v7527_v34, %v7454_v42  ;;  %v17333_v54 = vld [vmem:[%s25046_s4 + $0xa44] ss:$16 sps:$4 sm:$0xff]   ;;  %v17328_v34 = vld [vmem:[%s25046_s4 + $0x840] ss:$16 sps:$4 sm:$0xff]  }
 0x4df   :  { %9432 = vmatprep.subr.bf16.mxu0 %v17324_v15  ;;  %9505 = vmatprep.subr.bf16.mxu1 %v17327_v38  ;;  %v7456_v49 = vpop.f32.mrf.mxu0  ;;  %v7529_v1 = vpop.f32.mrf.mxu1 }
 0x4e0   :  { %7891 = vmatmul.mubr.bf16.gmra.mxu0 %v20641_v28  ;;  %7964 = vmatmul.mubr.bf16.gmra.mxu1 %v20647_v63  ;;  %v22325_v32 = vadd.f32 %v7529_v1, %v7456_v49 }
 0x4e1   :  { %7900 = vmatprep.mubr.bf16.mxu0 %v20839_v56  ;;  %7973 = vmatprep.mubr.bf16.mxu1 %v20841_v43  ;;  %v7458_v15 = vpop.f32.mrf.mxu0  ;;  %v7531_v38 = vpop.f32.mrf.mxu1 }
 0x4e2   :  { %9433 = vmatpush1.bf16.msra.mxu0 %v17322_v7  ;;  %9506 = vmatpush1.bf16.msra.mxu1 %v17325_v36  ;;  %v22329_v42 = vadd.f32 %v7531_v38, %v7458_v15  ;;  %v17336_v7 = vld [vmem:[%s25046_s4 + $0x824] ss:$16 sps:$4 sm:$0xff]  }
 0x4e3   :  { %9434 = vmatprep.subr.bf16.mxu0 %v17330_v9  ;;  %9507 = vmatprep.subr.bf16.mxu1 %v17333_v54  ;;  %v22337_v49 = vpop.f32.mrf.mxu0  ;;  %v22339_v1 = vpop.f32.mrf.mxu1  ;;  %v17339_v36 = vld [vmem:[%s25046_s4 + $0xa24] ss:$16 sps:$4 sm:$0xff]   ;;  %v17334_v9 = vld [vmem:[%s25046_s4 + $0x820] ss:$16 sps:$4 sm:$0xff]  }
 0x4e4   :  { %25517 = vst [vmem:[#allocation52_spill] sm:$0xff] %v22337_v49  ;;  %25518 = vst [vmem:[#allocation11_spill] sm:$0xff] %v22339_v1  ;;  %v17337_v54 = vld [vmem:[%s25046_s4 + $0xa20] ss:$16 sps:$4 sm:$0xff]   ;;  %v17342_v49 = vld [vmem:[%s25046_s4 + $0x804] ss:$16 sps:$4 sm:$0xff]  }
 0x4e5   :  { %v7464_v15 = vpop.f32.mrf.mxu0  ;;  %v7537_v38 = vpop.f32.mrf.mxu1 }
 0x4e6   :  { %9435 = vmatpush1.bf16.msra.mxu0 %v17328_v34  ;;  %9508 = vmatpush1.bf16.msra.mxu1 %v17331_v53  ;;  %v22347_v12 = vadd.f32 %v7537_v38, %v7464_v15  ;;  %v17345_v53 = vld [vmem:[%s25046_s4 + $0xa04] ss:$16 sps:$4 sm:$0xff]   ;;  %v17340_v38 = vld [vmem:[%s25046_s4 + $0x800] ss:$16 sps:$4 sm:$0xff]  }
 0x4e7   :  { %9436 = vmatprep.subr.bf16.mxu0 %v17336_v7  ;;  %9509 = vmatprep.subr.bf16.mxu1 %v17339_v36  ;;  %v7466_v58 = vpop.f32.mrf.mxu0  ;;  %v7539_v1 = vpop.f32.mrf.mxu1 }
 0x4e8   :  { %7901 = vmatmul.mubr.bf16.gmra.mxu0 %v20675_v46  ;;  %7974 = vmatmul.mubr.bf16.gmra.mxu1 %v20683_v29  ;;  %v22363_v34 = vadd.f32 %v7539_v1, %v7466_v58  ;;  %v17348_v58 = vld [vmem:[%s25046_s4 + $0x9e4] ss:$16 sps:$4 sm:$0xff]  }
 0x4e9   :  { %9456 = vmatprep.mubr.bf16.mxu0 %v20346_v61  ;;  %9529 = vmatprep.mubr.bf16.mxu1 %v20348_v4  ;;  %v7468_v7 = vpop.f32.mrf.mxu0  ;;  %v7541_v36 = vpop.f32.mrf.mxu1  ;;  %v17351_v1 = vld [vmem:[%s25046_s4 + $0xbe4] ss:$16 sps:$4 sm:$0xff]  }
 0x4ea   :  { %9437 = vmatpush1.bf16.msra.mxu0 %v17334_v9  ;;  %9510 = vmatpush1.bf16.msra.mxu1 %v17337_v54  ;;  %v22367_v15 = vadd.f32 %v7541_v36, %v7468_v7  ;;  %v17346_v9 = vld [vmem:[%s25046_s4 + $0x9e0] ss:$16 sps:$4 sm:$0xff]   ;;  %v17360_v36 = vld [vmem:[%s25046_s4 + $0x9a4] ss:$16 sps:$4 sm:$0xff]  }
 0x4eb   :  { %9438 = vmatprep.subr.bf16.mxu0 %v17342_v49  ;;  %9511 = vmatprep.subr.bf16.mxu1 %v17345_v53  ;;  %v17349_v54 = vld [vmem:[%s25046_s4 + $0xbe0] ss:$16 sps:$4 sm:$0xff]   ;;  %v17354_v49 = vld [vmem:[%s25046_s4 + $0x9c4] ss:$16 sps:$4 sm:$0xff]  }
 0x4ec   :  { %v17357_v53 = vld [vmem:[%s25046_s4 + $0xbc4] ss:$16 sps:$4 sm:$0xff]   ;;  %v17355_v7 = vld [vmem:[%s25046_s4 + $0xbc0] ss:$16 sps:$4 sm:$0xff]  }
 0x4ee   :  { %9439 = vmatpush1.bf16.msra.mxu0 %v17340_v38  ;;  %9512 = vmatpush1.bf16.msra.mxu1 %v17343_v2  ;;  %v17352_v2 = vld [vmem:[%s25046_s4 + $0x9c0] ss:$16 sps:$4 sm:$0xff]   ;;  %v17363_v38 = vld [vmem:[%s25046_s4 + $0xba4] ss:$16 sps:$4 sm:$0xff]  }
 0x4ef   :  { %9440 = vmatprep.subr.bf16.mxu0 %v17348_v58  ;;  %9513 = vmatprep.subr.bf16.mxu1 %v17351_v1  ;;  %v17358_v58 = vld [vmem:[%s25046_s4 + $0x9a0] ss:$16 sps:$4 sm:$0xff]  }
 0x4f0   :  { %v17361_v1 = vld [vmem:[%s25046_s4 + $0xba0] ss:$16 sps:$4 sm:$0xff]  }
 0x4f2   :  { %9441 = vmatpush2.bf16.msra.mxu0 %v17346_v9  ;;  %9514 = vmatpush2.bf16.msra.mxu1 %v17349_v54  ;;  %v17366_v9 = vld [vmem:[%s25046_s4 + $0x984] ss:$16 sps:$4 sm:$0xff]  }
 0x4f3   :  { %9442 = vmatprep.subr.bf16.mxu0 %v17354_v49  ;;  %9515 = vmatprep.subr.bf16.mxu1 %v17357_v53  ;;  %v17369_v54 = vld [vmem:[%s25046_s4 + $0xb84] ss:$16 sps:$4 sm:$0xff]   ;;  %v17364_v49 = vld [vmem:[%s25046_s4 + $0x980] ss:$16 sps:$4 sm:$0xff]  }
 0x4f4   :  { %v17367_v53 = vld [vmem:[%s25046_s4 + $0xb80] ss:$16 sps:$4 sm:$0xff]  }
 0x4f6   :  { %9443 = vmatpush2.bf16.msra.mxu0 %v17352_v2  ;;  %9516 = vmatpush2.bf16.msra.mxu1 %v17355_v7  ;;  %v17372_v2 = vld [vmem:[%s25046_s4 + $0x964] ss:$16 sps:$4 sm:$0xff]  }
 0x4f7   :  { %9444 = vmatprep.subr.bf16.mxu0 %v17360_v36  ;;  %9517 = vmatprep.subr.bf16.mxu1 %v17363_v38  ;;  %v17375_v7 = vld [vmem:[%s25046_s4 + $0xb64] ss:$16 sps:$4 sm:$0xff]   ;;  %v17370_v36 = vld [vmem:[%s25046_s4 + $0x960] ss:$16 sps:$4 sm:$0xff]  }
 0x4f8   :  { %v17373_v38 = vld [vmem:[%s25046_s4 + $0xb60] ss:$16 sps:$4 sm:$0xff]  }
 0x4fa   :  { %9445 = vmatpush2.bf16.msra.mxu0 %v17358_v58  ;;  %9518 = vmatpush2.bf16.msra.mxu1 %v17361_v1  ;;  %v17378_v58 = vld [vmem:[%s25046_s4 + $0x944] ss:$16 sps:$4 sm:$0xff]  }
 0x4fb   :  { %9446 = vmatprep.subr.bf16.mxu0 %v17366_v9  ;;  %9519 = vmatprep.subr.bf16.mxu1 %v17369_v54  ;;  %v17381_v1 = vld [vmem:[%s25046_s4 + $0xb44] ss:$16 sps:$4 sm:$0xff]   ;;  %v17376_v9 = vld [vmem:[%s25046_s4 + $0x940] ss:$16 sps:$4 sm:$0xff]  }
 0x4fc   :  { %v17379_v54 = vld [vmem:[%s25046_s4 + $0xb40] ss:$16 sps:$4 sm:$0xff]  }
 0x4fe   :  { %9447 = vmatpush2.bf16.msra.mxu0 %v17364_v49  ;;  %9520 = vmatpush2.bf16.msra.mxu1 %v17367_v53  ;;  %v17384_v49 = vld [vmem:[%s25046_s4 + $0x924] ss:$16 sps:$4 sm:$0xff]  }
 0x4ff   :  { %9448 = vmatprep.subr.bf16.mxu0 %v17372_v2  ;;  %9521 = vmatprep.subr.bf16.mxu1 %v17375_v7  ;;  %v17387_v53 = vld [vmem:[%s25046_s4 + $0xb24] ss:$16 sps:$4 sm:$0xff]   ;;  %v17382_v2 = vld [vmem:[%s25046_s4 + $0x920] ss:$16 sps:$4 sm:$0xff]  }
 0x500   :  { %v17385_v7 = vld [vmem:[%s25046_s4 + $0xb20] ss:$16 sps:$4 sm:$0xff]  }
 0x502   :  { %9449 = vmatpush2.bf16.msra.mxu0 %v17370_v36  ;;  %9522 = vmatpush2.bf16.msra.mxu1 %v17373_v38  ;;  %v17390_v36 = vld [vmem:[%s25046_s4 + $0x904] ss:$16 sps:$4 sm:$0xff]  }
 0x503   :  { %9450 = vmatprep.subr.bf16.mxu0 %v17378_v58  ;;  %9523 = vmatprep.subr.bf16.mxu1 %v17381_v1  ;;  %v17393_v38 = vld [vmem:[%s25046_s4 + $0xb04] ss:$16 sps:$4 sm:$0xff]   ;;  %v17388_v58 = vld [vmem:[%s25046_s4 + $0x900] ss:$16 sps:$4 sm:$0xff]  }
 0x504   :  { %v17391_v1 = vld [vmem:[%s25046_s4 + $0xb00] ss:$16 sps:$4 sm:$0xff]  }
 0x506   :  { %9451 = vmatpush2.bf16.msra.mxu0 %v17376_v9  ;;  %9524 = vmatpush2.bf16.msra.mxu1 %v17379_v54  ;;  %v17396_v9 = vld [vmem:[%s25046_s4 + $0xce4] ss:$16 sps:$4 sm:$0xff]  }
 0x507   :  { %9452 = vmatprep.subr.bf16.mxu0 %v17384_v49  ;;  %9525 = vmatprep.subr.bf16.mxu1 %v17387_v53  ;;  %v17399_v54 = vld [vmem:[%s25046_s4 + $0xee4] ss:$16 sps:$4 sm:$0xff]   ;;  %v22477_v49 = vpop.f32.mrf.mxu0  ;;  %v22479_v53 = vpop.f32.mrf.mxu1 }
 0x508   :  { %25519 = vst [vmem:[#allocation53_spill] sm:$0xff] %v22477_v49  ;;  %25520 = vst [vmem:[#allocation54_spill] sm:$0xff] %v22479_v53 }
 0x50a   :  { %9453 = vmatpush2.bf16.msra.mxu0 %v17382_v2  ;;  %9526 = vmatpush2.bf16.msra.mxu1 %v17385_v7 }
 0x50b   :  { %9454 = vmatprep.subr.bf16.mxu0 %v17390_v36  ;;  %9527 = vmatprep.subr.bf16.mxu1 %v17393_v38  ;;  %v17394_v36 = vld [vmem:[%s25046_s4 + $0xce0] ss:$16 sps:$4 sm:$0xff]  }
 0x50c   :  { %v17397_v38 = vld [vmem:[%s25046_s4 + $0xee0] ss:$16 sps:$4 sm:$0xff]  }
 0x50e   :  { %9455 = vmatpush2.bf16.msra.mxu0 %v17388_v58  ;;  %9528 = vmatpush2.bf16.msra.mxu1 %v17391_v1  ;;  %v7580_v2 = vpop.f32.mrf.mxu0  ;;  %v7653_v7 = vpop.f32.mrf.mxu1  ;;  %v17402_v58 = vld [vmem:[%s25046_s4 + $0xcc4] ss:$16 sps:$4 sm:$0xff]  }
 0x50f   :  { %v7581_v47 = vadd.f32 %v7580_v2, %v22233_v16  ;;  %9570 = vmatprep.subr.bf16.mxu0 %v17396_v9  ;;  %9643 = vmatprep.subr.bf16.mxu1 %v17399_v54  ;;  %v17405_v16 = vld [vmem:[%s25046_s4 + $0xec4] ss:$16 sps:$4 sm:$0xff]  }
 0x510   :  { %v7582_v17 = vpop.f32.mrf.mxu0  ;;  %v7655_v49 = vpop.f32.mrf.mxu1 }
 0x511   :  { %v7654_v1 = vadd.f32 %v7653_v7, %v7581_v47  ;;  %9457 = vmatmul.mubr.bf16.vlgmr.msra.gmra.mxu0 %v20358_v6  ;;  %9530 = vmatmul.mubr.bf16.vlgmr.msra.gmra.mxu1 %v20360_v21  ;;  %v7583_v9 = vadd.f32 %v7582_v17, %v22249_v5  ;;  %v17400_v47 = vld [vmem:[%s25046_s4 + $0xcc0] ss:$16 sps:$4 sm:$0xff]  }
 0x512   :  { %9466 = vmatprep.mubr.bf16.mxu0 %v20380_v20  ;;  %9539 = vmatprep.mubr.bf16.mxu1 %v20390_v10  ;;  %v7584_v54 = vpop.f32.mrf.mxu0  ;;  %v7657_v2 = vpop.f32.mrf.mxu1  ;;  %v17403_v5 = vld [vmem:[%s25046_s4 + $0xec0] ss:$16 sps:$4 sm:$0xff]  }
 0x513   :  { %9571 = vmatpush1.bf16.msra.mxu0 %v17394_v36  ;;  %9644 = vmatpush1.bf16.msra.mxu1 %v17397_v38  ;;  %v22499_v53 = vadd.f32 %v7655_v49, %v7583_v9  ;;  %v7585_v39 = vadd.f32 %v7584_v54, %v22253_v31  ;;  %v17408_v49 = vld [vmem:[%s25046_s4 + $0xca4] ss:$16 sps:$4 sm:$0xff]   ;;  %v10040_v54 = vrot.slane %v7654_v1, 1 }
 0x514   :  { %9572 = vmatprep.subr.bf16.mxu0 %v17402_v58  ;;  %9645 = vmatprep.subr.bf16.mxu1 %v17405_v16  ;;  %v22508_v17 = vpop.f32.mrf.mxu0  ;;  %v22510_v7 = vpop.f32.mrf.mxu1  ;;  %v17411_v31 = vld [vmem:[%s25046_s4 + $0xea4] ss:$16 sps:$4 sm:$0xff]   ;;  %v17406_v16 = vld [vmem:[%s25046_s4 + $0xca0] ss:$16 sps:$4 sm:$0xff]  }
 0x515   :  { %25521 = vst [vmem:[#allocation55_spill] sm:$0xff] %v22499_v53  ;;  %25522 = vst [vmem:[#allocation70_spill] sm:$0xff] %v22508_v17  ;;  %v7658_v36 = vadd.f32 %v7657_v2, %v7585_v39  ;;  %v17414_v1 = vld [vmem:[%s25046_s4 + $0xc84] ss:$16 sps:$4 sm:$0xff]  }
 0x516   :  { %25523 = vst [vmem:[#allocation58_spill] sm:$0xff] %v22510_v7  ;;  %v7590_v38 = vpop.f32.mrf.mxu0  ;;  %v7663_v9 = vpop.f32.mrf.mxu1  ;;  %v17409_v7 = vld [vmem:[%s25046_s4 + $0xea0] ss:$16 sps:$4 sm:$0xff]  }
 0x517   :  { %v10041_v53 = vrot.slane %v7658_v36, 1  ;;  %9573 = vmatpush1.bf16.msra.mxu0 %v17400_v47  ;;  %9646 = vmatpush1.bf16.msra.mxu1 %v17403_v5  ;;  %v7591_v58 = vadd.f32 %v7590_v38, %v22271_v50  ;;  %v17417_v50 = vld [vmem:[%s25046_s4 + $0xe84] ss:$16 sps:$4 sm:$0xff]  }
 0x518   :  { %9574 = vmatprep.subr.bf16.mxu0 %v17408_v49  ;;  %9647 = vmatprep.subr.bf16.mxu1 %v17411_v31  ;;  %v7592_v17 = vpop.f32.mrf.mxu0  ;;  %v7665_v39 = vpop.f32.mrf.mxu1 }
 0x519   :  { %v7664_v2 = vadd.f32 %v7663_v9, %v7591_v58  ;;  %9467 = vmatmul.mubr.bf16.gmra.mxu0 %v20410_v13  ;;  %9540 = vmatmul.mubr.bf16.gmra.mxu1 %v20426_v40  ;;  %v7593_v47 = vadd.f32 %v7592_v17, %v22287_v0  ;;  %v22535_v5 = vsel %vm2355_vm2, %v10040_v54, %v10041_v53  ;;  %v17412_v0 = vld [vmem:[%s25046_s4 + $0xc80] ss:$16 sps:$4 sm:$0xff]  }
 0x51a   :  { %25524 = vst [vmem:[#allocation61_spill] sm:$0xff] %v22535_v5  ;;  %9476 = vmatprep.mubr.bf16.mxu0 %v20428_v24  ;;  %9549 = vmatprep.mubr.bf16.mxu1 %v20432_v45  ;;  %v7594_v49 = vpop.f32.mrf.mxu0  ;;  %v7667_v31 = vpop.f32.mrf.mxu1  ;;  %v17415_v17 = vld [vmem:[%s25046_s4 + $0xe80] ss:$16 sps:$4 sm:$0xff]  }
 0x51b   :  { %v10052_v36 = vrot.slane %v7664_v2, 1  ;;  %9575 = vmatpush1.bf16.msra.mxu0 %v17406_v16  ;;  %9648 = vmatpush1.bf16.msra.mxu1 %v17409_v7  ;;  %v22539_v38 = vadd.f32 %v7665_v39, %v7593_v47  ;;  %v7595_v9 = vadd.f32 %v7594_v49, %v22291_v22  ;;  %v17420_v7 = vld [vmem:[%s25046_s4 + $0xc64] ss:$16 sps:$4 sm:$0xff]   ;;  %v17418_v49 = vld [vmem:[%s25046_s4 + $0xc60] ss:$16 sps:$4 sm:$0xff]  }
 0x51c   :  { %9576 = vmatprep.subr.bf16.mxu0 %v17414_v1  ;;  %9649 = vmatprep.subr.bf16.mxu1 %v17417_v50  ;;  %v22548_v54 = vpop.f32.mrf.mxu0  ;;  %v22550_v58 = vpop.f32.mrf.mxu1  ;;  %v17423_v22 = vld [vmem:[%s25046_s4 + $0xe64] ss:$16 sps:$4 sm:$0xff]   ;;  %v17421_v5 = vld [vmem:[%s25046_s4 + $0xe60] ss:$16 sps:$4 sm:$0xff]  }
 0x51d   :  { %25525 = vst [vmem:[#allocation17_spill] sm:$0xff] %v22539_v38  ;;  %25526 = vst [vmem:[#allocation62_spill] sm:$0xff] %v22548_v54  ;;  %v7668_v16 = vadd.f32 %v7667_v31, %v7595_v9  ;;  %v22559_v39 = vsel %vm2355_vm2, %v10041_v53, %v10052_v36  ;;  %v17426_v9 = vld [vmem:[%s25046_s4 + $0xc44] ss:$16 sps:$4 sm:$0xff]   ;;  %v17523_v38 = vld [vmem:[%s25046_s4 + $0xa48] ss:$16 sps:$4 sm:$0xff]  }
 0x51e   :  { %25527 = vst [vmem:[#allocation15_spill] sm:$0xff] %v22550_v58  ;;  %25528 = vst [vmem:[#allocation56_spill] sm:$0xff] %v22559_v39  ;;  %v7600_v2 = vpop.f32.mrf.mxu0  ;;  %v7673_v47 = vpop.f32.mrf.mxu1  ;;  %v17522_v58 = vld [vmem:[%s25046_s4 + $0x84c] ss:$16 sps:$4 sm:$0xff]  }
 0x51f   :  { %v10060_v1 = vrot.slane %v7668_v16, 1  ;;  %9577 = vmatpush1.bf16.msra.mxu0 %v17412_v0  ;;  %9650 = vmatpush1.bf16.msra.mxu1 %v17415_v17  ;;  %v7601_v50 = vadd.f32 %v7600_v2, %v22309_v59  ;;  %v17429_v59 = vld [vmem:[%s25046_s4 + $0xe44] ss:$16 sps:$4 sm:$0xff]  }
 0x520   :  { %9578 = vmatprep.subr.bf16.mxu0 %v17420_v7  ;;  %9651 = vmatprep.subr.bf16.mxu1 %v17423_v22  ;;  %v7602_v31 = vpop.f32.mrf.mxu0  ;;  %v7675_v53 = vpop.f32.mrf.mxu1 }
 0x521   :  { %v7674_v0 = vadd.f32 %v7673_v47, %v7601_v50  ;;  %9477 = vmatmul.mubr.bf16.gmra.mxu0 %v20483_v55  ;;  %9550 = vmatmul.mubr.bf16.gmra.mxu1 %v20485_v26  ;;  %v7603_v17 = vadd.f32 %v7602_v31, %v22325_v32  ;;  %v22578_v7 = vsel %vm2355_vm2, %v10052_v36, %v10060_v1  ;;  %v17424_v32 = vld [vmem:[%s25046_s4 + $0xc40] ss:$16 sps:$4 sm:$0xff]  }
 0x522   :  { %25529 = vst [vmem:[#allocation16_spill] sm:$0xff] %v22578_v7  ;;  %9486 = vmatprep.mubr.bf16.mxu0 %v20500_v23  ;;  %9559 = vmatprep.mubr.bf16.mxu1 %v20512_v41  ;;  %v7604_v22 = vpop.f32.mrf.mxu0  ;;  %v7677_v16 = vpop.f32.mrf.mxu1  ;;  %v17427_v36 = vld [vmem:[%s25046_s4 + $0xe40] ss:$16 sps:$4 sm:$0xff]  }
 0x523   :  { %v10068_v2 = vrot.slane %v7674_v0, 1  ;;  %9579 = vmatpush1.bf16.msra.mxu0 %v17418_v49  ;;  %9652 = vmatpush1.bf16.msra.mxu1 %v17421_v5  ;;  %v22582_v39 = vadd.f32 %v7675_v53, %v7603_v17  ;;  %v7605_v47 = vadd.f32 %v7604_v22, %v22329_v42  ;;  %v17432_v5 = vld [vmem:[%s25046_s4 + $0xc24] ss:$16 sps:$4 sm:$0xff]   ;;  %v17430_v22 = vld [vmem:[%s25046_s4 + $0xc20] ss:$16 sps:$4 sm:$0xff]  }
 0x524   :  { %9580 = vmatprep.subr.bf16.mxu0 %v17426_v9  ;;  %9653 = vmatprep.subr.bf16.mxu1 %v17429_v59  ;;  %v22591_v50 = vpop.f32.mrf.mxu0  ;;  %v22593_v31 = vpop.f32.mrf.mxu1  ;;  %v17435_v42 = vld [vmem:[%s25046_s4 + $0xe24] ss:$16 sps:$4 sm:$0xff]   ;;  %v17433_v7 = vld [vmem:[%s25046_s4 + $0xe20] ss:$16 sps:$4 sm:$0xff]  }
 0x525   :  { %25530 = vst [vmem:[#allocation57_spill] sm:$0xff] %v22582_v39  ;;  %25531 = vst [vmem:[#allocation72_spill] sm:$0xff] %v22591_v50  ;;  %v7678_v49 = vadd.f32 %v7677_v16, %v7605_v47  ;;  %v22602_v53 = vsel %vm2355_vm2, %v10060_v1, %v10068_v2  ;;  %v17438_v47 = vld [vmem:[%s25046_s4 + $0xc04] ss:$16 sps:$4 sm:$0xff]  }
 0x526   :  { %25532 = vst [vmem:[#allocation60_spill] sm:$0xff] %v22593_v31  ;;  %25533 = vst [vmem:[#allocation59_spill] sm:$0xff] %v22602_v53  ;;  %v7610_v0 = vpop.f32.mrf.mxu0  ;;  %v7683_v17 = vpop.f32.mrf.mxu1 }
 0x527   :  { %v10076_v9 = vrot.slane %v7678_v49, 1  ;;  %9581 = vmatpush1.bf16.msra.mxu0 %v17424_v32  ;;  %9654 = vmatpush1.bf16.msra.mxu1 %v17427_v36  ;;  %v7611_v59 = vadd.f32 %v7610_v0, %v22347_v12  ;;  %v17441_v12 = vld [vmem:[%s25046_s4 + $0xe04] ss:$16 sps:$4 sm:$0xff]  }
 0x528   :  { %9582 = vmatprep.subr.bf16.mxu0 %v17432_v5  ;;  %9655 = vmatprep.subr.bf16.mxu1 %v17435_v42  ;;  %v7612_v16 = vpop.f32.mrf.mxu0  ;;  %v7685_v1 = vpop.f32.mrf.mxu1 }
 0x529   :  { %v7684_v32 = vadd.f32 %v7683_v17, %v7611_v59  ;;  %9487 = vmatmul.mubr.bf16.gmra.mxu0 %v20561_v48  ;;  %9560 = vmatmul.mubr.bf16.gmra.mxu1 %v20563_v60  ;;  %v7613_v36 = vadd.f32 %v7612_v16, %v22363_v34  ;;  %v22621_v5 = vsel %vm2355_vm2, %v10068_v2, %v10076_v9  ;;  %v17436_v59 = vld [vmem:[%s25046_s4 + $0xc00] ss:$16 sps:$4 sm:$0xff]  }
 0x52a   :  { %25534 = vst [vmem:[#allocation82_spill] sm:$0xff] %v22621_v5  ;;  %9602 = vmatprep.mubr.bf16.mxu0 %v20571_v33  ;;  %9675 = vmatprep.mubr.bf16.mxu1 %v20583_v35  ;;  %v7614_v42 = vpop.f32.mrf.mxu0  ;;  %v17439_v34 = vld [vmem:[%s25046_s4 + $0xe00] ss:$16 sps:$4 sm:$0xff]   ;;  %v7687_v2 = vpop.f32.mrf.mxu1 }
 0x52b   :  { %v10084_v49 = vrot.slane %v7684_v32, 1  ;;  %9583 = vmatpush1.bf16.msra.mxu0 %v17430_v22  ;;  %9656 = vmatpush1.bf16.msra.mxu1 %v17433_v7  ;;  %v22625_v0 = vadd.f32 %v7685_v1, %v7613_v36  ;;  %v7615_v17 = vadd.f32 %v7614_v42, %v22367_v15  ;;  %v17444_v22 = vld [vmem:[%s25046_s4 + $0xde4] ss:$16 sps:$4 sm:$0xff]   ;;  %v17448_v42 = vld [vmem:[%s25046_s4 + $0xdc0] ss:$16 sps:$4 sm:$0xff]  }
 0x52c   :  { %9584 = vmatprep.subr.bf16.mxu0 %v17438_v47  ;;  %9657 = vmatprep.subr.bf16.mxu1 %v17441_v12  ;;  %v17447_v7 = vld [vmem:[%s25046_s4 + $0xfe4] ss:$16 sps:$4 sm:$0xff]   ;;  %v17442_v47 = vld [vmem:[%s25046_s4 + $0xde0] ss:$16 sps:$4 sm:$0xff]  }
 0x52d   :  { %25535 = vst [vmem:[#allocation83_spill] sm:$0xff] %v22625_v0  ;;  %v22640_v15 = vadd.f32 %v7687_v2, %v7615_v17  ;;  %v22643_v16 = vsel %vm2355_vm2, %v10076_v9, %v10084_v49  ;;  %v17445_v12 = vld [vmem:[%s25046_s4 + $0xfe0] ss:$16 sps:$4 sm:$0xff]   ;;  %v17450_v32 = vld [vmem:[%s25046_s4 + $0xdc4] ss:$16 sps:$4 sm:$0xff]  }
 0x52e   :  { %25537 = vst [vmem:[#allocation18_spill] sm:$0xff] %v22643_v16  ;;  %v17453_v9 = vld [vmem:[%s25046_s4 + $0xfc4] ss:$16 sps:$4 sm:$0xff]   ;;  %v17451_v17 = vld [vmem:[%s25046_s4 + $0xfc0] ss:$16 sps:$4 sm:$0xff]  }
 0x52f   :  { %25536 = vst [vmem:[#allocation40_spill] sm:$0xff] %v22640_v15  ;;  %v25132_v1 = vrot.slane %v22640_v15, 1  ;;  %9585 = vmatpush1.bf16.msra.mxu0 %v17436_v59  ;;  %9658 = vmatpush1.bf16.msra.mxu1 %v17439_v34  ;;  %v17456_v59 = vld [vmem:[%s25046_s4 + $0xda4] ss:$16 sps:$4 sm:$0xff]   ;;  %v17454_v34 = vld [vmem:[%s25046_s4 + $0xda0] ss:$16 sps:$4 sm:$0xff]  }
 0x530   :  { %9586 = vmatprep.subr.bf16.mxu0 %v17444_v22  ;;  %9659 = vmatprep.subr.bf16.mxu1 %v17447_v7  ;;  %v17457_v2 = vld [vmem:[%s25046_s4 + $0xfa0] ss:$16 sps:$4 sm:$0xff]   ;;  %v17462_v22 = vld [vmem:[%s25046_s4 + $0xd84] ss:$16 sps:$4 sm:$0xff]   ;;  %v17499_v16 = vld [vmem:[%s25046_s4 + $0xac8] ss:$16 sps:$4 sm:$0xff]  }
 0x531   :  { %v22661_v36 = vsel %vm2355_vm2, %v10084_v49, %v25132_v1  ;;  %v17459_v49 = vld [vmem:[%s25046_s4 + $0xfa4] ss:$16 sps:$4 sm:$0xff]   ;;  %v17510_v0 = vld [vmem:[%s25046_s4 + $0x88c] ss:$16 sps:$4 sm:$0xff]  }
 0x532   :  { %25538 = vst [vmem:[#allocation19_spill] sm:$0xff] %v22661_v36  ;;  %v17465_v7 = vld [vmem:[%s25046_s4 + $0xf84] ss:$16 sps:$4 sm:$0xff]   ;;  %v17496_v36 = vld [vmem:[%s25046_s4 + $0x8c8] ss:$16 sps:$4 sm:$0xff]  }
 0x533   :  { %9587 = vmatpush2.bf16.msra.mxu0 %v17442_v47  ;;  %9660 = vmatpush2.bf16.msra.mxu1 %v17445_v12  ;;  %v17460_v47 = vld [vmem:[%s25046_s4 + $0xd80] ss:$16 sps:$4 sm:$0xff]  }
 0x534   :  { %9588 = vmatprep.subr.bf16.mxu0 %v17450_v32  ;;  %9661 = vmatprep.subr.bf16.mxu1 %v17453_v9  ;;  %v17463_v12 = vld [vmem:[%s25046_s4 + $0xf80] ss:$16 sps:$4 sm:$0xff]   ;;  %v17468_v32 = vld [vmem:[%s25046_s4 + $0xd64] ss:$16 sps:$4 sm:$0xff]  }
 0x535   :  { %v17471_v9 = vld [vmem:[%s25046_s4 + $0xf64] ss:$16 sps:$4 sm:$0xff]  }
 0x537   :  { %9589 = vmatpush2.bf16.msra.mxu0 %v17448_v42  ;;  %9662 = vmatpush2.bf16.msra.mxu1 %v17451_v17  ;;  %v17466_v42 = vld [vmem:[%s25046_s4 + $0xd60] ss:$16 sps:$4 sm:$0xff]  }
 0x538   :  { %9590 = vmatprep.subr.bf16.mxu0 %v17456_v59  ;;  %9663 = vmatprep.subr.bf16.mxu1 %v17459_v49  ;;  %v17469_v17 = vld [vmem:[%s25046_s4 + $0xf60] ss:$16 sps:$4 sm:$0xff]   ;;  %v17474_v59 = vld [vmem:[%s25046_s4 + $0xd44] ss:$16 sps:$4 sm:$0xff]  }
 0x539   :  { %v17477_v49 = vld [vmem:[%s25046_s4 + $0xf44] ss:$16 sps:$4 sm:$0xff]  }
 0x53b   :  { %9591 = vmatpush2.bf16.msra.mxu0 %v17454_v34  ;;  %9664 = vmatpush2.bf16.msra.mxu1 %v17457_v2  ;;  %v17472_v34 = vld [vmem:[%s25046_s4 + $0xd40] ss:$16 sps:$4 sm:$0xff]  }
 0x53c   :  { %9592 = vmatprep.subr.bf16.mxu0 %v17462_v22  ;;  %9665 = vmatprep.subr.bf16.mxu1 %v17465_v7  ;;  %v17475_v2 = vld [vmem:[%s25046_s4 + $0xf40] ss:$16 sps:$4 sm:$0xff]   ;;  %v17480_v22 = vld [vmem:[%s25046_s4 + $0xd24] ss:$16 sps:$4 sm:$0xff]  }
 0x53d   :  { %v17483_v7 = vld [vmem:[%s25046_s4 + $0xf24] ss:$16 sps:$4 sm:$0xff]  }
 0x53f   :  { %9593 = vmatpush2.bf16.msra.mxu0 %v17460_v47  ;;  %9666 = vmatpush2.bf16.msra.mxu1 %v17463_v12  ;;  %v17478_v47 = vld [vmem:[%s25046_s4 + $0xd20] ss:$16 sps:$4 sm:$0xff]  }
 0x540   :  { %9594 = vmatprep.subr.bf16.mxu0 %v17468_v32  ;;  %9667 = vmatprep.subr.bf16.mxu1 %v17471_v9  ;;  %v17481_v12 = vld [vmem:[%s25046_s4 + $0xf20] ss:$16 sps:$4 sm:$0xff]   ;;  %v17486_v32 = vld [vmem:[%s25046_s4 + $0xd04] ss:$16 sps:$4 sm:$0xff]  }
 0x541   :  { %v17489_v9 = vld [vmem:[%s25046_s4 + $0xf04] ss:$16 sps:$4 sm:$0xff]  }
 0x543   :  { %9595 = vmatpush2.bf16.msra.mxu0 %v17466_v42  ;;  %9668 = vmatpush2.bf16.msra.mxu1 %v17469_v17  ;;  %v17484_v42 = vld [vmem:[%s25046_s4 + $0xd00] ss:$16 sps:$4 sm:$0xff]  }
 0x544   :  { %9596 = vmatprep.subr.bf16.mxu0 %v17474_v59  ;;  %9669 = vmatprep.subr.bf16.mxu1 %v17477_v49  ;;  %v17487_v17 = vld [vmem:[%s25046_s4 + $0xf00] ss:$16 sps:$4 sm:$0xff]   ;;  %v17492_v59 = vld [vmem:[%s25046_s4 + $0x8ec] ss:$16 sps:$4 sm:$0xff]  }
 0x545   :  { %v17495_v49 = vld [vmem:[%s25046_s4 + $0xaec] ss:$16 sps:$4 sm:$0xff]  }
 0x547   :  { %9597 = vmatpush2.bf16.msra.mxu0 %v17472_v34  ;;  %9670 = vmatpush2.bf16.msra.mxu1 %v17475_v2  ;;  %v22747_v34 = vpop.f32.mrf.mxu0  ;;  %v22749_v2 = vpop.f32.mrf.mxu1 }
 0x548   :  { %9598 = vmatprep.subr.bf16.mxu0 %v17480_v22  ;;  %9671 = vmatprep.subr.bf16.mxu1 %v17483_v7  ;;  %25539 = vst [vmem:[#allocation97_spill] sm:$0xff] %v22747_v34  ;;  %25540 = vst [vmem:[#allocation98_spill] sm:$0xff] %v22749_v2  ;;  %v17511_v2 = vld [vmem:[%s25046_s4 + $0xa88] ss:$16 sps:$4 sm:$0xff]  }
 0x54b   :  { %9599 = vmatpush2.bf16.msra.mxu0 %v17478_v47  ;;  %9672 = vmatpush2.bf16.msra.mxu1 %v17481_v12  ;;  %v17490_v12 = vld [vmem:[%s25046_s4 + $0x8e8] ss:$16 sps:$4 sm:$0xff]  }
 0x54c   :  { %9600 = vmatprep.subr.bf16.mxu0 %v17486_v32  ;;  %9673 = vmatprep.subr.bf16.mxu1 %v17489_v9  ;;  %v17493_v32 = vld [vmem:[%s25046_s4 + $0xae8] ss:$16 sps:$4 sm:$0xff]  }
 0x54f   :  { %9601 = vmatpush2.bf16.msra.mxu0 %v17484_v42  ;;  %9674 = vmatpush2.bf16.msra.mxu1 %v17487_v17  ;;  %v7726_v22 = vpop.f32.mrf.mxu0  ;;  %v7799_v7 = vpop.f32.mrf.mxu1  ;;  %v17498_v42 = vld [vmem:[%s25046_s4 + $0x8cc] ss:$16 sps:$4 sm:$0xff]  }
 0x550   :  { %v22751_v47 = vadd.f32 %v7799_v7, %v7726_v22  ;;  %9716 = vmatprep.subr.bf16.mxu0 %v17492_v59  ;;  %9789 = vmatprep.subr.bf16.mxu1 %v17495_v49  ;;  %v17501_v17 = vld [vmem:[%s25046_s4 + $0xacc] ss:$16 sps:$4 sm:$0xff]  }
 0x551   :  { %v7728_v9 = vpop.f32.mrf.mxu0  ;;  %v7801_v1 = vpop.f32.mrf.mxu1 }
 0x552   :  { %9603 = vmatmul.mubr.bf16.vlgmr.msra.gmra.mxu0 %v20549_v25  ;;  %9676 = vmatmul.mubr.bf16.vlgmr.msra.gmra.mxu1 %v20565_v44  ;;  %v22767_v59 = vadd.f32 %v7801_v1, %v7728_v9 }
 0x553   :  { %9612 = vmatprep.mubr.bf16.mxu0 %v20763_v37  ;;  %9685 = vmatprep.mubr.bf16.mxu1 %v20765_v30  ;;  %v7730_v49 = vpop.f32.mrf.mxu0  ;;  %v7803_v22 = vpop.f32.mrf.mxu1 }
 0x554   :  { %9717 = vmatpush1.bf16.msra.mxu0 %v17490_v12  ;;  %9790 = vmatpush1.bf16.msra.mxu1 %v17493_v32  ;;  %v22771_v7 = vadd.f32 %v7803_v22, %v7730_v49  ;;  %v17504_v12 = vld [vmem:[%s25046_s4 + $0x8ac] ss:$16 sps:$4 sm:$0xff]  }
 0x555   :  { %9718 = vmatprep.subr.bf16.mxu0 %v17498_v42  ;;  %9791 = vmatprep.subr.bf16.mxu1 %v17501_v17  ;;  %v22779_v1 = vpop.f32.mrf.mxu0  ;;  %v22781_v9 = vpop.f32.mrf.mxu1  ;;  %v17507_v32 = vld [vmem:[%s25046_s4 + $0xaac] ss:$16 sps:$4 sm:$0xff]   ;;  %v17502_v42 = vld [vmem:[%s25046_s4 + $0x8a8] ss:$16 sps:$4 sm:$0xff]  }
 0x556   :  { %v17505_v17 = vld [vmem:[%s25046_s4 + $0xaa8] ss:$16 sps:$4 sm:$0xff]   ;;  %v7806_v52 = vadd.f32 %v22781_v9, %v22779_v1 }
 0x557   :  { %v7736_v49 = vpop.f32.mrf.mxu0  ;;  %v7809_v22 = vpop.f32.mrf.mxu1 }
 0x558   :  { %9719 = vmatpush1.bf16.msra.mxu0 %v17496_v36  ;;  %9792 = vmatpush1.bf16.msra.mxu1 %v17499_v16  ;;  %v22789_v5 = vadd.f32 %v7809_v22, %v7736_v49  ;;  %v17513_v16 = vld [vmem:[%s25046_s4 + $0xa8c] ss:$16 sps:$4 sm:$0xff]   ;;  %v17508_v22 = vld [vmem:[%s25046_s4 + $0x888] ss:$16 sps:$4 sm:$0xff]  }
 0x559   :  { %9720 = vmatprep.subr.bf16.mxu0 %v17504_v12  ;;  %9793 = vmatprep.subr.bf16.mxu1 %v17507_v32  ;;  %v7738_v15 = vpop.f32.mrf.mxu0  ;;  %v7811_v53 = vpop.f32.mrf.mxu1 }
 0x55a   :  { %9613 = vmatmul.mubr.bf16.gmra.mxu0 %v20601_v11  ;;  %9686 = vmatmul.mubr.bf16.gmra.mxu1 %v20615_v19  ;;  %v22805_v36 = vadd.f32 %v7811_v53, %v7738_v15 }
 0x55b   :  { %9622 = vmatprep.mubr.bf16.mxu0 %v20803_v27  ;;  %9695 = vmatprep.mubr.bf16.mxu1 %v20805_v18  ;;  %v7740_v12 = vpop.f32.mrf.mxu0  ;;  %v7813_v32 = vpop.f32.mrf.mxu1 }
 0x55c   :  { %9721 = vmatpush1.bf16.msra.mxu0 %v17502_v42  ;;  %9794 = vmatpush1.bf16.msra.mxu1 %v17505_v17  ;;  %v22809_v49 = vadd.f32 %v7813_v32, %v7740_v12  ;;  %v17516_v42 = vld [vmem:[%s25046_s4 + $0x86c] ss:$16 sps:$4 sm:$0xff]  }
 0x55d   :  { %9722 = vmatprep.subr.bf16.mxu0 %v17510_v0  ;;  %9795 = vmatprep.subr.bf16.mxu1 %v17513_v16  ;;  %v22817_v53 = vpop.f32.mrf.mxu0  ;;  %v22819_v15 = vpop.f32.mrf.mxu1  ;;  %v17519_v17 = vld [vmem:[%s25046_s4 + $0xa6c] ss:$16 sps:$4 sm:$0xff]   ;;  %v17514_v0 = vld [vmem:[%s25046_s4 + $0x868] ss:$16 sps:$4 sm:$0xff]  }
 0x55e   :  { %v17517_v16 = vld [vmem:[%s25046_s4 + $0xa68] ss:$16 sps:$4 sm:$0xff]  }
 0x55f   :  { %v7746_v12 = vpop.f32.mrf.mxu0  ;;  %v7819_v32 = vpop.f32.mrf.mxu1 }
 0x560   :  { %9723 = vmatpush1.bf16.msra.mxu0 %v17508_v22  ;;  %9796 = vmatpush1.bf16.msra.mxu1 %v17511_v2  ;;  %v22827_v34 = vadd.f32 %v7819_v32, %v7746_v12  ;;  %v17525_v2 = vld [vmem:[%s25046_s4 + $0xa4c] ss:$16 sps:$4 sm:$0xff]   ;;  %v17520_v32 = vld [vmem:[%s25046_s4 + $0x848] ss:$16 sps:$4 sm:$0xff]  }
 0x561   :  { %9724 = vmatprep.subr.bf16.mxu0 %v17516_v42  ;;  %9797 = vmatprep.subr.bf16.mxu1 %v17519_v17  ;;  %v7748_v31 = vpop.f32.mrf.mxu0  ;;  %v7821_v39 = vpop.f32.mrf.mxu1 }
 0x562   :  { %9623 = vmatmul.mubr.bf16.gmra.mxu0 %v20641_v28  ;;  %9696 = vmatmul.mubr.bf16.gmra.mxu1 %v20647_v63  ;;  %v22843_v22 = vadd.f32 %v7821_v39, %v7748_v31 }
 0x563   :  { %9632 = vmatprep.mubr.bf16.mxu0 %v20839_v56  ;;  %9705 = vmatprep.mubr.bf16.mxu1 %v20841_v43  ;;  %v7750_v42 = vpop.f32.mrf.mxu0  ;;  %v7823_v17 = vpop.f32.mrf.mxu1 }
 0x564   :  { %9725 = vmatpush1.bf16.msra.mxu0 %v17514_v0  ;;  %9798 = vmatpush1.bf16.msra.mxu1 %v17517_v16  ;;  %v22847_v12 = vadd.f32 %v7823_v17, %v7750_v42  ;;  %v17528_v0 = vld [vmem:[%s25046_s4 + $0x82c] ss:$16 sps:$4 sm:$0xff]  }
 0x565   :  { %9726 = vmatprep.subr.bf16.mxu0 %v17522_v58  ;;  %9799 = vmatprep.subr.bf16.mxu1 %v17525_v2  ;;  %v22855_v39 = vpop.f32.mrf.mxu0  ;;  %v22857_v31 = vpop.f32.mrf.mxu1  ;;  %v17531_v16 = vld [vmem:[%s25046_s4 + $0xa2c] ss:$16 sps:$4 sm:$0xff]   ;;  %v17526_v58 = vld [vmem:[%s25046_s4 + $0x828] ss:$16 sps:$4 sm:$0xff]  }
 0x566   :  { %v17529_v2 = vld [vmem:[%s25046_s4 + $0xa28] ss:$16 sps:$4 sm:$0xff]  }
 0x567   :  { %v7756_v42 = vpop.f32.mrf.mxu0  ;;  %v7829_v17 = vpop.f32.mrf.mxu1 }
 0x568   :  { %9727 = vmatpush1.bf16.msra.mxu0 %v17520_v32  ;;  %9800 = vmatpush1.bf16.msra.mxu1 %v17523_v38  ;;  %v22865_v50 = vadd.f32 %v7829_v17, %v7756_v42  ;;  %v17537_v38 = vld [vmem:[%s25046_s4 + $0xa0c] ss:$16 sps:$4 sm:$0xff]   ;;  %v17532_v17 = vld [vmem:[%s25046_s4 + $0x808] ss:$16 sps:$4 sm:$0xff]  }
 0x569   :  { %9728 = vmatprep.subr.bf16.mxu0 %v17528_v0  ;;  %9801 = vmatprep.subr.bf16.mxu1 %v17531_v16  ;;  %v7758_v54 = vpop.f32.mrf.mxu0  ;;  %v7831_v14 = vpop.f32.mrf.mxu1 }
 0x56a   :  { %9633 = vmatmul.mubr.bf16.gmra.mxu0 %v20675_v46  ;;  %9706 = vmatmul.mubr.bf16.gmra.mxu1 %v20683_v29  ;;  %v22881_v32 = vadd.f32 %v7831_v14, %v7758_v54  ;;  %v17538_v14 = vld [vmem:[%s25046_s4 + $0x9e8] ss:$16 sps:$4 sm:$0xff]  }
 0x56b   :  { %9748 = vmatprep.mubr.bf16.mxu0 %v20346_v61  ;;  %9821 = vmatprep.mubr.bf16.mxu1 %v20348_v4  ;;  %v7760_v0 = vpop.f32.mrf.mxu0  ;;  %v7833_v16 = vpop.f32.mrf.mxu1  ;;  %v17540_v61 = vld [vmem:[%s25046_s4 + $0x9ec] ss:$16 sps:$4 sm:$0xff]   ;;  %v17541_v54 = vld [vmem:[%s25046_s4 + $0xbe8] ss:$16 sps:$4 sm:$0xff]  }
 0x56c   :  { %9729 = vmatpush1.bf16.msra.mxu0 %v17526_v58  ;;  %9802 = vmatpush1.bf16.msra.mxu1 %v17529_v2  ;;  %v22885_v42 = vadd.f32 %v7833_v16, %v7760_v0  ;;  %v17543_v4 = vld [vmem:[%s25046_s4 + $0xbec] ss:$16 sps:$4 sm:$0xff]   ;;  %v17547_v2 = vld [vmem:[%s25046_s4 + $0xbc8] ss:$16 sps:$4 sm:$0xff]  }
 0x56d   :  { %9730 = vmatprep.subr.bf16.mxu0 %v17534_v51  ;;  %9803 = vmatprep.subr.bf16.mxu1 %v17537_v38  ;;  %v17546_v51 = vld [vmem:[%s25046_s4 + $0x9cc] ss:$16 sps:$4 sm:$0xff]   ;;  %v17550_v16 = vld [vmem:[%s25046_s4 + $0x9a8] ss:$16 sps:$4 sm:$0xff]  }
 0x56e   :  { %v17549_v58 = vld [vmem:[%s25046_s4 + $0xbcc] ss:$16 sps:$4 sm:$0xff]  }
 0x56f   :  { %v17552_v38 = vld [vmem:[%s25046_s4 + $0x9ac] ss:$16 sps:$4 sm:$0xff]  }
 0x570   :  { %9731 = vmatpush1.bf16.msra.mxu0 %v17532_v17  ;;  %9804 = vmatpush1.bf16.msra.mxu1 %v17535_v3  ;;  %v17544_v3 = vld [vmem:[%s25046_s4 + $0x9c8] ss:$16 sps:$4 sm:$0xff]   ;;  %v17555_v0 = vld [vmem:[%s25046_s4 + $0xbac] ss:$16 sps:$4 sm:$0xff]  }
 0x571   :  { %9732 = vmatprep.subr.bf16.mxu0 %v17540_v61  ;;  %9805 = vmatprep.subr.bf16.mxu1 %v17543_v4  ;;  %v17553_v17 = vld [vmem:[%s25046_s4 + $0xba8] ss:$16 sps:$4 sm:$0xff]   ;;  %v17558_v61 = vld [vmem:[%s25046_s4 + $0x98c] ss:$16 sps:$4 sm:$0xff]  }
 0x572   :  { %v17561_v4 = vld [vmem:[%s25046_s4 + $0xb8c] ss:$16 sps:$4 sm:$0xff]  }
 0x574   :  { %9733 = vmatpush2.bf16.msra.mxu0 %v17538_v14  ;;  %9806 = vmatpush2.bf16.msra.mxu1 %v17541_v54  ;;  %v17556_v14 = vld [vmem:[%s25046_s4 + $0x988] ss:$16 sps:$4 sm:$0xff]  }
 0x575   :  { %9734 = vmatprep.subr.bf16.mxu0 %v17546_v51  ;;  %9807 = vmatprep.subr.bf16.mxu1 %v17549_v58  ;;  %v17559_v54 = vld [vmem:[%s25046_s4 + $0xb88] ss:$16 sps:$4 sm:$0xff]   ;;  %v17564_v51 = vld [vmem:[%s25046_s4 + $0x96c] ss:$16 sps:$4 sm:$0xff]  }
 0x576   :  { %v17567_v58 = vld [vmem:[%s25046_s4 + $0xb6c] ss:$16 sps:$4 sm:$0xff]  }
 0x578   :  { %9735 = vmatpush2.bf16.msra.mxu0 %v17544_v3  ;;  %9808 = vmatpush2.bf16.msra.mxu1 %v17547_v2  ;;  %v17562_v3 = vld [vmem:[%s25046_s4 + $0x968] ss:$16 sps:$4 sm:$0xff]  }
 0x579   :  { %9736 = vmatprep.subr.bf16.mxu0 %v17552_v38  ;;  %9809 = vmatprep.subr.bf16.mxu1 %v17555_v0  ;;  %v17565_v2 = vld [vmem:[%s25046_s4 + $0xb68] ss:$16 sps:$4 sm:$0xff]   ;;  %v17570_v38 = vld [vmem:[%s25046_s4 + $0x94c] ss:$16 sps:$4 sm:$0xff]  }
 0x57a   :  { %v17573_v0 = vld [vmem:[%s25046_s4 + $0xb4c] ss:$16 sps:$4 sm:$0xff]  }
 0x57c   :  { %9737 = vmatpush2.bf16.msra.mxu0 %v17550_v16  ;;  %9810 = vmatpush2.bf16.msra.mxu1 %v17553_v17  ;;  %v17568_v16 = vld [vmem:[%s25046_s4 + $0x948] ss:$16 sps:$4 sm:$0xff]  }
 0x57d   :  { %9738 = vmatprep.subr.bf16.mxu0 %v17558_v61  ;;  %9811 = vmatprep.subr.bf16.mxu1 %v17561_v4  ;;  %v17571_v17 = vld [vmem:[%s25046_s4 + $0xb48] ss:$16 sps:$4 sm:$0xff]   ;;  %v17576_v61 = vld [vmem:[%s25046_s4 + $0x92c] ss:$16 sps:$4 sm:$0xff]  }
 0x57e   :  { %v17579_v4 = vld [vmem:[%s25046_s4 + $0xb2c] ss:$16 sps:$4 sm:$0xff]  }
 0x580   :  { %9739 = vmatpush2.bf16.msra.mxu0 %v17556_v14  ;;  %9812 = vmatpush2.bf16.msra.mxu1 %v17559_v54  ;;  %v17574_v14 = vld [vmem:[%s25046_s4 + $0x928] ss:$16 sps:$4 sm:$0xff]  }
 0x581   :  { %9740 = vmatprep.subr.bf16.mxu0 %v17564_v51  ;;  %9813 = vmatprep.subr.bf16.mxu1 %v17567_v58  ;;  %v17577_v54 = vld [vmem:[%s25046_s4 + $0xb28] ss:$16 sps:$4 sm:$0xff]   ;;  %v17582_v51 = vld [vmem:[%s25046_s4 + $0x90c] ss:$16 sps:$4 sm:$0xff]  }
 0x582   :  { %v17585_v58 = vld [vmem:[%s25046_s4 + $0xb0c] ss:$16 sps:$4 sm:$0xff]  }
 0x584   :  { %9741 = vmatpush2.bf16.msra.mxu0 %v17562_v3  ;;  %9814 = vmatpush2.bf16.msra.mxu1 %v17565_v2  ;;  %v17580_v3 = vld [vmem:[%s25046_s4 + $0x908] ss:$16 sps:$4 sm:$0xff]  }
 0x585   :  { %9742 = vmatprep.subr.bf16.mxu0 %v17570_v38  ;;  %9815 = vmatprep.subr.bf16.mxu1 %v17573_v0  ;;  %v17583_v2 = vld [vmem:[%s25046_s4 + $0xb08] ss:$16 sps:$4 sm:$0xff]   ;;  %v17588_v38 = vld [vmem:[%s25046_s4 + $0xcec] ss:$16 sps:$4 sm:$0xff]  }
 0x586   :  { %v17591_v0 = vld [vmem:[%s25046_s4 + $0xeec] ss:$16 sps:$4 sm:$0xff]  }
 0x588   :  { %9743 = vmatpush2.bf16.msra.mxu0 %v17568_v16  ;;  %9816 = vmatpush2.bf16.msra.mxu1 %v17571_v17  ;;  %v22995_v16 = vpop.f32.mrf.mxu0  ;;  %v22997_v17 = vpop.f32.mrf.mxu1 }
 0x589   :  { %9744 = vmatprep.subr.bf16.mxu0 %v17576_v61  ;;  %9817 = vmatprep.subr.bf16.mxu1 %v17579_v4 }
 0x58c   :  { %9745 = vmatpush2.bf16.msra.mxu0 %v17574_v14  ;;  %9818 = vmatpush2.bf16.msra.mxu1 %v17577_v54  ;;  %v17586_v54 = vld [vmem:[%s25046_s4 + $0xce8] ss:$16 sps:$4 sm:$0xff]  }
 0x58d   :  { %9746 = vmatprep.subr.bf16.mxu0 %v17582_v51  ;;  %9819 = vmatprep.subr.bf16.mxu1 %v17585_v58  ;;  %v17589_v51 = vld [vmem:[%s25046_s4 + $0xee8] ss:$16 sps:$4 sm:$0xff]  }
 0x590   :  { %9747 = vmatpush2.bf16.msra.mxu0 %v17580_v3  ;;  %9820 = vmatpush2.bf16.msra.mxu1 %v17583_v2  ;;  %v7872_v61 = vpop.f32.mrf.mxu0  ;;  %v7945_v4 = vpop.f32.mrf.mxu1  ;;  %v17594_v3 = vld [vmem:[%s25046_s4 + $0xccc] ss:$16 sps:$4 sm:$0xff]  }
 0x591   :  { %v7873_v14 = vadd.f32 %v7872_v61, %v22751_v47  ;;  %9862 = vmatprep.subr.bf16.mxu0 %v17588_v38  ;;  %9935 = vmatprep.subr.bf16.mxu1 %v17591_v0  ;;  %v17597_v47 = vld [vmem:[%s25046_s4 + $0xecc] ss:$16 sps:$4 sm:$0xff]  }
 0x592   :  { %v7874_v58 = vpop.f32.mrf.mxu0  ;;  %v7947_v8 = vpop.f32.mrf.mxu1 }
 0x593   :  { %v7946_v2 = vadd.f32 %v7945_v4, %v7873_v14  ;;  %9749 = vmatmul.mubr.bf16.vlgmr.msra.gmra.mxu0 %v20358_v6  ;;  %9822 = vmatmul.mubr.bf16.vlgmr.msra.gmra.mxu1 %v20360_v21  ;;  %v7875_v38 = vadd.f32 %v7874_v58, %v22767_v59  ;;  %v17592_v6 = vld [vmem:[%s25046_s4 + $0xcc8] ss:$16 sps:$4 sm:$0xff]   ;;  %v17600_v59 = vld [vmem:[%s25046_s4 + $0xcac] ss:$16 sps:$4 sm:$0xff]  }
 0x594   :  { %9758 = vmatprep.mubr.bf16.mxu0 %v20380_v20  ;;  %9831 = vmatprep.mubr.bf16.mxu1 %v20390_v10  ;;  %v7876_v0 = vpop.f32.mrf.mxu0  ;;  %v7949_v61 = vpop.f32.mrf.mxu1  ;;  %v17595_v21 = vld [vmem:[%s25046_s4 + $0xec8] ss:$16 sps:$4 sm:$0xff]  }
 0x595   :  { %9863 = vmatpush1.bf16.msra.mxu0 %v17586_v54  ;;  %9936 = vmatpush1.bf16.msra.mxu1 %v17589_v51  ;;  %v7948_v62 = vadd.f32 %v7947_v8, %v7875_v38  ;;  %v7877_v4 = vadd.f32 %v7876_v0, %v22771_v7  ;;  %v17603_v8 = vld [vmem:[%s25046_s4 + $0xeac] ss:$16 sps:$4 sm:$0xff]   ;;  %v10046_v54 = vrot.slane %v7946_v2, 1  ;;  %v17601_v38 = vld [vmem:[%s25046_s4 + $0xea8] ss:$16 sps:$4 sm:$0xff]  }
 0x596   :  { %9864 = vmatprep.subr.bf16.mxu0 %v17594_v3  ;;  %9937 = vmatprep.subr.bf16.mxu1 %v17597_v47  ;;  %v7878_v20 = vpop.f32.mrf.mxu0  ;;  %v7951_v10 = vpop.f32.mrf.mxu1  ;;  %v17598_v47 = vld [vmem:[%s25046_s4 + $0xca8] ss:$16 sps:$4 sm:$0xff]   ;;  %v17606_v2 = vld [vmem:[%s25046_s4 + $0xc8c] ss:$16 sps:$4 sm:$0xff]  }
 0x597   :  { %v7950_v7 = vadd.f32 %v7949_v61, %v7877_v4  ;;  %v7879_v1 = vadd.f32 %v7878_v20, %v7806_v52  ;;  %v10049_v0 = vrot.slane %v7948_v62, 1  ;;  %v7816_v20 = vadd.f32 %v22819_v15, %v22817_v53  ;;  %v17607_v53 = vld [vmem:[%s25046_s4 + $0xe88] ss:$16 sps:$4 sm:$0xff]  }
 0x598   :  { %v7882_v9 = vpop.f32.mrf.mxu0  ;;  %v7955_v14 = vpop.f32.mrf.mxu1 }
 0x599   :  { %v10047_v51 = vrot.slane %v7950_v7, 1  ;;  %9865 = vmatpush1.bf16.msra.mxu0 %v17592_v6  ;;  %9938 = vmatpush1.bf16.msra.mxu1 %v17595_v21  ;;  %v7952_v58 = vadd.f32 %v7951_v10, %v7879_v1  ;;  %v7883_v3 = vadd.f32 %v7882_v9, %v22789_v5  ;;  %v17609_v5 = vld [vmem:[%s25046_s4 + $0xe8c] ss:$16 sps:$4 sm:$0xff]  }
 0x59a   :  { %9866 = vmatprep.subr.bf16.mxu0 %v17600_v59  ;;  %9939 = vmatprep.subr.bf16.mxu1 %v17603_v8  ;;  %v7884_v52 = vpop.f32.mrf.mxu0  ;;  %v7957_v61 = vpop.f32.mrf.mxu1  ;;  %v17612_v7 = vld [vmem:[%s25046_s4 + $0xc6c] ss:$16 sps:$4 sm:$0xff]  }
 0x59b   :  { %v10050_v4 = vrot.slane %v7952_v58, 1  ;;  %v7956_v6 = vadd.f32 %v7955_v14, %v7883_v3  ;;  %9759 = vmatmul.mubr.bf16.gmra.mxu0 %v20410_v13  ;;  %9832 = vmatmul.mubr.bf16.gmra.mxu1 %v20426_v40  ;;  %v7885_v62 = vadd.f32 %v7884_v52, %v22805_v36  ;;  %v23049_v21 = vsel %vm2355_vm2, %v10046_v54, %v10047_v51  ;;  %v17604_v36 = vld [vmem:[%s25046_s4 + $0xc88] ss:$16 sps:$4 sm:$0xff]  }
 0x59c   :  { %25541 = vst [vmem:[#allocation99_spill] sm:$0xff] %v23049_v21  ;;  %9768 = vmatprep.mubr.bf16.mxu0 %v20428_v24  ;;  %9841 = vmatprep.mubr.bf16.mxu1 %v20432_v45  ;;  %v7886_v10 = vpop.f32.mrf.mxu0  ;;  %v7959_v59 = vpop.f32.mrf.mxu1  ;;  %v17610_v52 = vld [vmem:[%s25046_s4 + $0xc68] ss:$16 sps:$4 sm:$0xff]  }
 0x59d   :  { %v10056_v8 = vrot.slane %v7956_v6, 1  ;;  %9867 = vmatpush1.bf16.msra.mxu0 %v17598_v47  ;;  %9940 = vmatpush1.bf16.msra.mxu1 %v17601_v38  ;;  %v7958_v13 = vadd.f32 %v7957_v61, %v7885_v62  ;;  %v7887_v40 = vadd.f32 %v7886_v10, %v22809_v49  ;;  %v23063_v24 = vsel %vm2355_vm2, %v10049_v0, %v10050_v4  ;;  %v17615_v49 = vld [vmem:[%s25046_s4 + $0xe6c] ss:$16 sps:$4 sm:$0xff]   ;;  %v17613_v61 = vld [vmem:[%s25046_s4 + $0xe68] ss:$16 sps:$4 sm:$0xff]  }
 0x59e   :  { %25542 = vst [vmem:[#allocation100_spill] sm:$0xff] %v23063_v24  ;;  %9868 = vmatprep.subr.bf16.mxu0 %v17606_v2  ;;  %9941 = vmatprep.subr.bf16.mxu1 %v17609_v5  ;;  %v7888_v45 = vpop.f32.mrf.mxu0  ;;  %v7961_v15 = vpop.f32.mrf.mxu1  ;;  %v17618_v6 = vld [vmem:[%s25046_s4 + $0xc4c] ss:$16 sps:$4 sm:$0xff]  }
 0x59f   :  { %v10058_v1 = vrot.slane %v7958_v13, 1  ;;  %v7960_v9 = vadd.f32 %v7959_v59, %v7887_v40  ;;  %v7889_v14 = vadd.f32 %v7888_v45, %v7816_v20  ;;  %v23072_v54 = vsel %vm2355_vm2, %v10047_v51, %v10056_v8 }
 0x5a0   :  { %25543 = vst [vmem:[#allocation101_spill] sm:$0xff] %v23072_v54  ;;  %v7892_v58 = vpop.f32.mrf.mxu0  ;;  %v7965_v3 = vpop.f32.mrf.mxu1  ;;  %v7826_v59 = vadd.f32 %v22857_v31, %v22855_v39  ;;  %v17619_v39 = vld [vmem:[%s25046_s4 + $0xe48] ss:$16 sps:$4 sm:$0xff]  }
 0x5a1   :  { %v10064_v47 = vrot.slane %v7960_v9, 1  ;;  %9869 = vmatpush1.bf16.msra.mxu0 %v17604_v36  ;;  %9942 = vmatpush1.bf16.msra.mxu1 %v17607_v53  ;;  %v7962_v38 = vadd.f32 %v7961_v15, %v7889_v14  ;;  %v7893_v0 = vadd.f32 %v7892_v58, %v22827_v34  ;;  %v23082_v2 = vsel %vm2355_vm2, %v10050_v4, %v10058_v1  ;;  %v17621_v34 = vld [vmem:[%s25046_s4 + $0xe4c] ss:$16 sps:$4 sm:$0xff]  }
 0x5a2   :  { %25544 = vst [vmem:[#allocation102_spill] sm:$0xff] %v23082_v2  ;;  %9870 = vmatprep.subr.bf16.mxu0 %v17612_v7  ;;  %9943 = vmatprep.subr.bf16.mxu1 %v17615_v49  ;;  %v7894_v51 = vpop.f32.mrf.mxu0  ;;  %v7967_v5 = vpop.f32.mrf.mxu1 }
 0x5a3   :  { %v10066_v62 = vrot.slane %v7962_v38, 1  ;;  %v7966_v20 = vadd.f32 %v7965_v3, %v7893_v0  ;;  %9769 = vmatmul.mubr.bf16.gmra.mxu0 %v20483_v55  ;;  %9842 = vmatmul.mubr.bf16.gmra.mxu1 %v20485_v26  ;;  %v7895_v4 = vadd.f32 %v7894_v51, %v22843_v22  ;;  %v23094_v10 = vsel %vm2355_vm2, %v10056_v8, %v10064_v47  ;;  %v17616_v22 = vld [vmem:[%s25046_s4 + $0xc48] ss:$16 sps:$4 sm:$0xff]   ;;  %v17624_v8 = vld [vmem:[%s25046_s4 + $0xc2c] ss:$16 sps:$4 sm:$0xff]  }
 0x5a4   :  { %25545 = vst [vmem:[#allocation103_spill] sm:$0xff] %v23094_v10  ;;  %9778 = vmatprep.mubr.bf16.mxu0 %v20500_v23  ;;  %9851 = vmatprep.mubr.bf16.mxu1 %v20512_v41  ;;  %v7896_v13 = vpop.f32.mrf.mxu0  ;;  %v7969_v40 = vpop.f32.mrf.mxu1  ;;  %v17622_v3 = vld [vmem:[%s25046_s4 + $0xc28] ss:$16 sps:$4 sm:$0xff]  }
 0x5a5   :  { %v10072_v36 = vrot.slane %v7966_v20, 1  ;;  %9871 = vmatpush1.bf16.msra.mxu0 %v17610_v52  ;;  %9944 = vmatpush1.bf16.msra.mxu1 %v17613_v61  ;;  %v7968_v55 = vadd.f32 %v7967_v5, %v7895_v4  ;;  %v7897_v26 = vadd.f32 %v7896_v13, %v22847_v12  ;;  %v23108_v23 = vsel %vm2355_vm2, %v10058_v1, %v10066_v62  ;;  %v17627_v12 = vld [vmem:[%s25046_s4 + $0xe2c] ss:$16 sps:$4 sm:$0xff]   ;;  %v17625_v38 = vld [vmem:[%s25046_s4 + $0xe28] ss:$16 sps:$4 sm:$0xff]  }
 0x5a6   :  { %25546 = vst [vmem:[#allocation104_spill] sm:$0xff] %v23108_v23  ;;  %9872 = vmatprep.subr.bf16.mxu0 %v17618_v6  ;;  %9945 = vmatprep.subr.bf16.mxu1 %v17621_v34  ;;  %v7898_v41 = vpop.f32.mrf.mxu0  ;;  %v7971_v31 = vpop.f32.mrf.mxu1  ;;  %v17630_v61 = vld [vmem:[%s25046_s4 + $0xc0c] ss:$16 sps:$4 sm:$0xff]   ;;  %v25585_v23 = vld [vmem:[#allocation11_spill] sm:$0xff] }
 0x5a7   :  { %v10074_v53 = vrot.slane %v7968_v55, 1  ;;  %v7970_v45 = vadd.f32 %v7969_v40, %v7897_v26  ;;  %v7899_v15 = vadd.f32 %v7898_v41, %v7826_v59  ;;  %v23117_v7 = vsel %vm2355_vm2, %v10064_v47, %v10072_v36  ;;  %v17634_v41 = vld [vmem:[%s25046_s4 + $0xde8] ss:$16 sps:$4 sm:$0xff]  }
 0x5a8   :  { %25547 = vst [vmem:[#allocation105_spill] sm:$0xff] %v23117_v7  ;;  %v7902_v49 = vpop.f32.mrf.mxu0  ;;  %v7975_v1 = vpop.f32.mrf.mxu1  ;;  %v25595_v7 = vld [vmem:[#allocation15_spill] sm:$0xff] }
 0x5a9   :  { %v10080_v9 = vrot.slane %v7970_v45, 1  ;;  %9873 = vmatpush1.bf16.msra.mxu0 %v17616_v22  ;;  %9946 = vmatpush1.bf16.msra.mxu1 %v17619_v39  ;;  %v7972_v14 = vadd.f32 %v7971_v31, %v7899_v15  ;;  %v7903_v58 = vadd.f32 %v7902_v49, %v22865_v50  ;;  %v23127_v0 = vsel %vm2355_vm2, %v10066_v62, %v10074_v53  ;;  %v17633_v50 = vld [vmem:[%s25046_s4 + $0xe0c] ss:$16 sps:$4 sm:$0xff]   ;;  %v17637_v31 = vld [vmem:[%s25046_s4 + $0xfe8] ss:$16 sps:$4 sm:$0xff]  }
 0x5aa   :  { %25548 = vst [vmem:[#allocation106_spill] sm:$0xff] %v23127_v0  ;;  %9874 = vmatprep.subr.bf16.mxu0 %v17624_v8  ;;  %9947 = vmatprep.subr.bf16.mxu1 %v17627_v12  ;;  %v7904_v47 = vpop.f32.mrf.mxu0  ;;  %v7977_v52 = vpop.f32.mrf.mxu1  ;;  %v7836_v62 = vadd.f32 %v22997_v17, %v22995_v16  ;;  %v17631_v16 = vld [vmem:[%s25046_s4 + $0xe08] ss:$16 sps:$4 sm:$0xff]   ;;  %v17636_v17 = vld [vmem:[%s25046_s4 + $0xdec] ss:$16 sps:$4 sm:$0xff]  }
 0x5ab   :  { %v10082_v51 = vrot.slane %v7972_v14, 1  ;;  %v7976_v5 = vadd.f32 %v7975_v1, %v7903_v58  ;;  %9779 = vmatmul.mubr.bf16.gmra.mxu0 %v20561_v48  ;;  %9852 = vmatmul.mubr.bf16.gmra.mxu1 %v20563_v60  ;;  %v7905_v6 = vadd.f32 %v7904_v47, %v22881_v32  ;;  %v23139_v34 = vsel %vm2355_vm2, %v10072_v36, %v10080_v9  ;;  %v17628_v32 = vld [vmem:[%s25046_s4 + $0xc08] ss:$16 sps:$4 sm:$0xff]   ;;  %v17642_v12 = vld [vmem:[%s25046_s4 + $0xdcc] ss:$16 sps:$4 sm:$0xff]  }
 0x5ac   :  { %25549 = vst [vmem:[#allocation107_spill] sm:$0xff] %v23139_v34  ;;  %9894 = vmatprep.mubr.bf16.mxu0 %v20571_v33  ;;  %9967 = vmatprep.mubr.bf16.mxu1 %v20583_v35  ;;  %v7906_v20 = vpop.f32.mrf.mxu0  ;;  %v7979_v4 = vpop.f32.mrf.mxu1  ;;  %v17640_v49 = vld [vmem:[%s25046_s4 + $0xdc8] ss:$16 sps:$4 sm:$0xff]   ;;  %v17648_v14 = vld [vmem:[%s25046_s4 + $0xdac] ss:$16 sps:$4 sm:$0xff]  }
 0x5ad   :  { %v10088_v59 = vrot.slane %v7976_v5, 1  ;;  %9875 = vmatpush1.bf16.msra.mxu0 %v17622_v3  ;;  %9948 = vmatpush1.bf16.msra.mxu1 %v17625_v38  ;;  %v7978_v48 = vadd.f32 %v7977_v52, %v7905_v6  ;;  %v7907_v60 = vadd.f32 %v7906_v20, %v22885_v42  ;;  %v23153_v33 = vsel %vm2355_vm2, %v10074_v53, %v10082_v51  ;;  %v17639_v42 = vld [vmem:[%s25046_s4 + $0xfec] ss:$16 sps:$4 sm:$0xff]   ;;  %v17643_v1 = vld [vmem:[%s25046_s4 + $0xfc8] ss:$16 sps:$4 sm:$0xff]  }
 0x5ae   :  { %25550 = vst [vmem:[#allocation108_spill] sm:$0xff] %v23153_v33  ;;  %9876 = vmatprep.subr.bf16.mxu0 %v17630_v61  ;;  %9949 = vmatprep.subr.bf16.mxu1 %v17633_v50  ;;  %v7908_v35 = vpop.f32.mrf.mxu0  ;;  %v7981_v26 = vpop.f32.mrf.mxu1  ;;  %v17645_v53 = vld [vmem:[%s25046_s4 + $0xfcc] ss:$16 sps:$4 sm:$0xff]   ;;  %v17646_v3 = vld [vmem:[%s25046_s4 + $0xda8] ss:$16 sps:$4 sm:$0xff]  }
 0x5af   :  { %v10090_v13 = vrot.slane %v7978_v48, 1  ;;  %v23161_v40 = vadd.f32 %v7979_v4, %v7907_v60  ;;  %v7909_v36 = vadd.f32 %v7908_v35, %v7836_v62  ;;  %v23164_v55 = vsel %vm2355_vm2, %v10080_v9, %v10088_v59  ;;  %v17651_v58 = vld [vmem:[%s25046_s4 + $0xfac] ss:$16 sps:$4 sm:$0xff]   ;;  %v17649_v38 = vld [vmem:[%s25046_s4 + $0xfa8] ss:$16 sps:$4 sm:$0xff]  }
 0x5b0   :  { %25552 = vst [vmem:[#allocation110_spill] sm:$0xff] %v23164_v55  ;;  %v17654_v47 = vld [vmem:[%s25046_s4 + $0xd8c] ss:$16 sps:$4 sm:$0xff]   ;;  %v17652_v61 = vld [vmem:[%s25046_s4 + $0xd88] ss:$16 sps:$4 sm:$0xff]  }
 0x5b1   :  { %25551 = vst [vmem:[#allocation109_spill] sm:$0xff] %v23161_v40  ;;  %v25135_v22 = vrot.slane %v23161_v40, 1  ;;  %9877 = vmatpush1.bf16.msra.mxu0 %v17628_v32  ;;  %9950 = vmatpush1.bf16.msra.mxu1 %v17631_v16  ;;  %v23167_v39 = vadd.f32 %v7981_v26, %v7909_v36  ;;  %v23176_v8 = vsel %vm2355_vm2, %v10082_v51, %v10090_v13  ;;  %v17657_v52 = vld [vmem:[%s25046_s4 + $0xf8c] ss:$16 sps:$4 sm:$0xff]   ;;  %v17655_v50 = vld [vmem:[%s25046_s4 + $0xf88] ss:$16 sps:$4 sm:$0xff]  }
 0x5b2   :  { %25554 = vst [vmem:[#allocation112_spill] sm:$0xff] %v23176_v8  ;;  %9878 = vmatprep.subr.bf16.mxu0 %v17636_v17  ;;  %9951 = vmatprep.subr.bf16.mxu1 %v17639_v42  ;;  %v17660_v51 = vld [vmem:[%s25046_s4 + $0xd6c] ss:$16 sps:$4 sm:$0xff]   ;;  %v17658_v6 = vld [vmem:[%s25046_s4 + $0xd68] ss:$16 sps:$4 sm:$0xff]  }
 0x5b3   :  { %25553 = vst [vmem:[#allocation111_spill] sm:$0xff] %v23167_v39  ;;  %v25134_v45 = vrot.slane %v23167_v39, 1  ;;  %v23188_v15 = vsel %vm2355_vm2, %v10088_v59, %v25135_v22  ;;  %v17663_v5 = vld [vmem:[%s25046_s4 + $0xf6c] ss:$16 sps:$4 sm:$0xff]   ;;  %v17661_v62 = vld [vmem:[%s25046_s4 + $0xf68] ss:$16 sps:$4 sm:$0xff]  }
 0x5b4   :  { %25555 = vst [vmem:[#allocation113_spill] sm:$0xff] %v23188_v15  ;;  %v17666_v20 = vld [vmem:[%s25046_s4 + $0xd4c] ss:$16 sps:$4 sm:$0xff]   ;;  %v17664_v59 = vld [vmem:[%s25046_s4 + $0xd48] ss:$16 sps:$4 sm:$0xff]  }
 0x5b5   :  { %9879 = vmatpush2.bf16.msra.mxu0 %v17634_v41  ;;  %9952 = vmatpush2.bf16.msra.mxu1 %v17637_v31  ;;  %v23199_v9 = vsel %vm2355_vm2, %v10090_v13, %v25134_v45  ;;  %v17669_v4 = vld [vmem:[%s25046_s4 + $0xf4c] ss:$16 sps:$4 sm:$0xff]   ;;  %v17667_v48 = vld [vmem:[%s25046_s4 + $0xf48] ss:$16 sps:$4 sm:$0xff]  }
 0x5b6   :  { %25556 = vst [vmem:[#allocation114_spill] sm:$0xff] %v23199_v9  ;;  %9880 = vmatprep.subr.bf16.mxu0 %v17642_v12  ;;  %9953 = vmatprep.subr.bf16.mxu1 %v17645_v53  ;;  %v17672_v60 = vld [vmem:[%s25046_s4 + $0xd2c] ss:$16 sps:$4 sm:$0xff]   ;;  %v17670_v16 = vld [vmem:[%s25046_s4 + $0xd28] ss:$16 sps:$4 sm:$0xff]  }
 0x5b7   :  { %v17675_v32 = vld [vmem:[%s25046_s4 + $0xf2c] ss:$16 sps:$4 sm:$0xff]   ;;  %v17673_v35 = vld [vmem:[%s25046_s4 + $0xf28] ss:$16 sps:$4 sm:$0xff]  }
 0x5b8   :  { %v17678_v17 = vld [vmem:[%s25046_s4 + $0xd0c] ss:$16 sps:$4 sm:$0xff]   ;;  %v17676_v13 = vld [vmem:[%s25046_s4 + $0xd08] ss:$16 sps:$4 sm:$0xff]  }
 0x5b9   :  { %9881 = vmatpush2.bf16.msra.mxu0 %v17640_v49  ;;  %9954 = vmatpush2.bf16.msra.mxu1 %v17643_v1  ;;  %v17681_v42 = vld [vmem:[%s25046_s4 + $0xf0c] ss:$16 sps:$4 sm:$0xff]   ;;  %v17679_v36 = vld [vmem:[%s25046_s4 + $0xf08] ss:$16 sps:$4 sm:$0xff]   ;;  %s17981_s4 = smov 16  }
 0x5ba   :  { %9882 = vmatprep.subr.bf16.mxu0 %v17648_v14  ;;  %9955 = vmatprep.subr.bf16.mxu1 %v17651_v58  ;;  %v25572_v22 = vld [vmem:[#allocation89_spill] sm:$0xff]  ;;  %v25578_v9 = vld [vmem:[#allocation35_spill] sm:$0xff]  ;;  %v25580_v55 = vld [vmem:[#allocation70_spill] sm:$0xff] }
 0x5bb   :  { %v25579_v15 = vld [vmem:[#allocation71_spill] sm:$0xff]  ;;  %v25584_v39 = vld [vmem:[#allocation52_spill] sm:$0xff]  ;;  %v25586_v0 = vld [vmem:[#allocation58_spill] sm:$0xff] }
 0x5bc   :  { %v8030_v8 = vrot.slane %v25579_v15, 7 }
 0x5bd   :  { %9883 = vmatpush2.bf16.msra.mxu0 %v17646_v3  ;;  %9956 = vmatpush2.bf16.msra.mxu1 %v17649_v38 }
 0x5be   :  { %9884 = vmatprep.subr.bf16.mxu0 %v17654_v47  ;;  %9957 = vmatprep.subr.bf16.mxu1 %v17657_v52  ;;  %v25558_v52 = vld [vmem:[#allocation64_spill] sm:$0xff] }
 0x5c1   :  { %9885 = vmatpush2.bf16.msra.mxu0 %v17652_v61  ;;  %9958 = vmatpush2.bf16.msra.mxu1 %v17655_v50  ;;  %v25559_v61 = vld [vmem:[#allocation21_spill] sm:$0xff] }
 0x5c2   :  { %9886 = vmatprep.subr.bf16.mxu0 %v17660_v51  ;;  %9959 = vmatprep.subr.bf16.mxu1 %v17663_v5  ;;  %v5146_v50 = vadd.f32 %v25559_v61, %v25558_v52  ;;  %v25560_v51 = vld [vmem:[#allocation80_spill] sm:$0xff]  ;;  %v25569_v52 = vld [vmem:[#allocation74_spill] sm:$0xff]  ;;  %v25570_v61 = vld [vmem:[#allocation67_spill] sm:$0xff] }
 0x5c5   :  { %9887 = vmatpush2.bf16.msra.mxu0 %v17658_v6  ;;  %9960 = vmatpush2.bf16.msra.mxu1 %v17661_v62  ;;  %v25561_v6 = vld [vmem:[#allocation22_spill] sm:$0xff]  ;;  %v25562_v62 = vld [vmem:[#allocation65_spill] sm:$0xff] }
 0x5c6   :  { %9888 = vmatprep.subr.bf16.mxu0 %v17666_v20  ;;  %9961 = vmatprep.subr.bf16.mxu1 %v17669_v4  ;;  %v5156_v20 = vadd.f32 %v25562_v62, %v25561_v6 }
 0x5c9   :  { %9889 = vmatpush2.bf16.msra.mxu0 %v17664_v59  ;;  %9962 = vmatpush2.bf16.msra.mxu1 %v17667_v48  ;;  %v25563_v48 = vld [vmem:[#allocation66_spill] sm:$0xff] }
 0x5ca   :  { %9890 = vmatprep.subr.bf16.mxu0 %v17672_v60  ;;  %9963 = vmatprep.subr.bf16.mxu1 %v17675_v32  ;;  %v25564_v60 = vld [vmem:[#allocation87_spill] sm:$0xff] }
 0x5cb   :  { %v5166_v32 = vadd.f32 %v25564_v60, %v25563_v48  ;;  %v25573_v60 = vld [vmem:[#allocation91_spill] sm:$0xff] }
 0x5cd   :  { %9891 = vmatpush2.bf16.msra.mxu0 %v17670_v16  ;;  %9964 = vmatpush2.bf16.msra.mxu1 %v17673_v35  ;;  %v25565_v16 = vld [vmem:[#allocation81_spill] sm:$0xff] }
 0x5ce   :  { %9892 = vmatprep.subr.bf16.mxu0 %v17678_v17  ;;  %9965 = vmatprep.subr.bf16.mxu1 %v17681_v42  ;;  %v5219_v35 = vadd.f32 %v25565_v16, %v5146_v50  ;;  %v25566_v17 = vld [vmem:[#allocation88_spill] sm:$0xff] }
 0x5cf   :  { %v8017_v42 = vrot.slane %v25566_v17, 7  ;;  %v25574_v17 = vld [vmem:[#allocation13_spill] sm:$0xff] }
 0x5d0   :  { %v5292_v48 = vadd.f32 %v25572_v22, %v5219_v35 }
 0x5d1   :  { %9893 = vmatpush2.bf16.msra.mxu0 %v17676_v13  ;;  %9966 = vmatpush2.bf16.msra.mxu1 %v17679_v36  ;;  %v23273_v26 = vpop.f32.mrf.mxu0  ;;  %v23275_v41 = vpop.f32.mrf.mxu1  ;;  %v25568_v36 = vld [vmem:[#allocation68_spill] sm:$0xff]  ;;  %v8109_v50 = vsel %vm1502_vm1, 0.0, %v8017_v42 }
 0x5d2   :  { %v8038_v35 = vrot.slane %v5292_v48, 7  ;;  %v7534_v48 = vadd.f32 %v25585_v23, %v25584_v39  ;;  %v25591_v39 = vld [vmem:[#allocation72_spill] sm:$0xff] }
 0x5d3   :  { %v23281_v31 = vpop.f32.mrf.mxu0  ;;  %v23283_v12 = vpop.f32.mrf.mxu1 }
 0x5d4   :  { %9895 = vmatmul.mubr.bf16.vlgmr.msra.gmra.mxu0 %v20549_v25  ;;  %9968 = vmatmul.mubr.bf16.vlgmr.msra.gmra.mxu1 %v20565_v44 }
 0x5d5   :  { %9904 = vmatprep.mubr.bf16.mxu0 %v20763_v37  ;;  %9977 = vmatprep.mubr.bf16.mxu1 %v20765_v30  ;;  %v23285_v53 = vpop.f32.mrf.mxu0  ;;  %v23287_v49 = vpop.f32.mrf.mxu1 }
 0x5d7   :  { %v23293_v25 = vpop.f32.mrf.mxu0  ;;  %v23295_v44 = vpop.f32.mrf.mxu1 }
 0x5d9   :  { %v23297_v37 = vpop.f32.mrf.mxu0  ;;  %v23299_v30 = vpop.f32.mrf.mxu1 }
 0x5dc   :  { %9905 = vmatmul.mubr.bf16.gmra.mxu0 %v20601_v11  ;;  %9978 = vmatmul.mubr.bf16.gmra.mxu1 %v20615_v19  ;;  %v23305_v11 = vpop.f32.mrf.mxu0  ;;  %v23307_v19 = vpop.f32.mrf.mxu1 }
 0x5dd   :  { %9914 = vmatprep.mubr.bf16.mxu0 %v20803_v27  ;;  %9987 = vmatprep.mubr.bf16.mxu1 %v20805_v18 }
 0x5de   :  { %v23309_v27 = vpop.f32.mrf.mxu0  ;;  %v23311_v18 = vpop.f32.mrf.mxu1 }
 0x5e0   :  { %v23315_v1 = vpop.f32.mrf.mxu0 }
 0x5e4   :  { %9915 = vmatmul.mubr.bf16.gmra.mxu0 %v20641_v28  ;;  %9988 = vmatmul.mubr.bf16.gmra.mxu1 %v20647_v63  ;;  %v23317_v28 = vpop.f32.mrf.mxu1  ;;  %v23319_v63 = vpop.f32.mrf.mxu0 }
 0x5e5   :  { %9924 = vmatprep.mubr.bf16.mxu0 %v20839_v56  ;;  %9997 = vmatprep.mubr.bf16.mxu1 %v20841_v43 }
 0x5e6   :  { %v23321_v56 = vpop.f32.mrf.mxu1  ;;  %v23323_v43 = vpop.f32.mrf.mxu0 }
 0x5e8   :  { %v23325_v14 = vpop.f32.mrf.mxu1  ;;  %v23327_v58 = vpop.f32.mrf.mxu0 }
 0x5ea   :  { %v23329_v3 = vpop.f32.mrf.mxu1  ;;  %v23331_v38 = vpop.f32.mrf.mxu0 }
 0x5ec   :  { %9925 = vmatmul.mubr.bf16.gmra.mxu0 %v20675_v46  ;;  %9998 = vmatmul.mubr.bf16.gmra.mxu1 %v20683_v29  ;;  %v23333_v46 = vpop.f32.mrf.mxu1  ;;  %v25557_v29 = vld [vmem:[#allocation63_spill] sm:$0xff]  ;;  %v23342_v4 = vpop.f32.mrf.mxu0 }
 0x5ed   :  { %v5136_v47 = vadd.f32 %v25557_v29, %v21231_v57  ;;  %v25567_v57 = vld [vmem:[#allocation73_spill] sm:$0xff] }
 0x5ee   :  { %v23344_v59 = vpop.f32.mrf.mxu1  ;;  %v5229_v13 = vadd.f32 %v25567_v57, %v5156_v20  ;;  %v23356_v62 = vpop.f32.mrf.mxu0  ;;  %v25575_v20 = vld [vmem:[#allocation12_spill] sm:$0xff] }
 0x5ef   :  { %v5209_v5 = vadd.f32 %v25560_v51, %v5136_v47  ;;  %v5239_v47 = vadd.f32 %v25569_v52, %v5166_v32  ;;  %v25571_v51 = vrot.slane %v25570_v61, 7  ;;  %v7514_v57 = vadd.f32 %v25575_v20, %v25574_v17  ;;  %v25577_v52 = vld [vmem:[#allocation37_spill] sm:$0xff] }
 0x5f0   :  { %v23358_v45 = vpop.f32.mrf.mxu1  ;;  %v5302_v16 = vadd.f32 %v25573_v60, %v5229_v13  ;;  %v23370_v34 = vpop.f32.mrf.mxu0  ;;  %v8113_v60 = vmul.f32 %v25578_v9, %v8109_v50  ;;  %v25581_v17 = vld [vmem:[#allocation25_spill] sm:$0xff] }
 0x5f1   :  { %v5282_v29 = vadd.f32 %v25568_v36, %v5209_v5  ;;  %v8108_v6 = vsel %vm1502_vm1, 0.0, %v25571_v51  ;;  %v25576_v36 = vld [vmem:[#allocation24_spill] sm:$0xff]  ;;  %v5312_v61 = vadd.f32 %v25577_v52, %v5239_v47  ;;  %v7587_v33 = vadd.f32 %v25580_v55, %v7514_v57  ;;  %v25583_v47 = vld [vmem:[#allocation51_spill] sm:$0xff] }
 0x5f2   :  { %v8046_v32 = vrot.slane %v25576_v36, 7  ;;  %v8112_v51 = vmul.f32 %v25578_v9, %v8108_v6  ;;  %v23372_v22 = vpop.f32.mrf.mxu1  ;;  %v8062_v20 = vrot.slane %v25581_v17, 7  ;;  %v25582_v36 = vld [vmem:[#allocation14_spill] sm:$0xff]  ;;  %v9461_v15 = vadd.f32 %v23281_v31, %v8113_v60  ;;  %v23387_v17 = vpop.f32.mrf.mxu0  ;;  %v25588_v31 = vld [vmem:[#allocation69_spill] sm:$0xff] }
 0x5f3   :  { %v8022_v5 = vrot.slane %v5282_v29, 7  ;;  %v8054_v29 = vrot.slane %v5302_v16, 7  ;;  %v7524_v52 = vadd.f32 %v25583_v47, %v25582_v36  ;;  %v8070_v6 = vrot.slane %v5312_v61, 7  ;;  %v25589_v36 = vld [vmem:[#allocation32_spill] sm:$0xff] }
 0x5f4   :  { %v9459_v13 = vadd.f32 %v23273_v26, %v8112_v51  ;;  %v8047_v57 = vsel %vm1502_vm1, %v8038_v35, %v8046_v32  ;;  %v7660_v26 = vadd.f32 %v25586_v0, %v7587_v33  ;;  %v25587_v51 = vld [vmem:[#allocation62_spill] sm:$0xff]  ;;  %v23389_v40 = vpop.f32.mrf.mxu1  ;;  %v8039_v60 = vsel %vm1502_vm1, %v8030_v8, %v8038_v35  ;;  %v25590_v47 = vld [vmem:[#allocation36_spill] sm:$0xff] }
 0x5f5   :  { %v8023_v55 = vsel %vm1502_vm1, %v8017_v42, %v8022_v5  ;;  %v7597_v50 = vadd.f32 %v25587_v51, %v7524_v52  ;;  %v8031_v16 = vsel %vm1502_vm1, %v8022_v5, %v8030_v8  ;;  %v9463_v42 = vadd.f32 %v23285_v53, %v25588_v31  ;;  %v25593_v31 = vld [vmem:[#allocation54_spill] sm:$0xff] }
 0x5f6   :  { %v9532_v61 = vadd.f32 %v23275_v41, %v9459_v13  ;;  %v8128_v23 = vmul.f32 %v25590_v47, %v25589_v36  ;;  %v7607_v0 = vadd.f32 %v25591_v39, %v7534_v48  ;;  %v23399_v33 = vmul.f32 %v25590_v47, %v8047_v57  ;;  %v25592_v48 = vld [vmem:[#allocation53_spill] sm:$0xff]  ;;  %v25596_v47 = vld [vmem:[#allocation90_spill] sm:$0xff] }
 0x5f7   :  { %v23402_v5 = vsel %vm1502_vm1, %v8046_v32, %v8054_v29  ;;  %v23405_v52 = vsel %vm1502_vm1, %v8054_v29, %v8062_v20  ;;  %v9534_v53 = vadd.f32 %v23283_v12, %v9461_v15  ;;  %v9465_v8 = vadd.f32 %v23293_v25, %v8023_v55  ;;  %v25594_v39 = vld [vmem:[#allocation17_spill] sm:$0xff] }
 0x5f8   :  { %v23410_v35 = vsel %vm1502_vm1, %v8062_v20, %v8070_v6  ;;  %v7544_v57 = vadd.f32 %v25593_v31, %v25592_v48  ;;  %v10044_v36 = vrot.slane %v7660_v26, 1  ;;  %v10054_v32 = vrot.slane %v25594_v39, 1  ;;  %v25597_v20 = vld [vmem:[#allocation55_spill] sm:$0xff]  ;;  %v25598_v55 = vld [vmem:[#allocation57_spill] sm:$0xff] }
 0x5f9   :  { %v7670_v10 = vadd.f32 %v25595_v7, %v7597_v50  ;;  %v9536_v54 = vadd.f32 %v23287_v49, %v9463_v42  ;;  %v9469_v12 = vadd.f32 %v23297_v37, %v25596_v47  ;;  %v10043_v6 = vrot.slane %v25597_v20, 1  ;;  %v25600_v26 = vld [vmem:[#allocation97_spill] sm:$0xff] }
 0x5fa   :  { %v7617_v31 = vadd.f32 %v25600_v26, %v7544_v57  ;;  %v9538_v7 = vadd.f32 %v23295_v44, %v9465_v8  ;;  %v25601_v50 = vld [vmem:[#allocation61_spill] sm:$0xff]  ;;  %v9471_v47 = vadd.f32 %v23305_v11, %v8031_v16 }
 0x5fb   :  { %v10062_v37 = vrot.slane %v7670_v10, 1  ;;  %v9542_v57 = vadd.f32 %v23299_v30, %v9469_v12 }
 0x612   :  { %v9604_v41 = vpop.f32.mrf.mxu0  ;;  %v9677_v13 = vpop.f32.mrf.mxu1 }
 0x613   :  { %v9605_v51 = vadd.f32 %v9604_v41, %v9532_v61  ;;  %v10070_v61 = vrot.slane %v25598_v55, 1  ;;  %v25599_v41 = vld [vmem:[#allocation60_spill] sm:$0xff] }
 0x614   :  { %v9606_v29 = vpop.f32.mrf.mxu0  ;;  %v9679_v2 = vpop.f32.mrf.mxu1  ;;  %v7680_v48 = vadd.f32 %v25599_v41, %v7607_v0  ;;  %v10055_v0 = vsel %vm2355_vm2, %v10044_v36, %v10054_v32  ;;  %v25606_v41 = vld [vmem:[#allocation83_spill] sm:$0xff] }
 0x615   :  { %v9678_v25 = vadd.f32 %v9677_v13, %v9605_v51  ;;  %v9607_v15 = vadd.f32 %v9606_v29, %v9534_v53  ;;  %v10045_v13 = vsel %vm2355_vm2, %v10043_v6, %v10044_v36  ;;  %v10071_v16 = vsel %vm2355_vm2, %v10062_v37, %v10070_v61  ;;  %v25604_v6 = vld [vmem:[#allocation56_spill] sm:$0xff] }
 0x616   :  { %v9608_v39 = vpop.f32.mrf.mxu0  ;;  %v9681_v24 = vpop.f32.mrf.mxu1  ;;  %v10078_v8 = vrot.slane %v7680_v48, 1  ;;  %v9544_v48 = vadd.f32 %v23307_v19, %v9471_v47 }
 0x617   :  { %v23425_v21 = vadd.f32 %v25601_v50, %v9678_v25  ;;  %v9680_v49 = vadd.f32 %v9679_v2, %v9607_v15  ;;  %v9609_v42 = vadd.f32 %v9608_v39, %v9536_v54  ;;  %v25602_v25 = vld [vmem:[#allocation98_spill] sm:$0xff]  ;;  %v25603_v2 = vld [vmem:[#allocation23_spill] sm:$0xff]  ;;  %v9475_v15 = vadd.f32 %v23315_v1, %v8039_v60 }
 0x618   :  { %v9610_v53 = vpop.f32.mrf.mxu0  ;;  %v9683_v51 = vpop.f32.mrf.mxu1  ;;  %v7690_v55 = vadd.f32 %v25602_v25, %v7617_v31  ;;  %v9473_v54 = vadd.f32 %v23309_v27, %v25603_v2  ;;  %v10063_v39 = vsel %vm2355_vm2, %v10054_v32, %v10062_v37  ;;  %v25607_v27 = vld [vmem:[#allocation59_spill] sm:$0xff]  ;;  %v9479_v60 = vadd.f32 %v23319_v63, %v8128_v23  ;;  %v25612_v2 = vld [vmem:[#allocation16_spill] sm:$0xff]  ;;  %v25614_v23 = vld [vmem:[#allocation38_spill] sm:$0xff] }
 0x619   :  { %v23431_v29 = vadd.f32 %v10045_v13, %v9680_v49  ;;  %v9682_v20 = vadd.f32 %v9681_v24, %v9609_v42  ;;  %v9611_v44 = vadd.f32 %v9610_v53, %v9538_v7  ;;  %v10086_v24 = vrot.slane %v25606_v41, 1  ;;  %v25608_v7 = vld [vmem:[#allocation39_spill] sm:$0xff]  ;;  %v25609_v49 = vld [vmem:[#allocation40_spill] sm:$0xff] }
 0x61a   :  { %v9614_v10 = vpop.f32.mrf.mxu0  ;;  %v9687_v11 = vpop.f32.mrf.mxu1  ;;  %v10148_v50 = vmul.f32 %v25608_v7, %v25607_v27  ;;  %v25610_v42 = vrot.slane %v25609_v49, 1  ;;  %v10079_v32 = vsel %vm2355_vm2, %v10070_v61, %v10078_v8  ;;  %v10094_v37 = vrot.slane %v7690_v55, 1  ;;  %v25615_v55 = vld [vmem:[#allocation86_spill] sm:$0xff] }
 0x61b   :  { %v23439_v36 = vadd.f32 %v25604_v6, %v9682_v20  ;;  %v9684_v30 = vadd.f32 %v9683_v51, %v9611_v44  ;;  %v9615_v12 = vadd.f32 %v9614_v10, %v9542_v57  ;;  %v9546_v51 = vadd.f32 %v23311_v18, %v9473_v54 }
 0x61c   :  { %v9616_v26 = vpop.f32.mrf.mxu0  ;;  %v9689_v31 = vpop.f32.mrf.mxu1  ;;  %v10132_v1 = vsel %vm2355_vm2, %v25610_v42, 0.0  ;;  %v10149_v20 = vmul.f32 %v25608_v7, %v10071_v16  ;;  %v9548_v44 = vadd.f32 %v23317_v28, %v9475_v15  ;;  %v9481_v25 = vadd.f32 %v23323_v43, %v23399_v33  ;;  %v25616_v15 = vld [vmem:[#allocation26_spill] sm:$0xff] }
 0x61d   :  { %25605 = vst [vmem:[#allocation63_spill] sm:$0xff] %v23439_v36  ;;  %v23450_v13 = vadd.f32 %v10055_v0, %v9684_v30  ;;  %v9688_v53 = vadd.f32 %v9687_v11, %v9615_v12  ;;  %v9617_v57 = vadd.f32 %v9616_v26, %v9544_v48  ;;  %v23462_v0 = vmul.f32 %v25614_v23, %v10132_v1 }
 0x61e   :  { %v9618_v19 = vpop.f32.mrf.mxu0  ;;  %v9691_v47 = vpop.f32.mrf.mxu1  ;;  %v23465_v16 = vsel %vm2355_vm2, %v10078_v8, %v10086_v24  ;;  %v9552_v61 = vadd.f32 %v23321_v56, %v9479_v60  ;;  %v9483_v28 = vadd.f32 %v23327_v58, %v25615_v55  ;;  %v9485_v43 = vadd.f32 %v23331_v38, %v23402_v5  ;;  %v25618_v38 = vld [vmem:[#allocation5_spill] sm:$0xff] }
 0x61f   :  { %25611 = vst [vmem:[#allocation64_spill] sm:$0xff] %v23450_v13  ;;  %v23459_v63 = vadd.f32 %v25612_v2, %v9688_v53  ;;  %v9690_v18 = vadd.f32 %v9689_v31, %v9617_v57  ;;  %v9619_v54 = vadd.f32 %v9618_v19, %v9546_v51  ;;  %v9489_v6 = vadd.f32 %v23342_v4, %v25616_v15  ;;  %v25621_v57 = vld [vmem:[#allocation82_spill] sm:$0xff] }
 0x620   :  { %v9620_v10 = vpop.f32.mrf.mxu0  ;;  %v9693_v11 = vpop.f32.mrf.mxu1  ;;  %v9491_v30 = vadd.f32 %v23356_v62, %v23405_v52  ;;  %v23479_v56 = vsel %vm2355_vm2, %v10094_v37, 0.0  ;;  %v9554_v58 = vadd.f32 %v23325_v14, %v9481_v25  ;;  %v9493_v5 = vadd.f32 %v23370_v34, %v25618_v38 }
 0x621   :  { %25613 = vst [vmem:[#allocation21_spill] sm:$0xff] %v23459_v63  ;;  %v9621_v33 = vadd.f32 %v9620_v10, %v9548_v44  ;;  %v23476_v12 = vadd.f32 %v10063_v39, %v9690_v18  ;;  %v9692_v41 = vadd.f32 %v9691_v47, %v9619_v54  ;;  %v9495_v4 = vadd.f32 %v23387_v17, %v23410_v35 }
 0x622   :  { %v9624_v8 = vpop.f32.mrf.mxu0  ;;  %v9697_v48 = vpop.f32.mrf.mxu1  ;;  %v10095_v39 = vsel %vm2355_vm2, %v10086_v24, %v10094_v37  ;;  %v10258_v49 = vmul.f32 %v23439_v36, %v23439_v36  ;;  %v9556_v60 = vadd.f32 %v23329_v3, %v9483_v28  ;;  %v9558_v34 = vadd.f32 %v23333_v46, %v9485_v43 }
 0x623   :  { %25617 = vst [vmem:[#allocation80_spill] sm:$0xff] %v23476_v12  ;;  %v9694_v26 = vadd.f32 %v9693_v11, %v9621_v33  ;;  %v9625_v31 = vadd.f32 %v9624_v8, %v9552_v61  ;;  %v23486_v27 = vadd.f32 %v10148_v50, %v9692_v41  ;;  %v9562_v53 = vadd.f32 %v23344_v59, %v9489_v6  ;;  %v25624_v6 = vld [vmem:[#allocation18_spill] sm:$0xff] }
 0x624   :  { %v9626_v62 = vpop.f32.mrf.mxu0  ;;  %v9699_v52 = vpop.f32.mrf.mxu1  ;;  %v9564_v17 = vadd.f32 %v23358_v45, %v9491_v30  ;;  %v10254_v24 = vmul.f32 %v23425_v21, %v23425_v21  ;;  %v10262_v51 = vmul.f32 %v23459_v63, %v23459_v63  ;;  %v9566_v3 = vadd.f32 %v23372_v22, %v9493_v5 }
 0x625   :  { %25619 = vst [vmem:[#allocation22_spill] sm:$0xff] %v23486_v27  ;;  %v23491_v42 = vadd.f32 %v10149_v20, %v9694_v26  ;;  %v9698_v14 = vadd.f32 %v9697_v48, %v9625_v31  ;;  %v9627_v1 = vadd.f32 %v9626_v62, %v9554_v58  ;;  %v9568_v46 = vadd.f32 %v23389_v40, %v9495_v4 }
 0x626   :  { %v9628_v35 = vpop.f32.mrf.mxu0  ;;  %v9701_v50 = vpop.f32.mrf.mxu1  ;;  %v10202_v59 = vadd.f32 %v23439_v36, %v23425_v21  ;;  %v10255_v44 = vmul.f32 %v23431_v29, %v23431_v29  ;;  %v10286_v25 = vadd.f32 %v10258_v49, %v10254_v24  ;;  %v10259_v2 = vmul.f32 %v23450_v13, %v23450_v13 }
 0x627   :  { %25620 = vst [vmem:[#allocation65_spill] sm:$0xff] %v23491_v42  ;;  %v23502_v19 = vadd.f32 %v25621_v57, %v9698_v14  ;;  %v9700_v47 = vadd.f32 %v9699_v52, %v9627_v1  ;;  %v9629_v45 = vadd.f32 %v9628_v35, %v9556_v60  ;;  %v10266_v40 = vmul.f32 %v23486_v27, %v23486_v27  ;;  %v25627_v1 = vld [vmem:[#allocation19_spill] sm:$0xff] }
 0x628   :  { %v9630_v20 = vpop.f32.mrf.mxu0  ;;  %v9703_v37 = vpop.f32.mrf.mxu1  ;;  %v10203_v54 = vadd.f32 %v10202_v59, %v23459_v63  ;;  %v10215_v55 = vadd.f32 %v23450_v13, %v23431_v29  ;;  %v10287_v28 = vadd.f32 %v10286_v25, %v10262_v51  ;;  %v10263_v43 = vmul.f32 %v23476_v12, %v23476_v12 }
 0x629   :  { %25622 = vst [vmem:[#allocation66_spill] sm:$0xff] %v23502_v19  ;;  %v23512_v18 = vadd.f32 %v10079_v32, %v9700_v47  ;;  %v9702_v22 = vadd.f32 %v9701_v50, %v9629_v45  ;;  %v9631_v10 = vadd.f32 %v9630_v20, %v9558_v34  ;;  %v10270_v15 = vmul.f32 %v23502_v19, %v23502_v19 }
 0x62a   :  { %v9634_v11 = vpop.f32.mrf.mxu0  ;;  %v9707_v61 = vpop.f32.mrf.mxu1  ;;  %v10204_v32 = vadd.f32 %v10203_v54, %v23486_v27  ;;  %v10299_v58 = vadd.f32 %v10259_v2, %v10255_v44  ;;  %v10216_v26 = vadd.f32 %v10215_v55, %v23476_v12  ;;  %v10288_v5 = vadd.f32 %v10287_v28, %v10266_v40 }
 0x62b   :  { %25623 = vst [vmem:[#allocation87_spill] sm:$0xff] %v23512_v18  ;;  %v9635_v33 = vadd.f32 %v9634_v11, %v9562_v53  ;;  %v23525_v30 = vadd.f32 %v25624_v6, %v9702_v22  ;;  %v9704_v41 = vadd.f32 %v9703_v37, %v9631_v10  ;;  %v10267_v4 = vmul.f32 %v23491_v42, %v23491_v42 }
 0x62c   :  { %v9636_v8 = vpop.f32.mrf.mxu0  ;;  %v9709_v48 = vpop.f32.mrf.mxu1  ;;  %v10205_v62 = vadd.f32 %v10204_v32, %v23502_v19  ;;  %v10217_v50 = vadd.f32 %v10216_v26, %v23491_v42  ;;  %v10289_v24 = vadd.f32 %v10288_v5, %v10270_v15  ;;  %v10271_v51 = vmul.f32 %v23512_v18, %v23512_v18  ;;  %v25643_v42 = vld [vmem:[#allocation75_spill] sm:$0xff] }
 0x62d   :  { %25625 = vst [vmem:[#allocation81_spill] sm:$0xff] %v23525_v30  ;;  %v9708_v31 = vadd.f32 %v9707_v61, %v9635_v33  ;;  %v9637_v38 = vadd.f32 %v9636_v8, %v9564_v17  ;;  %v23532_v52 = vadd.f32 %v23465_v16, %v9704_v41  ;;  %v10274_v14 = vmul.f32 %v23525_v30, %v23525_v30 }
 0x62e   :  { %v9638_v49 = vpop.f32.mrf.mxu0  ;;  %v9711_v35 = vpop.f32.mrf.mxu1  ;;  %v10300_v17 = vadd.f32 %v10299_v58, %v10263_v43  ;;  %v10206_v16 = vadd.f32 %v10205_v62, %v23525_v30  ;;  %v10165_v22 = vmul.f32 %v25614_v23, %v23479_v56  ;;  %v25650_v30 = vld [vmem:[#allocation10_spill] sm:$0xff] }
 0x62f   :  { %25626 = vst [vmem:[#allocation88_spill] sm:$0xff] %v23532_v52  ;;  %v23537_v60 = vadd.f32 %v25627_v1, %v9708_v31  ;;  %v9710_v34 = vadd.f32 %v9709_v48, %v9637_v38  ;;  %v9639_v53 = vadd.f32 %v9638_v49, %v9566_v3  ;;  %v10218_v3 = vadd.f32 %v10217_v50, %v23512_v18 }
 0x630   :  { %v9640_v57 = vpop.f32.mrf.mxu0  ;;  %v10301_v20 = vadd.f32 %v10300_v17, %v10267_v4  ;;  %v10275_v37 = vmul.f32 %v23532_v52, %v23532_v52  ;;  %v10290_v25 = vadd.f32 %v10289_v24, %v10274_v14  ;;  %v9713_v40 = vpop.f32.mrf.mxu1 }
 0x631   :  { %25628 = vst [vmem:[#allocation73_spill] sm:$0xff] %v23537_v60  ;;  %v10278_v47 = vmul.f32 %v23537_v60, %v23537_v60  ;;  %v23545_v59 = vadd.f32 %v10095_v39, %v9710_v34  ;;  %v9712_v45 = vadd.f32 %v9711_v35, %v9639_v53  ;;  %v9641_v44 = vadd.f32 %v9640_v57, %v9568_v46 }
 0x632   :  { %v10207_v2 = vadd.f32 %v10206_v16, %v23537_v60  ;;  %v10302_v39 = vadd.f32 %v10301_v20, %v10271_v51  ;;  %v10219_v10 = vadd.f32 %v10218_v3, %v23532_v52  ;;  %v25645_v60 = vld [vmem:[#allocation94_spill] sm:$0xff] }
 0x633   :  { %25629 = vst [vmem:[#allocation68_spill] sm:$0xff] %v23545_v59  ;;  %v23552_v54 = vadd.f32 %v23462_v0, %v9712_v45  ;;  %v10279_v11 = vmul.f32 %v23545_v59, %v23545_v59  ;;  %v9714_v61 = vadd.f32 %v9713_v40, %v9641_v44  ;;  %v10291_v55 = vadd.f32 %v10290_v25, %v10278_v47 }
 0x634   :  { %v10303_v43 = vadd.f32 %v10302_v39, %v10275_v37  ;;  %v10220_v0 = vadd.f32 %v10219_v10, %v23545_v59 }
 0x635   :  { %25630 = vst [vmem:[#allocation74_spill] sm:$0xff] %v23552_v54  ;;  %v10208_v46 = vadd.f32 %v10207_v2, %v23552_v54  ;;  %v10282_v28 = vmul.f32 %v23552_v54, %v23552_v54  ;;  %v23563_v33 = vadd.f32 %v10165_v22, %v9714_v61  ;;  %v25642_v54 = vld [vmem:[#allocation29_spill] sm:$0xff] }
 0x636   :  { %v10304_v15 = vadd.f32 %v10303_v43, %v10279_v11  ;;  %v5448_v27 = vadd.f32 %v25643_v42, %v25642_v54 }
 0x637   :  { %25631 = vst [vmem:[#allocation67_spill] sm:$0xff] %v23563_v33  ;;  %v10209_v32 = vrot.slane %v10208_v46, 4  ;;  %v10292_v56 = vadd.f32 %v10291_v55, %v10282_v28  ;;  %v10221_v6 = vadd.f32 %v10220_v0, %v23563_v33  ;;  %v10283_v41 = vmul.f32 %v23563_v33, %v23563_v33 }
 0x639   :  { %v10210_v8 = vadd.f32 %v10209_v32, %v10208_v46  ;;  %v10293_v48 = vrot.slane %v10292_v56, 4  ;;  %v10222_v58 = vrot.slane %v10221_v6, 4  ;;  %v10305_v26 = vadd.f32 %v10304_v15, %v10283_v41 }
 0x63b   :  { %v10211_v31 = vrot.slane %v10210_v8, 2  ;;  %v10294_v38 = vadd.f32 %v10293_v48, %v10292_v56  ;;  %v10223_v5 = vadd.f32 %v10222_v58, %v10221_v6  ;;  %v10306_v4 = vrot.slane %v10305_v26, 4 }
 0x63d   :  { %v10212_v62 = vadd.f32 %v10211_v31, %v10210_v8  ;;  %v10295_v49 = vrot.slane %v10294_v38, 2  ;;  %v10224_v14 = vrot.slane %v10223_v5, 2  ;;  %v10307_v1 = vadd.f32 %v10306_v4, %v10305_v26 }
 0x63f   :  { %v10213_v34 = vrot.slane %v10212_v62, 1  ;;  %v10296_v53 = vadd.f32 %v10295_v49, %v10294_v38  ;;  %v10225_v35 = vadd.f32 %v10224_v14, %v10223_v5  ;;  %v10308_v17 = vrot.slane %v10307_v1, 2  ;;  %v25632_v38 = vld [vmem:[#allocation6_spill] sm:$0xff]  ;;  %v25633_v5 = vld [vmem:[#allocation44_spill] sm:$0xff] }
 0x640   :  { %v5428_v4 = vadd.f32 %v25633_v5, %v25632_v38  ;;  %v25634_v14 = vld [vmem:[#allocation96_spill] sm:$0xff] }
 0x641   :  { %v10297_v50 = vrot.slane %v10296_v53, 1  ;;  %v10226_v24 = vrot.slane %v10225_v35, 1  ;;  %v10309_v51 = vadd.f32 %v10308_v17, %v10307_v1  ;;  %v10214_v57 = vadd.f32 %v10213_v34, %v10212_v62  ;;  %v25635_v34 = vld [vmem:[#allocation93_spill] sm:$0xff] }
 0x642   :  { %v8019_v1 = vrot.slane %v25634_v14, 7  ;;  %v25641_v14 = vld [vmem:[#allocation30_spill] sm:$0xff] }
 0x643   :  { %v10298_v16 = vadd.f32 %v10297_v50, %v10296_v53  ;;  %v10310_v47 = vrot.slane %v10309_v51, 1  ;;  %v10227_v20 = vadd.f32 %v10226_v24, %v10225_v35  ;;  %v5501_v53 = vadd.f32 %v25635_v34, %v5428_v4  ;;  %v25636_v35 = vld [vmem:[#allocation76_spill] sm:$0xff] }
 0x644   :  { %v25637_v17 = vrot.slane %v25636_v35, 7 }
 0x645   :  { %v23569_v45 = vsel %vm1502_vm1, %v10214_v57, %v10298_v16  ;;  %v10311_v3 = vadd.f32 %v10310_v47, %v10309_v51  ;;  %v25638_v57 = vld [vmem:[#allocation27_spill] sm:$0xff] }
 0x646   :  { %10342 = vrot.lane.b32.xlu0 %v23569_v45, %s17981_s4  ;;  %v8110_v50 = vsel %vm1502_vm1, 0.0, %v25637_v17  ;;  %v25639_v16 = vld [vmem:[#allocation43_spill] sm:$0xff] }
 0x647   :  { %v23574_v37 = vsel %vm1502_vm1, %v10227_v20, %v10311_v3  ;;  %v5438_v47 = vadd.f32 %v25639_v16, %v25638_v57  ;;  %v8111_v20 = vsel %vm1502_vm1, 0.0, %v8019_v1  ;;  %v25640_v3 = vld [vmem:[#allocation45_spill] sm:$0xff]  ;;  %v8114_v5 = vmul.f32 %v25578_v9, %v8110_v50  ;;  %v25644_v16 = vld [vmem:[#allocation92_spill] sm:$0xff] }
 0x648   :  { %10344 = vrot.lane.b32.xlu1 %v23574_v37, %s17981_s4  ;;  %v5574_v38 = vadd.f32 %v25640_v3, %v5501_v53  ;;  %v8115_v17 = vmul.f32 %v25578_v9, %v8111_v20  ;;  %v5458_v12 = vadd.f32 %v25645_v60, %v25644_v16  ;;  %v25646_v53 = vld [vmem:[#allocation33_spill] sm:$0xff]  ;;  %v25647_v50 = vld [vmem:[#allocation8_spill] sm:$0xff]  ;;  %v25649_v9 = vld [vmem:[#allocation7_spill] sm:$0xff] }
 0x649   :  { %v5511_v33 = vadd.f32 %v25641_v14, %v5438_v47  ;;  %v5521_v63 = vadd.f32 %v25647_v50, %v5448_v27  ;;  %v8034_v20 = vrot.slane %v25649_v9, 7  ;;  %v25651_v27 = vld [vmem:[#allocation41_spill] sm:$0xff]  ;;  %v25652_v50 = vld [vmem:[#allocation48_spill] sm:$0xff] }
 0x64a   :  { %v8026_v59 = vrot.slane %v5574_v38, 7  ;;  %v5531_v42 = vadd.f32 %v25650_v30, %v5458_v12  ;;  %v25654_v12 = vld [vmem:[#allocation50_spill] sm:$0xff] }
 0x64b   :  { %v5584_v3 = vadd.f32 %v25646_v53, %v5511_v33  ;;  %v8050_v53 = vrot.slane %v25651_v27, 7  ;;  %v5594_v13 = vadd.f32 %v25652_v50, %v5521_v63  ;;  %v25660_v27 = vld [vmem:[#allocation36_spill] sm:$0xff] }
 0x64c   :  { %v8027_v54 = vsel %vm1502_vm1, %v8019_v1, %v8026_v59  ;;  %v5604_v30 = vadd.f32 %v25654_v12, %v5531_v42  ;;  %v8035_v1 = vsel %vm1502_vm1, %v8026_v59, %v8034_v20 }
 0x64d   :  { %v8042_v16 = vrot.slane %v5584_v3, 7 }
 0x653   :  { %v9750_v44 = vpop.f32.mrf.mxu0  ;;  %v9823_v25 = vpop.f32.mrf.mxu1 }
 0x654   :  { %v9751_v35 = vadd.f32 %v9750_v44, %v8114_v5  ;;  %v25648_v44 = vld [vmem:[#allocation95_spill] sm:$0xff] }
 0x655   :  { %v9752_v2 = vpop.f32.mrf.mxu0  ;;  %v9825_v40 = vpop.f32.mrf.mxu1 }
 0x656   :  { %v9753_v57 = vadd.f32 %v9752_v2, %v8115_v17  ;;  %v9824_v52 = vadd.f32 %v9823_v25, %v9751_v35 }
 0x657   :  { %v9754_v22 = vpop.f32.mrf.mxu0  ;;  %v9827_v39 = vpop.f32.mrf.mxu1 }
 0x658   :  { %v9755_v5 = vadd.f32 %v9754_v22, %v25648_v44  ;;  %v9826_v60 = vadd.f32 %v9825_v40, %v9753_v57  ;;  %v25653_v22 = vld [vmem:[#allocation31_spill] sm:$0xff] }
 0x659   :  { %v9756_v10 = vpop.f32.mrf.mxu0  ;;  %v23578_v11 = vpop.f32.mrf.mxu1 }
 0x65a   :  { %v9757_v17 = vadd.f32 %v9756_v10, %v8027_v54  ;;  %v9828_v35 = vadd.f32 %v9827_v39, %v9755_v5  ;;  %v25655_v10 = vld [vmem:[#allocation99_spill] sm:$0xff]  ;;  %v8058_v54 = vrot.slane %v5594_v13, 7 }
 0x65b   :  { %v9760_v61 = vpop.f32.mrf.mxu0  ;;  %v23580_v55 = vpop.f32.mrf.mxu1 }
 0x65c   :  { %v9761_v44 = vadd.f32 %v9760_v61, %v25653_v22  ;;  %v8043_v61 = vsel %vm1502_vm1, %v8034_v20, %v8042_v16 }
 0x65d   :  { %v23582_v46 = vpop.f32.mrf.mxu0  ;;  %v23584_v28 = vpop.f32.mrf.mxu1 }
 0x65e   :  { %v9763_v39 = vadd.f32 %v23582_v46, %v8035_v1  ;;  %v9834_v59 = vadd.f32 %v23580_v55, %v9761_v44  ;;  %v25659_v46 = vld [vmem:[#allocation47_spill] sm:$0xff] }
 0x65f   :  { %v23586_v43 = vpop.f32.mrf.mxu0  ;;  %v23588_v0 = vpop.f32.mrf.mxu1  ;;  %v8130_v20 = vmul.f32 %v25660_v27, %v25659_v46 }
 0x661   :  { %v23590_v32 = vpop.f32.mrf.mxu0  ;;  %v23592_v56 = vpop.f32.mrf.mxu1 }
 0x663   :  { %v23594_v15 = vpop.f32.mrf.mxu0  ;;  %v23596_v6 = vpop.f32.mrf.mxu1 }
 0x665   :  { %v23598_v41 = vpop.f32.mrf.mxu0  ;;  %v23600_v8 = vpop.f32.mrf.mxu1 }
 0x667   :  { %v23602_v48 = vpop.f32.mrf.mxu0  ;;  %v23604_v58 = vpop.f32.mrf.mxu1 }
 0x669   :  { %v23606_v26 = vpop.f32.mrf.mxu0  ;;  %v23608_v31 = vpop.f32.mrf.mxu1 }
 0x66b   :  { %v23612_v62 = vpop.f32.mrf.mxu0  ;;  %v23614_v49 = vpop.f32.mrf.mxu1 }
 0x66d   :  { %v23621_v24 = vpop.f32.mrf.mxu0  ;;  %v23623_v51 = vpop.f32.mrf.mxu1 }
 0x66f   :  { %v23631_v4 = vpop.f32.mrf.mxu0  ;;  %v23633_v34 = vpop.f32.mrf.mxu1 }
 0x671   :  { %v23642_v47 = vpop.f32.mrf.mxu0  ;;  %v23644_v14 = vpop.f32.mrf.mxu1 }
 0x694   :  { %v9896_v2 = vpop.f32.mrf.mxu0  ;;  %v9969_v38 = vpop.f32.mrf.mxu1 }
 0x695   :  { %v9897_v33 = vadd.f32 %v9896_v2, %v9824_v52  ;;  %v9830_v52 = vadd.f32 %v23578_v11, %v9757_v17  ;;  %v25656_v2 = vld [vmem:[#allocation100_spill] sm:$0xff]  ;;  %v25657_v17 = vld [vmem:[#allocation42_spill] sm:$0xff] }
 0x696   :  { %v9898_v36 = vpop.f32.mrf.mxu0  ;;  %v9971_v25 = vpop.f32.mrf.mxu1 }
 0x697   :  { %v9970_v9 = vadd.f32 %v9969_v38, %v9897_v33  ;;  %v9899_v18 = vadd.f32 %v9898_v36, %v9826_v60  ;;  %v8051_v36 = vsel %vm1502_vm1, %v8042_v16, %v8050_v53  ;;  %v8066_v33 = vrot.slane %v25657_v17, 7 }
 0x698   :  { %v9900_v19 = vpop.f32.mrf.mxu0  ;;  %v9973_v40 = vpop.f32.mrf.mxu1  ;;  %v8131_v12 = vmul.f32 %v25660_v27, %v8051_v36 }
 0x699   :  { %v23657_v57 = vadd.f32 %v25655_v10, %v9970_v9  ;;  %v9972_v3 = vadd.f32 %v9971_v25, %v9899_v18  ;;  %v9901_v63 = vadd.f32 %v9900_v19, %v9828_v35  ;;  %v8074_v18 = vrot.slane %v5604_v30, 7  ;;  %v25658_v19 = vld [vmem:[#allocation34_spill] sm:$0xff]  ;;  %v25661_v35 = vld [vmem:[#allocation101_spill] sm:$0xff] }
 0x69a   :  { %v9902_v5 = vpop.f32.mrf.mxu0  ;;  %v9975_v42 = vpop.f32.mrf.mxu1  ;;  %v9765_v13 = vadd.f32 %v23586_v43, %v25658_v19  ;;  %v9767_v25 = vadd.f32 %v23590_v32, %v8043_v61  ;;  %v9836_v9 = vadd.f32 %v23584_v28, %v9763_v39  ;;  %v9771_v43 = vadd.f32 %v23594_v15, %v8130_v20  ;;  %v25663_v15 = vld [vmem:[#allocation103_spill] sm:$0xff]  ;;  %v25667_v19 = vld [vmem:[#allocation106_spill] sm:$0xff] }
 0x69b   :  { %v23664_v38 = vadd.f32 %v25656_v2, %v9972_v3  ;;  %v9974_v11 = vadd.f32 %v9973_v40, %v9901_v63  ;;  %v9903_v60 = vadd.f32 %v9902_v5, %v9830_v52  ;;  %v8059_v40 = vsel %vm1502_vm1, %v8050_v53, %v8058_v54  ;;  %v25662_v52 = vld [vmem:[#allocation102_spill] sm:$0xff]  ;;  %v25664_v53 = vld [vmem:[#allocation105_spill] sm:$0xff] }
 0x69c   :  { %v9906_v50 = vpop.f32.mrf.mxu0  ;;  %v9979_v16 = vpop.f32.mrf.mxu1  ;;  %v9838_v32 = vadd.f32 %v23588_v0, %v9765_v13  ;;  %v8067_v63 = vsel %vm1502_vm1, %v8058_v54, %v8066_v33  ;;  %v8075_v61 = vsel %vm1502_vm1, %v8066_v33, %v8074_v18  ;;  %v9840_v36 = vadd.f32 %v23592_v56, %v9767_v25 }
 0x69d   :  { %v23673_v55 = vadd.f32 %v25661_v35, %v9974_v11  ;;  %v9976_v22 = vadd.f32 %v9975_v42, %v9903_v60  ;;  %v9907_v44 = vadd.f32 %v9906_v50, %v9834_v59  ;;  %v9773_v42 = vadd.f32 %v23598_v41, %v8131_v12  ;;  %v25665_v11 = vld [vmem:[#allocation109_spill] sm:$0xff]  ;;  %v25670_v35 = vld [vmem:[#allocation104_spill] sm:$0xff] }
 0x69e   :  { %v9908_v30 = vpop.f32.mrf.mxu0  ;;  %v9981_v1 = vpop.f32.mrf.mxu1  ;;  %v10150_v2 = vmul.f32 %v25608_v7, %v25664_v53  ;;  %v25666_v60 = vrot.slane %v25665_v11, 1  ;;  %v10151_v13 = vmul.f32 %v25608_v7, %v25667_v19  ;;  %v9844_v56 = vadd.f32 %v23596_v6, %v9771_v43  ;;  %v25668_v41 = vld [vmem:[#allocation49_spill] sm:$0xff]  ;;  %v25675_v19 = vld [vmem:[#allocation108_spill] sm:$0xff] }
 0x69f   :  { %v23680_v10 = vadd.f32 %v25662_v52, %v9976_v22  ;;  %v9980_v3 = vadd.f32 %v9979_v16, %v9907_v44  ;;  %v9909_v5 = vadd.f32 %v9908_v30, %v9836_v9  ;;  %v9775_v46 = vadd.f32 %v23602_v48, %v25668_v41  ;;  %v25669_v50 = vld [vmem:[#allocation9_spill] sm:$0xff] }
 0x6a0   :  { %v9910_v28 = vpop.f32.mrf.mxu0  ;;  %v9983_v39 = vpop.f32.mrf.mxu1  ;;  %v10134_v0 = vsel %vm2355_vm2, %v25666_v60, 0.0  ;;  %v9777_v27 = vadd.f32 %v23606_v26, %v8059_v40  ;;  %v9781_v16 = vadd.f32 %v23612_v62, %v25669_v50  ;;  %v9783_v25 = vadd.f32 %v23621_v24, %v8067_v63  ;;  %v25671_v26 = vld [vmem:[#allocation111_spill] sm:$0xff]  ;;  %v25673_v62 = vld [vmem:[#allocation46_spill] sm:$0xff] }
 0x6a1   :  { %v23688_v59 = vadd.f32 %v25663_v15, %v9980_v3  ;;  %v9982_v54 = vadd.f32 %v9981_v1, %v9909_v5  ;;  %v9911_v17 = vadd.f32 %v9910_v28, %v9838_v32  ;;  %v23708_v7 = vmul.f32 %v25614_v23, %v10134_v0 }
 0x6a2   :  { %v9912_v33 = vpop.f32.mrf.mxu0  ;;  %v9985_v18 = vpop.f32.mrf.mxu1  ;;  %v9846_v6 = vadd.f32 %v23600_v8, %v9773_v42  ;;  %v25672_v1 = vrot.slane %v25671_v26, 1  ;;  %v9785_v24 = vadd.f32 %v23631_v4, %v25673_v62  ;;  %v9787_v40 = vadd.f32 %v23642_v47, %v8075_v61 }
 0x6a3   :  { %v9913_v20 = vadd.f32 %v9912_v33, %v9840_v36  ;;  %v23705_v22 = vadd.f32 %v25670_v35, %v9982_v54  ;;  %v9984_v44 = vadd.f32 %v9983_v39, %v9911_v17  ;;  %v10260_v63 = vmul.f32 %v23673_v55, %v23673_v55 }
 0x6a4   :  { %v9916_v9 = vpop.f32.mrf.mxu0  ;;  %v9989_v12 = vpop.f32.mrf.mxu1  ;;  %v23714_v43 = vsel %vm2355_vm2, %v25672_v1, 0.0  ;;  %v9848_v39 = vadd.f32 %v23604_v58, %v9775_v46  ;;  %v9850_v36 = vadd.f32 %v23608_v31, %v9777_v27  ;;  %v9854_v42 = vadd.f32 %v23614_v49, %v9781_v16 }
 0x6a5   :  { %v9986_v48 = vadd.f32 %v9985_v18, %v9913_v20  ;;  %v9917_v30 = vadd.f32 %v9916_v9, %v9844_v56  ;;  %v23719_v52 = vadd.f32 %v10150_v2, %v9984_v44  ;;  %v9856_v4 = vadd.f32 %v23623_v51, %v9783_v25  ;;  %v25674_v2 = vld [vmem:[#allocation107_spill] sm:$0xff]  ;;  %v25676_v9 = vld [vmem:[#allocation110_spill] sm:$0xff] }
 0x6a6   :  { %v9918_v3 = vpop.f32.mrf.mxu0  ;;  %v9991_v32 = vpop.f32.mrf.mxu1  ;;  %v10256_v15 = vmul.f32 %v23657_v57, %v23657_v57  ;;  %v10264_v53 = vmul.f32 %v23688_v59, %v23688_v59  ;;  %v9858_v58 = vadd.f32 %v23633_v34, %v9785_v24  ;;  %v9860_v31 = vadd.f32 %v23644_v14, %v9787_v40 }
 0x6a7   :  { %v23723_v8 = vadd.f32 %v10151_v13, %v9986_v48  ;;  %v9990_v5 = vadd.f32 %v9989_v12, %v9917_v30  ;;  %v9919_v28 = vadd.f32 %v9918_v3, %v9846_v6  ;;  %v10228_v49 = vadd.f32 %v23673_v55, %v23657_v57 }
 0x6a8   :  { %v9920_v47 = vpop.f32.mrf.mxu0  ;;  %v9993_v61 = vpop.f32.mrf.mxu1  ;;  %v10257_v17 = vmul.f32 %v23664_v38, %v23664_v38  ;;  %v10312_v33 = vadd.f32 %v10260_v63, %v10256_v15  ;;  %v10261_v18 = vmul.f32 %v23680_v10, %v23680_v10  ;;  %v10268_v14 = vmul.f32 %v23719_v52, %v23719_v52  ;;  %v25677_v63 = vld [vmem:[#allocation112_spill] sm:$0xff] }
 0x6a9   :  { %v23734_v11 = vadd.f32 %v25674_v2, %v9990_v5  ;;  %v9992_v60 = vadd.f32 %v9991_v32, %v9919_v28  ;;  %v9921_v51 = vadd.f32 %v9920_v47, %v9848_v39  ;;  %v10229_v34 = vadd.f32 %v10228_v49, %v23688_v59 }
 0x6aa   :  { %v9922_v0 = vpop.f32.mrf.mxu0  ;;  %v9995_v54 = vpop.f32.mrf.mxu1  ;;  %v10241_v20 = vadd.f32 %v23680_v10, %v23664_v38  ;;  %v10313_v50 = vadd.f32 %v10312_v33, %v10264_v53  ;;  %v10265_v16 = vmul.f32 %v23705_v22, %v23705_v22  ;;  %v10325_v26 = vadd.f32 %v10261_v18, %v10257_v17 }
 0x6ab   :  { %v23745_v13 = vadd.f32 %v25675_v19, %v9992_v60  ;;  %v9994_v56 = vadd.f32 %v9993_v61, %v9921_v51  ;;  %v9923_v41 = vadd.f32 %v9922_v0, %v9850_v36  ;;  %v10230_v35 = vadd.f32 %v10229_v34, %v23719_v52  ;;  %v25678_v36 = vld [vmem:[#allocation113_spill] sm:$0xff] }
 0x6ac   :  { %v9926_v46 = vpop.f32.mrf.mxu0  ;;  %v9999_v27 = vpop.f32.mrf.mxu1  ;;  %v10272_v44 = vmul.f32 %v23734_v11, %v23734_v11  ;;  %v10242_v1 = vadd.f32 %v10241_v20, %v23705_v22  ;;  %v10314_v40 = vadd.f32 %v10313_v50, %v10268_v14  ;;  %v10269_v3 = vmul.f32 %v23723_v8, %v23723_v8 }
 0x6ad   :  { %v9927_v25 = vadd.f32 %v9926_v46, %v9854_v42  ;;  %v23758_v12 = vadd.f32 %v25676_v9, %v9994_v56  ;;  %v9996_v6 = vadd.f32 %v9995_v54, %v9923_v41  ;;  %v10231_v32 = vadd.f32 %v10230_v35, %v23734_v11  ;;  %v25679_v54 = vld [vmem:[#allocation114_spill] sm:$0xff] }
 0x6ae   :  { %v9928_v48 = vpop.f32.mrf.mxu0  ;;  %v10001_v30 = vpop.f32.mrf.mxu1  ;;  %v10243_v53 = vadd.f32 %v10242_v1, %v23723_v8  ;;  %v10315_v2 = vadd.f32 %v10314_v40, %v10272_v44  ;;  %v10273_v60 = vmul.f32 %v23745_v13, %v23745_v13  ;;  %v10167_v14 = vmul.f32 %v25614_v23, %v23714_v43 }
 0x6af   :  { %v10000_v62 = vadd.f32 %v9999_v27, %v9927_v25  ;;  %v9929_v24 = vadd.f32 %v9928_v48, %v9856_v4  ;;  %v23765_v5 = vadd.f32 %v25677_v63, %v9996_v6  ;;  %v10276_v39 = vmul.f32 %v23758_v12, %v23758_v12 }
 0x6b0   :  { %v9930_v28 = vpop.f32.mrf.mxu0  ;;  %v10003_v15 = vpop.f32.mrf.mxu1  ;;  %v10326_v4 = vadd.f32 %v10325_v26, %v10265_v16  ;;  %v10232_v51 = vadd.f32 %v10231_v32, %v23758_v12 }
 0x6b1   :  { %v23770_v42 = vadd.f32 %v25678_v36, %v10000_v62  ;;  %v10002_v47 = vadd.f32 %v10001_v30, %v9929_v24  ;;  %v9931_v61 = vadd.f32 %v9930_v28, %v9858_v58  ;;  %v10244_v58 = vadd.f32 %v10243_v53, %v23745_v13 }
 0x6b2   :  { %v9932_v49 = vpop.f32.mrf.mxu0  ;;  %v10327_v18 = vadd.f32 %v10326_v4, %v10269_v3  ;;  %v10277_v19 = vmul.f32 %v23765_v5, %v23765_v5  ;;  %v10316_v56 = vadd.f32 %v10315_v2, %v10276_v39  ;;  %v10005_v27 = vpop.f32.mrf.mxu1 }
 0x6b3   :  { %v10280_v0 = vmul.f32 %v23770_v42, %v23770_v42  ;;  %v23779_v17 = vadd.f32 %v25679_v54, %v10002_v47  ;;  %v10004_v33 = vadd.f32 %v10003_v15, %v9931_v61  ;;  %v9933_v34 = vadd.f32 %v9932_v49, %v9860_v31 }
 0x6b4   :  { %v10233_v41 = vadd.f32 %v10232_v51, %v23770_v42  ;;  %v10328_v20 = vadd.f32 %v10327_v18, %v10273_v60  ;;  %v10245_v50 = vadd.f32 %v10244_v58, %v23765_v5  ;;  %v25680_v18 = vld [vmem:[#allocation20_spill] sm:$0xff] }
 0x6b5   :  { %v23788_v46 = vadd.f32 %v23708_v7, %v10004_v33  ;;  %v10281_v16 = vmul.f32 %v23779_v17, %v23779_v17  ;;  %v10006_v25 = vadd.f32 %v10005_v27, %v9933_v34  ;;  %v10317_v35 = vadd.f32 %v10316_v56, %v10280_v0 }
 0x6b6   :  { %v10329_v43 = vadd.f32 %v10328_v20, %v10277_v19  ;;  %v10246_v44 = vadd.f32 %v10245_v50, %v23779_v17  ;;  %vm10350_vm9 = vcmp.lt.s32.totalorder %v25680_v18, 16 }
 0x6b7   :  { %v10234_v31 = vadd.f32 %v10233_v41, %v23788_v46  ;;  %v10284_v23 = vmul.f32 %v23788_v46, %v23788_v46  ;;  %v23797_v9 = vadd.f32 %v10167_v14, %v10006_v25 }
 0x6b8   :  { %v10330_v48 = vadd.f32 %v10329_v43, %v10281_v16  ;;  %v10343_v56 = vpop.permute.xlu0 %10342 }
 0x6b9   :  { %v10235_v7 = vrot.slane %v10234_v31, 4  ;;  %v10318_v6 = vadd.f32 %v10317_v35, %v10284_v23  ;;  %v10247_v30 = vadd.f32 %v10246_v44, %v23797_v9  ;;  %v10285_v26 = vmul.f32 %v23797_v9, %v23797_v9 }
 0x6ba   :  { %v10345_v58 = vpop.permute.xlu1 %10344 }
 0x6bb   :  { %v10236_v1 = vadd.f32 %v10235_v7, %v10234_v31  ;;  %v10319_v62 = vrot.slane %v10318_v6, 4  ;;  %v10248_v24 = vrot.slane %v10247_v30, 4  ;;  %v10331_v40 = vadd.f32 %v10330_v48, %v10285_v26 }
 0x6bc   :  { %v10353_v41 = vsel %vm10350_vm9, %v10343_v56, %v10345_v58 }
 0x6bd   :  { %v10237_v3 = vrot.slane %v10236_v1, 2  ;;  %v10320_v32 = vadd.f32 %v10319_v62, %v10318_v6  ;;  %v10249_v63 = vadd.f32 %v10248_v24, %v10247_v30  ;;  %v10332_v28 = vrot.slane %v10331_v40, 4 }
 0x6be   :  { %v10356_v20 = vadd.f32 %v10353_v41, %v23574_v37  ;;  %v17703_v41 = vld [vmem:[%s25049_s7 + $0x10] sm:$0xff]  }
 0x6bf   :  { %v10238_v39 = vadd.f32 %v10237_v3, %v10236_v1  ;;  %v10321_v36 = vrot.slane %v10320_v32, 2  ;;  %v10250_v47 = vrot.slane %v10249_v63, 2  ;;  %v10333_v61 = vadd.f32 %v10332_v28, %v10331_v40  ;;  %v17684_v28 = vld [vmem:[%s25049_s7 + $0xf8] sm:$0xff]  }
 0x6c0   :  { %16186 = vmatprep.subr.bf16.mxu1 %v17684_v28 }
 0x6c1   :  { %v10239_v15 = vrot.slane %v10238_v39, 1  ;;  %v10322_v4 = vadd.f32 %v10321_v36, %v10320_v32  ;;  %v10251_v53 = vadd.f32 %v10250_v47, %v10249_v63  ;;  %v10334_v2 = vrot.slane %v10333_v61, 2  ;;  %v17682_v32 = vld [vmem:[%s25049_s7 + $0x78] sm:$0xff]   ;;  %v17686_v36 = vld [vmem:[%s25049_s7 + $0x70] sm:$0xff]  }
 0x6c2   :  { %v17683_v63 = vld [vmem:[%s25049_s7 + $0x38] sm:$0xff]   ;;  %16164 = vmatprep.subr.bf16.mxu0 %v17682_v32  ;;  %v17688_v47 = vld [vmem:[%s25049_s7 + $0xf0] sm:$0xff]  }
 0x6c3   :  { %v10323_v60 = vrot.slane %v10322_v4, 1  ;;  %v10252_v49 = vrot.slane %v10251_v53, 1  ;;  %v10335_v51 = vadd.f32 %v10334_v2, %v10333_v61  ;;  %v10240_v0 = vadd.f32 %v10239_v15, %v10238_v39  ;;  %v17685_v39 = vld [vmem:[%s25049_s7 + $0xb8] sm:$0xff]   ;;  %16165 = vmatpush3.bf16.msra.mxu0 %v17683_v63  ;;  %v17687_v61 = vld [vmem:[%s25049_s7 + $0x30] sm:$0xff]   ;;  %v17691_v2 = vld [vmem:[%s25049_s7 + $0x28] sm:$0xff]  }
 0x6c4   :  { %16187 = vmatpush3.bf16.msra.mxu1 %v17685_v39  ;;  %v17689_v15 = vld [vmem:[%s25049_s7 + $0xb0] sm:$0xff]   ;;  %16166 = vmatprep.subr.bf16.mxu0 %v17686_v36 }
 0x6c5   :  { %v10324_v54 = vadd.f32 %v10323_v60, %v10322_v4  ;;  %v10336_v33 = vrot.slane %v10335_v51, 1  ;;  %v10253_v34 = vadd.f32 %v10252_v49, %v10251_v53  ;;  %16188 = vmatprep.subr.bf16.mxu1 %v17688_v47  ;;  %v17690_v4 = vld [vmem:[%s25049_s7 + $0x68] sm:$0xff]   ;;  %v17694_v49 = vld [vmem:[%s25049_s7 + $0x60] sm:$0xff]  }
 0x6c6   :  { %v17692_v53 = vld [vmem:[%s25049_s7 + $0xe8] sm:$0xff]  }
 0x6c7   :  { %v10340_v19 = vsel %vm1502_vm1, %v10240_v0, %v10324_v54  ;;  %v10337_v14 = vadd.f32 %v10336_v33, %v10335_v51  ;;  %16167 = vmatpush3.bf16.msra.mxu0 %v17687_v61  ;;  %v17693_v60 = vld [vmem:[%s25049_s7 + $0xa8] sm:$0xff]   ;;  %v17696_v51 = vld [vmem:[%s25049_s7 + $0xe0] sm:$0xff]   ;;  %v17698_v33 = vld [vmem:[%s25049_s7 + $0x58] sm:$0xff]  }
 0x6c8   :  { %10346 = vrot.lane.b32.xlu0 %v10340_v19, %s17981_s4  ;;  %16189 = vmatpush3.bf16.msra.mxu1 %v17689_v15  ;;  %v17695_v0 = vld [vmem:[%s25049_s7 + $0x20] sm:$0xff]  }
 0x6c9   :  { %v10341_v27 = vsel %vm1502_vm1, %v10253_v34, %v10337_v14  ;;  %16168 = vmatprep.subr.bf16.mxu0 %v17690_v4  ;;  %16190 = vmatprep.subr.bf16.mxu1 %v17692_v53  ;;  %v17697_v54 = vld [vmem:[%s25049_s7 + $0xa0] sm:$0xff]   ;;  %v17701_v34 = vld [vmem:[%s25049_s7 + $0x98] sm:$0xff]   ;;  %v17702_v14 = vld [vmem:[%s25049_s7 + $0x50] sm:$0xff]  }
 0x6ca   :  { %10348 = vrot.lane.b32.xlu1 %v10341_v27, %s17981_s4 }
 0x6cb   :  { %16169 = vmatpush3.bf16.msra.mxu0 %v17691_v2 }
 0x6cc   :  { %16191 = vmatpush3.bf16.msra.mxu1 %v17693_v60  ;;  %16170 = vmatprep.subr.bf16.mxu0 %v17694_v49 }
 0x6cd   :  { %16192 = vmatprep.subr.bf16.mxu1 %v17696_v51 }
 0x6ce   :  { %10361 = vrot.lane.b32.xlu1 %v10356_v20, %s17978_s1 }
 0x6cf   :  { %16171 = vmatpush3.bf16.msra.mxu0 %v17695_v0 }
 0x6d0   :  { %16193 = vmatpush3.bf16.msra.mxu1 %v17697_v54  ;;  %16172 = vmatprep.subr.bf16.mxu0 %v17698_v33 }
 0x73a   :  { %v10347_v50 = vpop.permute.xlu0 %10346 }
 0x73b   :  { %v10352_v43 = vsel %vm10350_vm9, %v10345_v58, %v10347_v50  ;;  %v17700_v58 = vld [vmem:[%s25049_s7 + $0xd8] sm:$0xff]  }
 0x73c   :  { %v10349_v16 = vpop.permute.xlu1 %10348  ;;  %v10357_v37 = vadd.f32 %v10352_v43, %v10340_v19  ;;  %v17699_v19 = vld [vmem:[%s25049_s7 + $0x18] sm:$0xff]   ;;  %16194 = vmatprep.subr.bf16.mxu1 %v17700_v58  ;;  %v17713_v43 = vld [vmem:[%s25049_s7 + $0x80] sm:$0xff]  }
 0x73d   :  { %v10351_v25 = vsel %vm10350_vm9, %v10347_v50, %v10349_v16  ;;  %v10354_v35 = vsel %vm10350_vm9, %v10349_v16, %v10343_v56  ;;  %v17704_v56 = vld [vmem:[%s25049_s7 + $0xd0] sm:$0xff]   ;;  %16173 = vmatpush3.bf16.msra.mxu0 %v17699_v19  ;;  %16195 = vmatpush3.bf16.msra.mxu1 %v17701_v34  ;;  %v17708_v50 = vld [vmem:[%s25049_s7 + $0xc8] sm:$0xff]  }
 0x73e   :  { %v10355_v31 = vadd.f32 %v10354_v35, %v23569_v45  ;;  %v10358_v23 = vadd.f32 %v10351_v25, %v10341_v27  ;;  %v17705_v27 = vld [vmem:[%s25049_s7 + $0x90] sm:$0xff]   ;;  %16174 = vmatprep.subr.bf16.mxu0 %v17702_v14  ;;  %16196 = vmatprep.subr.bf16.mxu1 %v17704_v56  ;;  %v17707_v16 = vld [vmem:[%s25049_s7 + $0x8] sm:$0xff]   ;;  %v17710_v35 = vld [vmem:[%s25049_s7 + $0x40] sm:$0xff]  }
 0x73f   :  { %v17709_v25 = vld [vmem:[%s25049_s7 + $0x88] sm:$0xff]  }
 0x740   :  { %10359 = vrot.lane.b32.xlu0 %v10355_v31, %s17978_s1  ;;  %10365 = vrot.lane.b32.xlu1 %v10358_v23, %s17978_s1  ;;  %v10362_v44 = vpop.permute.xlu1 %10361  ;;  %v25681_v56 = vld [vmem:[#allocation77_spill] sm:$0xff] }
 0x741   :  { %16175 = vmatpush3.bf16.msra.mxu0 %v17703_v41  ;;  %16197 = vmatpush3.bf16.msra.mxu1 %v17705_v27 }
 0x742   :  { %16198 = vmatprep.subr.bf16.mxu1 %v17708_v50 }
 0x744   :  { %10363 = vrot.lane.b32.xlu0 %v10357_v37, %s17978_s1 }
 0x745   :  { %16199 = vmatpush3.bf16.msra.mxu1 %v17709_v25  ;;  %v17982_v25 = vmov 1983009808  }
 0x7b2   :  { %v10360_v7 = vpop.permute.xlu0 %10359  ;;  %v10366_v6 = vpop.permute.xlu1 %10365 }
 0x7b3   :  { %v10369_v48 = vsel %vm2976_vm7, %v10360_v7, %v10362_v44  ;;  %v10370_v45 = vsel %vm2976_vm7, %v10366_v6, %v10360_v7 }
 0x7b4   :  { %v23825_v30 = vadd.f32 %v10369_v48, %v10356_v20  ;;  %v23827_v26 = vadd.f32 %v10370_v45, %v10355_v31  ;;  %v17706_v20 = vld [vmem:[%s25049_s7 + $0x48] sm:$0xff]   ;;  %v17712_v31 = vld [vmem:[%s25049_s7 + $0xc0] sm:$0xff]  }
 0x7b5   :  { %16176 = vmatprep.subr.bf16.mxu0 %v17706_v20  ;;  %16200 = vmatprep.subr.bf16.mxu1 %v17712_v31  ;;  %v10200_v20 = vld [vmem:[%s25047_s5] sm:$0xf]  ;;  %v17983_v31 = vmov 572653568  }
 0x7b6   :  { %v10364_v1 = vpop.permute.xlu0 %10363  ;;  %10377 = vrot.lane.b32.xlu1 %v23825_v30, %s17979_s18  ;;  %10375 = vrot.lane.b32.xlu0 %v23827_v26, %s17979_s18 }
 0x7b7   :  { %v10367_v62 = vsel %vm2976_vm7, %v10364_v1, %v10366_v6  ;;  %v10368_v24 = vsel %vm2976_vm7, %v10362_v44, %v10364_v1  ;;  %16177 = vmatpush3.bf16.msra.mxu0 %v17707_v16  ;;  %16201 = vmatpush3.bf16.msra.mxu1 %v17713_v43  ;;  %v17716_v44 = vld [vmem:[%s25049_s7 + $0x1f8] sm:$0xff]   ;;  %v17984_v43 = vmov 1935823168  }
 0x7b8   :  { %v23837_v40 = vadd.f32 %v10368_v24, %v10357_v37  ;;  %v23839_v3 = vadd.f32 %v10367_v62, %v10358_v23  ;;  %v17711_v23 = vld [vmem:[%s25049_s7] sm:$0xff]   ;;  %16178 = vmatprep.subr.bf16.mxu0 %v17710_v35  ;;  %v17714_v37 = vld [vmem:[%s25049_s7 + $0x178] sm:$0xff]   ;;  %16230 = vmatprep.subr.bf16.mxu1 %v17716_v44  ;;  %v10642_v35 = vunpack.c.l.s4 %v17982_v25 }
 0x7b9   :  { %v25682_v44 = vld [vmem:[#allocation84_spill] sm:$0xff]  ;;  %v25691_v25 = vld [vmem:[#allocation81_spill] sm:$0xff] }
 0x7ba   :  { %10379 = vrot.lane.b32.xlu0 %v23837_v40, %s17979_s18  ;;  %10381 = vrot.lane.b32.xlu1 %v23839_v3, %s17979_s18 }
 0x7bb   :  { %16179 = vmatpush3.bf16.msra.mxu0 %v17711_v23  ;;  %v10976_v23 = vunpack.c.l.s4 %v17983_v31 }
 0x7bc   :  { %16208 = vmatprep.subr.bf16.mxu0 %v17714_v37  ;;  %v11262_v37 = vunpack.c.l.s4 %v17984_v43  ;;  %v25693_v43 = vld [vmem:[#allocation21_spill] sm:$0xff] }
 0x828   :  { %v10376_v7 = vpop.permute.xlu0 %10375  ;;  %v10378_v6 = vpop.permute.xlu1 %10377 }
 0x829   :  { %v10385_v48 = vsel %vm3009_vm8, %v10376_v7, %v10378_v6 }
 0x82a   :  { %v10388_v63 = vadd.f32 %v10385_v48, %v23825_v30 }
 0x82c   :  { %v10380_v45 = vpop.permute.xlu0 %10379  ;;  %v10382_v1 = vpop.permute.xlu1 %10381 }
 0x82d   :  { %v10384_v62 = vsel %vm3009_vm8, %v10378_v6, %v10380_v45  ;;  %v10383_v24 = vsel %vm3009_vm8, %v10380_v45, %v10382_v1  ;;  %v10386_v32 = vsel %vm3009_vm8, %v10382_v1, %v10376_v7  ;;  %v25683_v6 = vld [vmem:[#allocation85_spill] sm:$0xff]  ;;  %v25684_v45 = vld [vmem:[#allocation78_spill] sm:$0xff] }
 0x82e   :  { %v10389_v28 = vadd.f32 %v10384_v62, %v23837_v40  ;;  %v10387_v39 = vadd.f32 %v10386_v32, %v23827_v26  ;;  %v10390_v36 = vadd.f32 %v10383_v24, %v23839_v3  ;;  %v25685_v62 = vld [vmem:[#allocation79_spill] sm:$0xff] }
 0x830   :  { %v10393_v47 = vadd.f32 %v10389_v28, %v10388_v63  ;;  %v10391_v61 = vadd.f32 %v10390_v36, %v10387_v39  ;;  %v10392_v15 = vadd.f32 %v10388_v63, %v10387_v39  ;;  %v10394_v4 = vadd.f32 %v10390_v36, %v10389_v28 }
 0x831   :  { %v10643_v36 = vunpack.c.0.s8 %v10642_v35 }
 0x832   :  { %v10395_v53 = vadd.f32 %v10393_v47, %v10391_v61  ;;  %v10396_v2 = vadd.f32 %v10394_v4, %v10392_v15  ;;  %v10977_v15 = vunpack.c.0.s8 %v10976_v23  ;;  %v11263_v4 = vunpack.c.0.s8 %v11262_v37 }
 0x834   :  { %v10397_v60 = vmul.f32 0.00048828125, %v10395_v53  ;;  %v10398_v49 = vmul.f32 0.00048828125, %v10396_v2 }
 0x836   :  { %v10399_v51 = vmul.f32 %v10397_v60, %v10397_v60  ;;  %v10400_v0 = vmul.f32 %v10398_v49, %v10398_v49 }
 0x838   :  { %v10403_v18 = vrot.slane %v10399_v51, 7  ;;  %v10404_v54 = vrot.slane %v10400_v0, 7  ;;  %v25686_v51 = vld [vmem:[#allocation28_spill] sm:$0xff] }
 0x839   :  { %v23983_v0 = vsub.s32 %v10643_v36, %v25686_v51  ;;  %v25695_v36 = vld [vmem:[#allocation73_spill] sm:$0xff] }
 0x83a   :  { %v10407_v33 = vsub.f32 %v10397_v60, %v10403_v18  ;;  %v10408_v30 = vsub.f32 %v10398_v49, %v10404_v54 }
 0x83c   :  { %v10409_v58 = vmax.f32 %v10407_v33, 0.0  ;;  %v10410_v40 = vmax.f32 %v10408_v30, 0.0  ;;  %v10201_v33 = vld [vmem:[%s25048_s6] sm:$0xf] }
 0x83e   :  { %v10411_v19 = vadd.f32 1e-05, %v10409_v58  ;;  %v10412_v26 = vadd.f32 1e-05, %v10410_v40 }
 0x840   :  { %17946 = vrsqrt.f32 %v10411_v19 }
 0x841   :  { %17948 = vrsqrt.f32 %v10412_v26 }
 0x84d   :  { %v17947_v3 = vpop.eup %17946 }
 0x84e   :  { %v17949_v34 = vpop.eup %17948 }
 0x84f   :  { %v10417_v14 = vcombine.low %v17947_v3, %v17949_v34  ;;  %v25688_v3 = vld [vmem:[#allocation87_spill] sm:$0xff] }
 0x851   :  { %v10424_v41 = vrot.slane %v10417_v14, %v25681_v56 }
 0x853   :  { %v10425_v27 = vcombine.high %v10424_v41, %v10424_v41  ;;  %v25689_v41 = vld [vmem:[#allocation63_spill] sm:$0xff] }
 0x855   :  { %v10432_v50 = vrot.slane %v10425_v27, %v25681_v56  ;;  %v25690_v27 = vld [vmem:[#allocation64_spill] sm:$0xff] }
 0x857   :  { %v10434_v16 = vmul.f32 %v10432_v50, %v10200_v20 }
 0x859   :  { %v23965_v7 = vrot.slane %v10434_v16, %v25682_v44  ;;  %v23968_v48 = vrot.slane %v10434_v16, %v25683_v6  ;;  %v23971_v1 = vrot.slane %v10434_v16, %v25684_v45  ;;  %v23974_v24 = vrot.slane %v10434_v16, %v25685_v62 }
 0x85b   :  { %v10456_v32 = vmul.f32 %v23965_v7, %v10397_v60  ;;  %v10457_v63 = vmul.f32 %v23968_v48, %v10398_v49  ;;  %v10458_v28 = vmul.f32 %v23971_v1, %v10397_v60  ;;  %v10459_v39 = vmul.f32 %v23974_v24, %v10398_v49 }
 0x85c   :  { %v10490_v54 = vmul.f32 %v23965_v7, %v23425_v21  ;;  %v23988_v60 = vsub.s32 %v10977_v15, %v25686_v51  ;;  %v23991_v49 = vsub.s32 %v11263_v4, %v25686_v51  ;;  %v10491_v30 = vmul.f32 %v23968_v48, %v23431_v29  ;;  %v25687_v21 = vld [vmem:[#allocation66_spill] sm:$0xff] }
 0x85d   :  { %v10464_v47 = vcombine.low %v10456_v32, %v10457_v63  ;;  %v10465_v61 = vcombine.low %v10458_v28, %v10459_v39  ;;  %v10492_v58 = vmul.f32 %v23971_v1, %v23657_v57  ;;  %v10493_v40 = vmul.f32 %v23974_v24, %v23664_v38 }
 0x85e   :  { %v10506_v19 = vmul.f32 %v23965_v7, %v25687_v21  ;;  %v10507_v34 = vmul.f32 %v23968_v48, %v25688_v3  ;;  %v10508_v14 = vmul.f32 %v23971_v1, %v23734_v11  ;;  %v10509_v29 = vmul.f32 %v23974_v24, %v23745_v13  ;;  %v25692_v11 = vld [vmem:[#allocation88_spill] sm:$0xff] }
 0x85f   :  { %v10472_v53 = vrot.slane %v10464_v47, %v25681_v56  ;;  %v10479_v2 = vrot.slane %v10465_v61, %v25681_v56  ;;  %v10494_v57 = vmul.f32 %v23965_v7, %v25689_v41  ;;  %v10495_v38 = vmul.f32 %v23968_v48, %v25690_v27  ;;  %v25696_v47 = vld [vmem:[#allocation68_spill] sm:$0xff] }
 0x860   :  { %v10496_v20 = vmul.f32 %v23971_v1, %v23673_v55  ;;  %v10497_v50 = vmul.f32 %v23974_v24, %v23680_v10  ;;  %v10510_v35 = vmul.f32 %v23965_v7, %v25691_v25  ;;  %v10511_v31 = vmul.f32 %v23968_v48, %v25692_v11  ;;  %v25694_v55 = vld [vmem:[#allocation80_spill] sm:$0xff] }
 0x861   :  { %v10480_v18 = vcombine.low %v10472_v53, %v10479_v2  ;;  %v10512_v13 = vmul.f32 %v23971_v1, %v23758_v12  ;;  %v10513_v23 = vmul.f32 %v23974_v24, %v23765_v5  ;;  %v24029_v37 = vmul.f32 %v23965_v7, %v25693_v43 }
 0x862   :  { %v24033_v10 = vmul.f32 %v23968_v48, %v25694_v55  ;;  %v24037_v32 = vmul.f32 %v23971_v1, %v23688_v59  ;;  %v24053_v39 = vmul.f32 %v23974_v24, %v23705_v22  ;;  %v24057_v59 = vmul.f32 %v23965_v7, %v25695_v36 }
 0x863   :  { %v10487_v26 = vrot.slane %v10480_v18, %v25681_v56 }
 0x865   :  { %v10489_v16 = vsub.f32 %v10201_v33, %v10487_v26 }
 0x867   :  { %v24040_v63 = vrot.slane %v10489_v16, %v25682_v44  ;;  %v24043_v12 = vrot.slane %v10489_v16, %v25683_v6  ;;  %v24046_v5 = vrot.slane %v10489_v16, %v25684_v45  ;;  %v24049_v28 = vrot.slane %v10489_v16, %v25685_v62 }
 0x868   :  { %v24061_v44 = vmul.f32 %v23968_v48, %v25696_v47  ;;  %v24065_v6 = vmul.f32 %v23971_v1, %v23770_v42 }
 0x869   :  { %v10543_v45 = vadd.f32 %v24040_v63, %v10490_v54  ;;  %v10544_v62 = vadd.f32 %v24043_v12, %v10491_v30  ;;  %v10545_v61 = vadd.f32 %v24046_v5, %v10492_v58  ;;  %v10546_v22 = vadd.f32 %v24049_v28, %v10493_v40 }
 0x86a   :  { %v10559_v15 = vadd.f32 %v24040_v63, %v10506_v19  ;;  %v10560_v4 = vadd.f32 %v24043_v12, %v10507_v34  ;;  %v10561_v53 = vadd.f32 %v24046_v5, %v10508_v14  ;;  %v10562_v2 = vadd.f32 %v24049_v28, %v10509_v29 }
 0x86b   :  { %v10575_v51 = vmax.f32 %v10543_v45, 0.0  ;;  %v10576_v18 = vmax.f32 %v10544_v62, 0.0  ;;  %v10577_v42 = vmax.f32 %v10545_v61, 0.0  ;;  %v10578_v33 = vmax.f32 %v10546_v22, 0.0 }
 0x86c   :  { %v10591_v21 = vmax.f32 %v10559_v15, 0.0  ;;  %v10592_v54 = vmax.f32 %v10560_v4, 0.0  ;;  %v10593_v26 = vmax.f32 %v10561_v53, 0.0  ;;  %v10594_v30 = vmax.f32 %v10562_v2, 0.0 }
 0x86d   :  { %v10607_v3 = vmax.f32 %v10575_v51, %v10577_v42  ;;  %v10608_v58 = vmax.f32 %v10576_v18, %v10578_v33  ;;  %v10547_v40 = vadd.f32 %v24040_v63, %v10494_v57  ;;  %v10548_v19 = vadd.f32 %v24043_v12, %v10495_v38 }
 0x86e   :  { %v10615_v41 = vmax.f32 %v10591_v21, %v10593_v26  ;;  %v10616_v34 = vmax.f32 %v10592_v54, %v10594_v30  ;;  %v10549_v14 = vadd.f32 %v24046_v5, %v10496_v20  ;;  %v10550_v29 = vadd.f32 %v24049_v28, %v10497_v50 }
 0x86f   :  { %v10639_v27 = vcombine.low %v10607_v3, %v10608_v58  ;;  %v10640_v16 = vcombine.high %v10607_v3, %v10608_v58  ;;  %v10563_v25 = vadd.f32 %v24040_v63, %v10510_v35  ;;  %v10564_v11 = vadd.f32 %v24043_v12, %v10511_v31 }
 0x870   :  { %v10711_v43 = vcombine.low %v10615_v41, %v10616_v34  ;;  %v10712_v55 = vcombine.high %v10615_v41, %v10616_v34  ;;  %v10565_v36 = vadd.f32 %v24046_v5, %v10512_v13  ;;  %v10566_v57 = vadd.f32 %v24049_v28, %v10513_v23 }
 0x871   :  { %v10647_v38 = vrot.slane %v10639_v27, %v23983_v0  ;;  %v10654_v47 = vrot.slane %v10640_v16, %v23983_v0  ;;  %v10579_v20 = vmax.f32 %v10547_v40, 0.0  ;;  %v10580_v50 = vmax.f32 %v10548_v19, 0.0 }
 0x872   :  { %v10719_v45 = vrot.slane %v10711_v43, %v23983_v0  ;;  %v10726_v35 = vrot.slane %v10712_v55, %v23983_v0  ;;  %v10581_v31 = vmax.f32 %v10549_v14, 0.0  ;;  %v10582_v62 = vmax.f32 %v10550_v29, 0.0 }
 0x873   :  { %v10655_v61 = vcombine.high %v10647_v38, %v10647_v38  ;;  %v10656_v22 = vcombine.high %v10654_v47, %v10654_v47  ;;  %v15875_v15 = vrot.slane %v10647_v38, 9  ;;  %v15877_v13 = vrot.slane %v10654_v47, 9 }
 0x874   :  { %v10727_v23 = vcombine.high %v10719_v45, %v10719_v45  ;;  %v10728_v4 = vcombine.high %v10726_v35, %v10726_v35  ;;  %v15891_v53 = vrot.slane %v10719_v45, 9  ;;  %v15893_v2 = vrot.slane %v10726_v35, 9 }
 0x875   :  { %v15876_v51 = vrot.slane %v10655_v61, 9  ;;  %v15878_v18 = vrot.slane %v10656_v22, 9  ;;  %v10911_v42 = vmax.f32 %v10647_v38, %v15875_v15  ;;  %v10913_v33 = vmax.f32 %v10654_v47, %v15877_v13 }
 0x876   :  { %v15892_v21 = vrot.slane %v10727_v23, 9  ;;  %v15894_v54 = vrot.slane %v10728_v4, 9  ;;  %v10927_v26 = vmax.f32 %v10719_v45, %v15891_v53  ;;  %v10929_v30 = vmax.f32 %v10726_v35, %v15893_v2 }
 0x877   :  { %v10912_v3 = vmax.f32 %v10655_v61, %v15876_v51  ;;  %v10914_v58 = vmax.f32 %v10656_v22, %v15878_v18  ;;  %v10981_v40 = vrot.slane %v10911_v42, %v23988_v60  ;;  %v10995_v19 = vrot.slane %v10913_v33, %v23988_v60 }
 0x878   :  { %v10928_v41 = vmax.f32 %v10727_v23, %v15892_v21  ;;  %v10930_v34 = vmax.f32 %v10728_v4, %v15894_v54  ;;  %v11093_v14 = vrot.slane %v10927_v26, %v23988_v60  ;;  %v11107_v29 = vrot.slane %v10929_v30, %v23988_v60 }
 0x879   :  { %v10988_v27 = vrot.slane %v10912_v3, %v23988_v60  ;;  %v11002_v16 = vrot.slane %v10914_v58, %v23988_v60  ;;  %v10595_v43 = vmax.f32 %v10563_v25, 0.0  ;;  %v10596_v55 = vmax.f32 %v10564_v11, 0.0 }
 0x87a   :  { %v11100_v38 = vrot.slane %v10928_v41, %v23988_v60  ;;  %v11114_v47 = vrot.slane %v10930_v34, %v23988_v60  ;;  %v10597_v45 = vmax.f32 %v10565_v36, 0.0  ;;  %v10598_v35 = vmax.f32 %v10566_v57, 0.0 }
 0x87b   :  { %v11200_v61 = vsel %vm11199_vm10, %v10988_v27, %v10981_v40  ;;  %v10609_v22 = vmax.f32 %v10579_v20, %v10581_v31  ;;  %v10610_v15 = vmax.f32 %v10580_v50, %v10582_v62  ;;  %v24098_v13 = vadd.f32 %v24040_v63, %v24029_v37 }
 0x87c   :  { %v11202_v23 = vsel %vm11201_vm11, %v10988_v27, %v11200_v61  ;;  %v11229_v4 = vsel %vm11199_vm10, %v11100_v38, %v11093_v14  ;;  %v10617_v25 = vmax.f32 %v10595_v43, %v10597_v45  ;;  %v10618_v11 = vmax.f32 %v10596_v55, %v10598_v35 }
 0x87d   :  { %v11204_v53 = vsel %vm11203_vm12, %v10995_v19, %v11202_v23  ;;  %v11230_v2 = vsel %vm11201_vm11, %v11100_v38, %v11229_v4  ;;  %v10657_v36 = vcombine.low %v10609_v22, %v10610_v15  ;;  %v10658_v57 = vcombine.high %v10609_v22, %v10610_v15 }
 0x87e   :  { %v11206_v51 = vsel %vm11205_vm13, %v10995_v19, %v11204_v53  ;;  %v11231_v20 = vsel %vm11203_vm12, %v11107_v29, %v11230_v2  ;;  %v10729_v50 = vcombine.low %v10617_v25, %v10618_v11  ;;  %v10730_v31 = vcombine.high %v10617_v25, %v10618_v11  ;;  %v25697_v11 = vld [vmem:[#allocation22_spill] sm:$0xff] }
 0x87f   :  { %v11208_v37 = vsel %vm11207_vm14, %v11002_v16, %v11206_v51  ;;  %v11232_v62 = vsel %vm11205_vm13, %v11107_v29, %v11231_v20  ;;  %v10665_v18 = vrot.slane %v10657_v36, %v23983_v0  ;;  %v10672_v42 = vrot.slane %v10658_v57, %v23983_v0 }
 0x880   :  { %v11210_v33 = vsel %vm11209_vm15, %v11002_v16, %v11208_v37  ;;  %v11233_v21 = vsel %vm11207_vm14, %v11114_v47, %v11232_v62  ;;  %v10737_v54 = vrot.slane %v10729_v50, %v23983_v0  ;;  %v10744_v26 = vrot.slane %v10730_v31, %v23983_v0 }
 0x881   :  { %v11234_v30 = vsel %vm11209_vm15, %v11114_v47, %v11233_v21  ;;  %v11267_v3 = vrot.slane %v11210_v33, %v23991_v49  ;;  %v10673_v58 = vcombine.high %v10665_v18, %v10665_v18  ;;  %v10674_v40 = vcombine.high %v10672_v42, %v10672_v42 }
 0x882   :  { %v11295_v19 = vrot.slane %v11234_v30, %v23991_v49  ;;  %v10745_v41 = vcombine.high %v10737_v54, %v10737_v54  ;;  %v10746_v34 = vcombine.high %v10744_v26, %v10744_v26  ;;  %v15879_v14 = vrot.slane %v10665_v18, 9 }
 0x883   :  { %v15880_v29 = vrot.slane %v10673_v58, 9  ;;  %v15881_v27 = vrot.slane %v10672_v42, 9  ;;  %v15882_v16 = vrot.slane %v10674_v40, 9  ;;  %v15895_v43 = vrot.slane %v10737_v54, 9 }
 0x884   :  { %v11325_v55 = vcombine.low %v11267_v3, %v11295_v19  ;;  %v11326_v38 = vcombine.high %v11267_v3, %v11295_v19  ;;  %v15896_v45 = vrot.slane %v10745_v41, 9  ;;  %v15897_v35 = vrot.slane %v10744_v26, 9 }
 0x885   :  { %v15898_v61 = vrot.slane %v10746_v34, 9  ;;  %v10915_v22 = vmax.f32 %v10665_v18, %v15879_v14  ;;  %v10916_v47 = vmax.f32 %v10673_v58, %v15880_v29  ;;  %v24119_v15 = vmul.f32 %v23974_v24, %v23779_v17  ;;  %v25698_v18 = vld [vmem:[#allocation65_spill] sm:$0xff] }
 0x886   :  { %v11333_v23 = vrot.slane %v11325_v55, %v25681_v56  ;;  %v24123_v4 = vrot.slane %v11326_v38, %v25681_v56  ;;  %v10917_v25 = vmax.f32 %v10672_v42, %v15881_v27  ;;  %v24127_v53 = vmul.f32 %v23965_v7, %v25697_v11  ;;  %v17720_v11 = vld [vmem:[%s25049_s7 + $0x1f0] sm:$0xff]  }
 0x887   :  { %v10918_v2 = vmax.f32 %v10674_v40, %v15882_v16  ;;  %v10931_v36 = vmax.f32 %v10737_v54, %v15895_v43  ;;  %v10932_v57 = vmax.f32 %v10745_v41, %v15896_v45  ;;  %v10933_v51 = vmax.f32 %v10744_v26, %v15897_v35  ;;  %v17717_v45 = vld [vmem:[%s25049_s7 + $0x1b8] sm:$0xff]   ;;  %v17718_v35 = vld [vmem:[%s25049_s7 + $0x170] sm:$0xff]  }
 0x888   :  { %v11341_v20 = vcombine.high %v11333_v23, %v11333_v23  ;;  %v11349_v50 = vrot.slane %v11333_v23, %v25681_v56  ;;  %v11342_v17 = vcombine.high %v24123_v4, %v24123_v4  ;;  %v10934_v31 = vmax.f32 %v10746_v34, %v15898_v61 }
 0x889   :  { %v11009_v37 = vrot.slane %v10915_v22, %v23988_v60  ;;  %v11016_v62 = vrot.slane %v10916_v47, %v23988_v60  ;;  %v24136_v42 = vmul.f32 %v23968_v48, %v25698_v18  ;;  %v24140_v33 = vmul.f32 %v23971_v1, %v23719_v52  ;;  %v17715_v52 = vld [vmem:[%s25049_s7 + $0x138] sm:$0xff]  }
 0x88a   :  { %v11363_v21 = vrot.slane %v11341_v20, %v25681_v56  ;;  %v11371_v54 = vcombine.high %v11349_v50, %v11349_v50  ;;  %v11370_v26 = vrot.slane %v11342_v17, %v25681_v56  ;;  %v11023_v30 = vrot.slane %v10917_v25, %v23988_v60  ;;  %v17722_v17 = vld [vmem:[%s25049_s7 + $0x168] sm:$0xff]  }
 0x88b   :  { %v11557_v3 = vpack.c.bf16 %v11349_v50, %v11349_v50  ;;  %v11030_v58 = vrot.slane %v10918_v2, %v23988_v60  ;;  %v11121_v40 = vrot.slane %v10931_v36, %v23988_v60  ;;  %v11128_v19 = vrot.slane %v10932_v57, %v23988_v60  ;;  %v17719_v57 = vld [vmem:[%s25049_s7 + $0x130] sm:$0xff]  }
 0x88c   :  { %v11558_v41 = vpack.c.bf16 %v11363_v21, %v11363_v21  ;;  %v11373_v34 = vcombine.high %v11363_v21, %v11363_v21  ;;  %v11135_v14 = vrot.slane %v10933_v51, %v23988_v60  ;;  %v11142_v29 = vrot.slane %v10934_v31, %v23988_v60 }
 0x88d   :  { %v11559_v27 = vpack.c.bf16 %v11371_v54, %v11371_v54  ;;  %v11374_v16 = vcombine.high %v11370_v26, %v11370_v26  ;;  %v11211_v43 = vsel %vm11199_vm10, %v11016_v62, %v11009_v37  ;;  %v11235_v55 = vsel %vm11199_vm10, %v11128_v19, %v11121_v40 }
 0x88e   :  { %13676 = vmatprep.mubr.bf16.mxu0 %v11558_v41  ;;  %v11560_v38 = vpack.c.bf16 %v11373_v34, %v11373_v34  ;;  %v11212_v61 = vsel %vm11201_vm11, %v11016_v62, %v11211_v43  ;;  %v11236_v22 = vsel %vm11201_vm11, %v11128_v19, %v11235_v55  ;;  %v10552_v47 = vadd.f32 %v24043_v12, %v24033_v10 }
 0x88f   :  { %13677 = vmatmul.mubr.bf16.vlgmr.msra.gmra.mxu0 %v11557_v3  ;;  %v11562_v23 = vpack.c.bf16 %v11370_v26, %v11370_v26  ;;  %v11564_v25 = vpack.c.bf16 %v11374_v16, %v11374_v16  ;;  %v11213_v2 = vsel %vm11203_vm12, %v11023_v30, %v11212_v61  ;;  %v11237_v36 = vsel %vm11203_vm12, %v11135_v14, %v11236_v22 }
 0x890   :  { %16209 = vmatpush3.bf16.msra.mxu0 %v17715_v52  ;;  %13716 = vmatprep.mubr.bf16.mxu1 %v11560_v38  ;;  %v11214_v51 = vsel %vm11205_vm13, %v11023_v30, %v11213_v2  ;;  %v11238_v10 = vsel %vm11205_vm13, %v11135_v14, %v11237_v36  ;;  %v10553_v20 = vadd.f32 %v24046_v5, %v24037_v32  ;;  %v10583_v50 = vmax.f32 %v24098_v13, 0.0  ;;  %v17721_v32 = vld [vmem:[%s25049_s7 + $0x1b0] sm:$0xff]   ;;  %v17726_v14 = vld [vmem:[%s25049_s7 + $0x160] sm:$0xff]  }
 0x891   :  { %13756 = vmatprep.mubr.bf16.mxu0 %v11562_v23  ;;  %13717 = vmatmul.mubr.bf16.vlgmr.msra.gmra.mxu1 %v11559_v27  ;;  %v11215_v31 = vsel %vm11207_vm14, %v11030_v58, %v11214_v51  ;;  %v11239_v37 = vsel %vm11207_vm14, %v11142_v29, %v11238_v10  ;;  %v10554_v62 = vadd.f32 %v24049_v28, %v24053_v39  ;;  %v10584_v18 = vmax.f32 %v10552_v47, 0.0  ;;  %v17724_v39 = vld [vmem:[%s25049_s7 + $0x1e8] sm:$0xff]   ;;  %v17732_v51 = vld [vmem:[%s25049_s7 + $0x1d8] sm:$0xff]  }
 0x892   :  { %16231 = vmatpush3.bf16.msra.mxu1 %v17717_v45  ;;  %16210 = vmatprep.subr.bf16.mxu0 %v17718_v35  ;;  %v11216_v13 = vsel %vm11209_vm15, %v11030_v58, %v11215_v31  ;;  %v11240_v21 = vsel %vm11209_vm15, %v11142_v29, %v11239_v37  ;;  %v10567_v54 = vadd.f32 %v24040_v63, %v24057_v59  ;;  %v10585_v26 = vmax.f32 %v10553_v20, 0.0  ;;  %v17723_v59 = vld [vmem:[%s25049_s7 + $0x128] sm:$0xff]   ;;  %v17731_v10 = vld [vmem:[%s25049_s7 + $0x118] sm:$0xff]   ;;  %v17734_v37 = vld [vmem:[%s25049_s7 + $0x150] sm:$0xff]  }
 0x893   :  { %13796 = vmatprep.mubr.bf16.mxu1 %v11564_v25  ;;  %16232 = vmatprep.subr.bf16.mxu1 %v17720_v11  ;;  %v24196_v30 = vrot.slane %v11216_v13, %v23991_v49  ;;  %v24199_v3 = vrot.slane %v11240_v21, %v23991_v49  ;;  %v10568_v58 = vadd.f32 %v24043_v12, %v24061_v44  ;;  %v10586_v40 = vmax.f32 %v10554_v62, 0.0  ;;  %v17730_v25 = vld [vmem:[%s25049_s7 + $0x158] sm:$0xff]   ;;  %v17729_v11 = vld [vmem:[%s25049_s7 + $0x1a0] sm:$0xff]   ;;  %v25699_v62 = vld [vmem:[#allocation74_spill] sm:$0xff] }
 0x894   :  { %16211 = vmatpush3.bf16.msra.mxu0 %v17719_v57  ;;  %v10569_v19 = vadd.f32 %v24046_v5, %v24065_v6  ;;  %v10570_v41 = vadd.f32 %v24049_v28, %v24119_v15  ;;  %v10599_v52 = vmax.f32 %v10567_v54, 0.0  ;;  %v10611_v34 = vmax.f32 %v10583_v50, %v10585_v26  ;;  %v17725_v6 = vld [vmem:[%s25049_s7 + $0x1a8] sm:$0xff]   ;;  %v17733_v54 = vld [vmem:[%s25049_s7 + $0x198] sm:$0xff]  }
 0x895   :  { %16212 = vmatprep.subr.bf16.mxu0 %v17722_v17  ;;  %v11375_v44 = vcombine.low %v24196_v30, %v24199_v3  ;;  %v10600_v29 = vmax.f32 %v10568_v58, 0.0  ;;  %v10612_v27 = vmax.f32 %v10584_v18, %v10586_v40  ;;  %v10505_v16 = vmul.f32 %v23974_v24, %v23723_v8  ;;  %v17728_v8 = vld [vmem:[%s25049_s7 + $0x1e0] sm:$0xff]  }
 0x896   :  { %16233 = vmatpush3.bf16.msra.mxu1 %v17721_v32  ;;  %v10601_v15 = vmax.f32 %v10569_v19, 0.0  ;;  %v10602_v43 = vmax.f32 %v10570_v41, 0.0  ;;  %v24222_v55 = vadd.f32 %v24040_v63, %v24127_v53  ;;  %v24226_v38 = vadd.f32 %v24043_v12, %v24136_v42  ;;  %v17727_v53 = vld [vmem:[%s25049_s7 + $0x120] sm:$0xff]   ;;  %v25700_v32 = vld [vmem:[#allocation67_spill] sm:$0xff] }
 0x897   :  { %16234 = vmatprep.subr.bf16.mxu1 %v17724_v39  ;;  %v24232_v45 = vrot.slane %v11375_v44, %v25681_v56  ;;  %v10675_v35 = vcombine.low %v10611_v34, %v10612_v27  ;;  %v10676_v61 = vcombine.high %v10611_v34, %v10612_v27  ;;  %v24239_v42 = vadd.f32 %v24046_v5, %v24140_v33  ;;  %v17735_v19 = vld [vmem:[%s25049_s7 + $0x110] sm:$0xff]  }
 0x898   :  { %16213 = vmatpush3.bf16.msra.mxu0 %v17723_v59  ;;  %v10619_v22 = vmax.f32 %v10599_v52, %v10601_v15  ;;  %v10620_v47 = vmax.f32 %v10600_v29, %v10602_v43  ;;  %v24242_v23 = vadd.f32 %v24049_v28, %v10505_v16  ;;  %v10518_v18 = vmul.f32 %v23965_v7, %v25699_v62  ;;  %v17738_v52 = vld [vmem:[%s25049_s7 + $0x148] sm:$0xff]   ;;  %v17737_v27 = vld [vmem:[%s25049_s7 + $0x190] sm:$0xff]  }
 0x899   :  { %16214 = vmatprep.subr.bf16.mxu0 %v17726_v14  ;;  %v10683_v2 = vrot.slane %v10675_v35, %v23983_v0  ;;  %v10690_v36 = vrot.slane %v10676_v61, %v23983_v0  ;;  %v11391_v20 = vcombine.high %v24232_v45, %v24232_v45  ;;  %v10519_v13 = vmul.f32 %v23968_v48, %v25700_v32  ;;  %v17744_v32 = vld [vmem:[%s25049_s7 + $0x1c0] sm:$0xff]  }
 0x89a   :  { %16235 = vmatpush3.bf16.msra.mxu1 %v17725_v6  ;;  %v10747_v57 = vcombine.low %v10619_v22, %v10620_v47  ;;  %v10748_v33 = vcombine.high %v10619_v22, %v10620_v47  ;;  %v10520_v21 = vmul.f32 %v23971_v1, %v23788_v46  ;;  %v10521_v40 = vmul.f32 %v23974_v24, %v23797_v9  ;;  %v17736_v46 = vld [vmem:[%s25049_s7 + $0x1d0] sm:$0xff]   ;;  %v17739_v47 = vld [vmem:[%s25049_s7 + $0x108] sm:$0xff]  }
 0x89b   :  { %16236 = vmatprep.subr.bf16.mxu1 %v17728_v8  ;;  %v10691_v50 = vcombine.high %v10683_v2, %v10683_v2  ;;  %v10692_v17 = vcombine.high %v10690_v36, %v10690_v36  ;;  %v15883_v58 = vrot.slane %v10683_v2, 9  ;;  %v24278_v7 = vrot.slane %v24123_v4, %v25681_v56  ;;  %v17740_v8 = vld [vmem:[%s25049_s7 + $0x1c8] sm:$0xff]  }
 0x89c   :  { %16215 = vmatpush3.bf16.msra.mxu0 %v17727_v53  ;;  %v10755_v31 = vrot.slane %v10747_v57, %v23983_v0  ;;  %v10762_v26 = vrot.slane %v10748_v33, %v23983_v0  ;;  %v15885_v1 = vrot.slane %v10690_v36, 9  ;;  %v24287_v41 = vrot.slane %v11391_v20, %v25681_v56  ;;  %v17742_v57 = vld [vmem:[%s25049_s7 + $0x140] sm:$0xff]  }
 0x89d   :  { %16216 = vmatprep.subr.bf16.mxu0 %v17730_v25  ;;  %v15884_v48 = vrot.slane %v10691_v50, 9  ;;  %v15886_v59 = vrot.slane %v10692_v17, 9  ;;  %v10919_v14 = vmax.f32 %v10683_v2, %v15883_v58  ;;  %v24300_v35 = vcombine.high %v24278_v7, %v24278_v7 }
 0x89e   :  { %16237 = vmatpush3.bf16.msra.mxu1 %v17729_v11  ;;  %v10763_v39 = vcombine.high %v10755_v31, %v10755_v31  ;;  %v10764_v9 = vcombine.high %v10762_v26, %v10762_v26  ;;  %v15899_v24 = vrot.slane %v10755_v31, 9  ;;  %v15901_v34 = vrot.slane %v10762_v26, 9 }
 0x89f   :  { %16238 = vmatprep.subr.bf16.mxu1 %v17732_v51  ;;  %v10920_v44 = vmax.f32 %v10691_v50, %v15884_v48  ;;  %v10921_v29 = vmax.f32 %v10690_v36, %v15885_v1  ;;  %v10922_v6 = vmax.f32 %v10692_v17, %v15886_v59  ;;  %v11037_v53 = vrot.slane %v10919_v14, %v23988_v60  ;;  %v17741_v50 = vld [vmem:[%s25049_s7 + $0x188] sm:$0xff]   ;;  %v17746_v48 = vld [vmem:[%s25049_s7 + $0x278] sm:$0xff]  }
 0x8a0   :  { %16217 = vmatpush3.bf16.msra.mxu0 %v17731_v10  ;;  %v15900_v4 = vrot.slane %v10763_v39, 9  ;;  %v15902_v16 = vrot.slane %v10764_v9, 9  ;;  %v10935_v15 = vmax.f32 %v10755_v31, %v15899_v24  ;;  %v10937_v61 = vmax.f32 %v10762_v26, %v15901_v34  ;;  %v17748_v24 = vld [vmem:[%s25049_s7 + $0x2f8] sm:$0xff]  }
 0x8a1   :  { %16218 = vmatprep.subr.bf16.mxu0 %v17734_v37  ;;  %v11044_v22 = vrot.slane %v10920_v44, %v23988_v60  ;;  %v24309_v25 = vcombine.high %v24287_v41, %v24287_v41  ;;  %v11051_v33 = vrot.slane %v10921_v29, %v23988_v60  ;;  %v11058_v51 = vrot.slane %v10922_v6, %v23988_v60  ;;  %v17747_v34 = vld [vmem:[%s25049_s7 + $0x238] sm:$0xff]   ;;  %v17750_v6 = vld [vmem:[%s25049_s7 + $0x270] sm:$0xff]  }
 0x8a2   :  { %16239 = vmatpush3.bf16.msra.mxu1 %v17733_v54  ;;  %v10936_v43 = vmax.f32 %v10763_v39, %v15900_v4  ;;  %v10938_v11 = vmax.f32 %v10764_v9, %v15902_v16  ;;  %v11149_v2 = vrot.slane %v10935_v15, %v23988_v60  ;;  %v10571_v20 = vadd.f32 %v24040_v63, %v10518_v18  ;;  %v17743_v39 = vld [vmem:[%s25049_s7 + $0x100] sm:$0xff]  }
 0x8a3   :  { %16240 = vmatprep.subr.bf16.mxu1 %v17736_v46  ;;  %v11217_v10 = vsel %vm11199_vm10, %v11044_v22, %v11037_v53  ;;  %v11163_v17 = vrot.slane %v10937_v61, %v23988_v60  ;;  %v10572_v62 = vadd.f32 %v24043_v12, %v10519_v13  ;;  %v10573_v26 = vadd.f32 %v24046_v5, %v10520_v21 }
 0x8a4   :  { %16219 = vmatpush3.bf16.msra.mxu0 %v17735_v19  ;;  %v11156_v36 = vrot.slane %v10936_v43, %v23988_v60  ;;  %v11218_v31 = vsel %vm11201_vm11, %v11044_v22, %v11217_v10  ;;  %v11170_v63 = vrot.slane %v10938_v11, %v23988_v60  ;;  %v10574_v58 = vadd.f32 %v24049_v28, %v10521_v40  ;;  %v17745_v28 = vld [vmem:[%s25049_s7 + $0x180] sm:$0xff]   ;;  %v17749_v43 = vld [vmem:[%s25049_s7 + $0x2b8] sm:$0xff]   ;;  %v17752_v22 = vld [vmem:[%s25049_s7 + $0x2f0] sm:$0xff]  }
 0x8a5   :  { %16220 = vmatprep.subr.bf16.mxu0 %v17738_v52  ;;  %v11219_v18 = vsel %vm11203_vm12, %v11051_v33, %v11218_v31  ;;  %v10587_v46 = vmax.f32 %v24222_v55, 0.0  ;;  %v10588_v1 = vmax.f32 %v24226_v38, 0.0  ;;  %v10589_v59 = vmax.f32 %v24239_v42, 0.0  ;;  %v17756_v10 = vld [vmem:[%s25049_s7 + $0x2e8] sm:$0xff]  }
 0x8a6   :  { %16241 = vmatpush3.bf16.msra.mxu1 %v17737_v27  ;;  %v11241_v37 = vsel %vm11199_vm10, %v11156_v36, %v11149_v2  ;;  %v11220_v12 = vsel %vm11205_vm13, %v11051_v33, %v11219_v18  ;;  %v10590_v19 = vmax.f32 %v24242_v23, 0.0  ;;  %v10603_v9 = vmax.f32 %v10571_v20, 0.0  ;;  %v17751_v2 = vld [vmem:[%s25049_s7 + $0x230] sm:$0xff]   ;;  %v17755_v31 = vld [vmem:[%s25049_s7 + $0x228] sm:$0xff]  }
 0x8a7   :  { %16242 = vmatprep.subr.bf16.mxu1 %v17740_v8  ;;  %v11242_v54 = vsel %vm11201_vm11, %v11156_v36, %v11241_v37  ;;  %v11221_v5 = vsel %vm11207_vm14, %v11058_v51, %v11220_v12  ;;  %v10604_v4 = vmax.f32 %v10572_v62, 0.0  ;;  %v10605_v52 = vmax.f32 %v10573_v26, 0.0  ;;  %v17758_v37 = vld [vmem:[%s25049_s7 + $0x260] sm:$0xff]  }
 0x8a8   :  { %16221 = vmatpush3.bf16.msra.mxu0 %v17739_v47  ;;  %v11243_v13 = vsel %vm11203_vm12, %v11163_v17, %v11242_v54  ;;  %v11222_v55 = vsel %vm11209_vm15, %v11058_v51, %v11221_v5  ;;  %v10606_v14 = vmax.f32 %v10574_v58, 0.0  ;;  %v10613_v44 = vmax.f32 %v10587_v46, %v10589_v59  ;;  %v17757_v54 = vld [vmem:[%s25049_s7 + $0x2a8] sm:$0xff]   ;;  %v17760_v26 = vld [vmem:[%s25049_s7 + $0x2e0] sm:$0xff]   ;;  %v17762_v5 = vld [vmem:[%s25049_s7 + $0x258] sm:$0xff]  }
 0x8a9   :  { %16222 = vmatprep.subr.bf16.mxu0 %v17742_v57  ;;  %v11244_v21 = vsel %vm11205_vm13, %v11163_v17, %v11243_v13  ;;  %v24359_v42 = vrot.slane %v11222_v55, %v23991_v49  ;;  %v10614_v29 = vmax.f32 %v10588_v1, %v10590_v19  ;;  %v11561_v27 = vpack.c.bf16 %v24278_v7, %v24278_v7 }
 0x8aa   :  { %16243 = vmatpush3.bf16.msra.mxu1 %v17741_v50  ;;  %v11245_v40 = vsel %vm11207_vm14, %v11170_v63, %v11244_v21  ;;  %v11566_v16 = vpack.c.bf16 %v24287_v41, %v24287_v41  ;;  %v10621_v15 = vmax.f32 %v10603_v9, %v10605_v52  ;;  %v10622_v61 = vmax.f32 %v10604_v4, %v10606_v14  ;;  %v17764_v9 = vld [vmem:[%s25049_s7 + $0x2d8] sm:$0xff]  }
 0x8ab   :  { %16244 = vmatprep.subr.bf16.mxu1 %v17744_v32  ;;  %v11246_v38 = vsel %vm11209_vm15, %v11170_v63, %v11245_v40  ;;  %v10693_v53 = vcombine.low %v10613_v44, %v10614_v29  ;;  %v11563_v41 = vpack.c.bf16 %v24300_v35, %v24300_v35  ;;  %v10694_v47 = vcombine.high %v10613_v44, %v10614_v29  ;;  %v17754_v35 = vld [vmem:[%s25049_s7 + $0x268] sm:$0xff]  }
 0x8ac   :  { %16223 = vmatpush3.bf16.msra.mxu0 %v17743_v39  ;;  %v24365_v23 = vrot.slane %v11246_v38, %v23991_v49  ;;  %v11568_v11 = vpack.c.bf16 %v24309_v25, %v24309_v25  ;;  %v10765_v33 = vcombine.low %v10621_v15, %v10622_v61  ;;  %v10766_v51 = vcombine.high %v10621_v15, %v10622_v61  ;;  %v17753_v25 = vld [vmem:[%s25049_s7 + $0x2b0] sm:$0xff]  }
 0x8ad   :  { %16252 = vmatprep.subr.bf16.mxu0 %v17746_v48  ;;  %v10701_v36 = vrot.slane %v10693_v53, %v23983_v0  ;;  %v10708_v57 = vrot.slane %v10694_v47, %v23983_v0  ;;  %v11376_v14 = vcombine.high %v24196_v30, %v24199_v3  ;;  %v17768_v53 = vld [vmem:[%s25049_s7 + $0x2d0] sm:$0xff]  }
 0x8ae   :  { %16245 = vmatpush3.bf16.msra.mxu1 %v17745_v28  ;;  %v11425_v8 = vcombine.low %v24359_v42, %v24365_v23  ;;  %v11426_v7 = vcombine.high %v24359_v42, %v24365_v23  ;;  %v10773_v17 = vrot.slane %v10765_v33, %v23983_v0  ;;  %v10780_v62 = vrot.slane %v10766_v51, %v23983_v0  ;;  %v17759_v0 = vld [vmem:[%s25049_s7 + $0x220] sm:$0xff]   ;;  %v17770_v33 = vld [vmem:[%s25049_s7 + $0x248] sm:$0xff]  }
 0x8af   :  { %13757 = vmatmul.mubr.bf16.vlgmr.msra.gmra.mxu0 %v11561_v27  ;;  %16274 = vmatprep.subr.bf16.mxu1 %v17748_v24  ;;  %v10709_v20 = vcombine.high %v10701_v36, %v10701_v36  ;;  %v10710_v50 = vcombine.high %v10708_v57, %v10708_v57  ;;  %v15887_v63 = vrot.slane %v10701_v36, 9  ;;  %v15889_v12 = vrot.slane %v10708_v57, 9  ;;  %v17761_v28 = vld [vmem:[%s25049_s7 + $0x2a0] sm:$0xff]   ;;  %v17835_v42 = vld [vmem:[%s25049_s7 + $0x408] sm:$0xff]  }
 0x8b0   :  { %16253 = vmatpush3.bf16.msra.mxu0 %v17747_v34  ;;  %13836 = vmatprep.mubr.bf16.mxu0 %v11566_v16  ;;  %v10781_v32 = vcombine.high %v10773_v17, %v10773_v17  ;;  %v10782_v39 = vcombine.high %v10780_v62, %v10780_v62  ;;  %v15903_v58 = vrot.slane %v10773_v17, 9  ;;  %v15905_v48 = vrot.slane %v10780_v62, 9  ;;  %v17763_v34 = vld [vmem:[%s25049_s7 + $0x218] sm:$0xff]   ;;  %v17766_v16 = vld [vmem:[%s25049_s7 + $0x250] sm:$0xff]  }
 0x8b1   :  { %13797 = vmatmul.mubr.bf16.vlgmr.msra.gmra.mxu1 %v11563_v41  ;;  %16254 = vmatprep.subr.bf16.mxu0 %v17750_v6  ;;  %v15888_v18 = vrot.slane %v10709_v20, 9  ;;  %v15890_v13 = vrot.slane %v10710_v50, 9  ;;  %v10923_v1 = vmax.f32 %v10701_v36, %v15887_v63  ;;  %v10925_v55 = vmax.f32 %v10708_v57, %v15889_v12  ;;  %v17774_v63 = vld [vmem:[%s25049_s7 + $0x240] sm:$0xff]  }
 0x8b2   :  { %16275 = vmatpush3.bf16.msra.mxu1 %v17749_v43  ;;  %13876 = vmatprep.mubr.bf16.mxu1 %v11568_v11  ;;  %v15904_v46 = vrot.slane %v10781_v32, 9  ;;  %v15906_v21 = vrot.slane %v10782_v39, 9  ;;  %v10939_v40 = vmax.f32 %v10773_v17, %v15903_v58  ;;  %v10941_v38 = vmax.f32 %v10780_v62, %v15905_v48  ;;  %v17765_v43 = vld [vmem:[%s25049_s7 + $0x298] sm:$0xff]   ;;  %v17767_v11 = vld [vmem:[%s25049_s7 + $0x210] sm:$0xff]   ;;  %v17775_v12 = vld [vmem:[%s25049_s7 + $0x200] sm:$0xff]  }
 0x8b3   :  { %16276 = vmatprep.subr.bf16.mxu1 %v17752_v22  ;;  %v10924_v59 = vmax.f32 %v10709_v20, %v15888_v18  ;;  %v10926_v24 = vmax.f32 %v10710_v50, %v15890_v13  ;;  %v11065_v4 = vrot.slane %v10923_v1, %v23988_v60  ;;  %v11079_v6 = vrot.slane %v10925_v55, %v23988_v60  ;;  %v17772_v50 = vld [vmem:[%s25049_s7 + $0x2c8] sm:$0xff]   ;;  %v17779_v48 = vld [vmem:[%s25049_s7 + $0x338] sm:$0xff]   ;;  %v17782_v1 = vld [vmem:[%s25049_s7 + $0x370] sm:$0xff]  }
 0x8b4   :  { %16255 = vmatpush3.bf16.msra.mxu0 %v17751_v2  ;;  %v10940_v19 = vmax.f32 %v10781_v32, %v15904_v46  ;;  %v10942_v44 = vmax.f32 %v10782_v39, %v15906_v21  ;;  %v11177_v29 = vrot.slane %v10939_v40, %v23988_v60  ;;  %v11191_v30 = vrot.slane %v10941_v38, %v23988_v60  ;;  %v17773_v18 = vld [vmem:[%s25049_s7 + $0x288] sm:$0xff]   ;;  %v17776_v39 = vld [vmem:[%s25049_s7 + $0x2c0] sm:$0xff]   ;;  %v17780_v46 = vld [vmem:[%s25049_s7 + $0x3f8] sm:$0xff]  }
 0x8b5   :  { %16256 = vmatprep.subr.bf16.mxu0 %v17754_v35  ;;  %v11072_v52 = vrot.slane %v10924_v59, %v23988_v60  ;;  %v11086_v41 = vrot.slane %v10926_v24, %v23988_v60  ;;  %v24458_v2 = vrot.slane %v11376_v14, %v25681_v56  ;;  %v17784_v40 = vld [vmem:[%s25049_s7 + $0x3f0] sm:$0xff]   ;;  %v17786_v24 = vld [vmem:[%s25049_s7 + $0x368] sm:$0xff]  }
 0x8b6   :  { %16277 = vmatpush3.bf16.msra.mxu1 %v17753_v25  ;;  %v11184_v27 = vrot.slane %v10940_v19, %v23988_v60  ;;  %v11198_v36 = vrot.slane %v10942_v44, %v23988_v60  ;;  %v17785_v38 = vld [vmem:[%s25049_s7 + $0x3b0] sm:$0xff]   ;;  %v17789_v14 = vld [vmem:[%s25049_s7 + $0x3a8] sm:$0xff]   ;;  %v17792_v44 = vld [vmem:[%s25049_s7 + $0x3e0] sm:$0xff]  }
 0x8b7   :  { %16278 = vmatprep.subr.bf16.mxu1 %v17756_v10  ;;  %v11223_v15 = vsel %vm11199_vm10, %v11072_v52, %v11065_v4  ;;  %v17769_v10 = vld [vmem:[%s25049_s7 + $0x290] sm:$0xff]   ;;  %v11392_v62 = vcombine.high %v24458_v2, %v24458_v2  ;;  %v17788_v4 = vld [vmem:[%s25049_s7 + $0x3e8] sm:$0xff]  }
 0x8b8   :  { %16257 = vmatpush3.bf16.msra.mxu0 %v17755_v31  ;;  %v11224_v3 = vsel %vm11201_vm11, %v11072_v52, %v11223_v15  ;;  %v11247_v61 = vsel %vm11199_vm10, %v11184_v27, %v11177_v29  ;;  %v17787_v52 = vld [vmem:[%s25049_s7 + $0x328] sm:$0xff]   ;;  %v17791_v29 = vld [vmem:[%s25049_s7 + $0x320] sm:$0xff]   ;;  %v17795_v15 = vld [vmem:[%s25049_s7 + $0x318] sm:$0xff]  }
 0x8b9   :  { %16258 = vmatprep.subr.bf16.mxu0 %v17758_v37  ;;  %v11225_v22 = vsel %vm11203_vm12, %v11079_v6, %v11224_v3  ;;  %v11248_v47 = vsel %vm11201_vm11, %v11184_v27, %v11247_v61  ;;  %v17771_v37 = vld [vmem:[%s25049_s7 + $0x208] sm:$0xff]   ;;  %v11420_v13 = vrot.slane %v11392_v62, %v25681_v56  ;;  %v17794_v27 = vld [vmem:[%s25049_s7 + $0x358] sm:$0xff]   ;;  %v17800_v3 = vld [vmem:[%s25049_s7 + $0x3d0] sm:$0xff]  }
 0x8ba   :  { %16279 = vmatpush3.bf16.msra.mxu1 %v17757_v54  ;;  %v11226_v35 = vsel %vm11205_vm13, %v11079_v6, %v11225_v22  ;;  %v11249_v57 = vsel %vm11203_vm12, %v11191_v30, %v11248_v47  ;;  %v17796_v6 = vld [vmem:[%s25049_s7 + $0x3d8] sm:$0xff]   ;;  %v17799_v61 = vld [vmem:[%s25049_s7 + $0x310] sm:$0xff]   ;;  %v17804_v47 = vld [vmem:[%s25049_s7 + $0x3c8] sm:$0xff]  }
 0x8bb   :  { %16280 = vmatprep.subr.bf16.mxu1 %v17760_v26  ;;  %v11227_v51 = vsel %vm11207_vm14, %v11086_v41, %v11226_v35  ;;  %v11250_v25 = vsel %vm11205_vm13, %v11191_v30, %v11249_v57  ;;  %v11570_v59 = vpack.c.bf16 %v11420_v13, %v11420_v13  ;;  %v17797_v30 = vld [vmem:[%s25049_s7 + $0x398] sm:$0xff]   ;;  %v17801_v22 = vld [vmem:[%s25049_s7 + $0x390] sm:$0xff]   ;;  %v17805_v35 = vld [vmem:[%s25049_s7 + $0x388] sm:$0xff]   ;;  %v11406_v57 = vrot.slane %v24458_v2, %v25681_v56 }
 0x8bc   :  { %16259 = vmatpush3.bf16.msra.mxu0 %v17759_v0  ;;  %v11228_v60 = vsel %vm11209_vm15, %v11086_v41, %v11227_v51  ;;  %v11251_v20 = vsel %vm11207_vm14, %v11198_v36, %v11250_v25  ;;  %v17778_v0 = vld [vmem:[%s25049_s7 + $0x378] sm:$0xff]   ;;  %v17802_v41 = vld [vmem:[%s25049_s7 + $0x348] sm:$0xff]   ;;  %v17807_v51 = vld [vmem:[%s25049_s7 + $0x300] sm:$0xff]  }
 0x8bd   :  { %16260 = vmatprep.subr.bf16.mxu0 %v17762_v5  ;;  %v11252_v17 = vsel %vm11209_vm15, %v11198_v36, %v11251_v20  ;;  %v24478_v31 = vrot.slane %v11228_v60, %v23991_v49  ;;  %v11424_v5 = vcombine.high %v11420_v13, %v11420_v13  ;;  %v17806_v36 = vld [vmem:[%s25049_s7 + $0x340] sm:$0xff]   ;;  %v11422_v60 = vcombine.high %v11406_v57, %v11406_v57  ;;  %v17812_v20 = vld [vmem:[%s25049_s7 + $0x4f8] sm:$0xff]   ;;  %v17814_v62 = vld [vmem:[%s25049_s7 + $0x470] sm:$0xff]  }
 0x8be   :  { %16281 = vmatpush3.bf16.msra.mxu1 %v17761_v28  ;;  %v24486_v32 = vrot.slane %v11252_v17, %v23991_v49  ;;  %v11399_v49 = vrot.slane %v24232_v45, %v25681_v56  ;;  %v17777_v45 = vld [vmem:[%s25049_s7 + $0x280] sm:$0xff]   ;;  %v17781_v28 = vld [vmem:[%s25049_s7 + $0x3b8] sm:$0xff]   ;;  %v17815_v13 = vld [vmem:[%s25049_s7 + $0x430] sm:$0xff]  }
 0x8bf   :  { %16282 = vmatprep.subr.bf16.mxu1 %v17764_v9  ;;  %v11572_v19 = vpack.c.bf16 %v11424_v5, %v11424_v5  ;;  %v17783_v9 = vld [vmem:[%s25049_s7 + $0x330] sm:$0xff]   ;;  %v17809_v2 = vld [vmem:[%s25049_s7 + $0x380] sm:$0xff]   ;;  %v17821_v5 = vld [vmem:[%s25049_s7 + $0x4a8] sm:$0xff]  }
 0x8c0   :  { %16261 = vmatpush3.bf16.msra.mxu0 %v17763_v34  ;;  %v11475_v54 = vcombine.low %v24478_v31, %v24486_v32  ;;  %v11476_v26 = vcombine.high %v24478_v31, %v24486_v32  ;;  %v11421_v58 = vcombine.high %v11399_v49, %v11399_v49  ;;  %v11565_v21 = vpack.c.bf16 %v11399_v49, %v11399_v49  ;;  %v17790_v34 = vld [vmem:[%s25049_s7 + $0x360] sm:$0xff]   ;;  %v17899_v31 = vld [vmem:[%s25049_s7 + $0x608] sm:$0xff]  }
 0x8c1   :  { %16262 = vmatprep.subr.bf16.mxu0 %v17766_v16  ;;  %v17793_v16 = vld [vmem:[%s25049_s7 + $0x3a0] sm:$0xff]   ;;  %v11571_v49 = vpack.c.bf16 %v11422_v60, %v11422_v60  ;;  %v17853_v60 = vld [vmem:[%s25049_s7 + $0x5a8] sm:$0xff]  }
 0x8c2   :  { %16283 = vmatpush3.bf16.msra.mxu1 %v17765_v43  ;;  %v11567_v55 = vpack.c.bf16 %v11421_v58, %v11421_v58  ;;  %v17798_v43 = vld [vmem:[%s25049_s7 + $0x350] sm:$0xff]   ;;  %v17820_v58 = vld [vmem:[%s25049_s7 + $0x4e8] sm:$0xff]  }
 0x8c3   :  { %16284 = vmatprep.subr.bf16.mxu1 %v17768_v53  ;;  %v24583_v53 = vrot.slane %v11425_v8, %v25681_v56  ;;  %v17803_v8 = vld [vmem:[%s25049_s7 + $0x308] sm:$0xff]  }
 0x8c4   :  { %16263 = vmatpush3.bf16.msra.mxu0 %v17767_v11 }
 0x8c5   :  { %16264 = vmatprep.subr.bf16.mxu0 %v17770_v33  ;;  %v11441_v11 = vcombine.high %v24583_v53, %v24583_v53  ;;  %v17808_v33 = vld [vmem:[%s25049_s7 + $0x3c0] sm:$0xff]  }
 0x8c6   :  { %16285 = vmatpush3.bf16.msra.mxu1 %v17769_v10  ;;  %v17810_v10 = vld [vmem:[%s25049_s7 + $0x478] sm:$0xff]  }
 0x8c7   :  { %16286 = vmatprep.subr.bf16.mxu1 %v17772_v50  ;;  %v11463_v25 = vrot.slane %v11441_v11, %v25681_v56  ;;  %v17811_v50 = vld [vmem:[%s25049_s7 + $0x438] sm:$0xff]  }
 0x8c8   :  { %16265 = vmatpush3.bf16.msra.mxu0 %v17771_v37  ;;  %v11569_v37 = vpack.c.bf16 %v11406_v57, %v11406_v57  ;;  %v17847_v57 = vld [vmem:[%s25049_s7 + $0x530] sm:$0xff]  }
 0x8c9   :  { %16266 = vmatprep.subr.bf16.mxu0 %v17774_v63  ;;  %v11473_v17 = vcombine.high %v11463_v25, %v11463_v25  ;;  %v11574_v63 = vpack.c.bf16 %v11463_v25, %v11463_v25  ;;  %v17852_v25 = vld [vmem:[%s25049_s7 + $0x5e8] sm:$0xff]  }
 0x8ca   :  { %16287 = vmatpush3.bf16.msra.mxu1 %v17773_v18  ;;  %v17813_v18 = vld [vmem:[%s25049_s7 + $0x4b8] sm:$0xff]  }
 0x8cb   :  { %16288 = vmatprep.subr.bf16.mxu1 %v17776_v39  ;;  %v17816_v39 = vld [vmem:[%s25049_s7 + $0x4f0] sm:$0xff]  }
 0x8cc   :  { %16267 = vmatpush3.bf16.msra.mxu0 %v17775_v12  ;;  %v11576_v12 = vpack.c.bf16 %v11473_v17, %v11473_v17  ;;  %v17858_v17 = vld [vmem:[%s25049_s7 + $0x558] sm:$0xff]  }
 0x8cd   :  { %16296 = vmatprep.subr.bf16.mxu0 %v17778_v0  ;;  %v17818_v0 = vld [vmem:[%s25049_s7 + $0x468] sm:$0xff]  }
 0x8ce   :  { %16289 = vmatpush3.bf16.msra.mxu1 %v17777_v45  ;;  %v17817_v45 = vld [vmem:[%s25049_s7 + $0x4b0] sm:$0xff]  }
 0x8cf   :  { %13837 = vmatmul.mubr.bf16.vlgmr.msra.gmra.mxu0 %v11565_v21  ;;  %16318 = vmatprep.subr.bf16.mxu1 %v17780_v46  ;;  %v17819_v46 = vld [vmem:[%s25049_s7 + $0x428] sm:$0xff]   ;;  %v17824_v21 = vld [vmem:[%s25049_s7 + $0x4e0] sm:$0xff]  }
 0x8d0   :  { %16297 = vmatpush3.bf16.msra.mxu0 %v17779_v48  ;;  %13916 = vmatprep.mubr.bf16.mxu0 %v11570_v59  ;;  %v17822_v48 = vld [vmem:[%s25049_s7 + $0x460] sm:$0xff]   ;;  %v17826_v59 = vld [vmem:[%s25049_s7 + $0x458] sm:$0xff]  }
 0x8d1   :  { %13877 = vmatmul.mubr.bf16.vlgmr.msra.gmra.mxu1 %v11567_v55  ;;  %16298 = vmatprep.subr.bf16.mxu0 %v17782_v1  ;;  %v17823_v1 = vld [vmem:[%s25049_s7 + $0x420] sm:$0xff]   ;;  %v17828_v55 = vld [vmem:[%s25049_s7 + $0x4d8] sm:$0xff]  }
 0x8d2   :  { %16319 = vmatpush3.bf16.msra.mxu1 %v17781_v28  ;;  %13956 = vmatprep.mubr.bf16.mxu1 %v11572_v19  ;;  %v17825_v28 = vld [vmem:[%s25049_s7 + $0x4a0] sm:$0xff]   ;;  %v17830_v19 = vld [vmem:[%s25049_s7 + $0x450] sm:$0xff]  }
 0x8d3   :  { %16320 = vmatprep.subr.bf16.mxu1 %v17784_v40  ;;  %v17827_v40 = vld [vmem:[%s25049_s7 + $0x418] sm:$0xff]  }
 0x8d4   :  { %16299 = vmatpush3.bf16.msra.mxu0 %v17783_v9  ;;  %v17829_v9 = vld [vmem:[%s25049_s7 + $0x498] sm:$0xff]  }
 0x8d5   :  { %16300 = vmatprep.subr.bf16.mxu0 %v17786_v24  ;;  %v17832_v24 = vld [vmem:[%s25049_s7 + $0x4d0] sm:$0xff]  }
 0x8d6   :  { %16321 = vmatpush3.bf16.msra.mxu1 %v17785_v38  ;;  %v17831_v38 = vld [vmem:[%s25049_s7 + $0x410] sm:$0xff]  }
 0x8d7   :  { %16322 = vmatprep.subr.bf16.mxu1 %v17788_v4  ;;  %v24690_v4 = vrot.slane %v11426_v7, %v25681_v56  ;;  %v17838_v7 = vld [vmem:[%s25049_s7 + $0x440] sm:$0xff]  }
 0x8d8   :  { %16301 = vmatpush3.bf16.msra.mxu0 %v17787_v52  ;;  %v17834_v52 = vld [vmem:[%s25049_s7 + $0x448] sm:$0xff]  }
 0x8d9   :  { %16302 = vmatprep.subr.bf16.mxu0 %v17790_v34  ;;  %v17833_v34 = vld [vmem:[%s25049_s7 + $0x490] sm:$0xff]   ;;  %v11442_v23 = vcombine.high %v24690_v4, %v24690_v4 }
 0x8da   :  { %16323 = vmatpush3.bf16.msra.mxu1 %v17789_v14  ;;  %v17836_v14 = vld [vmem:[%s25049_s7 + $0x4c8] sm:$0xff]  }
 0x8db   :  { %16324 = vmatprep.subr.bf16.mxu1 %v17792_v44  ;;  %v17837_v44 = vld [vmem:[%s25049_s7 + $0x488] sm:$0xff]  }
 0x8dc   :  { %16303 = vmatpush3.bf16.msra.mxu0 %v17791_v29  ;;  %v11449_v29 = vrot.slane %v24583_v53, %v25681_v56 }
 0x8dd   :  { %16304 = vmatprep.subr.bf16.mxu0 %v17794_v27  ;;  %v17840_v27 = vld [vmem:[%s25049_s7 + $0x4c0] sm:$0xff]  }
 0x8de   :  { %16325 = vmatpush3.bf16.msra.mxu1 %v17793_v16  ;;  %v17839_v16 = vld [vmem:[%s25049_s7 + $0x400] sm:$0xff]  }
 0x8df   :  { %16326 = vmatprep.subr.bf16.mxu1 %v17796_v6  ;;  %v11470_v6 = vrot.slane %v11442_v23, %v25681_v56  ;;  %v17880_v23 = vld [vmem:[%s25049_s7 + $0x6f0] sm:$0xff]  }
 0x8e0   :  { %16305 = vmatpush3.bf16.msra.mxu0 %v17795_v15  ;;  %v17842_v15 = vld [vmem:[%s25049_s7 + $0x578] sm:$0xff]  }
 0x8e1   :  { %16306 = vmatprep.subr.bf16.mxu0 %v17798_v43  ;;  %v17841_v43 = vld [vmem:[%s25049_s7 + $0x480] sm:$0xff]   ;;  %v11474_v53 = vcombine.high %v11470_v6, %v11470_v6 }
 0x8e2   :  { %16327 = vmatpush3.bf16.msra.mxu1 %v17797_v30  ;;  %v11471_v30 = vcombine.high %v11449_v29, %v11449_v29 }
 0x8e3   :  { %16328 = vmatprep.subr.bf16.mxu1 %v17800_v3  ;;  %v17844_v3 = vld [vmem:[%s25049_s7 + $0x5f8] sm:$0xff]  }
 0x8e4   :  { %16307 = vmatpush3.bf16.msra.mxu0 %v17799_v61  ;;  %v17843_v61 = vld [vmem:[%s25049_s7 + $0x538] sm:$0xff]   ;;  %v11575_v11 = vpack.c.bf16 %v11471_v30, %v11471_v30  ;;  %v17888_v30 = vld [vmem:[%s25049_s7 + $0x6e0] sm:$0xff]  }
 0x8e5   :  { %16308 = vmatprep.subr.bf16.mxu0 %v17802_v41  ;;  %v11573_v41 = vpack.c.bf16 %v11449_v29, %v11449_v29  ;;  %v17882_v29 = vld [vmem:[%s25049_s7 + $0x668] sm:$0xff]  }
 0x8e6   :  { %16329 = vmatpush3.bf16.msra.mxu1 %v17801_v22  ;;  %v17846_v22 = vld [vmem:[%s25049_s7 + $0x570] sm:$0xff]  }
 0x8e7   :  { %16330 = vmatprep.subr.bf16.mxu1 %v17804_v47  ;;  %v11578_v47 = vpack.c.bf16 %v11470_v6, %v11470_v6  ;;  %v17883_v6 = vld [vmem:[%s25049_s7 + $0x628] sm:$0xff]  }
 0x8e8   :  { %16309 = vmatpush3.bf16.msra.mxu0 %v17803_v8  ;;  %v17845_v8 = vld [vmem:[%s25049_s7 + $0x5b8] sm:$0xff]  }
 0x8e9   :  { %16310 = vmatprep.subr.bf16.mxu0 %v17806_v36  ;;  %v17848_v36 = vld [vmem:[%s25049_s7 + $0x5f0] sm:$0xff]  }
 0x8ea   :  { %16331 = vmatpush3.bf16.msra.mxu1 %v17805_v35  ;;  %v11580_v35 = vpack.c.bf16 %v11474_v53, %v11474_v53  ;;  %v17889_v53 = vld [vmem:[%s25049_s7 + $0x6a0] sm:$0xff]  }
 0x8eb   :  { %16332 = vmatprep.subr.bf16.mxu1 %v17808_v33  ;;  %v17850_v33 = vld [vmem:[%s25049_s7 + $0x568] sm:$0xff]  }
 0x8ec   :  { %16311 = vmatpush3.bf16.msra.mxu0 %v17807_v51  ;;  %v17849_v51 = vld [vmem:[%s25049_s7 + $0x5b0] sm:$0xff]  }
 0x8ed   :  { %16340 = vmatprep.subr.bf16.mxu0 %v17810_v10  ;;  %v17851_v10 = vld [vmem:[%s25049_s7 + $0x528] sm:$0xff]  }
 0x8ee   :  { %16333 = vmatpush3.bf16.msra.mxu1 %v17809_v2  ;;  %v17854_v2 = vld [vmem:[%s25049_s7 + $0x560] sm:$0xff]  }
 0x8ef   :  { %13917 = vmatmul.mubr.bf16.vlgmr.msra.gmra.mxu0 %v11569_v37  ;;  %16362 = vmatprep.subr.bf16.mxu1 %v17812_v20  ;;  %v17856_v20 = vld [vmem:[%s25049_s7 + $0x5e0] sm:$0xff]  }
 0x8f0   :  { %16341 = vmatpush3.bf16.msra.mxu0 %v17811_v50  ;;  %13996 = vmatprep.mubr.bf16.mxu0 %v11574_v63  ;;  %v17855_v50 = vld [vmem:[%s25049_s7 + $0x520] sm:$0xff]   ;;  %v17859_v63 = vld [vmem:[%s25049_s7 + $0x518] sm:$0xff]  }
 0x8f1   :  { %13957 = vmatmul.mubr.bf16.vlgmr.msra.gmra.mxu1 %v11571_v49  ;;  %16342 = vmatprep.subr.bf16.mxu0 %v17814_v62  ;;  %v17857_v37 = vld [vmem:[%s25049_s7 + $0x5a0] sm:$0xff]   ;;  %v17860_v62 = vld [vmem:[%s25049_s7 + $0x5d8] sm:$0xff]  }
 0x8f2   :  { %16363 = vmatpush3.bf16.msra.mxu1 %v17813_v18  ;;  %14036 = vmatprep.mubr.bf16.mxu1 %v11576_v12  ;;  %v17862_v18 = vld [vmem:[%s25049_s7 + $0x550] sm:$0xff]   ;;  %v17861_v49 = vld [vmem:[%s25049_s7 + $0x598] sm:$0xff]  }
 0x8f3   :  { %16364 = vmatprep.subr.bf16.mxu1 %v17816_v39  ;;  %v17864_v39 = vld [vmem:[%s25049_s7 + $0x5d0] sm:$0xff]  }
 0x8f4   :  { %16343 = vmatpush3.bf16.msra.mxu0 %v17815_v13  ;;  %v17863_v12 = vld [vmem:[%s25049_s7 + $0x510] sm:$0xff]   ;;  %v24797_v13 = vrot.slane %v11475_v54, %v25681_v56  ;;  %v17867_v54 = vld [vmem:[%s25049_s7 + $0x508] sm:$0xff]  }
 0x8f5   :  { %16344 = vmatprep.subr.bf16.mxu0 %v17818_v0  ;;  %v17866_v0 = vld [vmem:[%s25049_s7 + $0x548] sm:$0xff]  }
 0x8f6   :  { %16365 = vmatpush3.bf16.msra.mxu1 %v17817_v45  ;;  %v17865_v45 = vld [vmem:[%s25049_s7 + $0x590] sm:$0xff]  }
 0x8f7   :  { %16366 = vmatprep.subr.bf16.mxu1 %v17820_v58  ;;  %v17868_v58 = vld [vmem:[%s25049_s7 + $0x5c8] sm:$0xff]  }
 0x8f8   :  { %16345 = vmatpush3.bf16.msra.mxu0 %v17819_v46  ;;  %v11491_v46 = vcombine.high %v24797_v13, %v24797_v13 }
 0x8f9   :  { %16346 = vmatprep.subr.bf16.mxu0 %v17822_v48  ;;  %v17870_v48 = vld [vmem:[%s25049_s7 + $0x540] sm:$0xff]  }
 0x8fa   :  { %16367 = vmatpush3.bf16.msra.mxu1 %v17821_v5  ;;  %v17869_v5 = vld [vmem:[%s25049_s7 + $0x588] sm:$0xff]  }
 0x8fb   :  { %16368 = vmatprep.subr.bf16.mxu1 %v17824_v21  ;;  %v11456_v21 = vrot.slane %v24690_v4, %v25681_v56 }
 0x8fc   :  { %16347 = vmatpush3.bf16.msra.mxu0 %v17823_v1  ;;  %v17872_v1 = vld [vmem:[%s25049_s7 + $0x5c0] sm:$0xff]  }
 0x8fd   :  { %16348 = vmatprep.subr.bf16.mxu0 %v17826_v59  ;;  %v17871_v59 = vld [vmem:[%s25049_s7 + $0x500] sm:$0xff]   ;;  %v11577_v4 = vpack.c.bf16 %v11456_v21, %v11456_v21 }
 0x8fe   :  { %16369 = vmatpush3.bf16.msra.mxu1 %v17825_v28  ;;  %v11513_v28 = vrot.slane %v11491_v46, %v25681_v56  ;;  %v17911_v46 = vld [vmem:[%s25049_s7 + $0x730] sm:$0xff]  }
 0x8ff   :  { %16370 = vmatprep.subr.bf16.mxu1 %v17828_v55  ;;  %v17874_v55 = vld [vmem:[%s25049_s7 + $0x678] sm:$0xff]  }
 0x900   :  { %16349 = vmatpush3.bf16.msra.mxu0 %v17827_v40  ;;  %v17873_v40 = vld [vmem:[%s25049_s7 + $0x580] sm:$0xff]  }
 0x901   :  { %16350 = vmatprep.subr.bf16.mxu0 %v17830_v19  ;;  %v11472_v19 = vcombine.high %v11456_v21, %v11456_v21 }
 0x902   :  { %16371 = vmatpush3.bf16.msra.mxu1 %v17829_v9  ;;  %v17876_v9 = vld [vmem:[%s25049_s7 + $0x6f8] sm:$0xff]  }
 0x903   :  { %16372 = vmatprep.subr.bf16.mxu1 %v17832_v24  ;;  %v17875_v24 = vld [vmem:[%s25049_s7 + $0x638] sm:$0xff]  }
 0x904   :  { %16351 = vmatpush3.bf16.msra.mxu0 %v17831_v38  ;;  %v11523_v38 = vcombine.high %v11513_v28, %v11513_v28 }
 0x905   :  { %16352 = vmatprep.subr.bf16.mxu0 %v17834_v52  ;;  %v17878_v52 = vld [vmem:[%s25049_s7 + $0x670] sm:$0xff]  }
 0x906   :  { %16373 = vmatpush3.bf16.msra.mxu1 %v17833_v34  ;;  %v11582_v34 = vpack.c.bf16 %v11513_v28, %v11513_v28  ;;  %v17913_v28 = vld [vmem:[%s25049_s7 + $0x7b0] sm:$0xff]  }
 0x907   :  { %16374 = vmatprep.subr.bf16.mxu1 %v17836_v14  ;;  %v17877_v14 = vld [vmem:[%s25049_s7 + $0x6b8] sm:$0xff]  }
 0x908   :  { %16353 = vmatpush3.bf16.msra.mxu0 %v17835_v42  ;;  %v11579_v42 = vpack.c.bf16 %v11472_v19, %v11472_v19  ;;  %v17916_v19 = vld [vmem:[%s25049_s7 + $0x7e8] sm:$0xff]  }
 0x909   :  { %16354 = vmatprep.subr.bf16.mxu0 %v17838_v7  ;;  %v11584_v7 = vpack.c.bf16 %v11523_v38, %v11523_v38  ;;  %v17915_v38 = vld [vmem:[%s25049_s7 + $0x728] sm:$0xff]  }
 0x90a   :  { %16375 = vmatpush3.bf16.msra.mxu1 %v17837_v44  ;;  %v17879_v44 = vld [vmem:[%s25049_s7 + $0x630] sm:$0xff]  }
 0x90b   :  { %16376 = vmatprep.subr.bf16.mxu1 %v17840_v27  ;;  %v17881_v27 = vld [vmem:[%s25049_s7 + $0x6b0] sm:$0xff]  }
 0x90c   :  { %16355 = vmatpush3.bf16.msra.mxu0 %v17839_v16  ;;  %v17884_v16 = vld [vmem:[%s25049_s7 + $0x6e8] sm:$0xff]  }
 0x90d   :  { %16384 = vmatprep.subr.bf16.mxu0 %v17842_v15  ;;  %v17886_v15 = vld [vmem:[%s25049_s7 + $0x660] sm:$0xff]  }
 0x90e   :  { %16377 = vmatpush3.bf16.msra.mxu1 %v17841_v43  ;;  %v17885_v43 = vld [vmem:[%s25049_s7 + $0x6a8] sm:$0xff]  }
 0x90f   :  { %13997 = vmatmul.mubr.bf16.vlgmr.msra.gmra.mxu0 %v11573_v41  ;;  %16406 = vmatprep.subr.bf16.mxu1 %v17844_v3  ;;  %v17887_v3 = vld [vmem:[%s25049_s7 + $0x620] sm:$0xff]   ;;  %v17892_v41 = vld [vmem:[%s25049_s7 + $0x6d8] sm:$0xff]  }
 0x910   :  { %16385 = vmatpush3.bf16.msra.mxu0 %v17843_v61  ;;  %14076 = vmatprep.mubr.bf16.mxu0 %v11578_v47  ;;  %v17890_v61 = vld [vmem:[%s25049_s7 + $0x658] sm:$0xff]   ;;  %v17894_v47 = vld [vmem:[%s25049_s7 + $0x650] sm:$0xff]  }
 0x911   :  { %14037 = vmatmul.mubr.bf16.vlgmr.msra.gmra.mxu1 %v11575_v11  ;;  %16386 = vmatprep.subr.bf16.mxu0 %v17846_v22  ;;  %v17891_v22 = vld [vmem:[%s25049_s7 + $0x618] sm:$0xff]   ;;  %v17896_v11 = vld [vmem:[%s25049_s7 + $0x6d0] sm:$0xff]  }
 0x912   :  { %16407 = vmatpush3.bf16.msra.mxu1 %v17845_v8  ;;  %14116 = vmatprep.mubr.bf16.mxu1 %v11580_v35  ;;  %v17893_v8 = vld [vmem:[%s25049_s7 + $0x698] sm:$0xff]   ;;  %v24904_v35 = vrot.slane %v11476_v26, %v25681_v56  ;;  %v17902_v26 = vld [vmem:[%s25049_s7 + $0x640] sm:$0xff]  }
 0x913   :  { %16408 = vmatprep.subr.bf16.mxu1 %v17848_v36  ;;  %v17895_v36 = vld [vmem:[%s25049_s7 + $0x610] sm:$0xff]  }
 0x914   :  { %16387 = vmatpush3.bf16.msra.mxu0 %v17847_v57  ;;  %v17898_v57 = vld [vmem:[%s25049_s7 + $0x648] sm:$0xff]   ;;  %v11492_v32 = vcombine.high %v24904_v35, %v24904_v35 }
 0x915   :  { %16388 = vmatprep.subr.bf16.mxu0 %v17850_v33  ;;  %v17897_v33 = vld [vmem:[%s25049_s7 + $0x690] sm:$0xff]  }
 0x916   :  { %16409 = vmatpush3.bf16.msra.mxu1 %v17849_v51  ;;  %v17900_v51 = vld [vmem:[%s25049_s7 + $0x6c8] sm:$0xff]  }
 0x917   :  { %16410 = vmatprep.subr.bf16.mxu1 %v17852_v25  ;;  %v17901_v25 = vld [vmem:[%s25049_s7 + $0x688] sm:$0xff]  }
 0x918   :  { %16389 = vmatpush3.bf16.msra.mxu0 %v17851_v10  ;;  %v11499_v10 = vrot.slane %v24797_v13, %v25681_v56  ;;  %v17909_v13 = vld [vmem:[%s25049_s7 + $0x7b8] sm:$0xff]  }
 0x919   :  { %16390 = vmatprep.subr.bf16.mxu0 %v17854_v2  ;;  %v17904_v2 = vld [vmem:[%s25049_s7 + $0x6c0] sm:$0xff]  }
 0x91a   :  { %16411 = vmatpush3.bf16.msra.mxu1 %v17853_v60  ;;  %v17903_v60 = vld [vmem:[%s25049_s7 + $0x600] sm:$0xff]  }
 0x91b   :  { %16412 = vmatprep.subr.bf16.mxu1 %v17856_v20  ;;  %v11520_v20 = vrot.slane %v11492_v32, %v25681_v56 }
 0x91c   :  { %16391 = vmatpush3.bf16.msra.mxu0 %v17855_v50  ;;  %v17906_v50 = vld [vmem:[%s25049_s7 + $0x778] sm:$0xff]  }
 0x91d   :  { %16392 = vmatprep.subr.bf16.mxu0 %v17858_v17  ;;  %v17905_v17 = vld [vmem:[%s25049_s7 + $0x680] sm:$0xff]  }
 0x91e   :  { %16413 = vmatpush3.bf16.msra.mxu1 %v17857_v37  ;;  %v11521_v37 = vcombine.high %v11499_v10, %v11499_v10 }
 0x91f   :  { %16414 = vmatprep.subr.bf16.mxu1 %v17860_v62  ;;  %v17908_v62 = vld [vmem:[%s25049_s7 + $0x7f8] sm:$0xff]  }
 0x920   :  { %16393 = vmatpush3.bf16.msra.mxu0 %v17859_v63  ;;  %v17907_v63 = vld [vmem:[%s25049_s7 + $0x738] sm:$0xff]  }
 0x921   :  { %16394 = vmatprep.subr.bf16.mxu0 %v17862_v18  ;;  %v11524_v18 = vcombine.high %v11520_v20, %v11520_v20 }
 0x922   :  { %16415 = vmatpush3.bf16.msra.mxu1 %v17861_v49  ;;  %v11581_v49 = vpack.c.bf16 %v11499_v10, %v11499_v10 }
 0x923   :  { %16416 = vmatprep.subr.bf16.mxu1 %v17864_v39  ;;  %v17910_v39 = vld [vmem:[%s25049_s7 + $0x770] sm:$0xff]  }
 0x924   :  { %16395 = vmatpush3.bf16.msra.mxu0 %v17863_v12  ;;  %v11586_v12 = vpack.c.bf16 %v11520_v20, %v11520_v20 }
 0x925   :  { %16396 = vmatprep.subr.bf16.mxu0 %v17866_v0 }
 0x926   :  { %16417 = vmatpush3.bf16.msra.mxu1 %v17865_v45  ;;  %v11583_v45 = vpack.c.bf16 %v11521_v37, %v11521_v37 }
 0x927   :  { %16418 = vmatprep.subr.bf16.mxu1 %v17868_v58  ;;  %v17912_v58 = vld [vmem:[%s25049_s7 + $0x7f0] sm:$0xff]  }
 0x928   :  { %16397 = vmatpush3.bf16.msra.mxu0 %v17867_v54  ;;  %v11588_v54 = vpack.c.bf16 %v11524_v18, %v11524_v18 }
 0x929   :  { %16398 = vmatprep.subr.bf16.mxu0 %v17870_v48  ;;  %v15907_v48 = vld [vmem:[%s25050_s8] ss:$0 sm:$0xff] }
 0x92a   :  { %16419 = vmatpush3.bf16.msra.mxu1 %v17869_v5 }
 0x92b   :  { %16420 = vmatprep.subr.bf16.mxu1 %v17872_v1  ;;  %v17914_v1 = vld [vmem:[%s25049_s7 + $0x768] sm:$0xff]  }
 0x92c   :  { %16399 = vmatpush3.bf16.msra.mxu0 %v17871_v59 }
 0x92d   :  { %16428 = vmatprep.subr.bf16.mxu0 %v17874_v55 }
 0x92e   :  { %16421 = vmatpush3.bf16.msra.mxu1 %v17873_v40 }
 0x92f   :  { %14077 = vmatmul.mubr.bf16.vlgmr.msra.gmra.mxu0 %v11577_v4  ;;  %16450 = vmatprep.subr.bf16.mxu1 %v17876_v9 }
 0x930   :  { %16429 = vmatpush3.bf16.msra.mxu0 %v17875_v24  ;;  %14156 = vmatprep.mubr.bf16.mxu0 %v11582_v34  ;;  %v17918_v34 = vld [vmem:[%s25049_s7 + $0x760] sm:$0xff]  }
 0x931   :  { %14117 = vmatmul.mubr.bf16.vlgmr.msra.gmra.mxu1 %v11579_v42  ;;  %16430 = vmatprep.subr.bf16.mxu0 %v17878_v52  ;;  %v17917_v42 = vld [vmem:[%s25049_s7 + $0x7a8] sm:$0xff]  }
 0x932   :  { %16451 = vmatpush3.bf16.msra.mxu1 %v17877_v14  ;;  %14196 = vmatprep.mubr.bf16.mxu1 %v11584_v7  ;;  %v17920_v7 = vld [vmem:[%s25049_s7 + $0x7e0] sm:$0xff]  }
 0x933   :  { %16452 = vmatprep.subr.bf16.mxu1 %v17880_v23 }
 0x934   :  { %16431 = vmatpush3.bf16.msra.mxu0 %v17879_v44  ;;  %v17919_v44 = vld [vmem:[%s25049_s7 + $0x720] sm:$0xff]  }
 0x935   :  { %16432 = vmatprep.subr.bf16.mxu0 %v17882_v29  ;;  %v17922_v29 = vld [vmem:[%s25049_s7 + $0x758] sm:$0xff]  }
 0x936   :  { %16453 = vmatpush3.bf16.msra.mxu1 %v17881_v27  ;;  %v17921_v27 = vld [vmem:[%s25049_s7 + $0x7a0] sm:$0xff]  }
 0x937   :  { %16454 = vmatprep.subr.bf16.mxu1 %v17884_v16  ;;  %v17924_v16 = vld [vmem:[%s25049_s7 + $0x7d8] sm:$0xff]  }
 0x938   :  { %16433 = vmatpush3.bf16.msra.mxu0 %v17883_v6  ;;  %v17923_v6 = vld [vmem:[%s25049_s7 + $0x718] sm:$0xff]  }
 0x939   :  { %16434 = vmatprep.subr.bf16.mxu0 %v17886_v15  ;;  %v17926_v15 = vld [vmem:[%s25049_s7 + $0x750] sm:$0xff]  }
 0x93a   :  { %16455 = vmatpush3.bf16.msra.mxu1 %v17885_v43  ;;  %v17925_v43 = vld [vmem:[%s25049_s7 + $0x798] sm:$0xff]  }
 0x93b   :  { %16456 = vmatprep.subr.bf16.mxu1 %v17888_v30  ;;  %v17928_v30 = vld [vmem:[%s25049_s7 + $0x7d0] sm:$0xff]  }
 0x93c   :  { %16435 = vmatpush3.bf16.msra.mxu0 %v17887_v3  ;;  %v17927_v3 = vld [vmem:[%s25049_s7 + $0x710] sm:$0xff]  }
 0x93d   :  { %16436 = vmatprep.subr.bf16.mxu0 %v17890_v61  ;;  %v17930_v61 = vld [vmem:[%s25049_s7 + $0x748] sm:$0xff]  }
 0x93e   :  { %16457 = vmatpush3.bf16.msra.mxu1 %v17889_v53  ;;  %v17929_v53 = vld [vmem:[%s25049_s7 + $0x790] sm:$0xff]  }
 0x93f   :  { %16458 = vmatprep.subr.bf16.mxu1 %v17892_v41  ;;  %v17932_v41 = vld [vmem:[%s25049_s7 + $0x7c8] sm:$0xff]  }
 0x940   :  { %16437 = vmatpush3.bf16.msra.mxu0 %v17891_v22  ;;  %v17931_v22 = vld [vmem:[%s25049_s7 + $0x708] sm:$0xff]  }
 0x941   :  { %16438 = vmatprep.subr.bf16.mxu0 %v17894_v47  ;;  %v17934_v47 = vld [vmem:[%s25049_s7 + $0x740] sm:$0xff]  }
 0x942   :  { %16459 = vmatpush3.bf16.msra.mxu1 %v17893_v8  ;;  %v17933_v8 = vld [vmem:[%s25049_s7 + $0x788] sm:$0xff]  }
 0x943   :  { %16460 = vmatprep.subr.bf16.mxu1 %v17896_v11  ;;  %v11506_v11 = vrot.slane %v24904_v35, %v25681_v56 }
 0x944   :  { %16439 = vmatpush3.bf16.msra.mxu0 %v17895_v36  ;;  %v17936_v36 = vld [vmem:[%s25049_s7 + $0x7c0] sm:$0xff]  }
 0x945   :  { %16440 = vmatprep.subr.bf16.mxu0 %v17898_v57  ;;  %v17935_v57 = vld [vmem:[%s25049_s7 + $0x700] sm:$0xff]   ;;  %v11585_v56 = vpack.c.bf16 %v11506_v11, %v11506_v11 }
 0x946   :  { %16461 = vmatpush3.bf16.msra.mxu1 %v17897_v33  ;;  %v17937_v33 = vld [vmem:[%s25049_s7 + $0x780] sm:$0xff]   ;;  %s17985_s7 = smov [#allocation2]  }
 0x947   :  { %16462 = vmatprep.subr.bf16.mxu1 %v17900_v51  ;;  %v11522_v51 = vcombine.high %v11506_v11, %v11506_v11  ;;  %s14291_s20 = sshll.u32 %s17985_s7, 4  ;;  %s14292_s20 = int_to_ptr.vmem [resolvable:$true] %s14291_s20 }
 0x948   :  { %16441 = vmatpush3.bf16.msra.mxu0 %v17899_v31  ;;  %s17954_s21 = scalar_lea.vmem %s14292_s20, 32  ;;  %p17959_p1 = scmp.lt.s32.totalorder %s14292_s20, %s14292_s20 }
 0x949   :  { %16442 = vmatprep.subr.bf16.mxu0 %v17902_v26  ;;  %v11587_v31 = vpack.c.bf16 %v11522_v51, %v11522_v51  ;;  %p17955_p0 = scmp.ne.s32.totalorder %s14292_s20, %s17954_s21  ;;  %p17960_p2 = scmp.lt.s32.totalorder %s17954_s21, %s17954_s21 }
 0x94a   :  { %16463 = vmatpush3.bf16.msra.mxu1 %v17901_v25 }
 0x94b   :  { %16464 = vmatprep.subr.bf16.mxu1 %v17904_v2  ;;  %p17961_p3 = por %p17960_p2, %p17959_p1 }
 0x94c   :  { %16443 = vmatpush3.bf16.msra.mxu0 %v17903_v60 }
 0x94d   :  { %16472 = vmatprep.subr.bf16.mxu0 %v17906_v50  ;;  %p17962_p4 = pnand %p17961_p3, %p17955_p0 }
 0x94e   :  { %16465 = vmatpush3.bf16.msra.mxu1 %v17905_v17 }
 0x94f   :  { %14157 = vmatmul.mubr.bf16.vlgmr.msra.gmra.mxu0 %v11581_v49  ;;  %v16180_v0 = vpop.f32.mrf.mxu0  ;;  %16494 = vmatprep.subr.bf16.mxu1 %v17908_v62 }
 0x950   :  { %16473 = vmatpush3.bf16.msra.mxu0 %v17907_v63  ;;  %14236 = vmatprep.mubr.bf16.mxu0 %v11586_v12 }
 0x951   :  { %14197 = vmatmul.mubr.bf16.vlgmr.msra.gmra.mxu1 %v11583_v45  ;;  %v16181_v5 = vpop.f32.mrf.mxu0  ;;  %v16202_v21 = vpop.f32.mrf.mxu1  ;;  %16474 = vmatprep.subr.bf16.mxu0 %v17910_v39 }
 0x952   :  { %v16182_v59 = vadd.f32 %v16181_v5, %v16180_v0  ;;  %16495 = vmatpush3.bf16.msra.mxu1 %v17909_v13  ;;  %14276 = vmatprep.mubr.bf16.mxu1 %v11588_v54 }
 0x953   :  { %v16183_v55 = vpop.f32.mrf.mxu0  ;;  %v16203_v40 = vpop.f32.mrf.mxu1  ;;  %16496 = vmatprep.subr.bf16.mxu1 %v17912_v58 }
 0x954   :  { %v13679_v9 = vadd.f32 %v16182_v59, %v15907_v48  ;;  %v16204_v24 = vadd.f32 %v16203_v40, %v16202_v21  ;;  %16475 = vmatpush3.bf16.msra.mxu0 %v17911_v46 }
 0x955   :  { %v16184_v4 = vpop.f32.mrf.mxu0  ;;  %v16205_v52 = vpop.f32.mrf.mxu1  ;;  %16476 = vmatprep.subr.bf16.mxu0 %v17914_v1 }
 0x956   :  { %v13719_v14 = vadd.f32 %v16204_v24, %v13679_v9  ;;  %16497 = vmatpush3.bf16.msra.mxu1 %v17913_v28 }
 0x957   :  { %v16206_v23 = vpop.f32.mrf.mxu1  ;;  %16498 = vmatprep.subr.bf16.mxu1 %v17916_v19 }
 0x958   :  { %16477 = vmatpush3.bf16.msra.mxu0 %v17915_v38 }
 0x959   :  { %16478 = vmatprep.subr.bf16.mxu0 %v17918_v34 }
 0x95a   :  { %16499 = vmatpush3.bf16.msra.mxu1 %v17917_v42 }
 0x95b   :  { %16500 = vmatprep.subr.bf16.mxu1 %v17920_v7 }
 0x95c   :  { %16479 = vmatpush3.bf16.msra.mxu0 %v17919_v44 }
 0x95d   :  { %16480 = vmatprep.subr.bf16.mxu0 %v17922_v29 }
 0x95e   :  { %16501 = vmatpush3.bf16.msra.mxu1 %v17921_v27 }
 0x95f   :  { %16502 = vmatprep.subr.bf16.mxu1 %v17924_v16 }
 0x960   :  { %16481 = vmatpush3.bf16.msra.mxu0 %v17923_v6 }
 0x961   :  { %16482 = vmatprep.subr.bf16.mxu0 %v17926_v15 }
 0x962   :  { %16503 = vmatpush3.bf16.msra.mxu1 %v17925_v43 }
 0x963   :  { %16504 = vmatprep.subr.bf16.mxu1 %v17928_v30 }
 0x964   :  { %16483 = vmatpush3.bf16.msra.mxu0 %v17927_v3 }
 0x965   :  { %16484 = vmatprep.subr.bf16.mxu0 %v17930_v61 }
 0x966   :  { %16505 = vmatpush3.bf16.msra.mxu1 %v17929_v53 }
 0x967   :  { %16506 = vmatprep.subr.bf16.mxu1 %v17932_v41 }
 0x968   :  { %16485 = vmatpush3.bf16.msra.mxu0 %v17931_v22 }
 0x969   :  { %16486 = vmatprep.subr.bf16.mxu0 %v17934_v47 }
 0x96a   :  { %16507 = vmatpush3.bf16.msra.mxu1 %v17933_v8 }
 0x96b   :  { %16508 = vmatprep.subr.bf16.mxu1 %v17936_v36 }
 0x96c   :  { %16487 = vmatpush3.bf16.msra.mxu0 %v17935_v57 }
 0x96e   :  { %16509 = vmatpush3.bf16.msra.mxu1 %v17937_v33 }
 0x96f   :  { %v16224_v35 = vpop.f32.mrf.mxu0  ;;  %14237 = vmatmul.mubr.bf16.vlgmr.msra.gmra.mxu0 %v11585_v56 }
 0x971   :  { %v16225_v32 = vpop.f32.mrf.mxu0  ;;  %v16246_v26 = vpop.f32.mrf.mxu1  ;;  %14277 = vmatmul.mubr.bf16.vlgmr.msra.gmra.mxu1 %v11587_v31 }
 0x972   :  { %v16226_v25 = vadd.f32 %v16225_v32, %v16224_v35 }
 0x973   :  { %v16227_v10 = vpop.f32.mrf.mxu0  ;;  %v16247_v2 = vpop.f32.mrf.mxu1 }
 0x974   :  { %v13759_v60 = vadd.f32 %v16226_v25, %v13719_v14  ;;  %v16248_v20 = vadd.f32 %v16247_v2, %v16246_v26 }
 0x975   :  { %v16228_v50 = vpop.f32.mrf.mxu0  ;;  %v16249_v17 = vpop.f32.mrf.mxu1 }
 0x976   :  { %v13799_v37 = vadd.f32 %v16248_v20, %v13759_v60 }
 0x977   :  { %v16250_v62 = vpop.f32.mrf.mxu1 }
 0x98f   :  { %v16268_v63 = vpop.f32.mrf.mxu0 }
 0x991   :  { %v16269_v18 = vpop.f32.mrf.mxu0  ;;  %v16290_v49 = vpop.f32.mrf.mxu1 }
 0x992   :  { %v16270_v39 = vadd.f32 %v16269_v18, %v16268_v63 }
 0x993   :  { %v16271_v12 = vpop.f32.mrf.mxu0  ;;  %v16291_v13 = vpop.f32.mrf.mxu1 }
 0x994   :  { %v13839_v0 = vadd.f32 %v16270_v39, %v13799_v37  ;;  %v16292_v45 = vadd.f32 %v16291_v13, %v16290_v49 }
 0x995   :  { %v16272_v58 = vpop.f32.mrf.mxu0  ;;  %v16293_v54 = vpop.f32.mrf.mxu1 }
 0x996   :  { %v13879_v46 = vadd.f32 %v16292_v45, %v13839_v0 }
 0x997   :  { %v16294_v48 = vpop.f32.mrf.mxu1 }
 0x9af   :  { %v16312_v5 = vpop.f32.mrf.mxu0 }
 0x9b1   :  { %v16313_v21 = vpop.f32.mrf.mxu0  ;;  %v16334_v1 = vpop.f32.mrf.mxu1 }
 0x9b2   :  { %v16314_v59 = vadd.f32 %v16313_v21, %v16312_v5 }
 0x9b3   :  { %v16315_v28 = vpop.f32.mrf.mxu0  ;;  %v16335_v55 = vpop.f32.mrf.mxu1 }
 0x9b4   :  { %v13919_v40 = vadd.f32 %v16314_v59, %v13879_v46  ;;  %v16336_v19 = vadd.f32 %v16335_v55, %v16334_v1 }
 0x9b5   :  { %v16316_v9 = vpop.f32.mrf.mxu0  ;;  %v16337_v24 = vpop.f32.mrf.mxu1 }
 0x9b6   :  { %v13959_v38 = vadd.f32 %v16336_v19, %v13919_v40 }
 0x9b7   :  { %v16338_v4 = vpop.f32.mrf.mxu1 }
 0x9cf   :  { %v16356_v52 = vpop.f32.mrf.mxu0 }
 0x9d1   :  { %v16357_v34 = vpop.f32.mrf.mxu0  ;;  %v16378_v14 = vpop.f32.mrf.mxu1 }
 0x9d2   :  { %v16358_v42 = vadd.f32 %v16357_v34, %v16356_v52 }
 0x9d3   :  { %v16359_v23 = vpop.f32.mrf.mxu0  ;;  %v16379_v7 = vpop.f32.mrf.mxu1 }
 0x9d4   :  { %v13999_v44 = vadd.f32 %v16358_v42, %v13959_v38  ;;  %v16380_v29 = vadd.f32 %v16379_v7, %v16378_v14 }
 0x9d5   :  { %v16360_v27 = vpop.f32.mrf.mxu0  ;;  %v16381_v16 = vpop.f32.mrf.mxu1 }
 0x9d6   :  { %v14039_v6 = vadd.f32 %v16380_v29, %v13999_v44 }
 0x9d7   :  { %v16382_v15 = vpop.f32.mrf.mxu1 }
 0x9ef   :  { %v16400_v43 = vpop.f32.mrf.mxu0 }
 0x9f1   :  { %v16401_v30 = vpop.f32.mrf.mxu0  ;;  %v16422_v3 = vpop.f32.mrf.mxu1 }
 0x9f2   :  { %v16402_v31 = vadd.f32 %v16401_v30, %v16400_v43 }
 0x9f3   :  { %v16403_v61 = vpop.f32.mrf.mxu0  ;;  %v16423_v53 = vpop.f32.mrf.mxu1 }
 0x9f4   :  { %v14079_v32 = vadd.f32 %v16402_v31, %v14039_v6  ;;  %v16424_v26 = vadd.f32 %v16423_v53, %v16422_v3 }
 0x9f5   :  { %v16404_v41 = vpop.f32.mrf.mxu0  ;;  %v16425_v22 = vpop.f32.mrf.mxu1 }
 0x9f6   :  { %v14119_v10 = vadd.f32 %v16424_v26, %v14079_v32 }
 0x9f7   :  { %v16426_v47 = vpop.f32.mrf.mxu1 }
 0xa0f   :  { %v16444_v8 = vpop.f32.mrf.mxu0 }
 0xa11   :  { %v16445_v11 = vpop.f32.mrf.mxu0  ;;  %v16466_v36 = vpop.f32.mrf.mxu1 }
 0xa12   :  { %v16446_v25 = vadd.f32 %v16445_v11, %v16444_v8 }
 0xa13   :  { %v16447_v57 = vpop.f32.mrf.mxu0  ;;  %v16467_v33 = vpop.f32.mrf.mxu1 }
 0xa14   :  { %v14159_v2 = vadd.f32 %v16446_v25, %v14119_v10  ;;  %v16468_v60 = vadd.f32 %v16467_v33, %v16466_v36 }
 0xa15   :  { %v16448_v51 = vpop.f32.mrf.mxu0  ;;  %v16469_v56 = vpop.f32.mrf.mxu1 }
 0xa16   :  { %v14199_v37 = vadd.f32 %v16468_v60, %v14159_v2 }
 0xa17   :  { %v16470_v35 = vpop.f32.mrf.mxu1 }
 0xa2f   :  { %v16488_v20 = vpop.f32.mrf.mxu0 }
 0xa31   :  { %v16489_v50 = vpop.f32.mrf.mxu0  ;;  %v16510_v17 = vpop.f32.mrf.mxu1 }
 0xa32   :  { %v16490_v62 = vadd.f32 %v16489_v50, %v16488_v20 }
 0xa33   :  { %v16491_v63 = vpop.f32.mrf.mxu0  ;;  %v16511_v18 = vpop.f32.mrf.mxu1 }
 0xa34   :  { %v14239_v49 = vadd.f32 %v16490_v62, %v14199_v37  ;;  %v16512_v39 = vadd.f32 %v16511_v18, %v16510_v17 }
 0xa35   :  { %v16492_v12 = vpop.f32.mrf.mxu0  ;;  %v16513_v13 = vpop.f32.mrf.mxu1 }
 0xa36   :  { %v14279_v0 = vadd.f32 %v16512_v39, %v14239_v49 }
 0xa37   :  { %v16514_v45 = vpop.f32.mrf.mxu1 }
 0xa38   :  { %14284 = vst [vmem:[#allocation2] sm:$0x3] %v14279_v0 }
 0xa39   :  { %17965 = shalt.err (!%p17962_p4)
}
 0xa3a   :  { %14294 = dma.vmem_to_hbm [thread:$0]  %s14292_s20, 32, %s25051_s9, [#allocation3]  }
 0xa3b   :  { %17974 = dma.done.wait [#allocation3], 32  }
 0xa3c   :  { %17975 = vsyncadd [#allocation3], 4294967264 }
 0xa3d   :  { %14298 = vsyncpa [#allocation3], 1 }

</bundles_post_ra>
